<compile_context>
chip_gen: v6e
topology: v6e:2x2x1
jax: 0.10.0
libtpu: 0.0.40
codegen_flags: <defaults>
</compile_context>

<pallas_src>
import functools

import jax
import jax.numpy as jnp
from jax import lax
from jax.experimental import pallas as pl
from jax.experimental.pallas import tpu as pltpu

_BN_EPS = 1e-5
_LANE = 128
_TAPS = tuple((dy, dx) for dy in range(3) for dx in range(3))  # 3x3 offsets
# Conservative cap that is safe on v7x (64 MiB physical VMEM per TensorCore).
# On v5e/v6e (128 MiB) raise toward 64-100 MiB with bigger row tiles if the
# kernel becomes DMA-bound at production sizes.
_VMEM_LIMIT = 48 * 1024 * 1024


# --------------------------------------------------------------------------
# Kernels 1/2: [optional BN affine + relu] -> 3x3 conv (single MXU matmul)
#              -> raw conv output + per-tile channel sum / sum-of-squares
# --------------------------------------------------------------------------
def _conv3x3_body(x_ref, w_ref, scale_shift, y_ref, sum_ref, ssq_ref,
                  xpad_ref, slab_ref, *, H, W, Cp, TH):
    # x_ref:     (1, H, W, Cp)   bf16 full-image activations (resident per b)
    # w_ref:     (9*Cp, Cp)      bf16 im2col weight matrix
    # scale_shift: None, or (scale_ref, shift_ref) each (1, Cp) f32
    # y_ref:     (1, TH, W, Cp)  bf16 raw conv output for this row tile
    # sum/ssq:   (1, 1, 1, Cp)   f32 partial BN statistics for this tile
    # xpad_ref:  (TH+2, W+2, Cp) bf16 zero-padded (pre-activated) input window
    # slab_ref:  (TH, W, 9*Cp)   bf16 im2col slab
    t = pl.program_id(1)
    row0 = t * TH

    if scale_shift is None:
        def prep(v):            # conv1: x is already bf16 (wrapper cast)
            return v
    else:
        scale = scale_shift[0][...]   # (1, Cp) f32
        shift = scale_shift[1][...]   # (1, Cp) f32

        def prep(v):            # conv2: fused bn1 affine + relu
            v = jnp.maximum(v.astype(jnp.float32) * scale + shift, 0.0)
            return v.astype(jnp.bfloat16)

    zrow = jnp.zeros((1, W, Cp), jnp.bfloat16)
    zcol = jnp.zeros((TH + 2, 1, Cp), jnp.bfloat16)

    # ---- zero-padded input window (halo handled on the load side) ---------
    # interior rows of this tile
    xpad_ref[1:TH + 1, 1:W + 1, :] = prep(x_ref[0, pl.ds(row0, TH), :, :])
    # left / right conv zero-padding columns (cover the corners too)
    xpad_ref[:, 0:1, :] = zcol
    xpad_ref[:, W + 1:W + 2, :] = zcol
    # top halo row: image row row0-1, or conv zero-padding at the image edge
    xpad_ref[0:1, 1:W + 1, :] = zrow

    @pl.when(row0 > 0)
    def _():
        xpad_ref[0:1, 1:W + 1, :] = prep(x_ref[0, pl.ds(row0 - 1, 1), :, :])

    # bottom halo row: image row row0+TH, or conv zero-padding at the edge
    xpad_ref[TH + 1:TH + 2, 1:W + 1, :] = zrow

    @pl.when(row0 + TH < H)
    def _():
        xpad_ref[TH + 1:TH + 2, 1:W + 1, :] = prep(
            x_ref[0, pl.ds(row0 + TH, 1), :, :])

    # ---- im2col slab: every tap store is a full, aligned (TH, W, Cp) block;
    # ---- the +/-1 shifts are shifted *reads* of the padded copy ------------
    for k, (dy, dx) in enumerate(_TAPS):
        slab_ref[:, :, k * Cp:(k + 1) * Cp] = \
            xpad_ref[dy:dy + TH, dx:dx + W, :]

    # ---- single fused MXU matmul: (TH*W, 9*Cp) x (9*Cp, Cp), f32 acc -------
    # (NOTE: with N = Cp = 128 the 256-wide MXU on v6e/v7x is half-filled; the
    #  data path, not the MXU, is the bottleneck for 64/128-channel blocks.)
    lhs = slab_ref[...].reshape(TH * W, 9 * Cp)
    acc = jnp.dot(lhs, w_ref[...], preferred_element_type=jnp.float32)

    yb = acc.astype(jnp.bfloat16)
    y_ref[0] = yb.reshape(TH, W, Cp)

    # Partial BN statistics from the bf16-rounded values the next pass
    # actually normalizes (finalized across tiles outside the kernel).
    yf = yb.astype(jnp.float32)
    sum_ref[0, 0] = jnp.sum(yf, axis=0, keepdims=True)
    ssq_ref[0, 0] = jnp.sum(yf * yf, axis=0, keepdims=True)


def _conv3x3_plain_kernel(x_ref, w_ref, y_ref, sum_ref, ssq_ref,
                          xpad_ref, slab_ref, **kw):
    _conv3x3_body(x_ref, w_ref, None, y_ref, sum_ref, ssq_ref,
                  xpad_ref, slab_ref, **kw)


def _conv3x3_bnrelu_kernel(x_ref, w_ref, scale_ref, shift_ref,
                           y_ref, sum_ref, ssq_ref, xpad_ref, slab_ref, **kw):
    _conv3x3_body(x_ref, w_ref, (scale_ref, shift_ref), y_ref, sum_ref,
                  ssq_ref, xpad_ref, slab_ref, **kw)


def _conv_pass(x, wmat, scale=None, shift=None, *, row_tile):
    B, H, W, Cp = x.shape
    TH = row_tile if (H % row_tile == 0) else H
    NT = H // TH
    static = dict(H=H, W=W, Cp=Cp, TH=TH)

    if scale is None:
        kern = functools.partial(_conv3x3_plain_kernel, **static)
        extra_in, extra_specs = (), ()
    else:
        kern = functools.partial(_conv3x3_bnrelu_kernel, **static)
        extra_in = (scale, shift)
        extra_specs = (pl.BlockSpec((1, Cp), lambda b, t: (0, 0)),
                       pl.BlockSpec((1, Cp), lambda b, t: (0, 0)))

    grid_spec = pltpu.PrefetchScalarGridSpec(
        num_scalar_prefetch=0,
        grid=(B, NT),
        in_specs=[
            # full image per b; resident across the row-tile axis
            pl.BlockSpec((1, H, W, Cp), lambda b, t: (b, 0, 0, 0)),
            pl.BlockSpec((9 * Cp, Cp), lambda b, t: (0, 0)),
            *extra_specs,
        ],
        out_specs=[
            pl.BlockSpec((1, TH, W, Cp), lambda b, t: (b, t, 0, 0)),
            pl.BlockSpec((1, 1, 1, Cp), lambda b, t: (b, t, 0, 0)),
            pl.BlockSpec((1, 1, 1, Cp), lambda b, t: (b, t, 0, 0)),
        ],
        scratch_shapes=[
            pltpu.VMEM((TH + 2, W + 2, Cp), jnp.bfloat16),   # padded input
            pltpu.VMEM((TH, W, 9 * Cp), jnp.bfloat16),       # bf16 im2col slab
        ],
    )
    out_shapes = (
        jax.ShapeDtypeStruct((B, H, W, Cp), jnp.bfloat16),    # raw conv out
        jax.ShapeDtypeStruct((B, NT, 1, Cp), jnp.float32),    # per-tile sum
        jax.ShapeDtypeStruct((B, NT, 1, Cp), jnp.float32),    # per-tile sum sq
    )
    return pl.pallas_call(
        kern,
        out_shape=out_shapes,
        grid_spec=grid_spec,
        compiler_params=pltpu.CompilerParams(
            dimension_semantics=("parallel", "arbitrary"),
            vmem_limit_bytes=_VMEM_LIMIT),
    )(x, wmat, *extra_in)


# --------------------------------------------------------------------------
# Kernel 3: bn2 affine + residual add + relu, un-padded (first C channels)
# --------------------------------------------------------------------------
def _bn_add_relu_kernel(h_ref, x_ref, scale_ref, shift_ref, o_ref, *, C):
    h = h_ref[0].astype(jnp.float32)
    r = h * scale_ref[...] + shift_ref[...] + x_ref[0].astype(jnp.float32)
    # Only the first C (real) channels go back to HBM.
    o_ref[0] = jnp.maximum(r, 0.0)[:, :, :C].astype(o_ref.dtype)


def _bn_add_relu_pass(h2, x, scale, shift, C, *, row_tile):
    B, H, W, Cp = x.shape
    TH = row_tile if (H % row_tile == 0) else H
    NT = H // TH
    grid_spec = pltpu.PrefetchScalarGridSpec(
        num_scalar_prefetch=0,
        grid=(B, NT),
        in_specs=[
            pl.BlockSpec((1, TH, W, Cp), lambda b, t: (b, t, 0, 0)),
            pl.BlockSpec((1, TH, W, Cp), lambda b, t: (b, t, 0, 0)),
            pl.BlockSpec((1, Cp), lambda b, t: (0, 0)),
            pl.BlockSpec((1, Cp), lambda b, t: (0, 0)),
        ],
        out_specs=pl.BlockSpec((1, TH, W, C), lambda b, t: (b, t, 0, 0)),
    )
    return pl.pallas_call(
        functools.partial(_bn_add_relu_kernel, C=C),
        out_shape=jax.ShapeDtypeStruct((B, H, W, C), jnp.float32),
        grid_spec=grid_spec,
        compiler_params=pltpu.CompilerParams(
            dimension_semantics=("parallel", "arbitrary"),
            vmem_limit_bytes=_VMEM_LIMIT),
    )(h2, x, scale, shift)


def _bn_scale_shift(psum, pssq, gamma, beta, count):
    """Finalize global training-mode BN stats -> fused (scale, shift)."""
    mean = jnp.sum(psum, axis=(0, 1, 2)) / count
    # E[x^2]-E[x]^2 in f32, clamped >= 0 (activations here are well-scaled).
    var = jnp.maximum(jnp.sum(pssq, axis=(0, 1, 2)) / count - mean * mean, 0.0)
    scale = gamma * lax.rsqrt(var + _BN_EPS)
    shift = beta - mean * scale
    return scale.reshape(1, -1), shift.reshape(1, -1)


# --------------------------------------------------------------------------
# Wrapper: PyTorch-style NCHW in / NCHW out
# --------------------------------------------------------------------------
@functools.partial(jax.jit, static_argnames=("row_tile",))
def basic_block_pallas(x_nchw, params, row_tile=32):
    B, C, H, W = x_nchw.shape
    Cp = ((C + _LANE - 1) // _LANE) * _LANE

    # NCHW -> NHWC, channel axis zero-padded to a lane-dense multiple of 128,
    # cast to bf16 once (MXU operand dtype; halves residual-read bytes).
    x = jnp.transpose(x_nchw, (0, 2, 3, 1))
    x = jnp.pad(x, ((0, 0), (0, 0), (0, 0), (0, Cp - C))).astype(jnp.bfloat16)

    def pad_weight(w):  # (3,3,C,C) HWIO -> bf16 (9*Cp, Cp) im2col matrix
        w = jnp.pad(w.astype(jnp.float32),
                    ((0, 0), (0, 0), (0, Cp - C), (0, Cp - C)))
        return w.reshape(9 * Cp, Cp).astype(jnp.bfloat16)

    def pad_vec(v):     # (C,) -> (Cp,); padded channels get 0
        return jnp.pad(v.astype(jnp.float32), (0, Cp - C))

    w1, w2 = pad_weight(params["w1"]), pad_weight(params["w2"])
    g1, b1 = pad_vec(params["g1"]), pad_vec(params["b1"])
    g2, b2 = pad_vec(params["g2"]), pad_vec(params["b2"])
    count = float(B * H * W)

    # pass 1: conv1 (+ partial BN1 statistics)
    h1, s1, q1 = _conv_pass(x, w1, row_tile=row_tile)
    scale1, shift1 = _bn_scale_shift(s1, q1, g1, b1, count)

    # pass 2: bn1 + relu + conv2 (+ partial BN2 statistics)
    h2, s2, q2 = _conv_pass(h1, w2, scale1, shift1, row_tile=row_tile)
    scale2, shift2 = _bn_scale_shift(s2, q2, g2, b2, count)

    # pass 3: bn2 + residual add + relu; writes only the C real channels
    out = _bn_add_relu_pass(h2, x, scale2, shift2, C, row_tile=row_tile)

    return jnp.transpose(out, (0, 3, 1, 2))  # small un-padded NCHW


# --------------------------------------------------------------------------
# Pure-JAX reference mirroring the PyTorch forward (training-mode BN)
# --------------------------------------------------------------------------
def basic_block_reference(x_nchw, params):
    def conv3x3(x, w_hwio):
        return lax.conv_general_dilated(
            x, w_hwio, window_strides=(1, 1), padding=((1, 1), (1, 1)),
            dimension_numbers=("NCHW", "HWIO", "NCHW"))

    def bn(x, g, b):
        mean = jnp.mean(x, axis=(0, 2, 3), keepdims=True)
        var = jnp.mean((x - mean) ** 2, axis=(0, 2, 3), keepdims=True)
        return (x - mean) * lax.rsqrt(var + _BN_EPS) * g.reshape(1, -1, 1, 1) \
            + b.reshape(1, -1, 1, 1)

    h = conv3x3(x_nchw, params["w1"])
    h = jnp.maximum(bn(h, params["g1"], params["b1"]), 0.0)
    h = conv3x3(h, params["w2"])
    h = bn(h, params["g2"], params["b2"])
    return jnp.maximum(h + x_nchw, 0.0)


def init_params(key, planes):
    """Deterministic synthetic init (conv weights in (3,3,Cin,Cout) = HWIO)."""
    k1, k2, k3, k4, k5, k6 = jax.random.split(key, 6)
    return {
        "w1": 0.1 * jax.random.normal(k1, (3, 3, planes, planes), jnp.float32),
        "w2": 0.1 * jax.random.normal(k2, (3, 3, planes, planes), jnp.float32),
        "g1": 1.0 + 0.1 * jax.random.normal(k3, (planes,), jnp.float32),
        "b1": 0.1 * jax.random.normal(k4, (planes,), jnp.float32),
        "g2": 1.0 + 0.1 * jax.random.normal(k5, (planes,), jnp.float32),
        "b2": 0.1 * jax.random.normal(k6, (planes,), jnp.float32),
    }


if __name__ == "__main__":
    key = jax.random.PRNGKey(0)
    kx, kp = jax.random.split(key)

    B, C, H, W = 2, 8, 16, 16  # inplanes == planes == 8 (stride=1, downsample=None)
    x = jax.random.normal(kx, (B, C, H, W), dtype=jnp.float32)
    params = init_params(kp, C)

    # row_tile=8 -> 2 row tiles per image, exercising the halo path.
    out = jax.block_until_ready(basic_block_pallas(x, params, row_tile=8))
    ref = jax.block_until_ready(basic_block_reference(x, params))

    assert out.shape == (B, C, H, W)
    max_err = float(jnp.max(jnp.abs(out - ref)))
    # bf16 MXU operands / activations (f32 accumulation, f32 BN statistics)
    assert jnp.allclose(out, ref, rtol=5e-2, atol=5e-2), max_err
    print("KERNEL_OK")
</pallas_src>

<mosaic_0001>
module attributes {stable_mosaic.version = 11 : i64} {
  func.func @_conv3x3_plain_kernel(%arg0: i32, %arg1: i32, %arg2: memref<1x16x16x128xbf16, #tpu.memory_space<vmem>>, %arg3: memref<1152x128xbf16, #tpu.memory_space<vmem>>, %arg4: memref<1x8x16x128xbf16, #tpu.memory_space<vmem>>, %arg5: memref<1x1x1x128xf32, #tpu.memory_space<vmem>>, %arg6: memref<1x1x1x128xf32, #tpu.memory_space<vmem>>, %arg7: memref<10x18x128xbf16, #tpu.memory_space<vmem>>, %arg8: memref<8x16x1152xbf16, #tpu.memory_space<vmem>>) attributes {dimension_semantics = [#tpu.dimension_semantics<parallel>, #tpu.dimension_semantics<arbitrary>], iteration_bounds = array<i64: 2, 2>, scalar_prefetch = 0 : i64, scratch_operands = 2 : i64, tpu.core_type = #tpu.core_type<tc>, window_params = [{transform_indices = @transform_0, window_bounds = array<i64: 1, 16, 16, 128>}, {pipeline_mode = #tpu.pipeline_mode<synchronous>, transform_indices = @transform_1, window_bounds = array<i64: 1152, 128>}, {transform_indices = @transform_2, window_bounds = array<i64: 1, 8, 16, 128>}, {transform_indices = @transform_3, window_bounds = array<i64: 1, 1, 1, 128>}, {transform_indices = @transform_4, window_bounds = array<i64: 1, 1, 1, 128>}]} {
    %c8_i32 = arith.constant 8 : i32
    %0 = arith.muli %arg1, %c8_i32 : i32
    %cst = arith.constant 0.000000e+00 : bf16
    %1 = vector.broadcast %cst : bf16 to vector<1x16x128xbf16>
    %cst_0 = arith.constant 0.000000e+00 : bf16
    %2 = vector.broadcast %cst_0 : bf16 to vector<10x1x128xbf16>
    %c0 = arith.constant 0 : index
    %3 = arith.index_cast %0 : i32 to index
    %c0_1 = arith.constant 0 : index
    %c0_2 = arith.constant 0 : index
    %4 = vector.load %arg2[%c0, %3, %c0_1, %c0_2] : memref<1x16x16x128xbf16, #tpu.memory_space<vmem>>, vector<1x8x16x128xbf16>
    %5 = vector.shape_cast %4 : vector<1x8x16x128xbf16> to vector<8x16x128xbf16>
    %c1 = arith.constant 1 : index
    %c1_3 = arith.constant 1 : index
    %c0_4 = arith.constant 0 : index
    %6 = vector.load %arg7[%c1, %c1_3, %c0_4] : memref<10x18x128xbf16, #tpu.memory_space<vmem>>, vector<8x16x128xbf16>
    tpu.vector_store %arg7[%c1, %c1_3, %c0_4], %5 {strides = array<i32>} : memref<10x18x128xbf16, #tpu.memory_space<vmem>>, vector<8x16x128xbf16>,
    %c0_5 = arith.constant 0 : index
    %c0_6 = arith.constant 0 : index
    %c0_7 = arith.constant 0 : index
    %7 = vector.load %arg7[%c0_5, %c0_6, %c0_7] : memref<10x18x128xbf16, #tpu.memory_space<vmem>>, vector<10x1x128xbf16>
    tpu.vector_store %arg7[%c0_5, %c0_6, %c0_7], %2 {strides = array<i32>} : memref<10x18x128xbf16, #tpu.memory_space<vmem>>, vector<10x1x128xbf16>,
    %c0_8 = arith.constant 0 : index
    %c17 = arith.constant 17 : index
    %c0_9 = arith.constant 0 : index
    %8 = vector.load %arg7[%c0_8, %c17, %c0_9] : memref<10x18x128xbf16, #tpu.memory_space<vmem>>, vector<10x1x128xbf16>
    tpu.vector_store %arg7[%c0_8, %c17, %c0_9], %2 {strides = array<i32>} : memref<10x18x128xbf16, #tpu.memory_space<vmem>>, vector<10x1x128xbf16>,
    %c0_10 = arith.constant 0 : index
    %c1_11 = arith.constant 1 : index
    %c0_12 = arith.constant 0 : index
    %9 = vector.load %arg7[%c0_10, %c1_11, %c0_12] : memref<10x18x128xbf16, #tpu.memory_space<vmem>>, vector<1x16x128xbf16>
    tpu.vector_store %arg7[%c0_10, %c1_11, %c0_12], %1 {strides = array<i32>} : memref<10x18x128xbf16, #tpu.memory_space<vmem>>, vector<1x16x128xbf16>,
    %c0_i32 = arith.constant 0 : i32
    %10 = arith.cmpi sgt, %0, %c0_i32 : i32
    %11 = arith.extui %10 : i1 to i32
    %c0_i32_13 = arith.constant 0 : i32
    %12 = arith.cmpi ne, %11, %c0_i32_13 : i32
    scf.if %12 {
      %c1_i32 = arith.constant 1 : i32
      %57 = arith.subi %0, %c1_i32 : i32
      %c0_83 = arith.constant 0 : index
      %58 = arith.index_cast %57 : i32 to index
      %c0_84 = arith.constant 0 : index
      %c0_85 = arith.constant 0 : index
      %59 = vector.load %arg2[%c0_83, %58, %c0_84, %c0_85] : memref<1x16x16x128xbf16, #tpu.memory_space<vmem>>, vector<1x1x16x128xbf16>
      %60 = vector.shape_cast %59 : vector<1x1x16x128xbf16> to vector<1x16x128xbf16>
      %c0_86 = arith.constant 0 : index
      %c1_87 = arith.constant 1 : index
      %c0_88 = arith.constant 0 : index
      %61 = vector.load %arg7[%c0_86, %c1_87, %c0_88] : memref<10x18x128xbf16, #tpu.memory_space<vmem>>, vector<1x16x128xbf16>
      tpu.vector_store %arg7[%c0_86, %c1_87, %c0_88], %60 {strides = array<i32>} : memref<10x18x128xbf16, #tpu.memory_space<vmem>>, vector<1x16x128xbf16>,
    } else {
    }
    %c9 = arith.constant 9 : index
    %c1_14 = arith.constant 1 : index
    %c0_15 = arith.constant 0 : index
    %13 = vector.load %arg7[%c9, %c1_14, %c0_15] : memref<10x18x128xbf16, #tpu.memory_space<vmem>>, vector<1x16x128xbf16>
    tpu.vector_store %arg7[%c9, %c1_14, %c0_15], %1 {strides = array<i32>} : memref<10x18x128xbf16, #tpu.memory_space<vmem>>, vector<1x16x128xbf16>,
    %c8_i32_16 = arith.constant 8 : i32
    %14 = arith.addi %0, %c8_i32_16 : i32
    %c16_i32 = arith.constant 16 : i32
    %15 = arith.cmpi slt, %14, %c16_i32 : i32
    %16 = arith.extui %15 : i1 to i32
    %c0_i32_17 = arith.constant 0 : i32
    %17 = arith.cmpi ne, %16, %c0_i32_17 : i32
    scf.if %17 {
      %c8_i32_83 = arith.constant 8 : i32
      %57 = arith.addi %0, %c8_i32_83 : i32
      %c0_84 = arith.constant 0 : index
      %58 = arith.index_cast %57 : i32 to index
      %c0_85 = arith.constant 0 : index
      %c0_86 = arith.constant 0 : index
      %59 = vector.load %arg2[%c0_84, %58, %c0_85, %c0_86] : memref<1x16x16x128xbf16, #tpu.memory_space<vmem>>, vector<1x1x16x128xbf16>
      %60 = vector.shape_cast %59 : vector<1x1x16x128xbf16> to vector<1x16x128xbf16>
      %c9_87 = arith.constant 9 : index
      %c1_88 = arith.constant 1 : index
      %c0_89 = arith.constant 0 : index
      %61 = vector.load %arg7[%c9_87, %c1_88, %c0_89] : memref<10x18x128xbf16, #tpu.memory_space<vmem>>, vector<1x16x128xbf16>
      tpu.vector_store %arg7[%c9_87, %c1_88, %c0_89], %60 {strides = array<i32>} : memref<10x18x128xbf16, #tpu.memory_space<vmem>>, vector<1x16x128xbf16>,
    } else {
    }
    %c0_18 = arith.constant 0 : index
    %c0_19 = arith.constant 0 : index
    %c0_20 = arith.constant 0 : index
    %18 = vector.load %arg7[%c0_18, %c0_19, %c0_20] : memref<10x18x128xbf16, #tpu.memory_space<vmem>>, vector<8x16x128xbf16>
    %c0_21 = arith.constant 0 : index
    %c0_22 = arith.constant 0 : index
    %c0_23 = arith.constant 0 : index
    %19 = vector.load %arg8[%c0_21, %c0_22, %c0_23] : memref<8x16x1152xbf16, #tpu.memory_space<vmem>>, vector<8x16x128xbf16>
    tpu.vector_store %arg8[%c0_21, %c0_22, %c0_23], %18 {strides = array<i32>} : memref<8x16x1152xbf16, #tpu.memory_space<vmem>>, vector<8x16x128xbf16>,
    %c0_24 = arith.constant 0 : index
    %c1_25 = arith.constant 1 : index
    %c0_26 = arith.constant 0 : index
    %20 = vector.load %arg7[%c0_24, %c1_25, %c0_26] : memref<10x18x128xbf16, #tpu.memory_space<vmem>>, vector<8x16x128xbf16>
    %c0_27 = arith.constant 0 : index
    %c0_28 = arith.constant 0 : index
    %c128 = arith.constant 128 : index
    %21 = vector.load %arg8[%c0_27, %c0_28, %c128] : memref<8x16x1152xbf16, #tpu.memory_space<vmem>>, vector<8x16x128xbf16>
    tpu.vector_store %arg8[%c0_27, %c0_28, %c128], %20 {strides = array<i32>} : memref<8x16x1152xbf16, #tpu.memory_space<vmem>>, vector<8x16x128xbf16>,
    %c0_29 = arith.constant 0 : index
    %c2 = arith.constant 2 : index
    %c0_30 = arith.constant 0 : index
    %22 = vector.load %arg7[%c0_29, %c2, %c0_30] : memref<10x18x128xbf16, #tpu.memory_space<vmem>>, vector<8x16x128xbf16>
    %c0_31 = arith.constant 0 : index
    %c0_32 = arith.constant 0 : index
    %c256 = arith.constant 256 : index
    %23 = vector.load %arg8[%c0_31, %c0_32, %c256] : memref<8x16x1152xbf16, #tpu.memory_space<vmem>>, vector<8x16x128xbf16>
    tpu.vector_store %arg8[%c0_31, %c0_32, %c256], %22 {strides = array<i32>} : memref<8x16x1152xbf16, #tpu.memory_space<vmem>>, vector<8x16x128xbf16>,
    %c1_33 = arith.constant 1 : index
    %c0_34 = arith.constant 0 : index
    %c0_35 = arith.constant 0 : index
    %24 = vector.load %arg7[%c1_33, %c0_34, %c0_35] : memref<10x18x128xbf16, #tpu.memory_space<vmem>>, vector<8x16x128xbf16>
    %c0_36 = arith.constant 0 : index
    %c0_37 = arith.constant 0 : index
    %c384 = arith.constant 384 : index
    %25 = vector.load %arg8[%c0_36, %c0_37, %c384] : memref<8x16x1152xbf16, #tpu.memory_space<vmem>>, vector<8x16x128xbf16>
    tpu.vector_store %arg8[%c0_36, %c0_37, %c384], %24 {strides = array<i32>} : memref<8x16x1152xbf16, #tpu.memory_space<vmem>>, vector<8x16x128xbf16>,
    %c1_38 = arith.constant 1 : index
    %c1_39 = arith.constant 1 : index
    %c0_40 = arith.constant 0 : index
    %26 = vector.load %arg7[%c1_38, %c1_39, %c0_40] : memref<10x18x128xbf16, #tpu.memory_space<vmem>>, vector<8x16x128xbf16>
    %c0_41 = arith.constant 0 : index
    %c0_42 = arith.constant 0 : index
    %c512 = arith.constant 512 : index
    %27 = vector.load %arg8[%c0_41, %c0_42, %c512] : memref<8x16x1152xbf16, #tpu.memory_space<vmem>>, vector<8x16x128xbf16>
    tpu.vector_store %arg8[%c0_41, %c0_42, %c512], %26 {strides = array<i32>} : memref<8x16x1152xbf16, #tpu.memory_space<vmem>>, vector<8x16x128xbf16>,
    %c1_43 = arith.constant 1 : index
    %c2_44 = arith.constant 2 : index
    %c0_45 = arith.constant 0 : index
    %28 = vector.load %arg7[%c1_43, %c2_44, %c0_45] : memref<10x18x128xbf16, #tpu.memory_space<vmem>>, vector<8x16x128xbf16>
    %c0_46 = arith.constant 0 : index
    %c0_47 = arith.constant 0 : index
    %c640 = arith.constant 640 : index
    %29 = vector.load %arg8[%c0_46, %c0_47, %c640] : memref<8x16x1152xbf16, #tpu.memory_space<vmem>>, vector<8x16x128xbf16>
    tpu.vector_store %arg8[%c0_46, %c0_47, %c640], %28 {strides = array<i32>} : memref<8x16x1152xbf16, #tpu.memory_space<vmem>>, vector<8x16x128xbf16>,
    %c2_48 = arith.constant 2 : index
    %c0_49 = arith.constant 0 : index
    %c0_50 = arith.constant 0 : index
    %30 = vector.load %arg7[%c2_48, %c0_49, %c0_50] : memref<10x18x128xbf16, #tpu.memory_space<vmem>>, vector<8x16x128xbf16>
    %c0_51 = arith.constant 0 : index
    %c0_52 = arith.constant 0 : index
    %c768 = arith.constant 768 : index
    %31 = vector.load %arg8[%c0_51, %c0_52, %c768] : memref<8x16x1152xbf16, #tpu.memory_space<vmem>>, vector<8x16x128xbf16>
    tpu.vector_store %arg8[%c0_51, %c0_52, %c768], %30 {strides = array<i32>} : memref<8x16x1152xbf16, #tpu.memory_space<vmem>>, vector<8x16x128xbf16>,
    %c2_53 = arith.constant 2 : index
    %c1_54 = arith.constant 1 : index
    %c0_55 = arith.constant 0 : index
    %32 = vector.load %arg7[%c2_53, %c1_54, %c0_55] : memref<10x18x128xbf16, #tpu.memory_space<vmem>>, vector<8x16x128xbf16>
    %c0_56 = arith.constant 0 : index
    %c0_57 = arith.constant 0 : index
    %c896 = arith.constant 896 : index
    %33 = vector.load %arg8[%c0_56, %c0_57, %c896] : memref<8x16x1152xbf16, #tpu.memory_space<vmem>>, vector<8x16x128xbf16>
    tpu.vector_store %arg8[%c0_56, %c0_57, %c896], %32 {strides = array<i32>} : memref<8x16x1152xbf16, #tpu.memory_space<vmem>>, vector<8x16x128xbf16>,
    %c2_58 = arith.constant 2 : index
    %c2_59 = arith.constant 2 : index
    %c0_60 = arith.constant 0 : index
    %34 = vector.load %arg7[%c2_58, %c2_59, %c0_60] : memref<10x18x128xbf16, #tpu.memory_space<vmem>>, vector<8x16x128xbf16>
    %c0_61 = arith.constant 0 : index
    %c0_62 = arith.constant 0 : index
    %c1024 = arith.constant 1024 : index
    %35 = vector.load %arg8[%c0_61, %c0_62, %c1024] : memref<8x16x1152xbf16, #tpu.memory_space<vmem>>, vector<8x16x128xbf16>
    tpu.vector_store %arg8[%c0_61, %c0_62, %c1024], %34 {strides = array<i32>} : memref<8x16x1152xbf16, #tpu.memory_space<vmem>>, vector<8x16x128xbf16>,
    %c0_63 = arith.constant 0 : index
    %c0_64 = arith.constant 0 : index
    %c0_65 = arith.constant 0 : index
    %36 = vector.load %arg8[%c0_63, %c0_64, %c0_65] : memref<8x16x1152xbf16, #tpu.memory_space<vmem>>, vector<8x16x1152xbf16>
    %37 = vector.shape_cast %36 : vector<8x16x1152xbf16> to vector<128x1152xbf16>
    %c0_66 = arith.constant 0 : index
    %c0_67 = arith.constant 0 : index
    %38 = vector.load %arg3[%c0_66, %c0_67] : memref<1152x128xbf16, #tpu.memory_space<vmem>>, vector<1152x128xbf16>
    %cst_68 = arith.constant dense<0.000000e+00> : vector<128x128xf32>
    %39 = tpu.matmul %37, %38, %cst_68 {dimension_numbers = #tpu.dot_dimension_numbers<[1], [0], [0], [1], [0, 0, 1, 1], [], []>} : vector<128x1152xbf16>, vector<1152x128xbf16>, vector<128x128xf32> -> vector<128x128xf32>
    %40 = arith.truncf %39 : vector<128x128xf32> to vector<128x128xbf16>
    %41 = vector.shape_cast %40 : vector<128x128xbf16> to vector<8x16x128xbf16>
    %c0_69 = arith.constant 0 : index
    %c0_70 = arith.constant 0 : index
    %c0_71 = arith.constant 0 : index
    %c0_72 = arith.constant 0 : index
    %42 = vector.load %arg4[%c0_69, %c0_70, %c0_71, %c0_72] : memref<1x8x16x128xbf16, #tpu.memory_space<vmem>>, vector<1x8x16x128xbf16>
    %43 = vector.shape_cast %42 : vector<1x8x16x128xbf16> to vector<8x16x128xbf16>
    %44 = vector.shape_cast %41 : vector<8x16x128xbf16> to vector<1x8x16x128xbf16>
    tpu.vector_store %arg4[%c0_69, %c0_70, %c0_71, %c0_72], %44 {strides = array<i32>} : memref<1x8x16x128xbf16, #tpu.memory_space<vmem>>, vector<1x8x16x128xbf16>,
    %45 = arith.extf %40 : vector<128x128xbf16> to vector<128x128xf32>
    %cst_73 = arith.constant dense<0.000000e+00> : vector<128xf32>
    %46 = vector.multi_reduction <add>, %45, %cst_73 [0] : vector<128x128xf32> to vector<128xf32>
    %47 = vector.shape_cast %46 : vector<128xf32> to vector<1x128xf32>
    %c0_74 = arith.constant 0 : index
    %c0_75 = arith.constant 0 : index
    %c0_76 = arith.constant 0 : index
    %c0_77 = arith.constant 0 : index
    %48 = vector.load %arg5[%c0_74, %c0_75, %c0_76, %c0_77] : memref<1x1x1x128xf32, #tpu.memory_space<vmem>>, vector<1x1x1x128xf32>
    %49 = vector.shape_cast %48 : vector<1x1x1x128xf32> to vector<1x128xf32>
    %50 = vector.shape_cast %47 : vector<1x128xf32> to vector<1x1x1x128xf32>
    tpu.vector_store %arg5[%c0_74, %c0_75, %c0_76, %c0_77], %50 {strides = array<i32>} : memref<1x1x1x128xf32, #tpu.memory_space<vmem>>, vector<1x1x1x128xf32>,
    %51 = arith.mulf %45, %45 : vector<128x128xf32>
    %cst_78 = arith.constant dense<0.000000e+00> : vector<128xf32>
    %52 = vector.multi_reduction <add>, %51, %cst_78 [0] : vector<128x128xf32> to vector<128xf32>
    %53 = vector.shape_cast %52 : vector<128xf32> to vector<1x128xf32>
    %c0_79 = arith.constant 0 : index
    %c0_80 = arith.constant 0 : index
    %c0_81 = arith.constant 0 : index
    %c0_82 = arith.constant 0 : index
    %54 = vector.load %arg6[%c0_79, %c0_80, %c0_81, %c0_82] : memref<1x1x1x128xf32, #tpu.memory_space<vmem>>, vector<1x1x1x128xf32>
    %55 = vector.shape_cast %54 : vector<1x1x1x128xf32> to vector<1x128xf32>
    %56 = vector.shape_cast %53 : vector<1x128xf32> to vector<1x1x1x128xf32>
    tpu.vector_store %arg6[%c0_79, %c0_80, %c0_81, %c0_82], %56 {strides = array<i32>} : memref<1x1x1x128xf32, #tpu.memory_space<vmem>>, vector<1x1x1x128xf32>,
    return
  }
  func.func @transform_0(%arg0: i32, %arg1: i32) -> (i32, i32, i32, i32) {
    %c0_i32 = arith.constant 0 : i32
    %c0_i32_0 = arith.constant 0 : i32
    %c0_i32_1 = arith.constant 0 : i32
    %c0_i32_2 = arith.constant 0 : i32
    return %arg0, %c0_i32, %c0_i32_0, %c0_i32_1 : i32, i32, i32, i32
  }
  func.func @transform_1(%arg0: i32, %arg1: i32) -> (i32, i32) {
    %c0_i32 = arith.constant 0 : i32
    %c0_i32_0 = arith.constant 0 : i32
    %c0_i32_1 = arith.constant 0 : i32
    return %c0_i32, %c0_i32_0 : i32, i32
  }
  func.func @transform_2(%arg0: i32, %arg1: i32) -> (i32, i32, i32, i32) {
    %c0_i32 = arith.constant 0 : i32
    %c0_i32_0 = arith.constant 0 : i32
    %c0_i32_1 = arith.constant 0 : i32
    return %arg0, %arg1, %c0_i32, %c0_i32_0 : i32, i32, i32, i32
  }
  func.func @transform_3(%arg0: i32, %arg1: i32) -> (i32, i32, i32, i32) {
    %c0_i32 = arith.constant 0 : i32
    %c0_i32_0 = arith.constant 0 : i32
    %c0_i32_1 = arith.constant 0 : i32
    return %arg0, %arg1, %c0_i32, %c0_i32_0 : i32, i32, i32, i32
  }
  func.func @transform_4(%arg0: i32, %arg1: i32) -> (i32, i32, i32, i32) {
    %c0_i32 = arith.constant 0 : i32
    %c0_i32_0 = arith.constant 0 : i32
    %c0_i32_1 = arith.constant 0 : i32
    return %arg0, %arg1, %c0_i32, %c0_i32_0 : i32, i32, i32, i32
  }
}

module attributes {stable_mosaic.version = 11 : i64} {
  func.func @_bn_add_relu_kernel(%arg0: i32, %arg1: i32, %arg2: memref<1x8x16x128xbf16, #tpu.memory_space<vmem>>, %arg3: memref<1x8x16x128xbf16, #tpu.memory_space<vmem>>, %arg4: memref<1x128xf32, #tpu.memory_space<vmem>>, %arg5: memref<1x128xf32, #tpu.memory_space<vmem>>, %arg6: memref<1x8x16x8xf32, #tpu.memory_space<vmem>>) attributes {dimension_semantics = [#tpu.dimension_semantics<parallel>, #tpu.dimension_semantics<arbitrary>], iteration_bounds = array<i64: 2, 2>, scalar_prefetch = 0 : i64, scratch_operands = 0 : i64, tpu.core_type = #tpu.core_type<tc>, window_params = [{transform_indices = @transform_0, window_bounds = array<i64: 1, 8, 16, 128>}, {transform_indices = @transform_1, window_bounds = array<i64: 1, 8, 16, 128>}, {pipeline_mode = #tpu.pipeline_mode<synchronous>, transform_indices = @transform_2, window_bounds = array<i64: 1, 128>}, {pipeline_mode = #tpu.pipeline_mode<synchronous>, transform_indices = @transform_3, window_bounds = array<i64: 1, 128>}, {transform_indices = @transform_4, window_bounds = array<i64: 1, 8, 16, 8>}]} {
    %c0 = arith.constant 0 : index
    %c0_0 = arith.constant 0 : index
    %c0_1 = arith.constant 0 : index
    %c0_2 = arith.constant 0 : index
    %0 = vector.load %arg2[%c0, %c0_0, %c0_1, %c0_2] : memref<1x8x16x128xbf16, #tpu.memory_space<vmem>>, vector<1x8x16x128xbf16>
    %1 = vector.shape_cast %0 : vector<1x8x16x128xbf16> to vector<8x16x128xbf16>
    %2 = arith.extf %1 : vector<8x16x128xbf16> to vector<8x16x128xf32>
    %c0_3 = arith.constant 0 : index
    %c0_4 = arith.constant 0 : index
    %3 = vector.load %arg4[%c0_3, %c0_4] : memref<1x128xf32, #tpu.memory_space<vmem>>, vector<1x128xf32>
    %4 = vector.shape_cast %3 : vector<1x128xf32> to vector<1x1x128xf32>
    %5 = vector.broadcast %4 : vector<1x1x128xf32> to vector<8x16x128xf32>
    %6 = arith.mulf %2, %5 : vector<8x16x128xf32>
    %c0_5 = arith.constant 0 : index
    %c0_6 = arith.constant 0 : index
    %7 = vector.load %arg5[%c0_5, %c0_6] : memref<1x128xf32, #tpu.memory_space<vmem>>, vector<1x128xf32>
    %8 = vector.shape_cast %7 : vector<1x128xf32> to vector<1x1x128xf32>
    %9 = vector.broadcast %8 : vector<1x1x128xf32> to vector<8x16x128xf32>
    %10 = arith.addf %6, %9 : vector<8x16x128xf32>
    %c0_7 = arith.constant 0 : index
    %c0_8 = arith.constant 0 : index
    %c0_9 = arith.constant 0 : index
    %c0_10 = arith.constant 0 : index
    %11 = vector.load %arg3[%c0_7, %c0_8, %c0_9, %c0_10] : memref<1x8x16x128xbf16, #tpu.memory_space<vmem>>, vector<1x8x16x128xbf16>
    %12 = vector.shape_cast %11 : vector<1x8x16x128xbf16> to vector<8x16x128xbf16>
    %13 = arith.extf %12 : vector<8x16x128xbf16> to vector<8x16x128xf32>
    %14 = arith.addf %10, %13 : vector<8x16x128xf32>
    %cst = arith.constant 0.000000e+00 : f32
    %15 = vector.broadcast %cst : f32 to vector<8x16x128xf32>
    %16 = arith.maximumf %14, %15 : vector<8x16x128xf32>
    %17 = vector.extract_strided_slice %16 {offsets = [0, 0, 0], sizes = [8, 16, 8], strides = [1, 1, 1]} : vector<8x16x128xf32> to vector<8x16x8xf32>
    %c0_11 = arith.constant 0 : index
    %c0_12 = arith.constant 0 : index
    %c0_13 = arith.constant 0 : index
    %c0_14 = arith.constant 0 : index
    %18 = vector.load %arg6[%c0_11, %c0_12, %c0_13, %c0_14] : memref<1x8x16x8xf32, #tpu.memory_space<vmem>>, vector<1x8x16x8xf32>
    %19 = vector.shape_cast %18 : vector<1x8x16x8xf32> to vector<8x16x8xf32>
    %20 = vector.shape_cast %17 : vector<8x16x8xf32> to vector<1x8x16x8xf32>
    tpu.vector_store %arg6[%c0_11, %c0_12, %c0_13, %c0_14], %20 {strides = array<i32>} : memref<1x8x16x8xf32, #tpu.memory_space<vmem>>, vector<1x8x16x8xf32>,
    return
  }
  func.func @transform_0(%arg0: i32, %arg1: i32) -> (i32, i32, i32, i32) {
    %c0_i32 = arith.constant 0 : i32
    %c0_i32_0 = arith.constant 0 : i32
    %c0_i32_1 = arith.constant 0 : i32
    return %arg0, %arg1, %c0_i32, %c0_i32_0 : i32, i32, i32, i32
  }
  func.func @transform_1(%arg0: i32, %arg1: i32) -> (i32, i32, i32, i32) {
    %c0_i32 = arith.constant 0 : i32
    %c0_i32_0 = arith.constant 0 : i32
    %c0_i32_1 = arith.constant 0 : i32
    return %arg0, %arg1, %c0_i32, %c0_i32_0 : i32, i32, i32, i32
  }
  func.func @transform_2(%arg0: i32, %arg1: i32) -> (i32, i32) {
    %c0_i32 = arith.constant 0 : i32
    %c0_i32_0 = arith.constant 0 : i32
    %c0_i32_1 = arith.constant 0 : i32
    return %c0_i32, %c0_i32_0 : i32, i32
  }
  func.func @transform_3(%arg0: i32, %arg1: i32) -> (i32, i32) {
    %c0_i32 = arith.constant 0 : i32
    %c0_i32_0 = arith.constant 0 : i32
    %c0_i32_1 = arith.constant 0 : i32
    return %c0_i32, %c0_i32_0 : i32, i32
  }
  func.func @transform_4(%arg0: i32, %arg1: i32) -> (i32, i32, i32, i32) {
    %c0_i32 = arith.constant 0 : i32
    %c0_i32_0 = arith.constant 0 : i32
    %c0_i32_1 = arith.constant 0 : i32
    return %arg0, %arg1, %c0_i32, %c0_i32_0 : i32, i32, i32, i32
  }
}

module attributes {stable_mosaic.version = 11 : i64} {
  func.func @_conv3x3_bnrelu_kernel(%arg0: i32, %arg1: i32, %arg2: memref<1x16x16x128xbf16, #tpu.memory_space<vmem>>, %arg3: memref<1152x128xbf16, #tpu.memory_space<vmem>>, %arg4: memref<1x128xf32, #tpu.memory_space<vmem>>, %arg5: memref<1x128xf32, #tpu.memory_space<vmem>>, %arg6: memref<1x8x16x128xbf16, #tpu.memory_space<vmem>>, %arg7: memref<1x1x1x128xf32, #tpu.memory_space<vmem>>, %arg8: memref<1x1x1x128xf32, #tpu.memory_space<vmem>>, %arg9: memref<10x18x128xbf16, #tpu.memory_space<vmem>>, %arg10: memref<8x16x1152xbf16, #tpu.memory_space<vmem>>) attributes {dimension_semantics = [#tpu.dimension_semantics<parallel>, #tpu.dimension_semantics<arbitrary>], iteration_bounds = array<i64: 2, 2>, scalar_prefetch = 0 : i64, scratch_operands = 2 : i64, tpu.core_type = #tpu.core_type<tc>, window_params = [{transform_indices = @transform_0, window_bounds = array<i64: 1, 16, 16, 128>}, {pipeline_mode = #tpu.pipeline_mode<synchronous>, transform_indices = @transform_1, window_bounds = array<i64: 1152, 128>}, {pipeline_mode = #tpu.pipeline_mode<synchronous>, transform_indices = @transform_2, window_bounds = array<i64: 1, 128>}, {pipeline_mode = #tpu.pipeline_mode<synchronous>, transform_indices = @transform_3, window_bounds = array<i64: 1, 128>}, {transform_indices = @transform_4, window_bounds = array<i64: 1, 8, 16, 128>}, {transform_indices = @transform_5, window_bounds = array<i64: 1, 1, 1, 128>}, {transform_indices = @transform_6, window_bounds = array<i64: 1, 1, 1, 128>}]} {
    %c8_i32 = arith.constant 8 : i32
    %0 = arith.muli %arg1, %c8_i32 : i32
    %c0 = arith.constant 0 : index
    %c0_0 = arith.constant 0 : index
    %1 = vector.load %arg4[%c0, %c0_0] : memref<1x128xf32, #tpu.memory_space<vmem>>, vector<1x128xf32>
    %c0_1 = arith.constant 0 : index
    %c0_2 = arith.constant 0 : index
    %2 = vector.load %arg5[%c0_1, %c0_2] : memref<1x128xf32, #tpu.memory_space<vmem>>, vector<1x128xf32>
    %cst = arith.constant 0.000000e+00 : bf16
    %3 = vector.broadcast %cst : bf16 to vector<1x16x128xbf16>
    %cst_3 = arith.constant 0.000000e+00 : bf16
    %4 = vector.broadcast %cst_3 : bf16 to vector<10x1x128xbf16>
    %c0_4 = arith.constant 0 : index
    %5 = arith.index_cast %0 : i32 to index
    %c0_5 = arith.constant 0 : index
    %c0_6 = arith.constant 0 : index
    %6 = vector.load %arg2[%c0_4, %5, %c0_5, %c0_6] : memref<1x16x16x128xbf16, #tpu.memory_space<vmem>>, vector<1x8x16x128xbf16>
    %7 = vector.shape_cast %6 : vector<1x8x16x128xbf16> to vector<8x16x128xbf16>
    %8 = arith.extf %7 : vector<8x16x128xbf16> to vector<8x16x128xf32>
    %9 = vector.shape_cast %1 : vector<1x128xf32> to vector<1x1x128xf32>
    %10 = vector.broadcast %9 : vector<1x1x128xf32> to vector<8x16x128xf32>
    %11 = arith.mulf %8, %10 : vector<8x16x128xf32>
    %12 = vector.shape_cast %2 : vector<1x128xf32> to vector<1x1x128xf32>
    %13 = vector.broadcast %12 : vector<1x1x128xf32> to vector<8x16x128xf32>
    %14 = arith.addf %11, %13 : vector<8x16x128xf32>
    %cst_7 = arith.constant 0.000000e+00 : f32
    %15 = vector.broadcast %cst_7 : f32 to vector<8x16x128xf32>
    %16 = arith.maximumf %14, %15 : vector<8x16x128xf32>
    %17 = arith.truncf %16 : vector<8x16x128xf32> to vector<8x16x128xbf16>
    %c1 = arith.constant 1 : index
    %c1_8 = arith.constant 1 : index
    %c0_9 = arith.constant 0 : index
    %18 = vector.load %arg9[%c1, %c1_8, %c0_9] : memref<10x18x128xbf16, #tpu.memory_space<vmem>>, vector<8x16x128xbf16>
    tpu.vector_store %arg9[%c1, %c1_8, %c0_9], %17 {strides = array<i32>} : memref<10x18x128xbf16, #tpu.memory_space<vmem>>, vector<8x16x128xbf16>,
    %c0_10 = arith.constant 0 : index
    %c0_11 = arith.constant 0 : index
    %c0_12 = arith.constant 0 : index
    %19 = vector.load %arg9[%c0_10, %c0_11, %c0_12] : memref<10x18x128xbf16, #tpu.memory_space<vmem>>, vector<10x1x128xbf16>
    tpu.vector_store %arg9[%c0_10, %c0_11, %c0_12], %4 {strides = array<i32>} : memref<10x18x128xbf16, #tpu.memory_space<vmem>>, vector<10x1x128xbf16>,
    %c0_13 = arith.constant 0 : index
    %c17 = arith.constant 17 : index
    %c0_14 = arith.constant 0 : index
    %20 = vector.load %arg9[%c0_13, %c17, %c0_14] : memref<10x18x128xbf16, #tpu.memory_space<vmem>>, vector<10x1x128xbf16>
    tpu.vector_store %arg9[%c0_13, %c17, %c0_14], %4 {strides = array<i32>} : memref<10x18x128xbf16, #tpu.memory_space<vmem>>, vector<10x1x128xbf16>,
    %c0_15 = arith.constant 0 : index
    %c1_16 = arith.constant 1 : index
    %c0_17 = arith.constant 0 : index
    %21 = vector.load %arg9[%c0_15, %c1_16, %c0_17] : memref<10x18x128xbf16, #tpu.memory_space<vmem>>, vector<1x16x128xbf16>
    tpu.vector_store %arg9[%c0_15, %c1_16, %c0_17], %3 {strides = array<i32>} : memref<10x18x128xbf16, #tpu.memory_space<vmem>>, vector<1x16x128xbf16>,
    %c0_i32 = arith.constant 0 : i32
    %22 = arith.cmpi sgt, %0, %c0_i32 : i32
    %23 = arith.extui %22 : i1 to i32
    %c0_i32_18 = arith.constant 0 : i32
    %24 = arith.cmpi ne, %23, %c0_i32_18 : i32
    scf.if %24 {
      %c1_i32 = arith.constant 1 : i32
      %69 = arith.subi %0, %c1_i32 : i32
      %c0_88 = arith.constant 0 : index
      %70 = arith.index_cast %69 : i32 to index
      %c0_89 = arith.constant 0 : index
      %c0_90 = arith.constant 0 : index
      %71 = vector.load %arg2[%c0_88, %70, %c0_89, %c0_90] : memref<1x16x16x128xbf16, #tpu.memory_space<vmem>>, vector<1x1x16x128xbf16>
      %72 = vector.shape_cast %71 : vector<1x1x16x128xbf16> to vector<1x16x128xbf16>
      %73 = arith.extf %72 : vector<1x16x128xbf16> to vector<1x16x128xf32>
      %74 = vector.shape_cast %1 : vector<1x128xf32> to vector<1x1x128xf32>
      %75 = vector.broadcast %74 : vector<1x1x128xf32> to vector<1x16x128xf32>
      %76 = arith.mulf %73, %75 : vector<1x16x128xf32>
      %77 = vector.shape_cast %2 : vector<1x128xf32> to vector<1x1x128xf32>
      %78 = vector.broadcast %77 : vector<1x1x128xf32> to vector<1x16x128xf32>
      %79 = arith.addf %76, %78 : vector<1x16x128xf32>
      %cst_91 = arith.constant 0.000000e+00 : f32
      %80 = vector.broadcast %cst_91 : f32 to vector<1x16x128xf32>
      %81 = arith.maximumf %79, %80 : vector<1x16x128xf32>
      %82 = arith.truncf %81 : vector<1x16x128xf32> to vector<1x16x128xbf16>
      %c0_92 = arith.constant 0 : index
      %c1_93 = arith.constant 1 : index
      %c0_94 = arith.constant 0 : index
      %83 = vector.load %arg9[%c0_92, %c1_93, %c0_94] : memref<10x18x128xbf16, #tpu.memory_space<vmem>>, vector<1x16x128xbf16>
      tpu.vector_store %arg9[%c0_92, %c1_93, %c0_94], %82 {strides = array<i32>} : memref<10x18x128xbf16, #tpu.memory_space<vmem>>, vector<1x16x128xbf16>,
    } else {
    }
    %c9 = arith.constant 9 : index
    %c1_19 = arith.constant 1 : index
    %c0_20 = arith.constant 0 : index
    %25 = vector.load %arg9[%c9, %c1_19, %c0_20] : memref<10x18x128xbf16, #tpu.memory_space<vmem>>, vector<1x16x128xbf16>
    tpu.vector_store %arg9[%c9, %c1_19, %c0_20], %3 {strides = array<i32>} : memref<10x18x128xbf16, #tpu.memory_space<vmem>>, vector<1x16x128xbf16>,
    %c8_i32_21 = arith.constant 8 : i32
    %26 = arith.addi %0, %c8_i32_21 : i32
    %c16_i32 = arith.constant 16 : i32
    %27 = arith.cmpi slt, %26, %c16_i32 : i32
    %28 = arith.extui %27 : i1 to i32
    %c0_i32_22 = arith.constant 0 : i32
    %29 = arith.cmpi ne, %28, %c0_i32_22 : i32
    scf.if %29 {
      %c8_i32_88 = arith.constant 8 : i32
      %69 = arith.addi %0, %c8_i32_88 : i32
      %c0_89 = arith.constant 0 : index
      %70 = arith.index_cast %69 : i32 to index
      %c0_90 = arith.constant 0 : index
      %c0_91 = arith.constant 0 : index
      %71 = vector.load %arg2[%c0_89, %70, %c0_90, %c0_91] : memref<1x16x16x128xbf16, #tpu.memory_space<vmem>>, vector<1x1x16x128xbf16>
      %72 = vector.shape_cast %71 : vector<1x1x16x128xbf16> to vector<1x16x128xbf16>
      %73 = arith.extf %72 : vector<1x16x128xbf16> to vector<1x16x128xf32>
      %74 = vector.shape_cast %1 : vector<1x128xf32> to vector<1x1x128xf32>
      %75 = vector.broadcast %74 : vector<1x1x128xf32> to vector<1x16x128xf32>
      %76 = arith.mulf %73, %75 : vector<1x16x128xf32>
      %77 = vector.shape_cast %2 : vector<1x128xf32> to vector<1x1x128xf32>
      %78 = vector.broadcast %77 : vector<1x1x128xf32> to vector<1x16x128xf32>
      %79 = arith.addf %76, %78 : vector<1x16x128xf32>
      %cst_92 = arith.constant 0.000000e+00 : f32
      %80 = vector.broadcast %cst_92 : f32 to vector<1x16x128xf32>
      %81 = arith.maximumf %79, %80 : vector<1x16x128xf32>
      %82 = arith.truncf %81 : vector<1x16x128xf32> to vector<1x16x128xbf16>
      %c9_93 = arith.constant 9 : index
      %c1_94 = arith.constant 1 : index
      %c0_95 = arith.constant 0 : index
      %83 = vector.load %arg9[%c9_93, %c1_94, %c0_95] : memref<10x18x128xbf16, #tpu.memory_space<vmem>>, vector<1x16x128xbf16>
      tpu.vector_store %arg9[%c9_93, %c1_94, %c0_95], %82 {strides = array<i32>} : memref<10x18x128xbf16, #tpu.memory_space<vmem>>, vector<1x16x128xbf16>,
    } else {
    }
    %c0_23 = arith.constant 0 : index
    %c0_24 = arith.constant 0 : index
    %c0_25 = arith.constant 0 : index
    %30 = vector.load %arg9[%c0_23, %c0_24, %c0_25] : memref<10x18x128xbf16, #tpu.memory_space<vmem>>, vector<8x16x128xbf16>
    %c0_26 = arith.constant 0 : index
    %c0_27 = arith.constant 0 : index
    %c0_28 = arith.constant 0 : index
    %31 = vector.load %arg10[%c0_26, %c0_27, %c0_28] : memref<8x16x1152xbf16, #tpu.memory_space<vmem>>, vector<8x16x128xbf16>
    tpu.vector_store %arg10[%c0_26, %c0_27, %c0_28], %30 {strides = array<i32>} : memref<8x16x1152xbf16, #tpu.memory_space<vmem>>, vector<8x16x128xbf16>,
    %c0_29 = arith.constant 0 : index
    %c1_30 = arith.constant 1 : index
    %c0_31 = arith.constant 0 : index
    %32 = vector.load %arg9[%c0_29, %c1_30, %c0_31] : memref<10x18x128xbf16, #tpu.memory_space<vmem>>, vector<8x16x128xbf16>
    %c0_32 = arith.constant 0 : index
    %c0_33 = arith.constant 0 : index
    %c128 = arith.constant 128 : index
    %33 = vector.load %arg10[%c0_32, %c0_33, %c128] : memref<8x16x1152xbf16, #tpu.memory_space<vmem>>, vector<8x16x128xbf16>
    tpu.vector_store %arg10[%c0_32, %c0_33, %c128], %32 {strides = array<i32>} : memref<8x16x1152xbf16, #tpu.memory_space<vmem>>, vector<8x16x128xbf16>,
    %c0_34 = arith.constant 0 : index
    %c2 = arith.constant 2 : index
    %c0_35 = arith.constant 0 : index
    %34 = vector.load %arg9[%c0_34, %c2, %c0_35] : memref<10x18x128xbf16, #tpu.memory_space<vmem>>, vector<8x16x128xbf16>
    %c0_36 = arith.constant 0 : index
    %c0_37 = arith.constant 0 : index
    %c256 = arith.constant 256 : index
    %35 = vector.load %arg10[%c0_36, %c0_37, %c256] : memref<8x16x1152xbf16, #tpu.memory_space<vmem>>, vector<8x16x128xbf16>
    tpu.vector_store %arg10[%c0_36, %c0_37, %c256], %34 {strides = array<i32>} : memref<8x16x1152xbf16, #tpu.memory_space<vmem>>, vector<8x16x128xbf16>,
    %c1_38 = arith.constant 1 : index
    %c0_39 = arith.constant 0 : index
    %c0_40 = arith.constant 0 : index
    %36 = vector.load %arg9[%c1_38, %c0_39, %c0_40] : memref<10x18x128xbf16, #tpu.memory_space<vmem>>, vector<8x16x128xbf16>
    %c0_41 = arith.constant 0 : index
    %c0_42 = arith.constant 0 : index
    %c384 = arith.constant 384 : index
    %37 = vector.load %arg10[%c0_41, %c0_42, %c384] : memref<8x16x1152xbf16, #tpu.memory_space<vmem>>, vector<8x16x128xbf16>
    tpu.vector_store %arg10[%c0_41, %c0_42, %c384], %36 {strides = array<i32>} : memref<8x16x1152xbf16, #tpu.memory_space<vmem>>, vector<8x16x128xbf16>,
    %c1_43 = arith.constant 1 : index
    %c1_44 = arith.constant 1 : index
    %c0_45 = arith.constant 0 : index
    %38 = vector.load %arg9[%c1_43, %c1_44, %c0_45] : memref<10x18x128xbf16, #tpu.memory_space<vmem>>, vector<8x16x128xbf16>
    %c0_46 = arith.constant 0 : index
    %c0_47 = arith.constant 0 : index
    %c512 = arith.constant 512 : index
    %39 = vector.load %arg10[%c0_46, %c0_47, %c512] : memref<8x16x1152xbf16, #tpu.memory_space<vmem>>, vector<8x16x128xbf16>
    tpu.vector_store %arg10[%c0_46, %c0_47, %c512], %38 {strides = array<i32>} : memref<8x16x1152xbf16, #tpu.memory_space<vmem>>, vector<8x16x128xbf16>,
    %c1_48 = arith.constant 1 : index
    %c2_49 = arith.constant 2 : index
    %c0_50 = arith.constant 0 : index
    %40 = vector.load %arg9[%c1_48, %c2_49, %c0_50] : memref<10x18x128xbf16, #tpu.memory_space<vmem>>, vector<8x16x128xbf16>
    %c0_51 = arith.constant 0 : index
    %c0_52 = arith.constant 0 : index
    %c640 = arith.constant 640 : index
    %41 = vector.load %arg10[%c0_51, %c0_52, %c640] : memref<8x16x1152xbf16, #tpu.memory_space<vmem>>, vector<8x16x128xbf16>
    tpu.vector_store %arg10[%c0_51, %c0_52, %c640], %40 {strides = array<i32>} : memref<8x16x1152xbf16, #tpu.memory_space<vmem>>, vector<8x16x128xbf16>,
    %c2_53 = arith.constant 2 : index
    %c0_54 = arith.constant 0 : index
    %c0_55 = arith.constant 0 : index
    %42 = vector.load %arg9[%c2_53, %c0_54, %c0_55] : memref<10x18x128xbf16, #tpu.memory_space<vmem>>, vector<8x16x128xbf16>
    %c0_56 = arith.constant 0 : index
    %c0_57 = arith.constant 0 : index
    %c768 = arith.constant 768 : index
    %43 = vector.load %arg10[%c0_56, %c0_57, %c768] : memref<8x16x1152xbf16, #tpu.memory_space<vmem>>, vector<8x16x128xbf16>
    tpu.vector_store %arg10[%c0_56, %c0_57, %c768], %42 {strides = array<i32>} : memref<8x16x1152xbf16, #tpu.memory_space<vmem>>, vector<8x16x128xbf16>,
    %c2_58 = arith.constant 2 : index
    %c1_59 = arith.constant 1 : index
    %c0_60 = arith.constant 0 : index
    %44 = vector.load %arg9[%c2_58, %c1_59, %c0_60] : memref<10x18x128xbf16, #tpu.memory_space<vmem>>, vector<8x16x128xbf16>
    %c0_61 = arith.constant 0 : index
    %c0_62 = arith.constant 0 : index
    %c896 = arith.constant 896 : index
    %45 = vector.load %arg10[%c0_61, %c0_62, %c896] : memref<8x16x1152xbf16, #tpu.memory_space<vmem>>, vector<8x16x128xbf16>
    tpu.vector_store %arg10[%c0_61, %c0_62, %c896], %44 {strides = array<i32>} : memref<8x16x1152xbf16, #tpu.memory_space<vmem>>, vector<8x16x128xbf16>,
    %c2_63 = arith.constant 2 : index
    %c2_64 = arith.constant 2 : index
    %c0_65 = arith.constant 0 : index
    %46 = vector.load %arg9[%c2_63, %c2_64, %c0_65] : memref<10x18x128xbf16, #tpu.memory_space<vmem>>, vector<8x16x128xbf16>
    %c0_66 = arith.constant 0 : index
    %c0_67 = arith.constant 0 : index
    %c1024 = arith.constant 1024 : index
    %47 = vector.load %arg10[%c0_66, %c0_67, %c1024] : memref<8x16x1152xbf16, #tpu.memory_space<vmem>>, vector<8x16x128xbf16>
    tpu.vector_store %arg10[%c0_66, %c0_67, %c1024], %46 {strides = array<i32>} : memref<8x16x1152xbf16, #tpu.memory_space<vmem>>, vector<8x16x128xbf16>,
    %c0_68 = arith.constant 0 : index
    %c0_69 = arith.constant 0 : index
    %c0_70 = arith.constant 0 : index
    %48 = vector.load %arg10[%c0_68, %c0_69, %c0_70] : memref<8x16x1152xbf16, #tpu.memory_space<vmem>>, vector<8x16x1152xbf16>
    %49 = vector.shape_cast %48 : vector<8x16x1152xbf16> to vector<128x1152xbf16>
    %c0_71 = arith.constant 0 : index
    %c0_72 = arith.constant 0 : index
    %50 = vector.load %arg3[%c0_71, %c0_72] : memref<1152x128xbf16, #tpu.memory_space<vmem>>, vector<1152x128xbf16>
    %cst_73 = arith.constant dense<0.000000e+00> : vector<128x128xf32>
    %51 = tpu.matmul %49, %50, %cst_73 {dimension_numbers = #tpu.dot_dimension_numbers<[1], [0], [0], [1], [0, 0, 1, 1], [], []>} : vector<128x1152xbf16>, vector<1152x128xbf16>, vector<128x128xf32> -> vector<128x128xf32>
    %52 = arith.truncf %51 : vector<128x128xf32> to vector<128x128xbf16>
    %53 = vector.shape_cast %52 : vector<128x128xbf16> to vector<8x16x128xbf16>
    %c0_74 = arith.constant 0 : index
    %c0_75 = arith.constant 0 : index
    %c0_76 = arith.constant 0 : index
    %c0_77 = arith.constant 0 : index
    %54 = vector.load %arg6[%c0_74, %c0_75, %c0_76, %c0_77] : memref<1x8x16x128xbf16, #tpu.memory_space<vmem>>, vector<1x8x16x128xbf16>
    %55 = vector.shape_cast %54 : vector<1x8x16x128xbf16> to vector<8x16x128xbf16>
    %56 = vector.shape_cast %53 : vector<8x16x128xbf16> to vector<1x8x16x128xbf16>
    tpu.vector_store %arg6[%c0_74, %c0_75, %c0_76, %c0_77], %56 {strides = array<i32>} : memref<1x8x16x128xbf16, #tpu.memory_space<vmem>>, vector<1x8x16x128xbf16>,
    %57 = arith.extf %52 : vector<128x128xbf16> to vector<128x128xf32>
    %cst_78 = arith.constant dense<0.000000e+00> : vector<128xf32>
    %58 = vector.multi_reduction <add>, %57, %cst_78 [0] : vector<128x128xf32> to vector<128xf32>
    %59 = vector.shape_cast %58 : vector<128xf32> to vector<1x128xf32>
    %c0_79 = arith.constant 0 : index
    %c0_80 = arith.constant 0 : index
    %c0_81 = arith.constant 0 : index
    %c0_82 = arith.constant 0 : index
    %60 = vector.load %arg7[%c0_79, %c0_80, %c0_81, %c0_82] : memref<1x1x1x128xf32, #tpu.memory_space<vmem>>, vector<1x1x1x128xf32>
    %61 = vector.shape_cast %60 : vector<1x1x1x128xf32> to vector<1x128xf32>
    %62 = vector.shape_cast %59 : vector<1x128xf32> to vector<1x1x1x128xf32>
    tpu.vector_store %arg7[%c0_79, %c0_80, %c0_81, %c0_82], %62 {strides = array<i32>} : memref<1x1x1x128xf32, #tpu.memory_space<vmem>>, vector<1x1x1x128xf32>,
    %63 = arith.mulf %57, %57 : vector<128x128xf32>
    %cst_83 = arith.constant dense<0.000000e+00> : vector<128xf32>
    %64 = vector.multi_reduction <add>, %63, %cst_83 [0] : vector<128x128xf32> to vector<128xf32>
    %65 = vector.shape_cast %64 : vector<128xf32> to vector<1x128xf32>
    %c0_84 = arith.constant 0 : index
    %c0_85 = arith.constant 0 : index
    %c0_86 = arith.constant 0 : index
    %c0_87 = arith.constant 0 : index
    %66 = vector.load %arg8[%c0_84, %c0_85, %c0_86, %c0_87] : memref<1x1x1x128xf32, #tpu.memory_space<vmem>>, vector<1x1x1x128xf32>
    %67 = vector.shape_cast %66 : vector<1x1x1x128xf32> to vector<1x128xf32>
    %68 = vector.shape_cast %65 : vector<1x128xf32> to vector<1x1x1x128xf32>
    tpu.vector_store %arg8[%c0_84, %c0_85, %c0_86, %c0_87], %68 {strides = array<i32>} : memref<1x1x1x128xf32, #tpu.memory_space<vmem>>, vector<1x1x1x128xf32>,
    return
  }
  func.func @transform_0(%arg0: i32, %arg1: i32) -> (i32, i32, i32, i32) {
    %c0_i32 = arith.constant 0 : i32
    %c0_i32_0 = arith.constant 0 : i32
    %c0_i32_1 = arith.constant 0 : i32
    %c0_i32_2 = arith.constant 0 : i32
    return %arg0, %c0_i32, %c0_i32_0, %c0_i32_1 : i32, i32, i32, i32
  }
  func.func @transform_1(%arg0: i32, %arg1: i32) -> (i32, i32) {
    %c0_i32 = arith.constant 0 : i32
    %c0_i32_0 = arith.constant 0 : i32
    %c0_i32_1 = arith.constant 0 : i32
    return %c0_i32, %c0_i32_0 : i32, i32
  }
  func.func @transform_2(%arg0: i32, %arg1: i32) -> (i32, i32) {
    %c0_i32 = arith.constant 0 : i32
    %c0_i32_0 = arith.constant 0 : i32
    %c0_i32_1 = arith.constant 0 : i32
    return %c0_i32, %c0_i32_0 : i32, i32
  }
  func.func @transform_3(%arg0: i32, %arg1: i32) -> (i32, i32) {
    %c0_i32 = arith.constant 0 : i32
    %c0_i32_0 = arith.constant 0 : i32
    %c0_i32_1 = arith.constant 0 : i32
    return %c0_i32, %c0_i32_0 : i32, i32
  }
  func.func @transform_4(%arg0: i32, %arg1: i32) -> (i32, i32, i32, i32) {
    %c0_i32 = arith.constant 0 : i32
    %c0_i32_0 = arith.constant 0 : i32
    %c0_i32_1 = arith.constant 0 : i32
    return %arg0, %arg1, %c0_i32, %c0_i32_0 : i32, i32, i32, i32
  }
  func.func @transform_5(%arg0: i32, %arg1: i32) -> (i32, i32, i32, i32) {
    %c0_i32 = arith.constant 0 : i32
    %c0_i32_0 = arith.constant 0 : i32
    %c0_i32_1 = arith.constant 0 : i32
    return %arg0, %arg1, %c0_i32, %c0_i32_0 : i32, i32, i32, i32
  }
  func.func @transform_6(%arg0: i32, %arg1: i32) -> (i32, i32, i32, i32) {
    %c0_i32 = arith.constant 0 : i32
    %c0_i32_0 = arith.constant 0 : i32
    %c0_i32_1 = arith.constant 0 : i32
    return %arg0, %arg1, %c0_i32, %c0_i32_0 : i32, i32, i32, i32
  }
}

</mosaic_0001>

<bundles_post_ra>
// kernel: basic_block_pallas.5
= control target key start
LH: loop header
LB: loop body
LE: loop exit
PB: predicated region body
PF: predicated region fallthrough
CT: control target
= control target key end

     0   :  { %s764_s15 = smov 0   ;;  %s766_s16 = smov 0   ;;  %s918_s0 = inlined_call_operand.vmem [shape: bf16[2,16,16,128], index: 0, kind: input, shape index: {}]   ;;  %s919_s1 = inlined_call_operand.vmem [shape: bf16[2,16,16,128], index: 1, kind: input, shape index: {}]   ;;  %s920_s2 = inlined_call_operand.vmem [shape: f32[1,128], index: 2, kind: input, shape index: {}]   ;;  %s921_s3 = inlined_call_operand.vmem [shape: f32[1,128], index: 3, kind: input, shape index: {}]   ;;  %s922_s4 = inlined_call_operand.vmem [shape: f32[2,16,16,8], index: 4, kind: output, shape index: {}]  }
   0x1   :  { %s768_s17 = smov 0   ;;  %s770_s18 = smov 0  }
   0x2   :  { %s772_s19 = smov 0  }
   0x3 LB: > { %s23_s20 = sadd.s32 1, %s729_s17  ;;  %s26_s21 = sadd.s32 1, %s733_s18  ;;  %s737_s19 = sphi %s772_s19, %s14_s19   ;;  %s733_s18 = sphi %s770_s18, %s926_s18   ;;  %s729_s17 = sphi %s768_s17, %s925_s17   ;;  %s725_s16 = sphi %s766_s16, %s924_s16   ;;  %s721_s15 = sphi %s764_s15, %s923_s15  }
   0x4   : > { %p24_p0 = scmp.ge.s32.totalorder %s23_s20, 2  ;;  %p564_p1 = scmp.ge.s32.totalorder %s737_s19, 1 }
   0x5   : > { %p202_p2 = scmp.lt.s32.totalorder %s737_s19, 5 }
   0x6   : > { %s928_s20 = smov (%p24_p0, %s23_s20), 0  ;;  %s930_s21 = smov (!%p24_p0, %s26_s21), %s733_s18 }
   0x7   : > { %p203_p3 = pnand %p564_p1, %p202_p2  ;;  %p28_p4 = scmp.ge.s32.totalorder %s930_s21, 2 }
   0x8   : > { %s565_s22 = sshll.u32 (!%p203_p3), %s721_s15, 3  ;;  %p249_p5 = scmp.lt.s32.totalorder (!%p203_p3), %s725_s16, 1 }
   0x9   : > { %s932_s21 = smov (%p28_p4, %s930_s21), 0  ;;  %206 = sbr.rel (%p203_p3) target bundleno = 51 (0x33), region = 36 }
   0xa   : > { %p251_p6 = scmp.lt.s32.totalorder (!%p203_p3), %s565_s22, 15 }
   0xe   : > { %s934_s16 = smov (!%p249_p5, %s725_s16), 1  ;;  %s936_s22 = smov (!%p251_p6, %s565_s22), 15  ;;  %v810_v0 = vld [vmem:[%s920_s2] ss:$0 sm:$0xff]  ;;  %vm423_vm0 = vcmask 64512  }
   0xf   : > { %s567_s23 = sshll.u32 %s934_s16, 5  ;;  %s566_s24 = sshll.u32 %s936_s22, 1  ;;  %v821_v11 = vld [vmem:[%s921_s3] ss:$0 sm:$0xff] }
  0x10   : > { %s794_s25 = sadd.s32 %s567_s23, %s566_s24 }
  0x11   : > { %s568_s26 = sshll.u32 %s794_s25, 2  ;;  %s576_s11 = sshll.u32 %s794_s25, 3 }
  0x12   : > { %s800_s29 = scalar_lea.vmem %s918_s0, %s568_s26  ;;  %s805_s6 = scalar_lea.vmem %s919_s1, %s568_s26 }
  0x13   : > { %v582_v1 = vld [vmem:[%s800_s29] sm:$0xff]   ;;  %v645_v3 = vld [vmem:[%s800_s29 + $0x8] sm:$0xff]   ;;  %v646_v9 = vld [vmem:[%s800_s29 + $0x10] sm:$0xff]   ;;  %s841_s14 = scalar_lea.vmem %s922_s4, %s576_s11 }
  0x14   : > { %v614_v2 = vld [vmem:[%s805_s6] sm:$0xff]   ;;  %v583_v4 = vunpack.c.l.bf16 %v582_v1  ;;  %v584_v6 = vunpack.c.h.bf16 %v582_v1  ;;  %v652_v8 = vld [vmem:[%s805_s6 + $0x8] sm:$0xff]   ;;  %v653_v10 = vld [vmem:[%s805_s6 + $0x10] sm:$0xff]   ;;  %v587_v12 = vunpack.c.l.bf16 %v645_v3  ;;  %v588_v14 = vunpack.c.h.bf16 %v645_v3 }
  0x15   : > { %v615_v5 = vunpack.c.l.bf16 %v614_v2  ;;  %v616_v7 = vunpack.c.h.bf16 %v614_v2  ;;  %v619_v13 = vunpack.c.l.bf16 %v652_v8  ;;  %v620_v15 = vunpack.c.h.bf16 %v652_v8  ;;  %v647_v16 = vld [vmem:[%s800_s29 + $0x18] sm:$0xff]   ;;  %v648_v42 = vld [vmem:[%s800_s29 + $0x20] sm:$0xff]   ;;  %v649_v52 = vld [vmem:[%s800_s29 + $0x28] sm:$0xff]  }
  0x16   : > { %v320_v17 = vmul.f32 %v583_v4, %v810_v0  ;;  %v321_v18 = vmul.f32 %v584_v6, %v810_v0  ;;  %v591_v19 = vunpack.c.l.bf16 %v646_v9  ;;  %v623_v20 = vunpack.c.l.bf16 %v653_v10  ;;  %v654_v21 = vld [vmem:[%s805_s6 + $0x18] sm:$0xff]   ;;  %v655_v47 = vld [vmem:[%s805_s6 + $0x20] sm:$0xff]   ;;  %v656_v57 = vld [vmem:[%s805_s6 + $0x28] sm:$0xff]  }
  0x17   : > { %v322_v22 = vmul.f32 %v587_v12, %v810_v0  ;;  %v323_v23 = vmul.f32 %v588_v14, %v810_v0  ;;  %v592_v24 = vunpack.c.h.bf16 %v646_v9  ;;  %v624_v25 = vunpack.c.h.bf16 %v653_v10  ;;  %v650_v62 = vld [vmem:[%s800_s29 + $0x30] sm:$0xff]   ;;  %v651_v14 = vld [vmem:[%s800_s29 + $0x38] sm:$0xff]  }
  0x18   : > { %v343_v26 = vadd.f32 %v821_v11, %v320_v17  ;;  %v344_v27 = vadd.f32 %v821_v11, %v321_v18  ;;  %v324_v28 = vmul.f32 %v591_v19, %v810_v0  ;;  %v595_v29 = vunpack.c.l.bf16 %v647_v16  ;;  %v657_v4 = vld [vmem:[%s805_s6 + $0x30] sm:$0xff]  }
  0x19   : > { %v345_v30 = vadd.f32 %v821_v11, %v322_v22  ;;  %v346_v31 = vadd.f32 %v821_v11, %v323_v23  ;;  %v325_v32 = vmul.f32 %v592_v24, %v810_v0  ;;  %v627_v33 = vunpack.c.l.bf16 %v654_v21  ;;  %v658_v23 = vld [vmem:[%s805_s6 + $0x38] sm:$0xff]  }
  0x1a   : > { %v391_v34 = vadd.f32 %v615_v5, %v343_v26  ;;  %v392_v35 = vadd.f32 %v616_v7, %v344_v27  ;;  %v347_v36 = vadd.f32 %v821_v11, %v324_v28  ;;  %v326_v37 = vmul.f32 %v595_v29, %v810_v0 }
  0x1b   : > { %v393_v38 = vadd.f32 %v619_v13, %v345_v30  ;;  %v394_v39 = vadd.f32 %v620_v15, %v346_v31  ;;  %v348_v40 = vadd.f32 %v821_v11, %v325_v32  ;;  %v596_v41 = vunpack.c.h.bf16 %v647_v16 }
  0x1c   : > { %v407_v43 = vmax.f32 %v391_v34, 0.0  ;;  %v408_v44 = vmax.f32 %v392_v35, 0.0  ;;  %v395_v45 = vadd.f32 %v623_v20, %v347_v36  ;;  %v349_v46 = vadd.f32 %v821_v11, %v326_v37 }
  0x1d   : > { %v409_v48 = vmax.f32 %v393_v38, 0.0  ;;  %v410_v49 = vmax.f32 %v394_v39, 0.0  ;;  %v396_v50 = vadd.f32 %v624_v25, %v348_v40  ;;  %v327_v51 = vmul.f32 %v596_v41, %v810_v0 }
  0x1e   : > { %424 = vst.msk [vmem:[%s841_s14] sm:$0xff] %vm423_vm0, %v407_v43  ;;  %425 = vst.msk [vmem:[%s841_s14 + $0x8] sm:$0xff] %vm423_vm0, %v408_v44  ;;  %v411_v53 = vmax.f32 %v395_v45, 0.0  ;;  %v397_v54 = vadd.f32 %v627_v33, %v349_v46  ;;  %v628_v55 = vunpack.c.h.bf16 %v654_v21  ;;  %v599_v56 = vunpack.c.l.bf16 %v648_v42 }
  0x1f   : > { %426 = vst.msk [vmem:[%s841_s14 + $0x10] sm:$0xff] %vm423_vm0, %v409_v48  ;;  %427 = vst.msk [vmem:[%s841_s14 + $0x18] sm:$0xff] %vm423_vm0, %v410_v49  ;;  %v412_v58 = vmax.f32 %v396_v50, 0.0  ;;  %v350_v59 = vadd.f32 %v821_v11, %v327_v51  ;;  %v631_v60 = vunpack.c.l.bf16 %v655_v47  ;;  %v600_v61 = vunpack.c.h.bf16 %v648_v42 }
  0x20   : > { %428 = vst.msk [vmem:[%s841_s14 + $0x20] sm:$0xff] %vm423_vm0, %v411_v53  ;;  %v413_v63 = vmax.f32 %v397_v54, 0.0  ;;  %v328_v1 = vmul.f32 %v599_v56, %v810_v0  ;;  %v632_v2 = vunpack.c.h.bf16 %v655_v47  ;;  %v603_v3 = vunpack.c.l.bf16 %v649_v52 }
  0x21   : > { %429 = vst.msk [vmem:[%s841_s14 + $0x28] sm:$0xff] %vm423_vm0, %v412_v58  ;;  %v398_v5 = vadd.f32 %v628_v55, %v350_v59  ;;  %v329_v6 = vmul.f32 %v600_v61, %v810_v0  ;;  %v635_v7 = vunpack.c.l.bf16 %v656_v57  ;;  %v604_v8 = vunpack.c.h.bf16 %v649_v52 }
  0x22   : > { %430 = vst.msk [vmem:[%s841_s14 + $0x30] sm:$0xff] %vm423_vm0, %v413_v63  ;;  %v351_v9 = vadd.f32 %v821_v11, %v328_v1  ;;  %v330_v10 = vmul.f32 %v603_v3, %v810_v0  ;;  %v636_v12 = vunpack.c.h.bf16 %v656_v57  ;;  %v607_v13 = vunpack.c.l.bf16 %v650_v62 }
  0x23   : > { %v414_v15 = vmax.f32 %v398_v5, 0.0  ;;  %v352_v16 = vadd.f32 %v821_v11, %v329_v6  ;;  %v331_v17 = vmul.f32 %v604_v8, %v810_v0  ;;  %v639_v18 = vunpack.c.l.bf16 %v657_v4 }
  0x24   : > { %v399_v19 = vadd.f32 %v631_v60, %v351_v9  ;;  %v353_v20 = vadd.f32 %v821_v11, %v330_v10  ;;  %v332_v21 = vmul.f32 %v607_v13, %v810_v0  ;;  %v608_v22 = vunpack.c.h.bf16 %v650_v62 }
  0x25   : > { %431 = vst.msk [vmem:[%s841_s14 + $0x38] sm:$0xff] %vm423_vm0, %v414_v15  ;;  %v400_v24 = vadd.f32 %v632_v2, %v352_v16  ;;  %v354_v25 = vadd.f32 %v821_v11, %v331_v17  ;;  %v640_v26 = vunpack.c.h.bf16 %v657_v4  ;;  %v611_v27 = vunpack.c.l.bf16 %v651_v14 }
  0x26   : > { %v415_v28 = vmax.f32 %v399_v19, 0.0  ;;  %v401_v29 = vadd.f32 %v635_v7, %v353_v20  ;;  %v355_v30 = vadd.f32 %v821_v11, %v332_v21  ;;  %v333_v31 = vmul.f32 %v608_v22, %v810_v0 }
  0x27   : > { %v416_v32 = vmax.f32 %v400_v24, 0.0  ;;  %v402_v33 = vadd.f32 %v636_v12, %v354_v25  ;;  %v334_v34 = vmul.f32 %v611_v27, %v810_v0  ;;  %v643_v35 = vunpack.c.l.bf16 %v658_v23 }
  0x28   : > { %432 = vst.msk [vmem:[%s841_s14 + $0x40] sm:$0xff] %vm423_vm0, %v415_v28  ;;  %v417_v36 = vmax.f32 %v401_v29, 0.0  ;;  %v403_v37 = vadd.f32 %v639_v18, %v355_v30  ;;  %v356_v38 = vadd.f32 %v821_v11, %v333_v31  ;;  %v612_v39 = vunpack.c.h.bf16 %v651_v14 }
  0x29   : > { %433 = vst.msk [vmem:[%s841_s14 + $0x48] sm:$0xff] %vm423_vm0, %v416_v32  ;;  %v418_v40 = vmax.f32 %v402_v33, 0.0  ;;  %v357_v41 = vadd.f32 %v821_v11, %v334_v34  ;;  %v644_v45 = vunpack.c.h.bf16 %v658_v23 }
  0x2a   : > { %434 = vst.msk [vmem:[%s841_s14 + $0x50] sm:$0xff] %vm423_vm0, %v417_v36  ;;  %v419_v42 = vmax.f32 %v403_v37, 0.0  ;;  %v404_v43 = vadd.f32 %v640_v26, %v356_v38  ;;  %v335_v44 = vmul.f32 %v612_v39, %v810_v0 }
  0x2b   : > { %435 = vst.msk [vmem:[%s841_s14 + $0x58] sm:$0xff] %vm423_vm0, %v418_v40  ;;  %v405_v46 = vadd.f32 %v643_v35, %v357_v41 }
  0x2c   : > { %436 = vst.msk [vmem:[%s841_s14 + $0x60] sm:$0xff] %vm423_vm0, %v419_v42  ;;  %v420_v47 = vmax.f32 %v404_v43, 0.0  ;;  %v358_v48 = vadd.f32 %v821_v11, %v335_v44 }
  0x2d   : > { %v421_v49 = vmax.f32 %v405_v46, 0.0 }
  0x2e   : > { %437 = vst.msk [vmem:[%s841_s14 + $0x68] sm:$0xff] %vm423_vm0, %v420_v47  ;;  %v406_v50 = vadd.f32 %v644_v45, %v358_v48 }
  0x2f   : > { %438 = vst.msk [vmem:[%s841_s14 + $0x70] sm:$0xff] %vm423_vm0, %v421_v49 }
  0x30   : > { %v422_v51 = vmax.f32 %v406_v50, 0.0 }
  0x32   : > { %439 = vst.msk [vmem:[%s841_s14 + $0x78] sm:$0xff] %vm423_vm0, %v422_v51 }
  0x33 PF: > { %s14_s19 = sadd.s32 1, %s737_s19   ;;  %s923_s15 = smov %s729_s17 }
  0x34   : > { %p11_p7 = scmp.ge.s32.totalorder %s14_s19, 6   ;;  %s924_s16 = smov %s733_s18 }
  0x35   : > { %s925_s17 = smov %s928_s20  ;;  %s926_s18 = smov %s932_s21 }
  0x36   :  { %13 = sbr.rel (!%p11_p7) target bundleno = 3 (0x3), region = 69 }

// kernel: basic_block_pallas.3
= control target key start
LH: loop header
LB: loop body
LE: loop exit
PB: predicated region body
PF: predicated region fallthrough
CT: control target
= control target key end

     0   :  { %s4624_s15 = smov 0   ;;  %s4626_s16 = smov 0   ;;  %s5549_s0 = inlined_call_operand.vmem [shape: bf16[2,16,16,128], index: 0, kind: input, shape index: {}]   ;;  %s5550_s1 = inlined_call_operand.vmem [shape: bf16[1152,128], index: 1, kind: input, shape index: {}]   ;;  %s5551_s2 = inlined_call_operand.vmem [shape: bf16[2,16,16,128], index: 2, kind: output, shape index: {0}]   ;;  %s5552_s3 = inlined_call_operand.vmem [shape: f32[2,2,1,128], index: 3, kind: output, shape index: {1}]   ;;  %s5553_s4 = inlined_call_operand.vmem [shape: f32[2,2,1,128], index: 4, kind: output, shape index: {2}]  }
   0x1   :  { %s4628_s17 = smov 0   ;;  %s4630_s18 = smov 0  }
   0x2   :  { %s4632_s19 = smov 0  }
   0x3 LB: > { %s24_s20 = sadd.s32 1, %s4588_s17  ;;  %s27_s21 = sadd.s32 1, %s4592_s18  ;;  %s4596_s19 = sphi %s4632_s19, %s15_s19   ;;  %s4592_s18 = sphi %s4630_s18, %s5615_s18   ;;  %s4588_s17 = sphi %s4628_s17, %s5614_s17   ;;  %s4584_s16 = sphi %s4626_s16, %s5613_s16   ;;  %s4580_s15 = sphi %s4624_s15, %s5612_s15  }
   0x4   : > { %p25_p0 = scmp.ge.s32.totalorder %s24_s20, 2  ;;  %p3760_p1 = scmp.ge.s32.totalorder %s4596_s19, 1 }
   0x5   : > { %p185_p2 = scmp.lt.s32.totalorder %s4596_s19, 5 }
   0x6   : > { %s5617_s20 = smov (%p25_p0, %s24_s20), 0  ;;  %s5619_s21 = smov (!%p25_p0, %s27_s21), %s4592_s18 }
   0x7   : > { %p186_p3 = pnand %p3760_p1, %p185_p2  ;;  %p29_p4 = scmp.ge.s32.totalorder %s5619_s21, 2 }
   0x9   : > { %s5621_s21 = smov (%p29_p4, %s5619_s21), 0  ;;  %189 = sbr.rel (%p186_p3) target bundleno = 573 (0x23d), region = 28 }
   0xe   : > { %p230_p5 = scmp.lt.s32.totalorder %s4584_s16, 1  ;;  %s4657_s22 = sshll.u32 %s4580_s15, 3  ;;  %v4598_v0 = vmov 0   ;;  %vm281_vm0 = vsmask.f32 256  ;;  %vm445_vm1 = vcmask 1043456  }
   0xf   : > { %p238_p6 = scmp.lt.s32.totalorder %s4657_s22, 15  ;;  %p248_p7 = scmp.lt.s32.totalorder %s4580_s15, 1  ;;  %570 = vst [vmem:[#allocation2 + $0x4] sm:$0xf] %v4598_v0  ;;  %vm446_vm2 = vsmask.f32 7938 }
  0x10   : > { %s5623_s16 = smov (!%p230_p5, %s4584_s16), 1  ;;  %s3969_s7 = sshll.u32 %s4580_s15, 6  ;;  %vm452_vm3 = vcmask 1040384   ;;  %v448_v8 = vld [vmem:[#allocation2 + $0xc] sm:$0xf]  ;;  %vm4717_vm5 = vmand %vm445_vm1, %vm446_vm2 }
  0x11   : > { %s239_s23 = scalar_select %p238_p6, %s4657_s22, 15  ;;  %v454_v9 = vld [vmem:[#allocation2 + $0x14] sm:$0x1]  ;;  %vm4705_vm4 = vmand %vm452_vm3, %vm281_vm0  ;;  %v457_v17 = vld [vmem:[#allocation2 + $0x18] sm:$0xf] }
  0x12   : > { %s3967_s24 = sshll.u32 %s5623_s16, 7  ;;  %s3765_s25 = sshll.u32 %s5623_s16, 5  ;;  %v461_v23 = vld [vmem:[#allocation2 + $0x20] sm:$0x1]  ;;  %v464_v25 = vld [vmem:[#allocation2 + $0x24] sm:$0xf]  ;;  %vm4797_vm6 = vmand %vm452_vm3, %vm446_vm2 }
  0x13   : > { %s4666_s28 = scalar_lea.vmem %s5549_s0, %s3967_s24  ;;  %s3764_s29 = sshll.u32 %s239_s23, 1  ;;  %v468_v33 = vld [vmem:[#allocation2 + $0x2c] sm:$0x1]  ;;  %v471_v53 = vld [vmem:[#allocation2 + $0x30] sm:$0xf] }
  0x14   : > { %s242_s30 = sadd.s32 %s3765_s25, %s3764_s29  ;;  %s3767_s5 = sshll.u32 %s5623_s16, 1  ;;  %v475_v60 = vld [vmem:[#allocation2 + $0x38] sm:$0x1]  ;;  %v478_v61 = vld [vmem:[#allocation2 + $0x3c] sm:$0xf] }
  0x15   : > { %s3766_s6 = sshll.u32 %s242_s30, 2  ;;  %s4675_s11 = scalar_lea.vmem %s4666_s28, %s3969_s7  ;;  %vm282_vm7 = vsmask.f32 4368 }
  0x16   : > { %s4672_s10 = scalar_lea.vmem %s5551_s2, %s3766_s6  ;;  %s5625_s15 = smov (!%p248_p7, %s4580_s15), 1  ;;  %v265_v1 = vld [vmem:[%s4675_s11] sm:$0xf]  ;;  %v4682_v2 = vld [vmem:[%s4675_s11 + $0x4] sm:$0xf]  ;;  %vm4831_vm8 = vmor %vm281_vm0, %vm282_vm7 }
  0x17   : > { %v285_v3 = vshrl.u32 %v265_v1, 16  ;;  %v288_v4 = vshll.u32 %v265_v1, 16  ;;  %v293_v5 = vshrl.u32 %v4682_v2, 16  ;;  %v267_v6 = vld [vmem:[%s4675_s11 + $0x8] sm:$0xf]  ;;  %v296_v7 = vshll.u32 %v4682_v2, 16  ;;  %s4687_s12 = sadd.s32 %s3767_s5, %s5625_s15 }
  0x18   : > { %v302_v10 = vshrl.u32 %v267_v6, 16  ;;  %v305_v11 = vshll.u32 %v267_v6, 16  ;;  %v4690_v12 = vld [vmem:[%s4675_s11 + $0xc] sm:$0xf]  ;;  %v269_v13 = vld [vmem:[%s4675_s11 + $0x10] sm:$0xf]  ;;  %s252_s16 = scalar_lea.vmem %s5552_s3, %s4687_s12  ;;  %s259_s25 = scalar_lea.vmem %s5553_s4, %s4687_s12 }
  0x19   : > { %v4701_v14 = vrot.slane %v285_v3, 7  ;;  %v4709_v16 = vrot.slane %v293_v5, 7  ;;  %v310_v18 = vshrl.u32 %v4690_v12, 16  ;;  %v319_v19 = vshrl.u32 %v269_v13, 16  ;;  %v4713_v20 = vld [vmem:[%s4675_s11 + $0x14] sm:$0xf] }
  0x1a   : > { %v4721_v22 = vrot.slane %v302_v10, 7  ;;  %v322_v24 = vshll.u32 %v269_v13, 16  ;;  %v327_v26 = vshrl.u32 %v4713_v20, 16  ;;  %v271_v27 = vld [vmem:[%s4675_s11 + $0x18] sm:$0xf]  ;;  %v313_v28 = vshll.u32 %v4690_v12, 16 }
  0x1b   : > { %v290_v29 = vor.u32 %v288_v4, %v4701_v14  ;;  %v300_v30 = vrot.slane %v4709_v16, 4  ;;  %v4728_v31 = vrot.slane %v310_v18, 7  ;;  %v4730_v32 = vrot.slane %v319_v19, 7  ;;  %v4733_v34 = vld [vmem:[%s4675_s11 + $0x1c] sm:$0xf]  ;;  %p3772_p8 = scmp.le.s32.totalorder %s4657_s22, 0 }
  0x1c   : > { %v307_v35 = vor.u32 %v305_v11, %v4721_v22  ;;  %v4736_v36 = vrot.slane %v327_v26, 7  ;;  %v336_v37 = vshrl.u32 %v271_v27, 16  ;;  %v339_v38 = vshll.u32 %v271_v27, 16  ;;  %v273_v39 = vld [vmem:[%s4675_s11 + $0x20] sm:$0xf]  ;;  %s3773_s15 = sadd.s32 (!%p3772_p8), 4294967295, %s4657_s22 }
  0x1d   : > { %v449_v40 = vsel %vm4717_vm5, %v290_v29, %v448_v8  ;;  %v455_v41 = vsel %vm4705_vm4, %v300_v30, %v454_v9  ;;  %v317_v42 = vrot.slane %v4728_v31, 4  ;;  %v324_v43 = vor.u32 %v322_v24, %v4730_v32  ;;  %v4746_v44 = vld [vmem:[%s4675_s11 + $0x24] sm:$0xf]  ;;  %v275_v45 = vld [vmem:[%s4675_s11 + $0x28] sm:$0xf]  ;;  %s3970_s26 = sshll.u32 (!%p3772_p8), %s3773_s15, 3 }
  0x1e   : > { %450 = vst [vmem:[#allocation2 + $0xc] sm:$0xf] %v449_v40  ;;  %456 = vst [vmem:[#allocation2 + $0x14] sm:$0x1] %v455_v41  ;;  %v458_v46 = vsel %vm4717_vm5, %v307_v35, %v457_v17  ;;  %v334_v47 = vrot.slane %v4736_v36, 4  ;;  %v4752_v48 = vrot.slane %v336_v37, 7  ;;  %s581_s27 = scalar_lea.vmem (!%p3772_p8), %s4666_s28, %s3970_s26 }
  0x1f   : > { %v344_v49 = vshrl.u32 %v4733_v34, 16  ;;  %v4756_v50 = vld [vmem:[%s4675_s11 + $0x2c] sm:$0xf]  ;;  %459 = vst [vmem:[#allocation2 + $0x18] sm:$0xf] %v458_v46  ;;  %v462_v51 = vsel %vm4705_vm4, %v317_v42, %v461_v23  ;;  %v465_v52 = vsel %vm4717_vm5, %v324_v43, %v464_v25  ;;  %v353_v54 = vshrl.u32 %v273_v39, 16 }
  0x20   : > { %v356_v55 = vshll.u32 %v273_v39, 16  ;;  %v277_v56 = vld [vmem:[%s4675_s11 + $0x30] sm:$0xf]  ;;  %463 = vst [vmem:[#allocation2 + $0x20] sm:$0x1] %v462_v51  ;;  %v469_v57 = vsel %vm4705_vm4, %v334_v47, %v468_v33  ;;  %v341_v58 = vor.u32 %v339_v38, %v4752_v48  ;;  %v361_v62 = vshrl.u32 %v4746_v44, 16 }
  0x21   : > { %466 = vst [vmem:[#allocation2 + $0x24] sm:$0xf] %v465_v52  ;;  %v4766_v59 = vrot.slane %v344_v49, 7  ;;  %470 = vst [vmem:[#allocation2 + $0x2c] sm:$0x1] %v469_v57  ;;  %v4769_v63 = vrot.slane %v353_v54, 7 }
  0x22   : > { %v482_v1 = vld [vmem:[#allocation2 + $0x44] sm:$0x1]  ;;  %v370_v3 = vshrl.u32 %v275_v45, 16  ;;  %v373_v4 = vshll.u32 %v275_v45, 16  ;;  %v378_v5 = vshrl.u32 %v4756_v50, 16  ;;  %v472_v8 = vsel %vm4717_vm5, %v341_v58, %v471_v53 }
  0x23   : > { %v4773_v6 = vld [vmem:[%s4675_s11 + $0x34] sm:$0xf]  ;;  %v351_v9 = vrot.slane %v4766_v59, 4  ;;  %v4778_v10 = vrot.slane %v361_v62, 7  ;;  %v485_v11 = vld [vmem:[#allocation2 + $0x48] sm:$0xf]  ;;  %v358_v19 = vor.u32 %v356_v55, %v4769_v63 }
  0x24   : > { %v489_v13 = vld [vmem:[#allocation2 + $0x50] sm:$0x1]  ;;  %v387_v17 = vshrl.u32 %v277_v56, 16  ;;  %v279_v18 = vld [vmem:[%s4675_s11 + $0x38] sm:$0xf]  ;;  %v4782_v23 = vrot.slane %v370_v3, 7 }
  0x25   : > { %473 = vst [vmem:[#allocation2 + $0x30] sm:$0xf] %v472_v8  ;;  %v4784_v24 = vrot.slane %v378_v5, 7  ;;  %v390_v25 = vshll.u32 %v277_v56, 16  ;;  %v492_v26 = vld [vmem:[#allocation2 + $0x54] sm:$0xf]  ;;  %v476_v27 = vsel %vm4705_vm4, %v351_v9, %v475_v60  ;;  %v479_v38 = vsel %vm4717_vm5, %v358_v19, %v478_v61 }
  0x26   : > { %v368_v29 = vrot.slane %v4778_v10, 4  ;;  %v4789_v30 = vrot.slane %v387_v17, 7  ;;  %v395_v33 = vshrl.u32 %v4773_v6, 16  ;;  %v4793_v35 = vld [vmem:[%s4675_s11 + $0x3c] sm:$0xf]  ;;  %v375_v39 = vor.u32 %v373_v4, %v4782_v23 }
  0x27   : > { %477 = vst [vmem:[#allocation2 + $0x38] sm:$0x1] %v476_v27  ;;  %v385_v40 = vrot.slane %v4784_v24, 4  ;;  %v404_v41 = vshrl.u32 %v279_v18, 16  ;;  %v506_v42 = vld [vmem:[#allocation2] sm:$0x1]  ;;  %v298_v9 = vor.u32 %v296_v7, %v4709_v16 }
  0x28   : > { %v537_v43 = vld [vmem:[#allocation2 + $0x8] sm:$0x1]  ;;  %480 = vst [vmem:[#allocation2 + $0x3c] sm:$0xf] %v479_v38  ;;  %v483_v45 = vsel %vm4705_vm4, %v368_v29, %v482_v1  ;;  %v392_v46 = vor.u32 %v390_v25, %v4789_v30  ;;  %v4808_v47 = vrot.slane %v395_v33, 7  ;;  %v407_v49 = vshll.u32 %v279_v18, 16 }
  0x29   : > { %484 = vst [vmem:[#allocation2 + $0x44] sm:$0x1] %v483_v45  ;;  %v486_v51 = vsel %vm4717_vm5, %v375_v39, %v485_v11  ;;  %v490_v52 = vsel %vm4705_vm4, %v385_v40, %v489_v13  ;;  %v496_v53 = vld [vmem:[#allocation2 + $0x5c] sm:$0x1]  ;;  %v4814_v54 = vrot.slane %v404_v41, 7  ;;  %v412_v55 = vshrl.u32 %v4793_v35, 16 }
  0x2a   : > { %487 = vst [vmem:[#allocation2 + $0x48] sm:$0xf] %v486_v51  ;;  %491 = vst [vmem:[#allocation2 + $0x50] sm:$0x1] %v490_v52  ;;  %v493_v56 = vsel %vm4717_vm5, %v392_v46, %v492_v26  ;;  %v402_v57 = vrot.slane %v4808_v47, 4  ;;  %v507_v60 = vsel %vm4705_vm4, 0, %v506_v42  ;;  %v315_v13 = vor.u32 %v313_v28, %v4728_v31 }
  0x2b   : > { %v499_v58 = vld [vmem:[#allocation2 + $0x60] sm:$0xf]  ;;  %v538_v61 = vsel %vm4797_vm6, 0, %v537_v43  ;;  %494 = vst [vmem:[#allocation2 + $0x54] sm:$0xf] %v493_v56  ;;  %v409_v62 = vor.u32 %v407_v49, %v4814_v54  ;;  %v4825_v1 = vrot.slane %v412_v55, 7 }
  0x2c   : > { %508 = vst [vmem:[#allocation2] sm:$0x1] %v507_v60  ;;  %539 = vst [vmem:[#allocation2 + $0x8] sm:$0x1] %v538_v61  ;;  %v291_v3 = vrot.slane %v4701_v14, 4  ;;  %v497_v4 = vsel %vm4705_vm4, %v402_v57, %v496_v53  ;;  %v308_v11 = vrot.slane %v4721_v22, 4 }
  0x2d   : > { %v503_v5 = vld [vmem:[#allocation2 + $0x68] sm:$0x1]  ;;  %498 = vst [vmem:[#allocation2 + $0x5c] sm:$0x1] %v497_v4  ;;  %v500_v14 = vsel %vm4717_vm5, %v409_v62, %v499_v58  ;;  %v419_v17 = vrot.slane %v4825_v1, 4  ;;  %v325_v18 = vrot.slane %v4730_v32, 4 }
  0x2e   : > { %v330_v19 = vshll.u32 %v4713_v20, 16  ;;  %501 = vst [vmem:[#allocation2 + $0x60] sm:$0xf] %v500_v14  ;;  %v299_v2 = vsel %vm4831_vm8, %v291_v3, %v298_v9  ;;  %v316_v7 = vsel %vm4831_vm8, %v308_v11, %v315_v13  ;;  %v342_v12 = vrot.slane %v4752_v48, 4  ;;  %v509_v32 = vld [vmem:[#allocation2 + $0xc] sm:$0x1] }
  0x2f   : > { %v347_v16 = vshll.u32 %v4733_v34, 16  ;;  %v504_v22 = vsel %vm4705_vm4, %v419_v17, %v503_v5  ;;  %451 = vst [vmem:[#allocation2 + $0x10] sm:$0xf] %v299_v2  ;;  %460 = vst [vmem:[#allocation2 + $0x1c] sm:$0xf] %v316_v7  ;;  %v359_v20 = vrot.slane %v4769_v63, 4 }
  0x30   : > { %v332_v28 = vor.u32 %v330_v19, %v4736_v36  ;;  %v364_v31 = vshll.u32 %v4746_v44, 16  ;;  %v512_v25 = vld [vmem:[#allocation2 + $0x18] sm:$0x1]  ;;  %505 = vst [vmem:[#allocation2 + $0x68] sm:$0x1] %v504_v22  ;;  %v376_v48 = vrot.slane %v4782_v23, 4 }
  0x31   : > { %v349_v26 = vor.u32 %v347_v16, %v4766_v59  ;;  %v381_v34 = vshll.u32 %v4756_v50, 16  ;;  %v393_v27 = vrot.slane %v4789_v30, 4  ;;  %v515_v29 = vld [vmem:[#allocation2 + $0x24] sm:$0x1]  ;;  %v533_v33 = vld [vmem:[#allocation2 + $0x6c] sm:$0x1] }
  0x32   : > { %v333_v36 = vsel %vm4831_vm8, %v325_v18, %v332_v28  ;;  %v366_v63 = vor.u32 %v364_v31, %v4778_v10  ;;  %v398_v44 = vshll.u32 %v4773_v6, 16  ;;  %v410_v38 = vrot.slane %v4814_v54, 4  ;;  %v518_v39 = vld [vmem:[#allocation2 + $0x30] sm:$0x1]  ;;  %v521_v40 = vld [vmem:[#allocation2 + $0x3c] sm:$0x1] }
  0x33   : > { %v540_v59 = vld [vmem:[#allocation2 + $0x14] sm:$0x1]  ;;  %v543_v41 = vld [vmem:[#allocation2 + $0x20] sm:$0x1]  ;;  %467 = vst [vmem:[#allocation2 + $0x28] sm:$0xf] %v333_v36  ;;  %v350_v50 = vsel %vm4831_vm8, %v342_v12, %v349_v26  ;;  %v383_v23 = vor.u32 %v381_v34, %v4784_v24 }
  0x34   : > { %v415_v30 = vshll.u32 %v4793_v35, 16  ;;  %v510_v42 = vsel %vm4705_vm4, 0, %v509_v32  ;;  %v524_v10 = vld [vmem:[#allocation2 + $0x48] sm:$0x1]  ;;  %v527_v43 = vld [vmem:[#allocation2 + $0x54] sm:$0x1]  ;;  %v367_v46 = vsel %vm4831_vm8, %v359_v20, %v366_v63  ;;  %v400_v49 = vor.u32 %v398_v44, %v4808_v47 }
  0x35   : > { %v546_v6 = vld [vmem:[#allocation2 + $0x2c] sm:$0x1]  ;;  %v549_v45 = vld [vmem:[#allocation2 + $0x38] sm:$0x1]  ;;  %474 = vst [vmem:[#allocation2 + $0x34] sm:$0xf] %v350_v50  ;;  %v384_v54 = vsel %vm4831_vm8, %v376_v48, %v383_v23 }
  0x36   : > { %511 = vst [vmem:[#allocation2 + $0xc] sm:$0x1] %v510_v42  ;;  %v513_v51 = vsel %vm4705_vm4, 0, %v512_v25  ;;  %v516_v24 = vsel %vm4705_vm4, 0, %v515_v29  ;;  %v552_v35 = vld [vmem:[#allocation2 + $0x44] sm:$0x1]  ;;  %v417_v55 = vor.u32 %v415_v30, %v4825_v1  ;;  %v401_v60 = vsel %vm4831_vm8, %v393_v27, %v400_v49 }
  0x37   : > { %v555_v52 = vld [vmem:[#allocation2 + $0x50] sm:$0x1]  ;;  %v564_v53 = vld [vmem:[#allocation2 + $0x74] sm:$0x1]  ;;  %481 = vst [vmem:[#allocation2 + $0x40] sm:$0xf] %v367_v46 }
  0x38   : > { %514 = vst [vmem:[#allocation2 + $0x18] sm:$0x1] %v513_v51  ;;  %517 = vst [vmem:[#allocation2 + $0x24] sm:$0x1] %v516_v24  ;;  %v519_v47 = vsel %vm4705_vm4, 0, %v518_v39  ;;  %v522_v56 = vsel %vm4705_vm4, 0, %v521_v40  ;;  %v418_v4 = vsel %vm4831_vm8, %v410_v38, %v417_v55 }
  0x39   : > { %v558_v57 = vld [vmem:[#allocation2 + $0x5c] sm:$0x1]  ;;  %v567_v58 = vld [vmem:[#allocation2] sm:$0xf]  ;;  %488 = vst [vmem:[#allocation2 + $0x4c] sm:$0xf] %v384_v54 }
  0x3a   : > { %520 = vst [vmem:[#allocation2 + $0x30] sm:$0x1] %v519_v47  ;;  %523 = vst [vmem:[#allocation2 + $0x3c] sm:$0x1] %v522_v56  ;;  %v525_v61 = vsel %vm4705_vm4, 0, %v524_v10  ;;  %v528_v62 = vsel %vm4705_vm4, 0, %v527_v43 }
  0x3b   : > { %v530_v1 = vld [vmem:[#allocation2 + $0x60] sm:$0x1]  ;;  %v534_v3 = vsel %vm4705_vm4, 0, %v533_v33  ;;  %495 = vst [vmem:[#allocation2 + $0x58] sm:$0xf] %v401_v60  ;;  %v541_v9 = vsel %vm4797_vm6, 0, %v540_v59 }
  0x3c   : > { %526 = vst [vmem:[#allocation2 + $0x48] sm:$0x1] %v525_v61  ;;  %529 = vst [vmem:[#allocation2 + $0x54] sm:$0x1] %v528_v62  ;;  %v531_v5 = vsel %vm4705_vm4, 0, %v530_v1  ;;  %v544_v11 = vsel %vm4797_vm6, 0, %v543_v41 }
  0x3d   : > { %535 = vst [vmem:[#allocation2 + $0x6c] sm:$0x1] %v534_v3  ;;  %v571_v13 = vld [vmem:[#allocation2 + $0x8] sm:$0x1]  ;;  %502 = vst [vmem:[#allocation2 + $0x64] sm:$0xf] %v418_v4 }
  0x3e   : > { %532 = vst [vmem:[#allocation2 + $0x60] sm:$0x1] %v531_v5  ;;  %542 = vst [vmem:[#allocation2 + $0x14] sm:$0x1] %v541_v9  ;;  %v547_v14 = vsel %vm4797_vm6, 0, %v546_v6  ;;  %v550_v17 = vsel %vm4797_vm6, 0, %v549_v45 }
  0x3f   : > { %545 = vst [vmem:[#allocation2 + $0x20] sm:$0x1] %v544_v11  ;;  %v553_v18 = vsel %vm4797_vm6, 0, %v552_v35  ;;  %v556_v19 = vsel %vm4797_vm6, 0, %v555_v52  ;;  %v561_v2 = vld [vmem:[#allocation2 + $0x68] sm:$0x1] }
  0x40   : > { %548 = vst [vmem:[#allocation2 + $0x2c] sm:$0x1] %v547_v14  ;;  %551 = vst [vmem:[#allocation2 + $0x38] sm:$0x1] %v550_v17  ;;  %v559_v7 = vsel %vm4797_vm6, 0, %v558_v57  ;;  %v562_v12 = vsel %vm4797_vm6, 0, %v561_v2 }
  0x41   : > { %554 = vst [vmem:[#allocation2 + $0x44] sm:$0x1] %v553_v18  ;;  %557 = vst [vmem:[#allocation2 + $0x50] sm:$0x1] %v556_v19  ;;  %v565_v16 = vsel %vm4797_vm6, 0, %v564_v53  ;;  %v568_v22 = vsel %vm4717_vm5, 0, %v567_v58 }
  0x42   : > { %560 = vst [vmem:[#allocation2 + $0x5c] sm:$0x1] %v559_v7  ;;  %563 = vst [vmem:[#allocation2 + $0x68] sm:$0x1] %v562_v12  ;;  %v572_v28 = vsel %vm4705_vm4, 0, %v571_v13  ;;  %577 = sbr.rel (%p3772_p8) target bundleno = 81 (0x51), region = 32 }
  0x43   : > { %566 = vst [vmem:[#allocation2 + $0x74] sm:$0x1] %v565_v16  ;;  %569 = vst [vmem:[#allocation2] sm:$0xf] %v568_v22 }
  0x44   : > { %573 = vst [vmem:[#allocation2 + $0x8] sm:$0x1] %v572_v28 }
  0x47   : > { %v582_v37 = vld [vmem:[%s581_s27] sm:$0xf]  ;;  %v583_v20 = vld [vmem:[%s581_s27 + $0x4] sm:$0xf] }
  0x48   : > { %v585_v31 = vshrl.u32 %v582_v37, 16  ;;  %v588_v32 = vshll.u32 %v582_v37, 16  ;;  %v593_v25 = vshrl.u32 %v583_v20, 16  ;;  %v596_v26 = vshll.u32 %v583_v20, 16 }
  0x4a   : > { %v587_v48 = vrot.slane %v585_v31, 7  ;;  %v595_v34 = vrot.slane %v593_v25, 7  ;;  %v604_v27 = vld [vmem:[#allocation2] sm:$0xf] }
  0x4b   : > { %v608_v29 = vld [vmem:[#allocation2 + $0x8] sm:$0x1] }
  0x4c   : > { %v590_v33 = vor.u32 %v588_v32, %v587_v48  ;;  %v591_v36 = vrot.slane %v587_v48, 4  ;;  %v598_v63 = vor.u32 %v596_v26, %v595_v34  ;;  %v600_v44 = vrot.slane %v595_v34, 4 }
  0x4e   : > { %v605_v38 = vsel %vm4717_vm5, %v590_v33, %v604_v27  ;;  %v599_v39 = vsel %vm4831_vm8, %v591_v36, %v598_v63  ;;  %v609_v40 = vsel %vm4705_vm4, %v600_v44, %v608_v29 }
  0x4f   : > { %606 = vst [vmem:[#allocation2] sm:$0xf] %v605_v38  ;;  %607 = vst [vmem:[#allocation2 + $0x4] sm:$0xf] %v599_v39 }
  0x50   : > { %610 = vst [vmem:[#allocation2 + $0x8] sm:$0x1] %v609_v40 }
  0x51 PF: > { %v612_v59 = vld [vmem:[#allocation2 + $0x6c] sm:$0xf]  ;;  %615 = vst [vmem:[#allocation2 + $0x70] sm:$0xf] %v4598_v0  ;;  %s619_s28 = sadd.s32 8, %s4657_s22 }
  0x52   : > { %v613_v50 = vsel %vm4717_vm5, 0, %v612_v59  ;;  %p3776_p9 = scmp.ge.s32.totalorder %s619_s28, 16 }
  0x53   : > { %614 = vst [vmem:[#allocation2 + $0x6c] sm:$0xf] %v613_v50 }
  0x54   : > { %v616_v41 = vld [vmem:[#allocation2 + $0x74] sm:$0x1]  ;;  %623 = sbr.rel (%p3776_p9) target bundleno = 99 (0x63), region = 36 }
  0x55   : > { %v617_v23 = vsel %vm4705_vm4, 0, %v616_v41 }
  0x56   : > { %618 = vst [vmem:[#allocation2 + $0x74] sm:$0x1] %v617_v23 }
  0x59   : > { %v3779_v30 = vld [vmem:[%s4675_s11 + $0x40] sm:$0xf]  ;;  %v3780_v42 = vld [vmem:[%s4675_s11 + $0x44] sm:$0xf] }
  0x5a   : > { %v630_v10 = vshrl.u32 %v3779_v30, 16  ;;  %v633_v43 = vshll.u32 %v3779_v30, 16  ;;  %v638_v6 = vshrl.u32 %v3780_v42, 16  ;;  %v641_v0 = vshll.u32 %v3780_v42, 16  ;;  %v649_v49 = vld [vmem:[#allocation2 + $0x6c] sm:$0xf] }
  0x5c   : > { %v632_v45 = vrot.slane %v630_v10, 7  ;;  %v640_v46 = vrot.slane %v638_v6, 7 }
  0x5d   : > { %v653_v51 = vld [vmem:[#allocation2 + $0x74] sm:$0x1] }
  0x5e   : > { %v635_v24 = vor.u32 %v633_v43, %v632_v45  ;;  %v636_v35 = vrot.slane %v632_v45, 4  ;;  %v643_v52 = vor.u32 %v641_v0, %v640_v46  ;;  %v645_v53 = vrot.slane %v640_v46, 4 }
  0x60   : > { %v650_v54 = vsel %vm4717_vm5, %v635_v24, %v649_v49  ;;  %v644_v55 = vsel %vm4831_vm8, %v636_v35, %v643_v52  ;;  %v654_v47 = vsel %vm4705_vm4, %v645_v53, %v653_v51 }
  0x61   : > { %651 = vst [vmem:[#allocation2 + $0x6c] sm:$0xf] %v650_v54  ;;  %652 = vst [vmem:[#allocation2 + $0x70] sm:$0xf] %v644_v55 }
  0x62   : > { %655 = vst [vmem:[#allocation2 + $0x74] sm:$0x1] %v654_v47 }
  0x63 PF: > { %v4396_v56 = vld [vmem:[%s5550_s1 + $0x78] sm:$0xff]   ;;  %v4400_v8 = vld [vmem:[%s5550_s1 + $0x70] sm:$0xff]   ;;  %v4404_v62 = vld [vmem:[%s5550_s1 + $0x68] sm:$0xff]   ;;  %vm987_vm9 = vcmask 1042432   ;;  %vm988_vm10 = vcmask 1046532  }
  0x64   : > { %v4397_v57 = vld [vmem:[%s5550_s1 + $0xf8] sm:$0xff]   ;;  %4035 = vmatprep.subr.bf16.mxu0 %v4396_v56  ;;  %v4401_v58 = vld [vmem:[%s5550_s1 + $0xf0] sm:$0xff]   ;;  %v4405_v1 = vld [vmem:[%s5550_s1 + $0xe8] sm:$0xff]   ;;  %vm712_vm11 = vsmask.f32 3328 }
  0x65   : > { %v4398_v21 = vld [vmem:[%s5550_s1 + $0x38] sm:$0xff]   ;;  %4099 = vmatprep.subr.bf16.mxu1 %v4397_v57  ;;  %v4402_v60 = vld [vmem:[%s5550_s1 + $0x30] sm:$0xff]   ;;  %v4406_v3 = vld [vmem:[%s5550_s1 + $0x28] sm:$0xff]   ;;  %vm713_vm12 = vsmask.f32 7440 }
  0x66   : > { %v4399_v15 = vld [vmem:[%s5550_s1 + $0xb8] sm:$0xff]   ;;  %4036 = vmatpush3.bf16.msra.mxu0 %v4398_v21  ;;  %v4403_v61 = vld [vmem:[%s5550_s1 + $0xb0] sm:$0xff]   ;;  %v4407_v4 = vld [vmem:[%s5550_s1 + $0xa8] sm:$0xff]  }
  0x67   : > { %4100 = vmatpush3.bf16.msra.mxu1 %v4399_v15  ;;  %4037 = vmatprep.subr.bf16.mxu0 %v4400_v8  ;;  %v4408_v5 = vld [vmem:[%s5550_s1 + $0x60] sm:$0xff]   ;;  %v4412_v14 = vld [vmem:[%s5550_s1 + $0x58] sm:$0xff]   ;;  %v4416_v2 = vld [vmem:[%s5550_s1 + $0x50] sm:$0xff]  }
  0x68   : > { %4101 = vmatprep.subr.bf16.mxu1 %v4401_v58  ;;  %v4409_v9 = vld [vmem:[%s5550_s1 + $0xe0] sm:$0xff]   ;;  %v4413_v17 = vld [vmem:[%s5550_s1 + $0xd8] sm:$0xff]   ;;  %v4417_v7 = vld [vmem:[%s5550_s1 + $0xd0] sm:$0xff]  }
  0x69   : > { %v4410_v11 = vld [vmem:[%s5550_s1 + $0x20] sm:$0xff]   ;;  %v4414_v18 = vld [vmem:[%s5550_s1 + $0x18] sm:$0xff]   ;;  %v4418_v12 = vld [vmem:[%s5550_s1 + $0x10] sm:$0xff]  }
  0x6a   : > { %4038 = vmatpush3.bf16.msra.mxu0 %v4402_v60  ;;  %v4411_v13 = vld [vmem:[%s5550_s1 + $0xa0] sm:$0xff]   ;;  %v4415_v19 = vld [vmem:[%s5550_s1 + $0x98] sm:$0xff]   ;;  %v4419_v16 = vld [vmem:[%s5550_s1 + $0x90] sm:$0xff]  }
  0x6b   : > { %4102 = vmatpush3.bf16.msra.mxu1 %v4403_v61  ;;  %4039 = vmatprep.subr.bf16.mxu0 %v4404_v62  ;;  %v4420_v22 = vld [vmem:[%s5550_s1 + $0x48] sm:$0xff]   ;;  %v4424_v31 = vld [vmem:[%s5550_s1 + $0x40] sm:$0xff]   ;;  %v4434_v38 = vld [vmem:[%s5550_s1 + $0x178] sm:$0xff]  }
  0x6c   : > { %4103 = vmatprep.subr.bf16.mxu1 %v4405_v1  ;;  %v4421_v28 = vld [vmem:[%s5550_s1 + $0xc8] sm:$0xff]   ;;  %v4425_v32 = vld [vmem:[%s5550_s1 + $0xc0] sm:$0xff]   ;;  %vm5045_vm13 = vmor %vm987_vm9, %vm988_vm10 }
  0x6d   : > { %v4422_v37 = vld [vmem:[%s5550_s1 + $0x8] sm:$0xff]   ;;  %v4426_v25 = vld [vmem:[%s5550_s1] sm:$0xff]   ;;  %v1079_v51 = vld [vmem:[#allocation2 + $0x10] sm:$0xf] }
  0x6e   : > { %4040 = vmatpush3.bf16.msra.mxu0 %v4406_v3  ;;  %v4423_v20 = vld [vmem:[%s5550_s1 + $0x88] sm:$0xff]   ;;  %v4427_v26 = vld [vmem:[%s5550_s1 + $0x80] sm:$0xff]   ;;  %vm5051_vm14 = vmor %vm712_vm11, %vm713_vm12  ;;  %1095 = vst [vmem:[#allocation3 + $0x30] sm:$0xf] %v1079_v51 }
  0x6f   : > { %4104 = vmatpush3.bf16.msra.mxu1 %v4407_v4  ;;  %4041 = vmatprep.subr.bf16.mxu0 %v4408_v5  ;;  %v656_v48 = vld [vmem:[#allocation2] sm:$0xf]  ;;  %v657_v34 = vld [vmem:[#allocation2 + $0x4] sm:$0xf]  ;;  %v690_v33 = vld [vmem:[#allocation2 + $0x8] sm:$0x1] }
  0x70   : > { %4105 = vmatprep.subr.bf16.mxu1 %v4409_v9  ;;  %v688_v27 = vld [vmem:[#allocation2] sm:$0xf]  ;;  %672 = vst [vmem:[#allocation3] sm:$0xf] %v656_v48  ;;  %673 = vst [vmem:[#allocation3 + $0x24] sm:$0xf] %v657_v34 }
  0x71   : > { %v689_v29 = vld [vmem:[#allocation2 + $0x4] sm:$0xf]  ;;  %v716_v36 = vshrl.u32 %v688_v27, 16  ;;  %v719_v63 = vshll.u32 %v688_v27, 16  ;;  %v735_v40 = vshll.u32 %v690_v33, 16  ;;  %v4449_v34 = vld [vmem:[%s5550_s1 + $0x1f8] sm:$0xff]  }
  0x72   : > { %4042 = vmatpush3.bf16.msra.mxu0 %v4410_v11  ;;  %v725_v44 = vshll.u32 %v689_v29, 16  ;;  %v729_v39 = vshrl.u32 %v689_v29, 16  ;;  %v939_v59 = vld [vmem:[#allocation2] sm:$0xe]  ;;  %v940_v41 = vld [vmem:[#allocation2 + $0x4] sm:$0xf] }
  0x73   : > { %4106 = vmatpush3.bf16.msra.mxu1 %v4411_v13  ;;  %4043 = vmatprep.subr.bf16.mxu0 %v4412_v14  ;;  %v718_v50 = vrot.slane %v716_v36, 4  ;;  %v721_v23 = vrot.slane %v719_v63, 5  ;;  %v941_v42 = vld [vmem:[#allocation2 + $0x8] sm:$0x1]  ;;  %v3781_v43 = vrot.slane %v939_v59, 9  ;;  %v992_v0 = vrot.slane %v940_v41, 5 }
  0x74   : > { %4107 = vmatprep.subr.bf16.mxu1 %v4413_v17  ;;  %v727_v30 = vrot.slane %v725_v44, 5  ;;  %v731_v6 = vrot.slane %v729_v39, 4  ;;  %v995_v45 = vrot.slane %v941_v42, 5  ;;  %v1078_v46 = vld [vmem:[#allocation2 + $0xc] sm:$0xf]  ;;  %v737_v52 = vrot.slane %v735_v40, 5 }
  0x75   : > { %v722_v49 = vor.u32 %v721_v23, %v718_v50  ;;  %1094 = vst [vmem:[#allocation3 + $0xc] sm:$0xf] %v1078_v46  ;;  %v993_v53 = vsel %vm5045_vm13, %v3781_v43, %v992_v0  ;;  %v994_v54 = vrot.slane %v992_v0, 4  ;;  %v658_v47 = vld [vmem:[#allocation2 + $0xc] sm:$0xf]  ;;  %v4435_v33 = vld [vmem:[%s5550_s1 + $0x138] sm:$0xff]  }
  0x76   : > { %4044 = vmatpush3.bf16.msra.mxu0 %v4414_v18  ;;  %v732_v35 = vor.u32 %v731_v6, %v727_v30  ;;  %1062 = vst [vmem:[#allocation3 + $0x8] sm:$0xf] %v993_v53  ;;  %v659_v56 = vld [vmem:[#allocation2 + $0x10] sm:$0xf]  ;;  %674 = vst [vmem:[#allocation3 + $0x48] sm:$0xf] %v658_v47 }
  0x77   : > { %4108 = vmatpush3.bf16.msra.mxu1 %v4415_v19  ;;  %4045 = vmatprep.subr.bf16.mxu0 %v4416_v2  ;;  %v723_v55 = vrot.slane %v722_v49, 4  ;;  %v996_v21 = vsel %vm5045_vm13, %v994_v54, %v995_v45  ;;  %675 = vst [vmem:[#allocation3 + $0x6c] sm:$0xf] %v659_v56  ;;  %v691_v15 = vld [vmem:[#allocation2 + $0xc] sm:$0xf]  ;;  %v4441_v23 = vld [vmem:[%s5550_s1 + $0x170] sm:$0xff]  }
  0x78   : > { %4109 = vmatprep.subr.bf16.mxu1 %v4417_v7  ;;  %v733_v57 = vrot.slane %v732_v35, 4  ;;  %v692_v8 = vld [vmem:[#allocation2 + $0x10] sm:$0xf]  ;;  %1063 = vst [vmem:[#allocation3 + $0x2c] sm:$0xf] %v996_v21  ;;  %v740_v61 = vshrl.u32 %v691_v15, 16 }
  0x79   : > { %v728_v58 = vsel %vm5051_vm14, %v723_v55, %v727_v30  ;;  %v693_v60 = vld [vmem:[#allocation2 + $0x14] sm:$0x1]  ;;  %v743_v62 = vshll.u32 %v691_v15, 16  ;;  %v749_v1 = vshll.u32 %v692_v8, 16  ;;  %v753_v4 = vshrl.u32 %v692_v8, 16  ;;  %v4448_v47 = vld [vmem:[%s5550_s1 + $0x168] sm:$0xff]  }
  0x7a   : > { %4046 = vmatpush3.bf16.msra.mxu0 %v4418_v12  ;;  %v738_v3 = vsel %vm5051_vm14, %v733_v57, %v737_v52  ;;  %923 = vst [vmem:[#allocation3 + $0x4] sm:$0xf] %v728_v58  ;;  %v759_v5 = vshll.u32 %v693_v60, 16  ;;  %v942_v9 = vld [vmem:[#allocation2 + $0xc] sm:$0xe]  ;;  %v742_v13 = vrot.slane %v740_v61, 4 }
  0x7b   : > { %4110 = vmatpush3.bf16.msra.mxu1 %v4419_v16  ;;  %4047 = vmatprep.subr.bf16.mxu0 %v4420_v22  ;;  %v943_v11 = vld [vmem:[#allocation2 + $0x10] sm:$0xf]  ;;  %924 = vst [vmem:[#allocation3 + $0x28] sm:$0xf] %v738_v3  ;;  %v745_v14 = vrot.slane %v743_v62, 5  ;;  %v751_v17 = vrot.slane %v749_v1, 5 }
  0x7c   : > { %4111 = vmatprep.subr.bf16.mxu1 %v4421_v28  ;;  %v944_v18 = vld [vmem:[#allocation2 + $0x14] sm:$0x1]  ;;  %v3782_v19 = vrot.slane %v942_v9, 9  ;;  %v755_v2 = vrot.slane %v753_v4, 4  ;;  %v761_v7 = vrot.slane %v759_v5, 5  ;;  %v999_v12 = vrot.slane %v943_v11, 5 }
  0x7d   : > { %v1002_v16 = vrot.slane %v944_v18, 5  ;;  %v1080_v22 = vld [vmem:[#allocation2 + $0x18] sm:$0xf]  ;;  %v746_v28 = vor.u32 %v745_v14, %v742_v13  ;;  %v661_v48 = vld [vmem:[#allocation2 + $0x1c] sm:$0xf]  ;;  %v4442_v0 = vld [vmem:[%s5550_s1 + $0x130] sm:$0xff]  }
  0x7e   : > { %4048 = vmatpush3.bf16.msra.mxu0 %v4422_v37  ;;  %v1081_v37 = vld [vmem:[#allocation2 + $0x1c] sm:$0xf]  ;;  %1096 = vst [vmem:[#allocation3 + $0x54] sm:$0xf] %v1080_v22  ;;  %v4433_v29 = vld [vmem:[#allocation3 + $0xc] ss:$36 sps:$4 sm:$0xff]  }
  0x7f   : > { %4112 = vmatpush3.bf16.msra.mxu1 %v4423_v20  ;;  %4049 = vmatprep.subr.bf16.mxu0 %v4424_v31  ;;  %v756_v20 = vor.u32 %v755_v2, %v751_v17  ;;  %v1000_v31 = vsel %vm5045_vm13, %v3782_v19, %v999_v12  ;;  %1097 = vst [vmem:[#allocation3 + $0x78] sm:$0xf] %v1081_v37  ;;  %v4431_v27 = vld [vmem:[#allocation3 + $0x8] ss:$36 sps:$4 sm:$0xff]   ;;  %677 = vst [vmem:[#allocation3 + $0xb4] sm:$0xf] %v661_v48 }
  0x80   : > { %4113 = vmatprep.subr.bf16.mxu1 %v4425_v32  ;;  %v1001_v32 = vrot.slane %v999_v12, 4  ;;  %1064 = vst [vmem:[#allocation3 + $0x50] sm:$0xf] %v1000_v31  ;;  %v695_v39 = vld [vmem:[#allocation2 + $0x1c] sm:$0xf]  ;;  %3064 = vmatprep.mubr.bf16.mxu1 %v4433_v29  ;;  %v4450_v4 = vld [vmem:[%s5550_s1 + $0x128] sm:$0xff]  }
  0x81   : > { %v757_v36 = vrot.slane %v756_v20, 4  ;;  %v4428_v40 = vld [vmem:[#allocation3] ss:$36 sps:$4 sm:$0xff]   ;;  %v696_v30 = vld [vmem:[#allocation2 + $0x20] sm:$0x1]  ;;  %v773_v43 = vshll.u32 %v695_v39, 16 }
  0x82   : > { %4050 = vmatpush3.bf16.msra.mxu0 %v4426_v25  ;;  %v747_v25 = vrot.slane %v746_v28, 4  ;;  %v1003_v63 = vsel %vm5045_vm13, %v1001_v32, %v1002_v16  ;;  %v4430_v59 = vld [vmem:[#allocation3 + $0x4] ss:$36 sps:$4 sm:$0xff]   ;;  %v777_v6 = vshrl.u32 %v695_v39, 16  ;;  %v783_v46 = vshll.u32 %v696_v30, 16 }
  0x83   : > { %4114 = vmatpush3.bf16.msra.mxu1 %v4427_v26  ;;  %4163 = vmatprep.subr.bf16.mxu0 %v4434_v38  ;;  %v660_v26 = vld [vmem:[#allocation2 + $0x18] sm:$0xf]  ;;  %1065 = vst [vmem:[#allocation3 + $0x74] sm:$0xf] %v1003_v63  ;;  %v762_v41 = vsel %vm5051_vm14, %v757_v36, %v761_v7  ;;  %v946_v51 = vld [vmem:[#allocation2 + $0x1c] sm:$0xf] }
  0x84   : > { %676 = vst [vmem:[#allocation3 + $0x90] sm:$0xf] %v660_v26  ;;  %v752_v44 = vsel %vm5051_vm14, %v747_v25, %v751_v17  ;;  %v694_v38 = vld [vmem:[#allocation2 + $0x18] sm:$0xf]  ;;  %4227 = vmatprep.subr.bf16.mxu1 %v4449_v34  ;;  %926 = vst [vmem:[#allocation3 + $0x70] sm:$0xf] %v762_v41  ;;  %2967 = vmatprep.mubr.bf16.mxu0 %v4430_v59 }
  0x85   : > { %925 = vst [vmem:[#allocation3 + $0x4c] sm:$0xf] %v752_v44  ;;  %v764_v50 = vshrl.u32 %v694_v38, 16  ;;  %v767_v42 = vshll.u32 %v694_v38, 16  ;;  %v945_v49 = vld [vmem:[#allocation2 + $0x18] sm:$0xe]  ;;  %2968 = vmatmul.mubr.bf16.vlgmr.msra.gmra.mxu0 %v4428_v40 }
  0x86   : > { %3065 = vmatmul.mubr.bf16.vlgmr.msra.gmra.mxu1 %v4431_v27  ;;  %v775_v52 = vrot.slane %v773_v43, 5  ;;  %v779_v53 = vrot.slane %v777_v6, 4  ;;  %v947_v54 = vld [vmem:[#allocation2 + $0x20] sm:$0x1]  ;;  %v3783_v55 = vrot.slane %v945_v49, 9  ;;  %4164 = vmatpush3.bf16.msra.mxu0 %v4435_v33  ;;  %v785_v56 = vrot.slane %v783_v46, 5 }
  0x87   : > { %v766_v45 = vrot.slane %v764_v50, 4  ;;  %v769_v35 = vrot.slane %v767_v42, 5  ;;  %v1006_v57 = vrot.slane %v946_v51, 5  ;;  %v1009_v21 = vrot.slane %v947_v54, 5  ;;  %v1082_v15 = vld [vmem:[#allocation2 + $0x24] sm:$0xf]  ;;  %4165 = vmatprep.subr.bf16.mxu0 %v4441_v23 }
  0x88   : > { %v780_v58 = vor.u32 %v779_v53, %v775_v52  ;;  %v1083_v60 = vld [vmem:[#allocation2 + $0x28] sm:$0xf]  ;;  %1098 = vst [vmem:[#allocation3 + $0x9c] sm:$0xf] %v1082_v15  ;;  %v4438_v61 = vld [vmem:[#allocation3 + $0x54] ss:$36 sps:$4 sm:$0xff]  }
  0x89   : > { %v770_v8 = vor.u32 %v769_v35, %v766_v45  ;;  %v1007_v1 = vsel %vm5045_vm13, %v3783_v55, %v1006_v57  ;;  %v1008_v3 = vrot.slane %v1006_v57, 4  ;;  %1099 = vst [vmem:[#allocation3 + $0xc0] sm:$0xf] %v1083_v60  ;;  %v4451_v13 = vld [vmem:[%s5550_s1 + $0x1b8] sm:$0xff]   ;;  %3072 = vmatprep.mubr.bf16.mxu1 %v4438_v61  ;;  %v662_v12 = vld [vmem:[#allocation2 + $0x24] sm:$0xf] }
  0x8a   : > { %v4440_v62 = vld [vmem:[#allocation3 + $0x50] ss:$36 sps:$4 sm:$0xff]   ;;  %v781_v11 = vrot.slane %v780_v58, 4  ;;  %1066 = vst [vmem:[#allocation3 + $0x98] sm:$0xf] %v1007_v1  ;;  %4166 = vmatpush3.bf16.msra.mxu0 %v4442_v0  ;;  %4228 = vmatpush3.bf16.msra.mxu1 %v4451_v13  ;;  %v4457_v38 = vld [vmem:[%s5550_s1 + $0x160] sm:$0xff]  }
  0x8b   : > { %v771_v9 = vrot.slane %v770_v8, 4  ;;  %v1926_v14 = vld [vmem:[#allocation3 + $0x6c] sm:$0xff]  ;;  %v1010_v18 = vsel %vm5045_vm13, %v1008_v3, %v1009_v21  ;;  %4167 = vmatprep.subr.bf16.mxu0 %v4448_v47  ;;  %678 = vst [vmem:[#allocation3 + $0xd8] sm:$0xf] %v662_v12  ;;  %v699_v37 = vld [vmem:[#allocation2 + $0x2c] sm:$0x1] }
  0x8c   : > { %v1921_v5 = vld [vmem:[#allocation3 + $0x48] sm:$0xff]  ;;  %v786_v7 = vsel %vm5051_vm14, %v781_v11, %v785_v56  ;;  %1067 = vst [vmem:[#allocation3 + $0xbc] sm:$0xf] %v1010_v18  ;;  %v663_v16 = vld [vmem:[#allocation2 + $0x28] sm:$0xf]  ;;  %v807_v48 = vshll.u32 %v699_v37, 16 }
  0x8d   : > { %v4436_v17 = vld [vmem:[#allocation3 + $0x4c] ss:$36 sps:$4 sm:$0xff]   ;;  %v3814_v19 = vcombine.low %v1921_v5, %v1926_v14  ;;  %v776_v2 = vsel %vm5051_vm14, %v771_v9, %v775_v52  ;;  %928 = vst [vmem:[#allocation3 + $0xb8] sm:$0xf] %v786_v7  ;;  %679 = vst [vmem:[#allocation3 + $0xfc] sm:$0xf] %v663_v16 }
  0x8e   : > { %3073 = vmatmul.mubr.bf16.gmra.mxu1 %v4440_v62  ;;  %2975 = vmatprep.mubr.bf16.mxu0 %v4436_v17  ;;  %927 = vst [vmem:[#allocation3 + $0x94] sm:$0xf] %v776_v2  ;;  %v697_v22 = vld [vmem:[#allocation2 + $0x24] sm:$0xf]  ;;  %v698_v28 = vld [vmem:[#allocation2 + $0x28] sm:$0xf] }
  0x8f   : > { %2976 = vmatmul.mubr.bf16.gmra.mxu0 %v3814_v19  ;;  %v788_v20 = vshrl.u32 %v697_v22, 16  ;;  %v791_v31 = vshll.u32 %v697_v22, 16  ;;  %v797_v32 = vshll.u32 %v698_v28, 16  ;;  %v801_v25 = vshrl.u32 %v698_v28, 16  ;;  %v948_v26 = vld [vmem:[#allocation2 + $0x24] sm:$0xe] }
  0x90   : > { %4168 = vmatpush3.bf16.msra.mxu0 %v4450_v4  ;;  %v949_v34 = vld [vmem:[#allocation2 + $0x28] sm:$0xf]  ;;  %v950_v27 = vld [vmem:[#allocation2 + $0x2c] sm:$0x1]  ;;  %v3784_v29 = vrot.slane %v948_v26, 9  ;;  %v4458_v41 = vld [vmem:[%s5550_s1 + $0x1f0] sm:$0xff]  }
  0x91   : > { %v790_v33 = vrot.slane %v788_v20, 4  ;;  %v793_v36 = vrot.slane %v791_v31, 5  ;;  %v799_v63 = vrot.slane %v797_v32, 5  ;;  %v803_v44 = vrot.slane %v801_v25, 4  ;;  %v1084_v59 = vld [vmem:[#allocation2 + $0x30] sm:$0xf]  ;;  %4169 = vmatprep.subr.bf16.mxu0 %v4457_v38  ;;  %4229 = vmatprep.subr.bf16.mxu1 %v4458_v41 }
  0x92   : > { %v1013_v39 = vrot.slane %v949_v34, 5  ;;  %v1016_v40 = vrot.slane %v950_v27, 5  ;;  %v4445_v50 = vld [vmem:[#allocation3 + $0x9c] ss:$36 sps:$4 sm:$0xff]   ;;  %v809_v43 = vrot.slane %v807_v48, 5  ;;  %v4459_v56 = vld [vmem:[%s5550_s1 + $0x120] sm:$0xff]  }
  0x93   : > { %v4447_v23 = vld [vmem:[#allocation3 + $0x98] ss:$36 sps:$4 sm:$0xff]   ;;  %v794_v30 = vor.u32 %v793_v36, %v790_v33  ;;  %v804_v42 = vor.u32 %v803_v44, %v799_v63  ;;  %1100 = vst [vmem:[#allocation3 + $0xe4] sm:$0xf] %v1084_v59  ;;  %3080 = vmatprep.mubr.bf16.mxu1 %v4445_v50  ;;  %v702_v60 = vld [vmem:[#allocation2 + $0x38] sm:$0x1] }
  0x94   : > { %v1936_v0 = vld [vmem:[#allocation3 + $0xb4] sm:$0xff]  ;;  %v1014_v46 = vsel %vm5045_vm13, %v3784_v29, %v1013_v39  ;;  %v1015_v49 = vrot.slane %v1013_v39, 4  ;;  %v1085_v53 = vld [vmem:[#allocation2 + $0x34] sm:$0xf]  ;;  %4170 = vmatpush3.bf16.msra.mxu0 %v4459_v56  ;;  %v831_v4 = vshll.u32 %v702_v60, 16  ;;  %v4466_v9 = vld [vmem:[%s5550_s1 + $0x158] sm:$0xff]  }
  0x95   : > { %v1931_v6 = vld [vmem:[#allocation3 + $0x90] sm:$0xff]  ;;  %v795_v35 = vrot.slane %v794_v30, 4  ;;  %v805_v52 = vrot.slane %v804_v42, 4  ;;  %1068 = vst [vmem:[#allocation3 + $0xe0] sm:$0xf] %v1014_v46  ;;  %v4460_v57 = vld [vmem:[%s5550_s1 + $0x1b0] sm:$0xff]   ;;  %4171 = vmatprep.subr.bf16.mxu0 %v4466_v9 }
  0x96   : > { %v4443_v45 = vld [vmem:[#allocation3 + $0x94] ss:$36 sps:$4 sm:$0xff]   ;;  %v3823_v51 = vcombine.low %v1931_v6, %v1936_v0  ;;  %3081 = vmatmul.mubr.bf16.gmra.mxu1 %v4447_v23  ;;  %v1017_v54 = vsel %vm5045_vm13, %v1015_v49, %v1016_v40  ;;  %1101 = vst [vmem:[#allocation3 + $0x108] sm:$0xf] %v1085_v53  ;;  %v665_v15 = vld [vmem:[#allocation2 + $0x34] sm:$0xf] }
  0x97   : > { %2983 = vmatprep.mubr.bf16.mxu0 %v4443_v45  ;;  %v800_v55 = vsel %vm5051_vm14, %v795_v35, %v799_v63  ;;  %v810_v47 = vsel %vm5051_vm14, %v805_v52, %v809_v43  ;;  %1069 = vst [vmem:[#allocation3 + $0x104] sm:$0xf] %v1017_v54  ;;  %v664_v21 = vld [vmem:[#allocation2 + $0x30] sm:$0xf]  ;;  %4230 = vmatpush3.bf16.msra.mxu1 %v4460_v57  ;;  %681 = vst [vmem:[#allocation3 + $0x144] sm:$0xf] %v665_v15 }
  0x98   : > { %2984 = vmatmul.mubr.bf16.gmra.mxu0 %v3823_v51  ;;  %929 = vst [vmem:[#allocation3 + $0xdc] sm:$0xf] %v800_v55  ;;  %930 = vst [vmem:[#allocation3 + $0x100] sm:$0xf] %v810_v47  ;;  %v700_v8 = vld [vmem:[#allocation2 + $0x30] sm:$0xf] }
  0x99   : > { %680 = vst [vmem:[#allocation3 + $0x120] sm:$0xf] %v664_v21  ;;  %v701_v58 = vld [vmem:[#allocation2 + $0x34] sm:$0xf]  ;;  %v812_v61 = vshrl.u32 %v700_v8, 16  ;;  %v815_v62 = vshll.u32 %v700_v8, 16 }
  0x9a   : > { %v821_v1 = vshll.u32 %v701_v58, 16  ;;  %v825_v3 = vshrl.u32 %v701_v58, 16  ;;  %v951_v5 = vld [vmem:[#allocation2 + $0x30] sm:$0xe]  ;;  %v952_v14 = vld [vmem:[#allocation2 + $0x34] sm:$0xf] }
  0x9b   : > { %v814_v11 = vrot.slane %v812_v61, 4  ;;  %v817_v13 = vrot.slane %v815_v62, 5  ;;  %v3785_v17 = vrot.slane %v951_v5, 9  ;;  %v953_v2 = vld [vmem:[#allocation2 + $0x38] sm:$0x1]  ;;  %v1020_v7 = vrot.slane %v952_v14, 5 }
  0x9c   : > { %v823_v18 = vrot.slane %v821_v1, 5  ;;  %v827_v19 = vrot.slane %v825_v3, 4  ;;  %v1023_v28 = vrot.slane %v953_v2, 5  ;;  %v833_v25 = vrot.slane %v831_v4, 5  ;;  %v1086_v29 = vld [vmem:[#allocation2 + $0x3c] sm:$0xf] }
  0x9d   : > { %v4454_v12 = vld [vmem:[#allocation3 + $0xe4] ss:$36 sps:$4 sm:$0xff]   ;;  %v818_v22 = vor.u32 %v817_v13, %v814_v11  ;;  %v1021_v26 = vsel %vm5045_vm13, %v3785_v17, %v1020_v7  ;;  %v1022_v48 = vrot.slane %v1020_v7, 4  ;;  %v4467_v36 = vld [vmem:[%s5550_s1 + $0x1e8] sm:$0xff]   ;;  %1102 = vst [vmem:[#allocation3 + $0x12c] sm:$0xf] %v1086_v29 }
  0x9e   : > { %v4456_v16 = vld [vmem:[#allocation3 + $0xe0] ss:$36 sps:$4 sm:$0xff]   ;;  %v828_v32 = vor.u32 %v827_v19, %v823_v18  ;;  %3088 = vmatprep.mubr.bf16.mxu1 %v4454_v12  ;;  %1070 = vst [vmem:[#allocation3 + $0x128] sm:$0xf] %v1021_v26  ;;  %v1087_v33 = vld [vmem:[#allocation2 + $0x40] sm:$0xf]  ;;  %4231 = vmatprep.subr.bf16.mxu1 %v4467_v36 }
  0x9f   : > { %v1941_v37 = vld [vmem:[#allocation3 + $0xd8] sm:$0xff]  ;;  %v819_v27 = vrot.slane %v818_v22, 4  ;;  %3089 = vmatmul.mubr.bf16.gmra.mxu1 %v4456_v16  ;;  %v1024_v44 = vsel %vm5045_vm13, %v1022_v48, %v1023_v28  ;;  %1103 = vst [vmem:[#allocation3 + $0x150] sm:$0xf] %v1087_v33  ;;  %v4468_v38 = vld [vmem:[%s5550_s1 + $0x118] sm:$0xff]   ;;  %v4469_v59 = vld [vmem:[%s5550_s1 + $0x1a8] sm:$0xff]  }
  0xa0   : > { %v1946_v20 = vld [vmem:[#allocation3 + $0xfc] sm:$0xff]  ;;  %v829_v63 = vrot.slane %v828_v32, 4  ;;  %1071 = vst [vmem:[#allocation3 + $0x14c] sm:$0xf] %v1024_v44  ;;  %4172 = vmatpush3.bf16.msra.mxu0 %v4468_v38  ;;  %v666_v41 = vld [vmem:[#allocation2 + $0x3c] sm:$0xf]  ;;  %4232 = vmatpush3.bf16.msra.mxu1 %v4469_v59 }
  0xa1   : > { %v4452_v31 = vld [vmem:[#allocation3 + $0xdc] ss:$36 sps:$4 sm:$0xff]   ;;  %v3832_v34 = vcombine.low %v1941_v37, %v1946_v20  ;;  %v824_v39 = vsel %vm5051_vm14, %v819_v27, %v823_v18  ;;  %v667_v50 = vld [vmem:[#allocation2 + $0x40] sm:$0xf]  ;;  %682 = vst [vmem:[#allocation3 + $0x168] sm:$0xf] %v666_v41 }
  0xa2   : > { %2991 = vmatprep.mubr.bf16.mxu0 %v4452_v31  ;;  %v834_v40 = vsel %vm5051_vm14, %v829_v63, %v833_v25  ;;  %931 = vst [vmem:[#allocation3 + $0x124] sm:$0xf] %v824_v39  ;;  %683 = vst [vmem:[#allocation3 + $0x18c] sm:$0xf] %v667_v50  ;;  %v703_v23 = vld [vmem:[#allocation2 + $0x3c] sm:$0xf] }
  0xa3   : > { %2992 = vmatmul.mubr.bf16.gmra.mxu0 %v3832_v34  ;;  %932 = vst [vmem:[#allocation3 + $0x148] sm:$0xf] %v834_v40  ;;  %v704_v30 = vld [vmem:[#allocation2 + $0x40] sm:$0xf]  ;;  %v705_v42 = vld [vmem:[#allocation2 + $0x44] sm:$0x1] }
  0xa4   : > { %v836_v43 = vshrl.u32 %v703_v23, 16  ;;  %v839_v6 = vshll.u32 %v703_v23, 16  ;;  %v845_v0 = vshll.u32 %v704_v30, 16  ;;  %v849_v45 = vshrl.u32 %v704_v30, 16  ;;  %v954_v46 = vld [vmem:[#allocation2 + $0x3c] sm:$0xe] }
  0xa5   : > { %v855_v49 = vshll.u32 %v705_v42, 16  ;;  %v955_v51 = vld [vmem:[#allocation2 + $0x40] sm:$0xf]  ;;  %v956_v35 = vld [vmem:[#allocation2 + $0x44] sm:$0x1]  ;;  %v3786_v52 = vrot.slane %v954_v46, 9 }
  0xa6   : > { %v838_v53 = vrot.slane %v836_v43, 4  ;;  %v841_v54 = vrot.slane %v839_v6, 5  ;;  %v847_v55 = vrot.slane %v845_v0, 5  ;;  %v851_v47 = vrot.slane %v849_v45, 4  ;;  %v4475_v56 = vld [vmem:[%s5550_s1 + $0x150] sm:$0xff]   ;;  %v4476_v1 = vld [vmem:[%s5550_s1 + $0x1e0] sm:$0xff]  }
  0xa7   : > { %v4463_v57 = vld [vmem:[#allocation3 + $0x12c] ss:$36 sps:$4 sm:$0xff]   ;;  %v857_v60 = vrot.slane %v855_v49, 5  ;;  %v1027_v61 = vrot.slane %v955_v51, 5  ;;  %4173 = vmatprep.subr.bf16.mxu0 %v4475_v56  ;;  %v1030_v5 = vrot.slane %v956_v35, 5  ;;  %4233 = vmatprep.subr.bf16.mxu1 %v4476_v1  ;;  %v4477_v19 = vld [vmem:[%s5550_s1 + $0x110] sm:$0xff]  }
  0xa8   : > { %v4465_v21 = vld [vmem:[#allocation3 + $0x128] ss:$36 sps:$4 sm:$0xff]   ;;  %v842_v8 = vor.u32 %v841_v54, %v838_v53  ;;  %v852_v58 = vor.u32 %v851_v47, %v847_v55  ;;  %v1088_v62 = vld [vmem:[#allocation2 + $0x48] sm:$0xf]  ;;  %3096 = vmatprep.mubr.bf16.mxu1 %v4463_v57  ;;  %v1089_v9 = vld [vmem:[#allocation2 + $0x4c] sm:$0xf]  ;;  %4174 = vmatpush3.bf16.msra.mxu0 %v4477_v19 }
  0xa9   : > { %v1951_v15 = vld [vmem:[#allocation3 + $0x120] sm:$0xff]  ;;  %1104 = vst [vmem:[#allocation3 + $0x174] sm:$0xf] %v1088_v62  ;;  %3097 = vmatmul.mubr.bf16.gmra.mxu1 %v4465_v21  ;;  %v1028_v17 = vsel %vm5045_vm13, %v3786_v52, %v1027_v61  ;;  %1105 = vst [vmem:[#allocation3 + $0x198] sm:$0xf] %v1089_v9  ;;  %v1029_v18 = vrot.slane %v1027_v61, 4 }
  0xaa   : > { %v1956_v3 = vld [vmem:[#allocation3 + $0x144] sm:$0xff]  ;;  %v843_v13 = vrot.slane %v842_v8, 4  ;;  %v853_v14 = vrot.slane %v852_v58, 4  ;;  %1072 = vst [vmem:[#allocation3 + $0x170] sm:$0xf] %v1028_v17  ;;  %v4484_v33 = vld [vmem:[%s5550_s1 + $0x148] sm:$0xff]  }
  0xab   : > { %v4461_v4 = vld [vmem:[#allocation3 + $0x124] ss:$36 sps:$4 sm:$0xff]   ;;  %v3841_v11 = vcombine.low %v1951_v15, %v1956_v3  ;;  %v1031_v12 = vsel %vm5045_vm13, %v1029_v18, %v1030_v5  ;;  %v668_v22 = vld [vmem:[#allocation2 + $0x48] sm:$0xf]  ;;  %v669_v28 = vld [vmem:[#allocation2 + $0x4c] sm:$0xf]  ;;  %4175 = vmatprep.subr.bf16.mxu0 %v4484_v33 }
  0xac   : > { %2999 = vmatprep.mubr.bf16.mxu0 %v4461_v4  ;;  %v848_v2 = vsel %vm5051_vm14, %v843_v13, %v847_v55  ;;  %v858_v7 = vsel %vm5051_vm14, %v853_v14, %v857_v60  ;;  %v4478_v16 = vld [vmem:[%s5550_s1 + $0x1a0] sm:$0xff]   ;;  %1073 = vst [vmem:[#allocation3 + $0x194] sm:$0xf] %v1031_v12  ;;  %684 = vst [vmem:[#allocation3 + $0x1b0] sm:$0xf] %v668_v22  ;;  %v4485_v50 = vld [vmem:[%s5550_s1 + $0x1d8] sm:$0xff]  }
  0xad   : > { %3000 = vmatmul.mubr.bf16.gmra.mxu0 %v3841_v11  ;;  %933 = vst [vmem:[#allocation3 + $0x16c] sm:$0xf] %v848_v2  ;;  %934 = vst [vmem:[#allocation3 + $0x190] sm:$0xf] %v858_v7  ;;  %v706_v37 = vld [vmem:[#allocation2 + $0x48] sm:$0xf]  ;;  %4234 = vmatpush3.bf16.msra.mxu1 %v4478_v16 }
  0xae   : > { %v707_v20 = vld [vmem:[#allocation2 + $0x4c] sm:$0xf]  ;;  %685 = vst [vmem:[#allocation3 + $0x1d4] sm:$0xf] %v669_v28  ;;  %v708_v31 = vld [vmem:[#allocation2 + $0x50] sm:$0x1]  ;;  %4235 = vmatprep.subr.bf16.mxu1 %v4485_v50 }
  0xaf   : > { %v860_v32 = vshrl.u32 %v706_v37, 16  ;;  %v863_v25 = vshll.u32 %v706_v37, 16  ;;  %v869_v26 = vshll.u32 %v707_v20, 16  ;;  %v873_v48 = vshrl.u32 %v707_v20, 16  ;;  %v957_v27 = vld [vmem:[#allocation2 + $0x48] sm:$0xe] }
  0xb0   : > { %v879_v34 = vshll.u32 %v708_v31, 16  ;;  %v958_v29 = vld [vmem:[#allocation2 + $0x4c] sm:$0xf]  ;;  %v959_v39 = vld [vmem:[#allocation2 + $0x50] sm:$0x1]  ;;  %v3787_v40 = vrot.slane %v957_v27, 9 }
  0xb1   : > { %v862_v36 = vrot.slane %v860_v32, 4  ;;  %v865_v63 = vrot.slane %v863_v25, 5  ;;  %v871_v44 = vrot.slane %v869_v26, 5  ;;  %v875_v38 = vrot.slane %v873_v48, 4  ;;  %v1090_v42 = vld [vmem:[#allocation2 + $0x54] sm:$0xf] }
  0xb2   : > { %v1034_v59 = vrot.slane %v958_v29, 5  ;;  %v1037_v41 = vrot.slane %v959_v39, 5  ;;  %v1091_v43 = vld [vmem:[#allocation2 + $0x58] sm:$0xf]  ;;  %v881_v46 = vrot.slane %v879_v34, 5  ;;  %v4486_v56 = vld [vmem:[%s5550_s1 + $0x108] sm:$0xff]  }
  0xb3   : > { %v866_v23 = vor.u32 %v865_v63, %v862_v36  ;;  %v876_v30 = vor.u32 %v875_v38, %v871_v44  ;;  %1106 = vst [vmem:[#allocation3 + $0x1bc] sm:$0xf] %v1090_v42  ;;  %1107 = vst [vmem:[#allocation3 + $0x1e0] sm:$0xf] %v1091_v43  ;;  %v4472_v35 = vld [vmem:[#allocation3 + $0x174] ss:$36 sps:$4 sm:$0xff]   ;;  %4176 = vmatpush3.bf16.msra.mxu0 %v4486_v56 }
  0xb4   : > { %v1961_v6 = vld [vmem:[#allocation3 + $0x168] sm:$0xff]  ;;  %v1035_v49 = vsel %vm5045_vm13, %v3787_v40, %v1034_v59  ;;  %v1036_v51 = vrot.slane %v1034_v59, 4  ;;  %v4474_v53 = vld [vmem:[#allocation3 + $0x170] ss:$36 sps:$4 sm:$0xff]   ;;  %3104 = vmatprep.mubr.bf16.mxu1 %v4472_v35  ;;  %v4487_v15 = vld [vmem:[%s5550_s1 + $0x198] sm:$0xff]  }
  0xb5   : > { %v1966_v0 = vld [vmem:[#allocation3 + $0x18c] sm:$0xff]  ;;  %v867_v54 = vrot.slane %v866_v23, 4  ;;  %1074 = vst [vmem:[#allocation3 + $0x1b8] sm:$0xf] %v1035_v49  ;;  %v877_v55 = vrot.slane %v876_v30, 4  ;;  %3105 = vmatmul.mubr.bf16.gmra.mxu1 %v4474_v53  ;;  %v4488_v8 = vld [vmem:[%s5550_s1 + $0x1d0] sm:$0xff]  }
  0xb6   : > { %v4470_v45 = vld [vmem:[#allocation3 + $0x16c] ss:$36 sps:$4 sm:$0xff]   ;;  %v3850_v52 = vcombine.low %v1961_v6, %v1966_v0  ;;  %v1038_v47 = vsel %vm5045_vm13, %v1036_v51, %v1037_v41  ;;  %4236 = vmatpush3.bf16.msra.mxu1 %v4487_v15  ;;  %v4489_v58 = vld [vmem:[%s5550_s1 + $0x190] sm:$0xff]   ;;  %v671_v61 = vld [vmem:[#allocation2 + $0x58] sm:$0xf] }
  0xb7   : > { %3007 = vmatprep.mubr.bf16.mxu0 %v4470_v45  ;;  %v872_v57 = vsel %vm5051_vm14, %v867_v54, %v871_v44  ;;  %1075 = vst [vmem:[#allocation3 + $0x1dc] sm:$0xf] %v1038_v47  ;;  %v882_v21 = vsel %vm5051_vm14, %v877_v55, %v881_v46  ;;  %4237 = vmatprep.subr.bf16.mxu1 %v4488_v8  ;;  %v670_v60 = vld [vmem:[#allocation2 + $0x54] sm:$0xf]  ;;  %687 = vst [vmem:[#allocation3 + $0x21c] sm:$0xf] %v671_v61 }
  0xb8   : > { %3008 = vmatmul.mubr.bf16.gmra.mxu0 %v3850_v52  ;;  %935 = vst [vmem:[#allocation3 + $0x1b4] sm:$0xf] %v872_v57  ;;  %936 = vst [vmem:[#allocation3 + $0x1d8] sm:$0xf] %v882_v21  ;;  %v709_v62 = vld [vmem:[#allocation2 + $0x54] sm:$0xf] }
  0xb9   : > { %686 = vst [vmem:[#allocation3 + $0x1f8] sm:$0xf] %v670_v60  ;;  %v710_v1 = vld [vmem:[#allocation2 + $0x58] sm:$0xf]  ;;  %v711_v3 = vld [vmem:[#allocation2 + $0x5c] sm:$0x1] }
  0xba   : > { %v884_v4 = vshrl.u32 %v709_v62, 16  ;;  %v887_v5 = vshll.u32 %v709_v62, 16  ;;  %v893_v9 = vshll.u32 %v710_v1, 16  ;;  %v897_v11 = vshrl.u32 %v710_v1, 16  ;;  %v960_v14 = vld [vmem:[#allocation2 + $0x54] sm:$0xe]  ;;  %4238 = vmatpush3.bf16.msra.mxu1 %v4489_v58 }
  0xbb   : > { %v903_v13 = vshll.u32 %v711_v3, 16  ;;  %v4481_v17 = vld [vmem:[#allocation3 + $0x1bc] ss:$36 sps:$4 sm:$0xff]   ;;  %v4495_v28 = vld [vmem:[%s5550_s1 + $0x140] sm:$0xff]   ;;  %v3788_v32 = vrot.slane %v960_v14, 9  ;;  %v4496_v33 = vld [vmem:[%s5550_s1 + $0x1c8] sm:$0xff]  }
  0xbc   : > { %v886_v19 = vrot.slane %v884_v4, 4  ;;  %v889_v7 = vrot.slane %v887_v5, 5  ;;  %v895_v12 = vrot.slane %v893_v9, 5  ;;  %v899_v16 = vrot.slane %v897_v11, 4  ;;  %3112 = vmatprep.mubr.bf16.mxu1 %v4481_v17  ;;  %v961_v31 = vld [vmem:[#allocation2 + $0x58] sm:$0xf]  ;;  %4177 = vmatprep.subr.bf16.mxu0 %v4495_v28 }
  0xbd   : > { %v905_v22 = vrot.slane %v903_v13, 5  ;;  %v962_v34 = vld [vmem:[#allocation2 + $0x5c] sm:$0x1]  ;;  %v1041_v27 = vrot.slane %v961_v31, 5  ;;  %v1092_v29 = vld [vmem:[#allocation2 + $0x60] sm:$0xf]  ;;  %4239 = vmatprep.subr.bf16.mxu1 %v4496_v33 }
  0xbe   : > { %v4483_v18 = vld [vmem:[#allocation3 + $0x1b8] ss:$36 sps:$4 sm:$0xff]   ;;  %v890_v26 = vor.u32 %v889_v7, %v886_v19  ;;  %v900_v48 = vor.u32 %v899_v16, %v895_v12  ;;  %v1044_v36 = vrot.slane %v962_v34, 5  ;;  %v1093_v63 = vld [vmem:[#allocation2 + $0x64] sm:$0xf]  ;;  %v4498_v41 = vld [vmem:[%s5550_s1 + $0x188] sm:$0xff]  }
  0xbf   : > { %v1971_v2 = vld [vmem:[#allocation3 + $0x1b0] sm:$0xff]  ;;  %3113 = vmatmul.mubr.bf16.gmra.mxu1 %v4483_v18  ;;  %1108 = vst [vmem:[#allocation3 + $0x204] sm:$0xf] %v1092_v29  ;;  %v4497_v44 = vld [vmem:[%s5550_s1 + $0x100] sm:$0xff]   ;;  %v1042_v40 = vsel %vm5045_vm13, %v3788_v32, %v1041_v27  ;;  %v1043_v59 = vrot.slane %v1041_v27, 4  ;;  %v5215_v8 = vld [vmem:[%s5550_s1 + $0x238] sm:$0xff]  }
  0xc0   : > { %v1976_v37 = vld [vmem:[#allocation3 + $0x1d4] sm:$0xff]  ;;  %v891_v38 = vrot.slane %v890_v26, 4  ;;  %v901_v39 = vrot.slane %v900_v48, 4  ;;  %1109 = vst [vmem:[#allocation3 + $0x228] sm:$0xf] %v1093_v63  ;;  %4178 = vmatpush3.bf16.msra.mxu0 %v4497_v44  ;;  %4240 = vmatpush3.bf16.msra.mxu1 %v4498_v41  ;;  %v4499_v42 = vld [vmem:[%s5550_s1 + $0x1c0] sm:$0xff]  }
  0xc1   : > { %v4479_v20 = vld [vmem:[#allocation3 + $0x1b4] ss:$36 sps:$4 sm:$0xff]   ;;  %v3859_v25 = vcombine.low %v1971_v2, %v1976_v37  ;;  %1076 = vst [vmem:[#allocation3 + $0x200] sm:$0xf] %v1042_v40  ;;  %v1045_v30 = vsel %vm5045_vm13, %v1043_v59, %v1044_v36  ;;  %v4500_v43 = vld [vmem:[%s5550_s1 + $0x180] sm:$0xff]   ;;  %4241 = vmatprep.subr.bf16.mxu1 %v4499_v42  ;;  %4307 = vmatprep.subr.bf16.mxu0 %v5215_v8 }
  0xc2   : > { %3015 = vmatprep.mubr.bf16.mxu0 %v4479_v20  ;;  %v896_v50 = vsel %vm5051_vm14, %v891_v38, %v895_v12  ;;  %v906_v23 = vsel %vm5051_vm14, %v901_v39, %v905_v22  ;;  %1077 = vst [vmem:[#allocation3 + $0x224] sm:$0xf] %v1045_v30  ;;  %v1110_v6 = vld [vmem:[#allocation2 + $0xc] sm:$0xf]  ;;  %v1111_v0 = vld [vmem:[#allocation2 + $0x10] sm:$0xf] }
  0xc3   : > { %3016 = vmatmul.mubr.bf16.gmra.mxu0 %v3859_v25  ;;  %937 = vst [vmem:[#allocation3 + $0x1fc] sm:$0xf] %v896_v50  ;;  %938 = vst [vmem:[#allocation3 + $0x220] sm:$0xf] %v906_v23  ;;  %v1112_v45 = vld [vmem:[#allocation2 + $0x14] sm:$0x1] }
  0xc4   : > { %4242 = vmatpush3.bf16.msra.mxu1 %v4500_v43  ;;  %v1135_v46 = vshrl.u32 %v1110_v6, 16  ;;  %v1138_v49 = vshll.u32 %v1110_v6, 16  ;;  %v1144_v51 = vshll.u32 %v1111_v0, 16  ;;  %v1148_v35 = vshrl.u32 %v1111_v0, 16  ;;  %v1358_v52 = vld [vmem:[#allocation2 + $0xc] sm:$0xe] }
  0xc5   : > { %v1154_v53 = vshll.u32 %v1112_v45, 16  ;;  %v1359_v54 = vld [vmem:[#allocation2 + $0x10] sm:$0xf]  ;;  %v1360_v55 = vld [vmem:[#allocation2 + $0x14] sm:$0x1]  ;;  %v3789_v47 = vrot.slane %v1358_v52, 9  ;;  %4339 = vmatprep.subr.bf16.mxu1 %v5215_v8 }
  0xc6   : > { %v1137_v56 = vrot.slane %v1135_v46, 4  ;;  %v1140_v57 = vrot.slane %v1138_v49, 5  ;;  %v1146_v21 = vrot.slane %v1144_v51, 5  ;;  %v1150_v15 = vrot.slane %v1148_v35, 4  ;;  %v1495_v61 = vld [vmem:[#allocation2 + $0x18] sm:$0xf] }
  0xc7   : > { %v1408_v58 = vrot.slane %v1359_v54, 5  ;;  %v1411_v60 = vrot.slane %v1360_v55, 5  ;;  %v1156_v9 = vrot.slane %v1154_v53, 5  ;;  %1511 = vst [vmem:[#allocation3 + $0x18] sm:$0xf] %v1495_v61 }
  0xc8   : > { %v1141_v4 = vor.u32 %v1140_v57, %v1137_v56  ;;  %v1151_v5 = vor.u32 %v1150_v15, %v1146_v21  ;;  %v4492_v11 = vld [vmem:[#allocation3 + $0x204] ss:$36 sps:$4 sm:$0xff]   ;;  %v1527_v12 = vld [vmem:[#allocation2 + $0x18] sm:$0xf]  ;;  %v1497_v54 = vld [vmem:[#allocation2 + $0x24] sm:$0xf] }
  0xc9   : > { %v4494_v14 = vld [vmem:[#allocation3 + $0x200] ss:$36 sps:$4 sm:$0xff]   ;;  %v1409_v17 = vsel %vm5045_vm13, %v3789_v47, %v1408_v58  ;;  %v1410_v18 = vrot.slane %v1408_v58, 4  ;;  %3120 = vmatprep.mubr.bf16.mxu1 %v4492_v11  ;;  %v1529_v28 = vld [vmem:[#allocation2 + $0x20] sm:$0x1]  ;;  %v1552_v37 = vshrl.u32 %v1527_v12, 16 }
  0xca   : > { %v1981_v62 = vld [vmem:[#allocation3 + $0x1f8] sm:$0xff]  ;;  %v1142_v19 = vrot.slane %v1141_v4, 4  ;;  %v1152_v2 = vrot.slane %v1151_v5, 4  ;;  %1478 = vst [vmem:[#allocation3 + $0x14] sm:$0xf] %v1409_v17  ;;  %v1555_v20 = vshll.u32 %v1527_v12, 16  ;;  %3121 = vmatmul.mubr.bf16.gmra.mxu1 %v4494_v14 }
  0xcb   : > { %v1986_v1 = vld [vmem:[#allocation3 + $0x21c] sm:$0xff]  ;;  %v1496_v7 = vld [vmem:[#allocation2 + $0x1c] sm:$0xf]  ;;  %v1412_v16 = vsel %vm5045_vm13, %v1410_v18, %v1411_v60  ;;  %v1554_v48 = vrot.slane %v1552_v37, 4  ;;  %v1571_v27 = vshll.u32 %v1529_v28, 16 }
  0xcc   : > { %v4490_v3 = vld [vmem:[#allocation3 + $0x1fc] ss:$36 sps:$4 sm:$0xff]   ;;  %v3868_v13 = vcombine.low %v1981_v62, %v1986_v1  ;;  %1512 = vst [vmem:[#allocation3 + $0x3c] sm:$0xf] %v1496_v7  ;;  %v1528_v22 = vld [vmem:[#allocation2 + $0x1c] sm:$0xf]  ;;  %v1147_v31 = vsel %vm5051_vm14, %v1142_v19, %v1146_v21  ;;  %v1157_v32 = vsel %vm5051_vm14, %v1152_v2, %v1156_v9 }
  0xcd   : > { %3023 = vmatprep.mubr.bf16.mxu0 %v4490_v3  ;;  %1479 = vst [vmem:[#allocation3 + $0x38] sm:$0xf] %v1412_v16  ;;  %v1561_v25 = vshll.u32 %v1528_v22, 16  ;;  %v1565_v26 = vshrl.u32 %v1528_v22, 16  ;;  %1342 = vst [vmem:[#allocation3 + $0x10] sm:$0xf] %v1147_v31 }
  0xce   : > { %3024 = vmatmul.mubr.bf16.gmra.mxu0 %v3868_v13  ;;  %1343 = vst [vmem:[#allocation3 + $0x34] sm:$0xf] %v1157_v32  ;;  %v1557_v34 = vrot.slane %v1555_v20, 5  ;;  %v1113_v29 = vld [vmem:[#allocation2 + $0x18] sm:$0xf]  ;;  %v1573_v39 = vrot.slane %v1571_v27, 5 }
  0xcf   : > { %v1563_v33 = vrot.slane %v1561_v25, 5  ;;  %v1567_v36 = vrot.slane %v1565_v26, 4  ;;  %v1114_v63 = vld [vmem:[#allocation2 + $0x1c] sm:$0xf]  ;;  %v1115_v44 = vld [vmem:[#allocation2 + $0x20] sm:$0x1] }
  0xd0   : > { %v1558_v38 = vor.u32 %v1557_v34, %v1554_v48  ;;  %v1159_v40 = vshrl.u32 %v1113_v29, 16  ;;  %v1162_v59 = vshll.u32 %v1113_v29, 16  ;;  %v1361_v41 = vld [vmem:[#allocation2 + $0x18] sm:$0xe]  ;;  %v1168_v23 = vshll.u32 %v1114_v63, 16  ;;  %v5234_v3 = vld [vmem:[%s5550_s1 + $0x230] sm:$0xff]  }
  0xd1   : > { %v1568_v50 = vor.u32 %v1567_v36, %v1563_v33  ;;  %v1172_v30 = vshrl.u32 %v1114_v63, 16  ;;  %v1178_v42 = vshll.u32 %v1115_v44, 16  ;;  %v1362_v43 = vld [vmem:[#allocation2 + $0x1c] sm:$0xf]  ;;  %v1363_v46 = vld [vmem:[#allocation2 + $0x20] sm:$0x1] }
  0xd2   : > { %v1559_v6 = vrot.slane %v1558_v38, 4  ;;  %v1161_v0 = vrot.slane %v1159_v40, 4  ;;  %v1164_v45 = vrot.slane %v1162_v59, 5  ;;  %v3790_v49 = vrot.slane %v1361_v41, 9  ;;  %v1498_v21 = vld [vmem:[#allocation2 + $0x28] sm:$0xf] }
  0xd3   : > { %v1569_v51 = vrot.slane %v1568_v50, 4  ;;  %v1170_v35 = vrot.slane %v1168_v23, 5  ;;  %v1174_v52 = vrot.slane %v1172_v30, 4  ;;  %v1180_v53 = vrot.slane %v1178_v42, 5  ;;  %1513 = vst [vmem:[#allocation3 + $0x60] sm:$0xf] %v1497_v54 }
  0xd4   : > { %v1564_v55 = vsel %vm5051_vm14, %v1559_v6, %v1563_v33  ;;  %v1165_v47 = vor.u32 %v1164_v45, %v1161_v0  ;;  %v1415_v56 = vrot.slane %v1362_v43, 5  ;;  %v1418_v57 = vrot.slane %v1363_v46, 5  ;;  %v1530_v15 = vld [vmem:[#allocation2 + $0x24] sm:$0xf]  ;;  %1514 = vst [vmem:[#allocation3 + $0x84] sm:$0xf] %v1498_v21 }
  0xd5   : > { %v4501_v58 = vld [vmem:[#allocation3 + $0x10] ss:$36 sps:$4 sm:$0xff]   ;;  %v1574_v60 = vsel %vm5051_vm14, %v1569_v51, %v1573_v39  ;;  %1759 = vst [vmem:[#allocation3 + $0x1c] sm:$0xf] %v1564_v55  ;;  %v1175_v61 = vor.u32 %v1174_v52, %v1170_v35  ;;  %v1576_v62 = vshrl.u32 %v1530_v15, 16  ;;  %v1579_v1 = vshll.u32 %v1530_v15, 16 }
  0xd6   : > { %v4503_v4 = vld [vmem:[#allocation3 + $0x14] ss:$36 sps:$4 sm:$0xff]   ;;  %1760 = vst [vmem:[#allocation3 + $0x40] sm:$0xf] %v1574_v60  ;;  %v1166_v5 = vrot.slane %v1165_v47, 4  ;;  %v1416_v9 = vsel %vm5045_vm13, %v3790_v49, %v1415_v56  ;;  %v1417_v11 = vrot.slane %v1415_v56, 4 }
  0xd7   : > { %v1531_v13 = vld [vmem:[#allocation2 + $0x28] sm:$0xf]  ;;  %v1176_v14 = vrot.slane %v1175_v61, 4  ;;  %1480 = vst [vmem:[#allocation3 + $0x5c] sm:$0xf] %v1416_v9  ;;  %v1578_v18 = vrot.slane %v1576_v62, 4  ;;  %3161 = vmatprep.mubr.bf16.mxu0 %v4503_v4 }
  0xd8   : > { %v1532_v17 = vld [vmem:[#allocation2 + $0x2c] sm:$0x1]  ;;  %v1581_v19 = vrot.slane %v1579_v1, 5  ;;  %v1585_v2 = vshll.u32 %v1531_v13, 16  ;;  %v1171_v7 = vsel %vm5051_vm14, %v1166_v5, %v1170_v35  ;;  %v1419_v12 = vsel %vm5045_vm13, %v1417_v11, %v1418_v57  ;;  %3162 = vmatmul.mubr.bf16.vlgmr.msra.gmra.mxu0 %v4501_v58  ;;  %v1116_v31 = vld [vmem:[#allocation2 + $0x24] sm:$0xf] }
  0xd9   : > { %v1589_v16 = vshrl.u32 %v1531_v13, 16  ;;  %v1595_v22 = vshll.u32 %v1532_v17, 16  ;;  %v1181_v28 = vsel %vm5051_vm14, %v1176_v14, %v1180_v53  ;;  %1344 = vst [vmem:[#allocation3 + $0x58] sm:$0xf] %v1171_v7  ;;  %1481 = vst [vmem:[#allocation3 + $0x80] sm:$0xf] %v1419_v12  ;;  %4308 = vmatpush3.bf16.msra.mxu0 %v5215_v8 }
  0xda   : > { %v1582_v37 = vor.u32 %v1581_v19, %v1578_v18  ;;  %v1587_v20 = vrot.slane %v1585_v2, 5  ;;  %v1117_v32 = vld [vmem:[#allocation2 + $0x28] sm:$0xf]  ;;  %1345 = vst [vmem:[#allocation3 + $0x7c] sm:$0xf] %v1181_v28  ;;  %v1183_v27 = vshrl.u32 %v1116_v31, 16  ;;  %4309 = vmatprep.subr.bf16.mxu0 %v5234_v3 }
  0xdb   : > { %v5247_v25 = vld [vmem:[%s5550_s1 + $0x228] sm:$0xff]   ;;  %v1591_v26 = vrot.slane %v1589_v16, 4  ;;  %v1597_v48 = vrot.slane %v1595_v22, 5  ;;  %v1186_v29 = vshll.u32 %v1116_v31, 16  ;;  %v1192_v36 = vshll.u32 %v1117_v32, 16  ;;  %v5257_v51 = vld [vmem:[%s5550_s1 + $0x220] sm:$0xff]  }
  0xdc   : > { %v1118_v34 = vld [vmem:[#allocation2 + $0x2c] sm:$0x1]  ;;  %v1583_v33 = vrot.slane %v1582_v37, 4  ;;  %v1196_v63 = vshrl.u32 %v1117_v32, 16  ;;  %v1364_v38 = vld [vmem:[#allocation2 + $0x24] sm:$0xe] }
  0xdd   : > { %v1202_v44 = vshll.u32 %v1118_v34, 16  ;;  %v1592_v39 = vor.u32 %v1591_v26, %v1587_v20  ;;  %v1185_v40 = vrot.slane %v1183_v27, 4  ;;  %v1188_v59 = vrot.slane %v1186_v29, 5  ;;  %v1365_v41 = vld [vmem:[#allocation2 + $0x28] sm:$0xf]  ;;  %4310 = vmatpush3.bf16.msra.mxu0 %v5234_v3  ;;  %v5275_v19 = vld [vmem:[%s5550_s1 + $0x218] sm:$0xff]  }
  0xde   : > { %v3791_v50 = vrot.slane %v1364_v38, 9  ;;  %v4504_v23 = vld [vmem:[#allocation3 + $0x18] ss:$36 sps:$4 sm:$0xff]   ;;  %v1588_v42 = vsel %vm5051_vm14, %v1583_v33, %v1587_v20  ;;  %v1194_v43 = vrot.slane %v1192_v36, 5  ;;  %v1198_v45 = vrot.slane %v1196_v63, 4  ;;  %4311 = vmatprep.subr.bf16.mxu0 %v5247_v25 }
  0xdf   : > { %v4506_v30 = vld [vmem:[#allocation3 + $0x1c] ss:$36 sps:$4 sm:$0xff]   ;;  %v1593_v6 = vrot.slane %v1592_v39, 4  ;;  %1761 = vst [vmem:[#allocation3 + $0x64] sm:$0xf] %v1588_v42  ;;  %v1189_v0 = vor.u32 %v1188_v59, %v1185_v40  ;;  %v1204_v46 = vrot.slane %v1202_v44, 5 }
  0xe0   : > { %v1366_v49 = vld [vmem:[#allocation2 + $0x2c] sm:$0x1]  ;;  %3258 = vmatprep.mubr.bf16.mxu1 %v4506_v30  ;;  %v1422_v35 = vrot.slane %v1365_v41, 5  ;;  %v1499_v53 = vld [vmem:[#allocation2 + $0x30] sm:$0xf]  ;;  %v1199_v57 = vor.u32 %v1198_v45, %v1194_v43 }
  0xe1   : > { %v1425_v52 = vrot.slane %v1366_v49, 5  ;;  %v1500_v54 = vld [vmem:[#allocation2 + $0x34] sm:$0xf]  ;;  %3259 = vmatmul.mubr.bf16.vlgmr.msra.gmra.mxu1 %v4504_v23  ;;  %v1598_v47 = vsel %vm5051_vm14, %v1593_v6, %v1597_v48  ;;  %v1190_v56 = vrot.slane %v1189_v0, 4  ;;  %1515 = vst [vmem:[#allocation3 + $0xa8] sm:$0xf] %v1499_v53  ;;  %4312 = vmatpush3.bf16.msra.mxu0 %v5247_v25 }
  0xe2   : > { %v1923_v55 = vld [vmem:[#allocation3 + $0x58] sm:$0xff]  ;;  %1516 = vst [vmem:[#allocation3 + $0xcc] sm:$0xf] %v1500_v54  ;;  %1762 = vst [vmem:[#allocation3 + $0x88] sm:$0xf] %v1598_v47  ;;  %v1423_v61 = vsel %vm5045_vm13, %v3791_v50, %v1422_v35  ;;  %v1424_v62 = vrot.slane %v1422_v35, 4  ;;  %4347 = vmatpush3.bf16.msra.mxu1 %v5215_v8  ;;  %4313 = vmatprep.subr.bf16.mxu0 %v5257_v51 }
  0xe3   : > { %v1533_v21 = vld [vmem:[#allocation2 + $0x30] sm:$0xf]  ;;  %v1534_v15 = vld [vmem:[#allocation2 + $0x34] sm:$0xf]  ;;  %v1535_v1 = vld [vmem:[#allocation2 + $0x38] sm:$0x1]  ;;  %v1195_v5 = vsel %vm5051_vm14, %v1190_v56, %v1194_v43  ;;  %4340 = vmatprep.subr.bf16.mxu1 %v5234_v3 }
  0xe4   : > { %v1928_v58 = vld [vmem:[#allocation3 + $0x7c] sm:$0xff]  ;;  %v1200_v9 = vrot.slane %v1199_v57, 4  ;;  %1482 = vst [vmem:[#allocation3 + $0xa4] sm:$0xf] %v1423_v61  ;;  %v1600_v11 = vshrl.u32 %v1533_v21, 16  ;;  %v1426_v13 = vsel %vm5045_vm13, %v1424_v62, %v1425_v52  ;;  %v1603_v14 = vshll.u32 %v1533_v21, 16 }
  0xe5   : > { %v4508_v60 = vld [vmem:[#allocation3 + $0x5c] ss:$36 sps:$4 sm:$0xff]   ;;  %v3818_v4 = vcombine.low %v1923_v55, %v1928_v58  ;;  %1346 = vst [vmem:[#allocation3 + $0xa0] sm:$0xf] %v1195_v5  ;;  %v1609_v17 = vshll.u32 %v1534_v15, 16  ;;  %v1613_v18 = vshrl.u32 %v1534_v15, 16  ;;  %4314 = vmatpush3.bf16.msra.mxu0 %v5257_v51 }
  0xe6   : > { %3169 = vmatprep.mubr.bf16.mxu0 %v4508_v60  ;;  %v1119_v8 = vld [vmem:[#allocation2 + $0x30] sm:$0xf]  ;;  %v1205_v2 = vsel %vm5051_vm14, %v1200_v9, %v1204_v46  ;;  %1483 = vst [vmem:[#allocation3 + $0xc8] sm:$0xf] %v1426_v13  ;;  %v1602_v7 = vrot.slane %v1600_v11, 4  ;;  %v1619_v12 = vshll.u32 %v1535_v1, 16  ;;  %4348 = vmatpush3.bf16.msra.mxu1 %v5234_v3 }
  0xe7   : > { %3170 = vmatmul.mubr.bf16.gmra.mxu0 %v3818_v4  ;;  %v1120_v16 = vld [vmem:[#allocation2 + $0x34] sm:$0xf]  ;;  %v1121_v22 = vld [vmem:[#allocation2 + $0x38] sm:$0x1]  ;;  %1347 = vst [vmem:[#allocation3 + $0xc4] sm:$0xf] %v1205_v2  ;;  %4341 = vmatprep.subr.bf16.mxu1 %v5247_v25 }
  0xe8   : > { %v1605_v28 = vrot.slane %v1603_v14, 5  ;;  %v1611_v37 = vrot.slane %v1609_v17, 5  ;;  %v1615_v20 = vrot.slane %v1613_v18, 4  ;;  %v1207_v31 = vshrl.u32 %v1119_v8, 16  ;;  %v1367_v27 = vld [vmem:[#allocation2 + $0x30] sm:$0xe]  ;;  %4315 = vmatprep.subr.bf16.mxu0 %v5275_v19 }
  0xe9   : > { %v1621_v32 = vrot.slane %v1619_v12, 5  ;;  %v1210_v26 = vshll.u32 %v1119_v8, 16  ;;  %v1216_v48 = vshll.u32 %v1120_v16, 16  ;;  %v1220_v34 = vshrl.u32 %v1120_v16, 16  ;;  %v5285_v29 = vld [vmem:[%s5550_s1 + $0x210] sm:$0xff]   ;;  %4316 = vmatpush3.bf16.msra.mxu0 %v5275_v19  ;;  %v5298_v47 = vld [vmem:[%s5550_s1 + $0x208] sm:$0xff]  }
  0xea   : > { %v1606_v33 = vor.u32 %v1605_v28, %v1602_v7  ;;  %v1616_v36 = vor.u32 %v1615_v20, %v1611_v37  ;;  %v1209_v63 = vrot.slane %v1207_v31, 4  ;;  %v1226_v44 = vshll.u32 %v1121_v22, 16  ;;  %v1368_v38 = vld [vmem:[#allocation2 + $0x34] sm:$0xf]  ;;  %v1369_v3 = vld [vmem:[#allocation2 + $0x38] sm:$0x1]  ;;  %4349 = vmatpush3.bf16.msra.mxu1 %v5247_v25  ;;  %4317 = vmatprep.subr.bf16.mxu0 %v5285_v29 }
  0xeb   : > { %v4510_v39 = vld [vmem:[#allocation3 + $0x64] ss:$36 sps:$4 sm:$0xff]   ;;  %v1212_v59 = vrot.slane %v1210_v26, 5  ;;  %v1218_v23 = vrot.slane %v1216_v48, 5  ;;  %v1222_v30 = vrot.slane %v1220_v34, 4  ;;  %v3792_v45 = vrot.slane %v1367_v27, 9  ;;  %4342 = vmatprep.subr.bf16.mxu1 %v5257_v51 }
  0xec   : > { %v4512_v40 = vld [vmem:[#allocation3 + $0x60] ss:$36 sps:$4 sm:$0xff]   ;;  %v1607_v41 = vrot.slane %v1606_v33, 4  ;;  %v1617_v50 = vrot.slane %v1616_v36, 4  ;;  %3266 = vmatprep.mubr.bf16.mxu1 %v4510_v39  ;;  %v1228_v0 = vrot.slane %v1226_v44, 5  ;;  %v1429_v46 = vrot.slane %v1368_v38, 5 }
  0xed   : > { %v1501_v42 = vld [vmem:[#allocation2 + $0x3c] sm:$0xf]  ;;  %v1213_v6 = vor.u32 %v1212_v59, %v1209_v63  ;;  %v1502_v49 = vld [vmem:[#allocation2 + $0x40] sm:$0xf]  ;;  %3267 = vmatmul.mubr.bf16.gmra.mxu1 %v4512_v40  ;;  %v1223_v53 = vor.u32 %v1222_v30, %v1218_v23  ;;  %v1432_v54 = vrot.slane %v1369_v3, 5  ;;  %4318 = vmatpush3.bf16.msra.mxu0 %v5285_v29 }
  0xee   : > { %v1933_v43 = vld [vmem:[#allocation3 + $0xa0] sm:$0xff]  ;;  %1517 = vst [vmem:[#allocation3 + $0xf0] sm:$0xf] %v1501_v42  ;;  %v1612_v35 = vsel %vm5051_vm14, %v1607_v41, %v1611_v37  ;;  %v1622_v52 = vsel %vm5051_vm14, %v1617_v50, %v1621_v32  ;;  %1518 = vst [vmem:[#allocation3 + $0x114] sm:$0xf] %v1502_v49  ;;  %v1430_v15 = vsel %vm5045_vm13, %v3792_v45, %v1429_v46  ;;  %v1431_v58 = vrot.slane %v1429_v46, 4 }
  0xef   : > { %v1536_v25 = vld [vmem:[#allocation2 + $0x3c] sm:$0xf]  ;;  %v1537_v55 = vld [vmem:[#allocation2 + $0x40] sm:$0xf]  ;;  %1763 = vst [vmem:[#allocation3 + $0xac] sm:$0xf] %v1612_v35  ;;  %4350 = vmatpush3.bf16.msra.mxu1 %v5257_v51  ;;  %4319 = vmatprep.subr.bf16.mxu0 %v5298_v47 }
  0xf0   : > { %v1938_v56 = vld [vmem:[#allocation3 + $0xc4] sm:$0xff]  ;;  %1764 = vst [vmem:[#allocation3 + $0xd0] sm:$0xf] %v1622_v52  ;;  %v1214_v21 = vrot.slane %v1213_v6, 4  ;;  %v1624_v60 = vshrl.u32 %v1536_v25, 16  ;;  %v1224_v62 = vrot.slane %v1223_v53, 4  ;;  %v1433_v11 = vsel %vm5045_vm13, %v1431_v58, %v1432_v54  ;;  %4343 = vmatprep.subr.bf16.mxu1 %v5275_v19 }
  0xf1   : > { %v4514_v57 = vld [vmem:[#allocation3 + $0xa4] ss:$36 sps:$4 sm:$0xff]   ;;  %v3827_v61 = vcombine.low %v1933_v43, %v1938_v56  ;;  %1484 = vst [vmem:[#allocation3 + $0xec] sm:$0xf] %v1430_v15  ;;  %v1538_v1 = vld [vmem:[#allocation2 + $0x44] sm:$0x1]  ;;  %4320 = vmatpush3.bf16.msra.mxu0 %v5298_v47 }
  0xf2   : > { %v1627_v4 = vshll.u32 %v1536_v25, 16  ;;  %v1633_v5 = vshll.u32 %v1537_v55, 16  ;;  %3177 = vmatprep.mubr.bf16.mxu0 %v4514_v57  ;;  %v1219_v9 = vsel %vm5051_vm14, %v1214_v21, %v1218_v23  ;;  %v1626_v13 = vrot.slane %v1624_v60, 4  ;;  %1485 = vst [vmem:[#allocation3 + $0x110] sm:$0xf] %v1433_v11  ;;  %v5315_v7 = vld [vmem:[%s5550_s1 + $0x200] sm:$0xff]  }
  0xf3   : > { %v1637_v14 = vshrl.u32 %v1537_v55, 16  ;;  %3178 = vmatmul.mubr.bf16.gmra.mxu0 %v3827_v61  ;;  %v1229_v17 = vsel %vm5051_vm14, %v1224_v62, %v1228_v0  ;;  %1348 = vst [vmem:[#allocation3 + $0xe8] sm:$0xf] %v1219_v9  ;;  %v1643_v51 = vshll.u32 %v1538_v1, 16  ;;  %v1122_v2 = vld [vmem:[#allocation2 + $0x3c] sm:$0xf]  ;;  %4351 = vmatpush3.bf16.msra.mxu1 %v5275_v19 }
  0xf4   : > { %v1629_v18 = vrot.slane %v1627_v4, 5  ;;  %v1635_v8 = vrot.slane %v1633_v5, 5  ;;  %1349 = vst [vmem:[#allocation3 + $0x10c] sm:$0xf] %v1229_v17  ;;  %v1123_v16 = vld [vmem:[#allocation2 + $0x40] sm:$0xf]  ;;  %4344 = vmatprep.subr.bf16.mxu1 %v5285_v29  ;;  %4321 = vmatprep.subr.bf16.mxu0 %v5315_v7 }
  0xf5   : > { %v1639_v12 = vrot.slane %v1637_v14, 4  ;;  %v1124_v22 = vld [vmem:[#allocation2 + $0x44] sm:$0x1]  ;;  %v1231_v28 = vshrl.u32 %v1122_v2, 16  ;;  %v1645_v20 = vrot.slane %v1643_v51, 5  ;;  %v1234_v31 = vshll.u32 %v1122_v2, 16  ;;  %4322 = vmatpush3.bf16.msra.mxu0 %v5315_v7 }
  0xf6   : > { %v1630_v37 = vor.u32 %v1629_v18, %v1626_v13  ;;  %v1240_v32 = vshll.u32 %v1123_v16, 16  ;;  %v1370_v26 = vld [vmem:[#allocation2 + $0x3c] sm:$0xe]  ;;  %v1244_v27 = vshrl.u32 %v1123_v16, 16  ;;  %v1250_v33 = vshll.u32 %v1124_v22, 16 }
  0xf7   : > { %v1640_v48 = vor.u32 %v1639_v12, %v1635_v8  ;;  %v1233_v34 = vrot.slane %v1231_v28, 4  ;;  %v1371_v36 = vld [vmem:[#allocation2 + $0x40] sm:$0xf]  ;;  %v4516_v63 = vld [vmem:[#allocation3 + $0xac] ss:$36 sps:$4 sm:$0xff]   ;;  %v1236_v38 = vrot.slane %v1234_v31, 5  ;;  %4352 = vmatpush3.bf16.msra.mxu1 %v5285_v29 }
  0xf8   : > { %v1631_v44 = vrot.slane %v1630_v37, 4  ;;  %v4518_v3 = vld [vmem:[#allocation3 + $0xa8] ss:$36 sps:$4 sm:$0xff]   ;;  %v1242_v40 = vrot.slane %v1240_v32, 5  ;;  %v1246_v59 = vrot.slane %v1244_v27, 4  ;;  %v1252_v41 = vrot.slane %v1250_v33, 5  ;;  %3274 = vmatprep.mubr.bf16.mxu1 %v4516_v63  ;;  %4345 = vmatprep.subr.bf16.mxu1 %v5298_v47 }
  0xf9   : > { %v1641_v39 = vrot.slane %v1640_v48, 4  ;;  %v1237_v50 = vor.u32 %v1236_v38, %v1233_v34  ;;  %v1372_v23 = vld [vmem:[#allocation2 + $0x44] sm:$0x1]  ;;  %v3793_v30 = vrot.slane %v1370_v26, 9  ;;  %v1436_v42 = vrot.slane %v1371_v36, 5  ;;  %3275 = vmatmul.mubr.bf16.gmra.mxu1 %v4518_v3 }
  0xfa   : > { %v1636_v19 = vsel %vm5051_vm14, %v1631_v44, %v1635_v8  ;;  %v1503_v43 = vld [vmem:[#allocation2 + $0x48] sm:$0xf]  ;;  %v1943_v6 = vld [vmem:[#allocation3 + $0xe8] sm:$0xff]  ;;  %v1247_v45 = vor.u32 %v1246_v59, %v1242_v40  ;;  %v1439_v46 = vrot.slane %v1372_v23, 5  ;;  %v1504_v49 = vld [vmem:[#allocation2 + $0x4c] sm:$0xf] }
  0xfb   : > { %v1646_v0 = vsel %vm5051_vm14, %v1641_v39, %v1645_v20  ;;  %1765 = vst [vmem:[#allocation3 + $0xf4] sm:$0xf] %v1636_v19  ;;  %1519 = vst [vmem:[#allocation3 + $0x138] sm:$0xf] %v1503_v43  ;;  %v1539_v35 = vld [vmem:[#allocation2 + $0x48] sm:$0xf]  ;;  %v1437_v29 = vsel %vm5045_vm13, %v3793_v30, %v1436_v42  ;;  %4353 = vmatpush3.bf16.msra.mxu1 %v5298_v47 }
  0xfc   : > { %v1948_v52 = vld [vmem:[#allocation3 + $0x10c] sm:$0xff]  ;;  %1766 = vst [vmem:[#allocation3 + $0x118] sm:$0xf] %v1646_v0  ;;  %v1238_v54 = vrot.slane %v1237_v50, 4  ;;  %v1438_v25 = vrot.slane %v1436_v42, 4  ;;  %v1648_v55 = vshrl.u32 %v1539_v35, 16  ;;  %4346 = vmatprep.subr.bf16.mxu1 %v5315_v7 }
  0xfd   : > { %v4520_v53 = vld [vmem:[#allocation3 + $0xec] ss:$36 sps:$4 sm:$0xff]   ;;  %1520 = vst [vmem:[#allocation3 + $0x15c] sm:$0xf] %v1504_v49  ;;  %v3836_v56 = vcombine.low %v1943_v6, %v1948_v52  ;;  %v1248_v57 = vrot.slane %v1247_v45, 4  ;;  %v1651_v58 = vshll.u32 %v1539_v35, 16 }
  0xfe   : > { %1486 = vst [vmem:[#allocation3 + $0x134] sm:$0xf] %v1437_v29  ;;  %v1540_v21 = vld [vmem:[#allocation2 + $0x4c] sm:$0xf]  ;;  %v1541_v15 = vld [vmem:[#allocation2 + $0x50] sm:$0x1]  ;;  %3185 = vmatprep.mubr.bf16.mxu0 %v4520_v53  ;;  %v1243_v60 = vsel %vm5051_vm14, %v1238_v54, %v1242_v40  ;;  %v1440_v61 = vsel %vm5045_vm13, %v1438_v25, %v1439_v46 }
  0xff   : > { %v1650_v62 = vrot.slane %v1648_v55, 4  ;;  %v1657_v1 = vshll.u32 %v1540_v21, 16  ;;  %3186 = vmatmul.mubr.bf16.gmra.mxu0 %v3836_v56  ;;  %v1253_v4 = vsel %vm5051_vm14, %v1248_v57, %v1252_v41  ;;  %1350 = vst [vmem:[#allocation3 + $0x130] sm:$0xf] %v1243_v60  ;;  %1487 = vst [vmem:[#allocation3 + $0x158] sm:$0xf] %v1440_v61  ;;  %4354 = vmatpush3.bf16.msra.mxu1 %v5315_v7 }
 0x100   : > { %v1653_v5 = vrot.slane %v1651_v58, 5  ;;  %v1661_v9 = vshrl.u32 %v1540_v21, 16  ;;  %v1667_v11 = vshll.u32 %v1541_v15, 16  ;;  %v1125_v13 = vld [vmem:[#allocation2 + $0x48] sm:$0xf] }
 0x101   : > { %1351 = vst [vmem:[#allocation3 + $0x154] sm:$0xf] %v1253_v4  ;;  %v1659_v14 = vrot.slane %v1657_v1, 5  ;;  %v1126_v17 = vld [vmem:[#allocation2 + $0x4c] sm:$0xf]  ;;  %v1255_v8 = vshrl.u32 %v1125_v13, 16 }
 0x102   : > { %v1127_v18 = vld [vmem:[#allocation2 + $0x50] sm:$0x1]  ;;  %v1654_v51 = vor.u32 %v1653_v5, %v1650_v62  ;;  %v1663_v2 = vrot.slane %v1661_v9, 4  ;;  %v1669_v47 = vrot.slane %v1667_v11, 5  ;;  %v1258_v12 = vshll.u32 %v1125_v13, 16 }
 0x103   : > { %v1373_v16 = vld [vmem:[#allocation2 + $0x48] sm:$0xe]  ;;  %v1257_v22 = vrot.slane %v1255_v8, 4  ;;  %v1264_v28 = vshll.u32 %v1126_v17, 16  ;;  %v1268_v37 = vshrl.u32 %v1126_v17, 16  ;;  %v1274_v20 = vshll.u32 %v1127_v18, 16 }
 0x104   : > { %v4522_v31 = vld [vmem:[#allocation3 + $0xf4] ss:$36 sps:$4 sm:$0xff]   ;;  %v1655_v26 = vrot.slane %v1654_v51, 4  ;;  %v1664_v48 = vor.u32 %v1663_v2, %v1659_v14  ;;  %v1260_v34 = vrot.slane %v1258_v12, 5  ;;  %v3794_v39 = vrot.slane %v1373_v16, 9 }
 0x105   : > { %v4524_v32 = vld [vmem:[#allocation3 + $0xf0] ss:$36 sps:$4 sm:$0xff]   ;;  %v1266_v27 = vrot.slane %v1264_v28, 5  ;;  %v1270_v33 = vrot.slane %v1268_v37, 4  ;;  %v1276_v36 = vrot.slane %v1274_v20, 5  ;;  %3282 = vmatprep.mubr.bf16.mxu1 %v4522_v31 }
 0x106   : > { %v1374_v63 = vld [vmem:[#allocation2 + $0x4c] sm:$0xf]  ;;  %v1660_v44 = vsel %vm5051_vm14, %v1655_v26, %v1659_v14  ;;  %v1665_v38 = vrot.slane %v1664_v48, 4  ;;  %v1375_v3 = vld [vmem:[#allocation2 + $0x50] sm:$0x1]  ;;  %3283 = vmatmul.mubr.bf16.gmra.mxu1 %v4524_v32  ;;  %v1261_v7 = vor.u32 %v1260_v34, %v1257_v22 }
 0x107   : > { %v1443_v40 = vrot.slane %v1374_v63, 5  ;;  %v1953_v59 = vld [vmem:[#allocation3 + $0x130] sm:$0xff]  ;;  %1767 = vst [vmem:[#allocation3 + $0x13c] sm:$0xf] %v1660_v44  ;;  %v1271_v41 = vor.u32 %v1270_v33, %v1266_v27  ;;  %v1446_v19 = vrot.slane %v1375_v3, 5 }
 0x108   : > { %v1505_v50 = vld [vmem:[#allocation2 + $0x54] sm:$0xf]  ;;  %v1506_v23 = vld [vmem:[#allocation2 + $0x58] sm:$0xf]  ;;  %v1958_v30 = vld [vmem:[#allocation3 + $0x154] sm:$0xff]  ;;  %v1670_v43 = vsel %vm5051_vm14, %v1665_v38, %v1669_v47  ;;  %v1262_v49 = vrot.slane %v1261_v7, 4 }
 0x109   : > { %v4526_v42 = vld [vmem:[#allocation3 + $0x134] ss:$36 sps:$4 sm:$0xff]   ;;  %v1444_v6 = vsel %vm5045_vm13, %v3794_v39, %v1443_v40  ;;  %v1445_v0 = vrot.slane %v1443_v40, 4  ;;  %1521 = vst [vmem:[#allocation3 + $0x180] sm:$0xf] %v1505_v50  ;;  %v3845_v46 = vcombine.low %v1953_v59, %v1958_v30  ;;  %v1272_v35 = vrot.slane %v1271_v41, 4 }
 0x10a   : > { %1522 = vst [vmem:[#allocation3 + $0x1a4] sm:$0xf] %v1506_v23  ;;  %v1542_v45 = vld [vmem:[#allocation2 + $0x54] sm:$0xf]  ;;  %1768 = vst [vmem:[#allocation3 + $0x160] sm:$0xf] %v1670_v43  ;;  %3193 = vmatprep.mubr.bf16.mxu0 %v4526_v42  ;;  %v1267_v56 = vsel %vm5051_vm14, %v1262_v49, %v1266_v27 }
 0x10b   : > { %1488 = vst [vmem:[#allocation3 + $0x17c] sm:$0xf] %v1444_v6  ;;  %v1543_v52 = vld [vmem:[#allocation2 + $0x58] sm:$0xf]  ;;  %v1544_v53 = vld [vmem:[#allocation2 + $0x5c] sm:$0x1]  ;;  %v1447_v54 = vsel %vm5045_vm13, %v1445_v0, %v1446_v19  ;;  %3194 = vmatmul.mubr.bf16.gmra.mxu0 %v3845_v46  ;;  %v1277_v57 = vsel %vm5051_vm14, %v1272_v35, %v1276_v36 }
 0x10c   : > { %v1672_v29 = vshrl.u32 %v1542_v45, 16  ;;  %v1675_v25 = vshll.u32 %v1542_v45, 16  ;;  %v1681_v55 = vshll.u32 %v1543_v52, 16  ;;  %1489 = vst [vmem:[#allocation3 + $0x1a0] sm:$0xf] %v1447_v54  ;;  %v1685_v21 = vshrl.u32 %v1543_v52, 16 }
 0x10d   : > { %v1691_v15 = vshll.u32 %v1544_v53, 16  ;;  %v1128_v58 = vld [vmem:[#allocation2 + $0x54] sm:$0xf]  ;;  %1352 = vst [vmem:[#allocation3 + $0x178] sm:$0xf] %v1267_v56 }
 0x10e   : > { %1353 = vst [vmem:[#allocation3 + $0x19c] sm:$0xf] %v1277_v57  ;;  %v1674_v60 = vrot.slane %v1672_v29, 4  ;;  %v1677_v61 = vrot.slane %v1675_v25, 5  ;;  %v1683_v62 = vrot.slane %v1681_v55, 5  ;;  %v1279_v4 = vshrl.u32 %v1128_v58, 16 }
 0x10f   : > { %v1129_v1 = vld [vmem:[#allocation2 + $0x58] sm:$0xf]  ;;  %v1687_v5 = vrot.slane %v1685_v21, 4  ;;  %v1693_v9 = vrot.slane %v1691_v15, 5  ;;  %v1130_v11 = vld [vmem:[#allocation2 + $0x5c] sm:$0x1] }
 0x110   : > { %v1282_v13 = vshll.u32 %v1128_v58, 16  ;;  %v1288_v14 = vshll.u32 %v1129_v1, 16  ;;  %v1678_v17 = vor.u32 %v1677_v61, %v1674_v60  ;;  %v1281_v18 = vrot.slane %v1279_v4, 4  ;;  %v1376_v2 = vld [vmem:[#allocation2 + $0x54] sm:$0xe] }
 0x111   : > { %v1292_v8 = vshrl.u32 %v1129_v1, 16  ;;  %v1298_v51 = vshll.u32 %v1130_v11, 16  ;;  %v1688_v47 = vor.u32 %v1687_v5, %v1683_v62  ;;  %v1377_v22 = vld [vmem:[#allocation2 + $0x58] sm:$0xf]  ;;  %v1378_v28 = vld [vmem:[#allocation2 + $0x5c] sm:$0x1] }
 0x112   : > { %v1284_v12 = vrot.slane %v1282_v13, 5  ;;  %v1290_v16 = vrot.slane %v1288_v14, 5  ;;  %v4528_v37 = vld [vmem:[#allocation3 + $0x13c] ss:$36 sps:$4 sm:$0xff]   ;;  %v1679_v31 = vrot.slane %v1678_v17, 4  ;;  %v3795_v33 = vrot.slane %v1376_v2, 9 }
 0x113   : > { %v4530_v20 = vld [vmem:[#allocation3 + $0x138] ss:$36 sps:$4 sm:$0xff]   ;;  %v1689_v32 = vrot.slane %v1688_v47, 4  ;;  %v1294_v48 = vrot.slane %v1292_v8, 4  ;;  %v1507_v34 = vld [vmem:[#allocation2 + $0x60] sm:$0xf]  ;;  %3290 = vmatprep.mubr.bf16.mxu1 %v4528_v37 }
 0x114   : > { %v1285_v26 = vor.u32 %v1284_v12, %v1281_v18  ;;  %v1684_v27 = vsel %vm5051_vm14, %v1679_v31, %v1683_v62  ;;  %v1450_v36 = vrot.slane %v1377_v22, 5  ;;  %v1453_v63 = vrot.slane %v1378_v28, 5  ;;  %v1508_v44 = vld [vmem:[#allocation2 + $0x64] sm:$0xf]  ;;  %1523 = vst [vmem:[#allocation3 + $0x1c8] sm:$0xf] %v1507_v34  ;;  %3291 = vmatmul.mubr.bf16.gmra.mxu1 %v4530_v20 }
 0x115   : > { %v1963_v38 = vld [vmem:[#allocation3 + $0x178] sm:$0xff]  ;;  %v1694_v40 = vsel %vm5051_vm14, %v1689_v32, %v1693_v9  ;;  %1769 = vst [vmem:[#allocation3 + $0x184] sm:$0xf] %v1684_v27  ;;  %v1295_v7 = vor.u32 %v1294_v48, %v1290_v16  ;;  %v1300_v41 = vrot.slane %v1298_v51, 5  ;;  %1524 = vst [vmem:[#allocation3 + $0x1ec] sm:$0xf] %v1508_v44 }
 0x116   : > { %v1968_v3 = vld [vmem:[#allocation3 + $0x19c] sm:$0xff]  ;;  %v1286_v59 = vrot.slane %v1285_v26, 4  ;;  %1770 = vst [vmem:[#allocation3 + $0x1a8] sm:$0xf] %v1694_v40  ;;  %v1451_v50 = vsel %vm5045_vm13, %v3795_v33, %v1450_v36  ;;  %v1452_v23 = vrot.slane %v1450_v36, 4 }
 0x117   : > { %v4532_v39 = vld [vmem:[#allocation3 + $0x17c] ss:$36 sps:$4 sm:$0xff]   ;;  %v3854_v19 = vcombine.low %v1963_v38, %v1968_v3  ;;  %v1545_v30 = vld [vmem:[#allocation2 + $0x60] sm:$0xf]  ;;  %v1546_v42 = vld [vmem:[#allocation2 + $0x64] sm:$0xf] }
 0x118   : > { %3201 = vmatprep.mubr.bf16.mxu0 %v4532_v39  ;;  %v1291_v43 = vsel %vm5051_vm14, %v1286_v59, %v1290_v16  ;;  %v1296_v6 = vrot.slane %v1295_v7, 4  ;;  %1490 = vst [vmem:[#allocation3 + $0x1c4] sm:$0xf] %v1451_v50  ;;  %v1547_v0 = vld [vmem:[#allocation2 + $0x68] sm:$0x1]  ;;  %v1696_v45 = vshrl.u32 %v1545_v30, 16  ;;  %v1454_v49 = vsel %vm5045_vm13, %v1452_v23, %v1453_v63 }
 0x119   : > { %v1699_v46 = vshll.u32 %v1545_v30, 16  ;;  %3202 = vmatmul.mubr.bf16.gmra.mxu0 %v3854_v19  ;;  %1354 = vst [vmem:[#allocation3 + $0x1c0] sm:$0xf] %v1291_v43  ;;  %v1705_v35 = vshll.u32 %v1546_v42, 16  ;;  %v1709_v52 = vshrl.u32 %v1546_v42, 16  ;;  %v1715_v53 = vshll.u32 %v1547_v0, 16 }
 0x11a   : > { %v1301_v54 = vsel %vm5051_vm14, %v1296_v6, %v1300_v41  ;;  %1491 = vst [vmem:[#allocation3 + $0x1e8] sm:$0xf] %v1454_v49  ;;  %v1698_v29 = vrot.slane %v1696_v45, 4  ;;  %v1131_v55 = vld [vmem:[#allocation2 + $0x60] sm:$0xf] }
 0x11b   : > { %v1701_v25 = vrot.slane %v1699_v46, 5  ;;  %1355 = vst [vmem:[#allocation3 + $0x1e4] sm:$0xf] %v1301_v54  ;;  %v1707_v56 = vrot.slane %v1705_v35, 5  ;;  %v1711_v57 = vrot.slane %v1709_v52, 4  ;;  %v1303_v15 = vshrl.u32 %v1131_v55, 16 }
 0x11c   : > { %v1132_v21 = vld [vmem:[#allocation2 + $0x64] sm:$0xf]  ;;  %v1133_v60 = vld [vmem:[#allocation2 + $0x68] sm:$0x1]  ;;  %v1306_v61 = vshll.u32 %v1131_v55, 16  ;;  %v1717_v5 = vrot.slane %v1715_v53, 5 }
 0x11d   : > { %v1702_v58 = vor.u32 %v1701_v25, %v1698_v29  ;;  %v1312_v62 = vshll.u32 %v1132_v21, 16  ;;  %v1316_v1 = vshrl.u32 %v1132_v21, 16  ;;  %v1712_v4 = vor.u32 %v1711_v57, %v1707_v56  ;;  %v1379_v13 = vld [vmem:[#allocation2 + $0x60] sm:$0xe]  ;;  %v4536_v17 = vld [vmem:[#allocation3 + $0x180] ss:$36 sps:$4 sm:$0xff]  }
 0x11e   : > { %v1305_v9 = vrot.slane %v1303_v15, 4  ;;  %v1322_v11 = vshll.u32 %v1133_v60, 16  ;;  %v4534_v14 = vld [vmem:[#allocation3 + $0x184] ss:$36 sps:$4 sm:$0xff]   ;;  %v1308_v51 = vrot.slane %v1306_v61, 5  ;;  %v3796_v20 = vrot.slane %v1379_v13, 9 }
 0x11f   : > { %v1703_v18 = vrot.slane %v1702_v58, 4  ;;  %v1713_v8 = vrot.slane %v1712_v4, 4  ;;  %v1314_v2 = vrot.slane %v1312_v62, 5  ;;  %v1318_v47 = vrot.slane %v1316_v1, 4  ;;  %v1380_v12 = vld [vmem:[#allocation2 + $0x64] sm:$0xf]  ;;  %3298 = vmatprep.mubr.bf16.mxu1 %v4534_v14 }
 0x120   : > { %v1973_v16 = vld [vmem:[#allocation3 + $0x1c0] sm:$0xff]  ;;  %v1324_v28 = vrot.slane %v1322_v11, 5  ;;  %v1381_v37 = vld [vmem:[#allocation2 + $0x68] sm:$0x1]  ;;  %v1457_v31 = vrot.slane %v1380_v12, 5  ;;  %3299 = vmatmul.mubr.bf16.gmra.mxu1 %v4536_v17  ;;  %v1309_v26 = vor.u32 %v1308_v51, %v1305_v9 }
 0x121   : > { %v1708_v22 = vsel %vm5051_vm14, %v1703_v18, %v1707_v56  ;;  %v1718_v32 = vsel %vm5051_vm14, %v1713_v8, %v1717_v5  ;;  %v1319_v48 = vor.u32 %v1318_v47, %v1314_v2  ;;  %v1460_v34 = vrot.slane %v1381_v37, 5  ;;  %v1509_v27 = vld [vmem:[#allocation2 + $0x6c] sm:$0xf]  ;;  %v1510_v33 = vld [vmem:[#allocation2 + $0x70] sm:$0xf] }
 0x122   : > { %1771 = vst [vmem:[#allocation3 + $0x1cc] sm:$0xf] %v1708_v22  ;;  %v1978_v36 = vld [vmem:[#allocation3 + $0x1e4] sm:$0xff]  ;;  %1772 = vst [vmem:[#allocation3 + $0x1f0] sm:$0xf] %v1718_v32  ;;  %v1458_v44 = vsel %vm5045_vm13, %v3796_v20, %v1457_v31  ;;  %v1459_v38 = vrot.slane %v1457_v31, 4 }
 0x123   : > { %v4538_v63 = vld [vmem:[#allocation3 + $0x1c4] ss:$36 sps:$4 sm:$0xff]   ;;  %1525 = vst [vmem:[#allocation3 + $0x210] sm:$0xf] %v1509_v27  ;;  %1526 = vst [vmem:[#allocation3 + $0x234] sm:$0xf] %v1510_v33  ;;  %v3863_v39 = vcombine.low %v1973_v16, %v1978_v36 }
 0x124   : > { %v1548_v3 = vld [vmem:[#allocation2 + $0x6c] sm:$0xf]  ;;  %v1310_v40 = vrot.slane %v1309_v26, 4  ;;  %v1320_v59 = vrot.slane %v1319_v48, 4  ;;  %1492 = vst [vmem:[#allocation3 + $0x20c] sm:$0xf] %v1458_v44  ;;  %3209 = vmatprep.mubr.bf16.mxu0 %v4538_v63  ;;  %v1461_v19 = vsel %vm5045_vm13, %v1459_v38, %v1460_v34 }
 0x125   : > { %v1549_v7 = vld [vmem:[#allocation2 + $0x70] sm:$0xf]  ;;  %v1550_v41 = vld [vmem:[#allocation2 + $0x74] sm:$0x1]  ;;  %v1720_v50 = vshrl.u32 %v1548_v3, 16  ;;  %v1723_v23 = vshll.u32 %v1548_v3, 16  ;;  %3210 = vmatmul.mubr.bf16.gmra.mxu0 %v3863_v39 }
 0x126   : > { %v1729_v30 = vshll.u32 %v1549_v7, 16  ;;  %v1315_v42 = vsel %vm5051_vm14, %v1310_v40, %v1314_v2  ;;  %v1325_v43 = vsel %vm5051_vm14, %v1320_v59, %v1324_v28  ;;  %1493 = vst [vmem:[#allocation3 + $0x230] sm:$0xf] %v1461_v19  ;;  %v1733_v6 = vshrl.u32 %v1549_v7, 16  ;;  %v1775_v45 = vld [vmem:[#allocation2 + $0x18] sm:$0xe] }
 0x127   : > { %v1739_v0 = vshll.u32 %v1550_v41, 16  ;;  %1356 = vst [vmem:[#allocation3 + $0x208] sm:$0xf] %v1315_v42  ;;  %1357 = vst [vmem:[#allocation3 + $0x22c] sm:$0xf] %v1325_v43  ;;  %v1722_v46 = vrot.slane %v1720_v50, 4 }
 0x128   : > { %v1725_v49 = vrot.slane %v1723_v23, 5  ;;  %v1731_v35 = vrot.slane %v1729_v30, 5  ;;  %v1776_v52 = vld [vmem:[#allocation2 + $0x1c] sm:$0xf]  ;;  %v3797_v53 = vrot.slane %v1775_v45, 9  ;;  %v1735_v54 = vrot.slane %v1733_v6, 4 }
 0x129   : > { %v1741_v29 = vrot.slane %v1739_v0, 5  ;;  %v1777_v25 = vld [vmem:[#allocation2 + $0x20] sm:$0x1]  ;;  %v1825_v55 = vrot.slane %v1776_v52, 5  ;;  %v1787_v21 = vld [vmem:[#allocation2 + $0x48] sm:$0xe] }
 0x12a   : > { %v1726_v56 = vor.u32 %v1725_v49, %v1722_v46  ;;  %v1828_v57 = vrot.slane %v1777_v25, 5  ;;  %v1788_v15 = vld [vmem:[#allocation2 + $0x4c] sm:$0xf]  ;;  %v4540_v58 = vld [vmem:[#allocation3 + $0x1cc] ss:$36 sps:$4 sm:$0xff]   ;;  %v1736_v61 = vor.u32 %v1735_v54, %v1731_v35  ;;  %v3801_v9 = vrot.slane %v1787_v21, 9 }
 0x12b   : > { %v4542_v60 = vld [vmem:[#allocation3 + $0x1c8] ss:$36 sps:$4 sm:$0xff]   ;;  %v1826_v62 = vsel %vm5045_vm13, %v3797_v53, %v1825_v55  ;;  %v1827_v1 = vrot.slane %v1825_v55, 4  ;;  %v1789_v5 = vld [vmem:[#allocation2 + $0x50] sm:$0x1]  ;;  %v1853_v11 = vrot.slane %v1788_v15, 5  ;;  %3306 = vmatprep.mubr.bf16.mxu1 %v4540_v58 }
 0x12c   : > { %v1727_v4 = vrot.slane %v1726_v56, 4  ;;  %1895 = vst [vmem:[#allocation3 + $0x20] sm:$0xf] %v1826_v62  ;;  %v1737_v13 = vrot.slane %v1736_v61, 4  ;;  %v1856_v17 = vrot.slane %v1789_v5, 5  ;;  %3307 = vmatmul.mubr.bf16.gmra.mxu1 %v4542_v60 }
 0x12d   : > { %v1829_v14 = vsel %vm5045_vm13, %v1827_v1, %v1828_v57  ;;  %v1778_v18 = vld [vmem:[#allocation2 + $0x24] sm:$0xe]  ;;  %v1779_v8 = vld [vmem:[#allocation2 + $0x28] sm:$0xf]  ;;  %v1854_v2 = vsel %vm5045_vm13, %v3801_v9, %v1853_v11  ;;  %v1855_v47 = vrot.slane %v1853_v11, 4 }
 0x12e   : > { %v1732_v51 = vsel %vm5051_vm14, %v1727_v4, %v1731_v35  ;;  %1896 = vst [vmem:[#allocation3 + $0x44] sm:$0xf] %v1829_v14  ;;  %v1780_v12 = vld [vmem:[#allocation2 + $0x2c] sm:$0x1]  ;;  %v3798_v16 = vrot.slane %v1778_v18, 9  ;;  %v1983_v28 = vld [vmem:[#allocation3 + $0x208] sm:$0xff]  ;;  %v1742_v31 = vsel %vm5051_vm14, %v1737_v13, %v1741_v29 }
 0x12f   : > { %v1790_v22 = vld [vmem:[#allocation2 + $0x54] sm:$0xe]  ;;  %v1988_v37 = vld [vmem:[#allocation3 + $0x22c] sm:$0xff]  ;;  %1773 = vst [vmem:[#allocation3 + $0x214] sm:$0xf] %v1732_v51  ;;  %v1832_v32 = vrot.slane %v1779_v8, 5  ;;  %v1857_v34 = vsel %vm5045_vm13, %v1855_v47, %v1856_v17 }
 0x130   : > { %v4544_v20 = vld [vmem:[#allocation3 + $0x20c] ss:$36 sps:$4 sm:$0xff]   ;;  %1903 = vst [vmem:[#allocation3 + $0x140] sm:$0xf] %v1854_v2  ;;  %v1835_v26 = vrot.slane %v1780_v12, 5  ;;  %v3872_v48 = vcombine.low %v1983_v28, %v1988_v37  ;;  %v3802_v36 = vrot.slane %v1790_v22, 9 }
 0x131   : > { %1774 = vst [vmem:[#allocation3 + $0x238] sm:$0xf] %v1742_v31  ;;  %v1791_v27 = vld [vmem:[#allocation2 + $0x58] sm:$0xf]  ;;  %v1792_v33 = vld [vmem:[#allocation2 + $0x5c] sm:$0x1]  ;;  %3217 = vmatprep.mubr.bf16.mxu0 %v4544_v20  ;;  %v1833_v63 = vsel %vm5045_vm13, %v3798_v16, %v1832_v32 }
 0x132   : > { %1904 = vst [vmem:[#allocation3 + $0x164] sm:$0xf] %v1857_v34  ;;  %v1834_v44 = vrot.slane %v1832_v32, 4  ;;  %v1860_v24 = vrot.slane %v1791_v27, 5  ;;  %v1863_v38 = vrot.slane %v1792_v33, 5  ;;  %3218 = vmatmul.mubr.bf16.gmra.mxu0 %v3872_v48 }
 0x133   : > { %v1781_v3 = vld [vmem:[#allocation2 + $0x30] sm:$0xe]  ;;  %1897 = vst [vmem:[#allocation3 + $0x68] sm:$0xf] %v1833_v63  ;;  %v1782_v39 = vld [vmem:[#allocation2 + $0x34] sm:$0xf] }
 0x134   : > { %v1783_v40 = vld [vmem:[#allocation2 + $0x38] sm:$0x1]  ;;  %v3799_v59 = vrot.slane %v1781_v3, 9  ;;  %v1836_v7 = vsel %vm5045_vm13, %v1834_v44, %v1835_v26  ;;  %v1861_v41 = vsel %vm5045_vm13, %v3802_v36, %v1860_v24  ;;  %v1862_v19 = vrot.slane %v1860_v24, 4  ;;  %v1793_v23 = vld [vmem:[#allocation2 + $0x60] sm:$0xe] }
 0x135   : > { %v1839_v50 = vrot.slane %v1782_v39, 5  ;;  %1898 = vst [vmem:[#allocation3 + $0x8c] sm:$0xf] %v1836_v7  ;;  %1905 = vst [vmem:[#allocation3 + $0x188] sm:$0xf] %v1861_v41  ;;  %v1842_v30 = vrot.slane %v1783_v40, 5 }
 0x136   : > { %v1794_v42 = vld [vmem:[#allocation2 + $0x64] sm:$0xf]  ;;  %v1795_v43 = vld [vmem:[#allocation2 + $0x68] sm:$0x1]  ;;  %v3803_v6 = vrot.slane %v1793_v23, 9  ;;  %v1864_v45 = vsel %vm5045_vm13, %v1862_v19, %v1863_v38 }
 0x137   : > { %v4550_v0 = vld [vmem:[#allocation3 + $0x20] ss:$36 sps:$4 sm:$0xff]   ;;  %v1840_v46 = vsel %vm5045_vm13, %v3799_v59, %v1839_v50  ;;  %v1841_v49 = vrot.slane %v1839_v50, 4  ;;  %v1867_v35 = vrot.slane %v1794_v42, 5  ;;  %1906 = vst [vmem:[#allocation3 + $0x1ac] sm:$0xf] %v1864_v45 }
 0x138   : > { %1899 = vst [vmem:[#allocation3 + $0xb0] sm:$0xf] %v1840_v46  ;;  %v1870_v52 = vrot.slane %v1795_v43, 5  ;;  %v1784_v53 = vld [vmem:[#allocation2 + $0x3c] sm:$0xe]  ;;  %4323 = vmatprep.mubr.bf16.mxu0 %v4550_v0 }
 0x139   : > { %v4546_v54 = vld [vmem:[#allocation3 + $0x214] ss:$36 sps:$4 sm:$0xff]   ;;  %v1843_v25 = vsel %vm5045_vm13, %v1841_v49, %v1842_v30  ;;  %v1868_v55 = vsel %vm5045_vm13, %v3803_v6, %v1867_v35  ;;  %v1869_v56 = vrot.slane %v1867_v35, 4  ;;  %v4551_v57 = vld [vmem:[#allocation3 + $0x140] ss:$36 sps:$4 sm:$0xff]   ;;  %v3800_v60 = vrot.slane %v1784_v53, 9 }
 0x13a   : > { %v4548_v29 = vld [vmem:[#allocation3 + $0x210] ss:$36 sps:$4 sm:$0xff]   ;;  %1900 = vst [vmem:[#allocation3 + $0xd4] sm:$0xf] %v1843_v25  ;;  %1907 = vst [vmem:[#allocation3 + $0x1d0] sm:$0xf] %v1868_v55  ;;  %3314 = vmatprep.mubr.bf16.mxu1 %v4546_v54 }
 0x13b   : > { %v1785_v21 = vld [vmem:[#allocation2 + $0x40] sm:$0xf]  ;;  %v1871_v15 = vsel %vm5045_vm13, %v1869_v56, %v1870_v52  ;;  %v1786_v58 = vld [vmem:[#allocation2 + $0x44] sm:$0x1]  ;;  %3315 = vmatmul.mubr.bf16.gmra.mxu1 %v4548_v29  ;;  %v1796_v1 = vld [vmem:[#allocation2 + $0x6c] sm:$0xe] }
 0x13c   : > { %v1846_v61 = vrot.slane %v1785_v21, 5  ;;  %1908 = vst [vmem:[#allocation3 + $0x1f4] sm:$0xf] %v1871_v15  ;;  %v1849_v62 = vrot.slane %v1786_v58, 5  ;;  %v1797_v4 = vld [vmem:[#allocation2 + $0x70] sm:$0xf]  ;;  %4331 = vmatprep.mubr.bf16.mxu1 %v4551_v57 }
 0x13d   : > { %v4552_v5 = vld [vmem:[#allocation3 + $0x68] ss:$36 sps:$4 sm:$0xff]   ;;  %v1798_v13 = vld [vmem:[#allocation2 + $0x74] sm:$0x1]  ;;  %v3804_v14 = vrot.slane %v1796_v1, 9  ;;  %v1874_v17 = vrot.slane %v1797_v4, 5 }
 0x13e   : > { %v1847_v9 = vsel %vm5045_vm13, %v3800_v60, %v1846_v61  ;;  %v1848_v11 = vrot.slane %v1846_v61, 4  ;;  %4324 = vmatmul.mubr.bf16.vlgmr.msra.gmra.mxu0 %v4552_v5  ;;  %v4553_v18 = vld [vmem:[#allocation3 + $0x188] ss:$36 sps:$4 sm:$0xff]   ;;  %v1877_v47 = vrot.slane %v1798_v13, 5 }
 0x13f   : > { %1901 = vst [vmem:[#allocation3 + $0xf8] sm:$0xf] %v1847_v9  ;;  %v1875_v51 = vsel %vm5045_vm13, %v3804_v14, %v1874_v17  ;;  %v1876_v2 = vrot.slane %v1874_v17, 4 }
 0x140   : > { %v1850_v8 = vsel %vm5045_vm13, %v1848_v11, %v1849_v62  ;;  %1909 = vst [vmem:[#allocation3 + $0x218] sm:$0xf] %v1875_v51 }
 0x141   : > { %v4554_v12 = vld [vmem:[#allocation3 + $0xb0] ss:$36 sps:$4 sm:$0xff]   ;;  %1902 = vst [vmem:[#allocation3 + $0x11c] sm:$0xf] %v1850_v8  ;;  %v1878_v16 = vsel %vm5045_vm13, %v1876_v2, %v1877_v47 }
 0x142   : > { %4327 = vmatprep.mubr.bf16.mxu0 %v4554_v12  ;;  %1910 = vst [vmem:[#allocation3 + $0x23c] sm:$0xf] %v1878_v16 }
 0x143   : > { %v4555_v22 = vld [vmem:[#allocation3 + $0x1d0] ss:$36 sps:$4 sm:$0xff]   ;;  %4332 = vmatmul.mubr.bf16.vlgmr.msra.gmra.mxu1 %v4553_v18 }
 0x144   : > { %4335 = vmatprep.mubr.bf16.mxu1 %v4555_v22 }
 0x145   : > { %v4051_v31 = vpop.f32.mrf.mxu0 }
 0x146   : > { %v4115_v20 = vpop.f32.mrf.mxu1 }
 0x147   : > { %v4052_v48 = vpop.f32.mrf.mxu0 }
 0x148   : > { %v4556_v28 = vld [vmem:[#allocation3 + $0xf8] ss:$36 sps:$4 sm:$0xff]   ;;  %v4116_v32 = vpop.f32.mrf.mxu1  ;;  %v4053_v27 = vadd.f32 %v4052_v48, %v4051_v31 }
 0x149   : > { %4328 = vmatmul.mubr.bf16.gmra.mxu0 %v4556_v28  ;;  %v4557_v37 = vld [vmem:[#allocation3 + $0x218] ss:$36 sps:$4 sm:$0xff]   ;;  %v4117_v26 = vadd.f32 %v4116_v32, %v4115_v20  ;;  %v4054_v33 = vpop.f32.mrf.mxu0 }
 0x14a   : > { %v4118_v34 = vpop.f32.mrf.mxu1 }
 0x14b   : > { %4336 = vmatmul.mubr.bf16.gmra.mxu1 %v4557_v37  ;;  %v5412_v10 = vadd.f32 %v4117_v26, %v4053_v27  ;;  %v4055_v44 = vpop.f32.mrf.mxu0 }
 0x14c   : > { %v4119_v36 = vpop.f32.mrf.mxu1  ;;  %v4056_v38 = vadd.f32 %v4055_v44, %v4054_v33 }
 0x14d   : > { %v4120_v63 = vadd.f32 %v4119_v36, %v4118_v34 }
 0x14e   : > { %v4121_v24 = vpop.f32.mrf.mxu1 }
 0x14f   : > { %v4057_v3 = vpop.f32.mrf.mxu0  ;;  %v5414_v40 = vadd.f32 %v4120_v63, %v4056_v38 }
 0x150   : > { %v4122_v39 = vpop.f32.mrf.mxu1 }
 0x151   : > { %v4123_v59 = vadd.f32 %v4122_v39, %v4121_v24  ;;  %v4058_v7 = vpop.f32.mrf.mxu0 }
 0x152   : > { %v4124_v41 = vpop.f32.mrf.mxu1  ;;  %v4059_v19 = vadd.f32 %v4058_v7, %v4057_v3 }
 0x153   : > { %v4060_v50 = vpop.f32.mrf.mxu0 }
 0x154   : > { %v4125_v23 = vpop.f32.mrf.mxu1  ;;  %v5416_v30 = vadd.f32 %v4123_v59, %v4059_v19 }
 0x155   : > { %v4126_v42 = vadd.f32 %v4125_v23, %v4124_v41  ;;  %v4061_v43 = vpop.f32.mrf.mxu0 }
 0x156   : > { %v4062_v6 = vadd.f32 %v4061_v43, %v4060_v50  ;;  %v4127_v0 = vpop.f32.mrf.mxu1 }
 0x158   : > { %v5418_v45 = vadd.f32 %v4126_v42, %v4062_v6  ;;  %v4063_v46 = vpop.f32.mrf.mxu0  ;;  %v4128_v49 = vpop.f32.mrf.mxu1 }
 0x159   : > { %v4129_v52 = vadd.f32 %v4128_v49, %v4127_v0 }
 0x15a   : > { %v4064_v35 = vpop.f32.mrf.mxu0  ;;  %v4130_v54 = vpop.f32.mrf.mxu1 }
 0x15b   : > { %v4065_v53 = vadd.f32 %v4064_v35, %v4063_v46 }
 0x15c   : > { %v4066_v29 = vpop.f32.mrf.mxu0  ;;  %v4131_v55 = vpop.f32.mrf.mxu1 }
 0x15d   : > { %v5420_v25 = vadd.f32 %v4129_v52, %v4065_v53  ;;  %v4132_v57 = vadd.f32 %v4131_v55, %v4130_v54 }
 0x15e   : > { %v4067_v56 = vpop.f32.mrf.mxu0 }
 0x15f   : > { %v4068_v21 = vadd.f32 %v4067_v56, %v4066_v29  ;;  %v4133_v58 = vpop.f32.mrf.mxu1 }
 0x161   : > { %v5422_v15 = vadd.f32 %v4132_v57, %v4068_v21  ;;  %v4134_v61 = vpop.f32.mrf.mxu1 }
 0x162   : > { %v4135_v1 = vadd.f32 %v4134_v61, %v4133_v58 }
 0x163   : > { %5566 = vst [vmem:[#allocation4_spill] sm:$0xff] %v5422_v15  ;;  %v4069_v60 = vpop.f32.mrf.mxu0  ;;  %v4136_v5 = vpop.f32.mrf.mxu1 }
 0x165   : > { %v4070_v62 = vpop.f32.mrf.mxu0  ;;  %v4137_v13 = vpop.f32.mrf.mxu1 }
 0x166   : > { %v4071_v4 = vadd.f32 %v4070_v62, %v4069_v60  ;;  %v4138_v17 = vadd.f32 %v4137_v13, %v4136_v5 }
 0x167   : > { %v4072_v9 = vpop.f32.mrf.mxu0 }
 0x168   : > { %v5424_v11 = vadd.f32 %v4135_v1, %v4071_v4 }
 0x169   : > { %v4073_v14 = vpop.f32.mrf.mxu0  ;;  %v4139_v51 = vpop.f32.mrf.mxu1 }
 0x16a   : > { %5567 = vst [vmem:[#allocation5_spill] sm:$0xff] %v5424_v11  ;;  %v4074_v18 = vadd.f32 %v4073_v14, %v4072_v9 }
 0x16b   : > { %v4140_v47 = vpop.f32.mrf.mxu1 }
 0x16c   : > { %v5426_v8 = vadd.f32 %v4138_v17, %v4074_v18  ;;  %v4141_v12 = vadd.f32 %v4140_v47, %v4139_v51 }
 0x16d   : > { %v4075_v2 = vpop.f32.mrf.mxu0  ;;  %v4142_v22 = vpop.f32.mrf.mxu1 }
 0x16e   : > { %5568 = vst [vmem:[#allocation6_spill] sm:$0xff] %v5426_v8 }
 0x16f   : > { %v4076_v16 = vpop.f32.mrf.mxu0  ;;  %v4143_v20 = vpop.f32.mrf.mxu1 }
 0x170   : > { %v4077_v28 = vadd.f32 %v4076_v16, %v4075_v2  ;;  %v4144_v32 = vadd.f32 %v4143_v20, %v4142_v22 }
 0x171   : > { %v4078_v37 = vpop.f32.mrf.mxu0 }
 0x172   : > { %v5428_v31 = vadd.f32 %v4141_v12, %v4077_v28 }
 0x173   : > { %v4079_v26 = vpop.f32.mrf.mxu0 }
 0x174   : > { %5569 = vst [vmem:[#allocation7_spill] sm:$0xff] %v5428_v31  ;;  %v4080_v48 = vadd.f32 %v4079_v26, %v4078_v37 }
 0x175   : > { %v4145_v33 = vpop.f32.mrf.mxu1 }
 0x176   : > { %v5430_v34 = vadd.f32 %v4144_v32, %v4080_v48 }
 0x177   : > { %v4146_v44 = vpop.f32.mrf.mxu1 }
 0x178   : > { %5570 = vst [vmem:[#allocation8_spill] sm:$0xff] %v5430_v34  ;;  %v4081_v27 = vpop.f32.mrf.mxu0  ;;  %v4147_v24 = vadd.f32 %v4146_v44, %v4145_v33 }
 0x179   : > { %v4148_v3 = vpop.f32.mrf.mxu1 }
 0x17a   : > { %v4082_v36 = vpop.f32.mrf.mxu0 }
 0x17b   : > { %v4083_v63 = vadd.f32 %v4082_v36, %v4081_v27  ;;  %v4149_v41 = vpop.f32.mrf.mxu1 }
 0x17c   : > { %v4084_v38 = vpop.f32.mrf.mxu0  ;;  %v4150_v19 = vadd.f32 %v4149_v41, %v4148_v3 }
 0x17d   : > { %v5432_v39 = vadd.f32 %v4147_v24, %v4083_v63 }
 0x17e   : > { %v4085_v59 = vpop.f32.mrf.mxu0 }
 0x17f   : > { %5571 = vst [vmem:[#allocation9_spill] sm:$0xff] %v5432_v39  ;;  %v4086_v7 = vadd.f32 %v4085_v59, %v4084_v38  ;;  %v4151_v23 = vpop.f32.mrf.mxu1 }
 0x181   : > { %v5434_v50 = vadd.f32 %v4150_v19, %v4086_v7  ;;  %v4152_v43 = vpop.f32.mrf.mxu1 }
 0x182   : > { %v4153_v6 = vadd.f32 %v4152_v43, %v4151_v23 }
 0x183   : > { %5572 = vst [vmem:[#allocation10_spill] sm:$0xff] %v5434_v50  ;;  %v4087_v42 = vpop.f32.mrf.mxu0  ;;  %v4154_v46 = vpop.f32.mrf.mxu1 }
 0x185   : > { %v4088_v0 = vpop.f32.mrf.mxu0  ;;  %v4155_v52 = vpop.f32.mrf.mxu1 }
 0x186   : > { %v4089_v49 = vadd.f32 %v4088_v0, %v4087_v42  ;;  %v4156_v54 = vadd.f32 %v4155_v52, %v4154_v46 }
 0x187   : > { %v4090_v35 = vpop.f32.mrf.mxu0 }
 0x188   : > { %v5436_v53 = vadd.f32 %v4153_v6, %v4089_v49 }
 0x189   : > { %v4091_v29 = vpop.f32.mrf.mxu0 }
 0x18a   : > { %5573 = vst [vmem:[#allocation11_spill] sm:$0xff] %v5436_v53  ;;  %v4092_v55 = vadd.f32 %v4091_v29, %v4090_v35  ;;  %v4157_v21 = vpop.f32.mrf.mxu1 }
 0x18c   : > { %v5438_v56 = vadd.f32 %v4156_v54, %v4092_v55  ;;  %v4158_v61 = vpop.f32.mrf.mxu1 }
 0x18d   : > { %v4159_v62 = vadd.f32 %v4158_v61, %v4157_v21 }
 0x18e   : > { %5574 = vst [vmem:[#allocation12_spill] sm:$0xff] %v5438_v56  ;;  %v4093_v57 = vpop.f32.mrf.mxu0  ;;  %v4160_v4 = vpop.f32.mrf.mxu1 }
 0x190   : > { %v4094_v58 = vpop.f32.mrf.mxu0  ;;  %v4161_v14 = vpop.f32.mrf.mxu1 }
 0x191   : > { %v4095_v60 = vadd.f32 %v4094_v58, %v4093_v57  ;;  %v4162_v17 = vadd.f32 %v4161_v14, %v4160_v4 }
 0x192   : > { %v4096_v1 = vpop.f32.mrf.mxu0 }
 0x193   : > { %v5440_v5 = vadd.f32 %v4159_v62, %v4095_v60 }
 0x194   : > { %v4097_v9 = vpop.f32.mrf.mxu0 }
 0x195   : > { %5575 = vst [vmem:[#allocation13_spill] sm:$0xff] %v5440_v5  ;;  %v4098_v13 = vadd.f32 %v4097_v9, %v4096_v1 }
 0x197   : > { %v5442_v18 = vadd.f32 %v4162_v17, %v4098_v13 }
 0x198   : > { %v4179_v51 = vpop.f32.mrf.mxu0 }
 0x199   : > { %5576 = vst [vmem:[#allocation14_spill] sm:$0xff] %v5442_v18 }
 0x19a   : > { %v4180_v2 = vpop.f32.mrf.mxu0 }
 0x19b   : > { %v4181_v47 = vadd.f32 %v4180_v2, %v4179_v51 }
 0x19c   : > { %v4182_v12 = vpop.f32.mrf.mxu0 }
 0x19d   : > { %v5445_v16 = vadd.f32 %v4181_v47, %v5412_v10 }
 0x19e   : > { %v4183_v28 = vpop.f32.mrf.mxu0 }
 0x1a1   : > { %v4243_v22 = vpop.f32.mrf.mxu1 }
 0x1a3   : > { %v4244_v37 = vpop.f32.mrf.mxu1 }
 0x1a4   : > { %v4245_v31 = vadd.f32 %v4244_v37, %v4243_v22 }
 0x1a5   : > { %v4246_v20 = vpop.f32.mrf.mxu1 }
 0x1a7   : > { %v4185_v32 = vpop.f32.mrf.mxu0  ;;  %v4247_v48 = vpop.f32.mrf.mxu1 }
 0x1a9   : > { %v4186_v26 = vpop.f32.mrf.mxu0 }
 0x1ab   : > { %v4188_v27 = vpop.f32.mrf.mxu0 }
 0x1ad   : > { %v4249_v33 = vpop.f32.mrf.mxu1  ;;  %v4189_v36 = vpop.f32.mrf.mxu0 }
 0x1ae   : > { %v4190_v50 = vadd.f32 %v4189_v36, %v4188_v27 }
 0x1af   : > { %v4250_v63 = vpop.f32.mrf.mxu1 }
 0x1b1   : > { %v4252_v44 = vpop.f32.mrf.mxu1 }
 0x1b3   : > { %v4191_v24 = vpop.f32.mrf.mxu0  ;;  %v4253_v3 = vpop.f32.mrf.mxu1 }
 0x1b5   : > { %v4192_v38 = vpop.f32.mrf.mxu0 }
 0x1b7   : > { %v4194_v59 = vpop.f32.mrf.mxu0 }
 0x1b9   : > { %v4255_v7 = vpop.f32.mrf.mxu1  ;;  %v4195_v41 = vpop.f32.mrf.mxu0 }
 0x1bb   : > { %v4256_v10 = vpop.f32.mrf.mxu1 }
 0x1bd   : > { %v5447_v19 = vpop.f32.mrf.mxu1 }
 0x1be   : > { %5577 = vst [vmem:[#allocation15_spill] sm:$0xff] %v5447_v19  ;;  %v4196_v19 = vadd.f32 %v4195_v41, %v4194_v59 }
 0x1bf   : > { %v4197_v23 = vpop.f32.mrf.mxu0  ;;  %v5449_v43 = vpop.f32.mrf.mxu1 }
 0x1c0   : > { %5578 = vst [vmem:[#allocation16_spill] sm:$0xff] %v5449_v43  ;;  %v4251_v43 = vadd.f32 %v4250_v63, %v4249_v33 }
 0x1c1   : > { %v4198_v42 = vpop.f32.mrf.mxu0 }
 0x1c3   : > { %v5451_v6 = vpop.f32.mrf.mxu0 }
 0x1c4   : > { %5579 = vst [vmem:[#allocation17_spill] sm:$0xff] %v5451_v6  ;;  %v4248_v6 = vadd.f32 %v4247_v48, %v4246_v20  ;;  %v3261_v20 = vadd.f32 %v4245_v31, %v5445_v16 }
 0x1c5   : > { %v4201_v46 = vpop.f32.mrf.mxu0 }
 0x1c6   : > { %v5453_v0 = vpop.f32.mrf.mxu1 }
 0x1c7   : > { %5580 = vst [vmem:[#allocation18_spill] sm:$0xff] %v5453_v0  ;;  %v4187_v0 = vadd.f32 %v4186_v26, %v4185_v32  ;;  %v4199_v32 = vadd.f32 %v4198_v42, %v4197_v23  ;;  %v5594_v23 = vld [vmem:[#allocation7_spill] sm:$0xff] }
 0x1c8   : > { %v5455_v49 = vpop.f32.mrf.mxu1 }
 0x1c9   : > { %5581 = vst [vmem:[#allocation19_spill] sm:$0xff] %v5455_v49  ;;  %v4184_v49 = vadd.f32 %v4183_v28, %v4182_v12  ;;  %v4257_v28 = vadd.f32 %v4256_v10, %v4255_v7 }
 0x1ca   : > { %v5457_v35 = vpop.f32.mrf.mxu1 }
 0x1cb   : > { %5582 = vst [vmem:[#allocation20_spill] sm:$0xff] %v5457_v35  ;;  %v4203_v52 = vpop.f32.mrf.mxu0  ;;  %v5593_v59 = vld [vmem:[#allocation17_spill] sm:$0xff] }
 0x1cc   : > { %v5459_v29 = vpop.f32.mrf.mxu1  ;;  %v4202_v7 = vadd.f32 %v4201_v46, %v5593_v59 }
 0x1cd   : > { %v4204_v54 = vpop.f32.mrf.mxu0  ;;  %5583 = vst [vmem:[#allocation21_spill] sm:$0xff] %v5459_v29 }
 0x1ce   : > { %v4205_v26 = vadd.f32 %v4204_v54, %v4203_v52 }
 0x1cf   : > { %v4206_v55 = vpop.f32.mrf.mxu0 }
 0x1d0   : > { %v3196_v31 = vadd.f32 %v4205_v26, %v5594_v23 }
 0x1d1   : > { %v4207_v57 = vpop.f32.mrf.mxu0 }
 0x1d2   : > { %v4208_v27 = vadd.f32 %v4207_v57, %v4206_v55 }
 0x1d4   : > { %v4267_v21 = vpop.f32.mrf.mxu1 }
 0x1d6   : > { %v4268_v58 = vpop.f32.mrf.mxu1 }
 0x1d7   : > { %v4269_v16 = vadd.f32 %v4268_v58, %v4267_v21  ;;  %v5600_v21 = vld [vmem:[#allocation6_spill] sm:$0xff] }
 0x1d8   : > { %v4270_v61 = vpop.f32.mrf.mxu1  ;;  %v3191_v58 = vadd.f32 %v4202_v7, %v5600_v21 }
 0x1d9   : > { %v4209_v60 = vpop.f32.mrf.mxu0 }
 0x1da   : > { %v4271_v1 = vpop.f32.mrf.mxu1 }
 0x1db   : > { %v4210_v62 = vpop.f32.mrf.mxu0 }
 0x1dc   : > { %v4211_v22 = vadd.f32 %v4210_v62, %v4209_v60 }
 0x1dd   : > { %v4212_v4 = vpop.f32.mrf.mxu0 }
 0x1df   : > { %v4213_v13 = vpop.f32.mrf.mxu0 }
 0x1e0   : > { %v4273_v9 = vpop.f32.mrf.mxu1  ;;  %v4214_v37 = vadd.f32 %v4213_v13, %v4212_v4  ;;  %v5598_v4 = vld [vmem:[#allocation18_spill] sm:$0xff]  ;;  %v5599_v13 = vld [vmem:[#allocation19_spill] sm:$0xff] }
 0x1e2   : > { %v4274_v14 = vpop.f32.mrf.mxu1 }
 0x1e4   : > { %v4276_v17 = vpop.f32.mrf.mxu1 }
 0x1e5   : > { %v5461_v51 = vpop.f32.mrf.mxu0 }
 0x1e6   : > { %5584 = vst [vmem:[#allocation22_spill] sm:$0xff] %v5461_v51  ;;  %v4277_v47 = vpop.f32.mrf.mxu1  ;;  %v4193_v51 = vadd.f32 %v4192_v38, %v4191_v24  ;;  %v5591_v24 = vld [vmem:[#allocation16_spill] sm:$0xff]  ;;  %v5592_v38 = vld [vmem:[#allocation5_spill] sm:$0xff] }
 0x1e7   : > { %v5463_v2 = vpop.f32.mrf.mxu0  ;;  %v4278_v54 = vadd.f32 %v4277_v47, %v4276_v17 }
 0x1e8   : > { %5585 = vst [vmem:[#allocation23_spill] sm:$0xff] %v5463_v2  ;;  %v3167_v2 = vadd.f32 %v4184_v49, %v5414_v40  ;;  %v3180_v12 = vadd.f32 %v4193_v51, %v5420_v25  ;;  %v5597_v49 = vld [vmem:[#allocation10_spill] sm:$0xff]  ;;  %v4263_v51 = vadd.f32 %v5599_v13, %v5598_v4 }
 0x1e9   : > { %v4218_v53 = vpop.f32.mrf.mxu0  ;;  %v3207_v52 = vadd.f32 %v4214_v37, %v5597_v49 }
 0x1ea   : > { %v3264_v63 = vadd.f32 %v4248_v6, %v3167_v2  ;;  %v5487_v10 = vadd.f32 %v4257_v28, %v3180_v12  ;;  %v4275_v6 = vadd.f32 %v4274_v14, %v4273_v9  ;;  %v5601_v2 = vld [vmem:[#allocation20_spill] sm:$0xff]  ;;  %v3293_v28 = vadd.f32 %v4269_v16, %v3196_v31 }
 0x1eb   : > { %v4219_v5 = vpop.f32.mrf.mxu0  ;;  %v3304_v26 = vadd.f32 %v4278_v54, %v3207_v52 }
 0x1ec   : > { %v5465_v18 = vpop.f32.mrf.mxu1  ;;  %v4220_v55 = vadd.f32 %v4219_v5, %v4218_v53 }
 0x1ed   : > { %5586 = vst [vmem:[#allocation24_spill] sm:$0xff] %v5465_v18  ;;  %v3172_v18 = vadd.f32 %v4187_v0, %v5416_v30  ;;  %v5589_v30 = vld [vmem:[#allocation4_spill] sm:$0xff]  ;;  %v4272_v0 = vadd.f32 %v4271_v1, %v4270_v61  ;;  %v5602_v61 = vld [vmem:[#allocation21_spill] sm:$0xff] }
 0x1ee   : > { %v5467_v56 = vpop.f32.mrf.mxu1  ;;  %v5479_v48 = vadd.f32 %v4196_v19, %v5589_v30  ;;  %v5595_v19 = vld [vmem:[#allocation8_spill] sm:$0xff]  ;;  %v4266_v1 = vadd.f32 %v5602_v61, %v5601_v2 }
 0x1ef   : > { %5587 = vst [vmem:[#allocation25_spill] sm:$0xff] %v5467_v56  ;;  %v3175_v56 = vadd.f32 %v4190_v50, %v5418_v45  ;;  %v3269_v45 = vadd.f32 %v4251_v43, %v3172_v18  ;;  %v3199_v42 = vadd.f32 %v4208_v27, %v5595_v19  ;;  %v5604_v5 = vld [vmem:[#allocation23_spill] sm:$0xff] }
 0x1f0   : > { %v5469_v29 = vpop.f32.mrf.mxu1 }
 0x1f1   : > { %5588 = vst [vmem:[#allocation26_spill] sm:$0xff] %v5469_v29  ;;  %v4254_v29 = vadd.f32 %v4253_v3, %v4252_v44  ;;  %v5590_v44 = vld [vmem:[#allocation15_spill] sm:$0xff]  ;;  %v5484_v3 = vadd.f32 %v4199_v32, %v5592_v38  ;;  %v3296_v27 = vadd.f32 %v4272_v0, %v3199_v42 }
 0x1f2   : > { %v4221_v35 = vpop.f32.mrf.mxu0  ;;  %v5471_v39 = vpop.f32.mrf.mxu1  ;;  %v4260_v25 = vadd.f32 %v5591_v24, %v5590_v44  ;;  %v5608_v44 = vld [vmem:[#allocation14_spill] sm:$0xff] }
 0x1f3   : > { %v3272_v50 = vadd.f32 %v4254_v29, %v3175_v56  ;;  %v5596_v56 = vld [vmem:[#allocation9_spill] sm:$0xff]  ;;  %v3285_v54 = vadd.f32 %v4263_v51, %v5484_v3 }
 0x1f4   : > { %v4222_v8 = vpop.f32.mrf.mxu0  ;;  %v3204_v43 = vadd.f32 %v4211_v22, %v5596_v56  ;;  %v5605_v22 = vld [vmem:[#allocation12_spill] sm:$0xff] }
 0x1f5   : > { %v4223_v57 = vadd.f32 %v4222_v8, %v4221_v35  ;;  %v5603_v8 = vld [vmem:[#allocation22_spill] sm:$0xff]  ;;  %v3215_v37 = vadd.f32 %v4220_v55, %v5605_v22  ;;  %v5610_v55 = vld [vmem:[#allocation24_spill] sm:$0xff] }
 0x1f6   : > { %v4224_v34 = vpop.f32.mrf.mxu0  ;;  %v4217_v35 = vadd.f32 %v5604_v5, %v5603_v8  ;;  %v3301_v32 = vadd.f32 %v4275_v6, %v3204_v43 }
 0x1f8   : > { %v4225_v11 = vpop.f32.mrf.mxu0 }
 0x1f9   : > { %v4226_v12 = vadd.f32 %v4225_v11, %v4224_v34 }
 0x1fb   : > { %v4285_v15 = vpop.f32.mrf.mxu1 }
 0x1fd   : > { %v4286_v36 = vpop.f32.mrf.mxu1 }
 0x1fe   : > { %v4325_v40 = vpop.f32.mrf.mxu0 }
 0x1ff   : > { %v4288_v33 = vpop.f32.mrf.mxu1  ;;  %v3366_v46 = vadd.f32 %v4325_v40, %v3269_v45  ;;  %v5606_v40 = vld [vmem:[#allocation26_spill] sm:$0xff]  ;;  %v5607_v45 = vld [vmem:[#allocation13_spill] sm:$0xff] }
 0x200   : > { %v3357_v41 = vpop.f32.mrf.mxu0  ;;  %v4284_v30 = vadd.f32 %v5471_v39, %v5606_v40  ;;  %v3220_v11 = vadd.f32 %v4223_v57, %v5607_v45  ;;  %v5611_v57 = vld [vmem:[#allocation25_spill] sm:$0xff] }
 0x201   : > { %v4289_v18 = vpop.f32.mrf.mxu1  ;;  %v3358_v14 = vadd.f32 %v3357_v41, %v3261_v20 }
 0x202   : > { %v4326_v29 = vpop.f32.mrf.mxu0  ;;  %v4290_v59 = vadd.f32 %v4289_v18, %v4288_v33  ;;  %v3280_v33 = vadd.f32 %v4260_v25, %v5479_v48  ;;  %v5609_v18 = vld [vmem:[#allocation11_spill] sm:$0xff]  ;;  %v3312_v25 = vadd.f32 %v4284_v30, %v3215_v37 }
 0x203   : > { %v4333_v60 = vpop.f32.mrf.mxu1  ;;  %v3369_v62 = vadd.f32 %v4326_v29, %v3272_v50  ;;  %v4287_v50 = vadd.f32 %v4286_v36, %v4285_v15  ;;  %v3212_v49 = vadd.f32 %v4217_v35, %v5609_v18  ;;  %v3288_v29 = vadd.f32 %v4266_v1, %v3191_v58 }
 0x204   : > { %v3360_v9 = vpop.f32.mrf.mxu0  ;;  %v3398_v24 = vadd.f32 %v4333_v60, %v3301_v32 }
 0x205   : > { %v3389_v17 = vpop.f32.mrf.mxu1  ;;  %v3421_v47 = vpack.c.bf16 %v3369_v62, %v3366_v46  ;;  %v3361_v53 = vadd.f32 %v3360_v9, %v3264_v63  ;;  %v3223_v63 = vadd.f32 %v4226_v12, %v5608_v44  ;;  %v4281_v46 = vadd.f32 %v5611_v57, %v5610_v55 }
 0x206   : > { %v3390_v19 = vadd.f32 %v3389_v17, %v3293_v28  ;;  %v3317_v61 = vadd.f32 %v4287_v50, %v3220_v11 }
 0x207   : > { %4028 = vst [vmem:[%s4672_s10 + $0x8] sm:$0xff] %v3421_v47   ;;  %v4334_v34 = vpop.f32.mrf.mxu1  ;;  %v3420_v20 = vpack.c.bf16 %v3361_v53, %v3358_v14  ;;  %v3502_v7 = vunpack.c.l.bf16 %v3421_v47  ;;  %v3503_v39 = vunpack.c.h.bf16 %v3421_v47  ;;  %v3320_v48 = vadd.f32 %v4290_v59, %v3223_v63 }
 0x208   : > { %v3401_v38 = vadd.f32 %v4334_v34, %v3304_v26  ;;  %v3309_v53 = vadd.f32 %v4281_v46, %v3212_v49 }
 0x209   : > { %3992 = vst [vmem:[%s4672_s10] sm:$0xff] %v3420_v20   ;;  %v3500_v41 = vunpack.c.l.bf16 %v3420_v20  ;;  %v3501_v23 = vunpack.c.h.bf16 %v3420_v20  ;;  %v3392_v31 = vpop.f32.mrf.mxu1  ;;  %v4329_v16 = vpop.f32.mrf.mxu0  ;;  %v3540_v60 = vmul.f32 %v3502_v7, %v3502_v7  ;;  %v3541_v2 = vmul.f32 %v3503_v39, %v3503_v39 }
 0x20a   : > { %v5507_v42 = vpack.c.bf16 %v3401_v38, %v3398_v24  ;;  %v3393_v0 = vadd.f32 %v3392_v31, %v3296_v27  ;;  %v3382_v9 = vadd.f32 %v4329_v16, %v3285_v54 }
 0x20b   : > { %v3516_v56 = vadd.f32 %v3501_v23, %v3500_v41  ;;  %v3538_v43 = vmul.f32 %v3500_v41, %v3500_v41  ;;  %v3539_v15 = vmul.f32 %v3501_v23, %v3501_v23  ;;  %v4337_v36 = vpop.f32.mrf.mxu1  ;;  %v3373_v6 = vpop.f32.mrf.mxu0 }
 0x20c   : > { %4032 = vst [vmem:[%s4672_s10 + $0x28] sm:$0xff] %v5507_v42   ;;  %v3424_v52 = vpack.c.bf16 %v3393_v0, %v3390_v19  ;;  %v3414_v58 = vadd.f32 %v4337_v36, %v3317_v61  ;;  %v3374_v1 = vadd.f32 %v3373_v6, %v5487_v10  ;;  %v3510_v16 = vunpack.c.l.bf16 %v5507_v42 }
 0x20d   : > { %v3517_v62 = vadd.f32 %v3516_v56, %v3502_v7  ;;  %v3554_v4 = vadd.f32 %v3539_v15, %v3538_v43  ;;  %v3405_v13 = vpop.f32.mrf.mxu1  ;;  %v4330_v21 = vpop.f32.mrf.mxu0  ;;  %v3511_v56 = vunpack.c.h.bf16 %v5507_v42 }
 0x20e   : > { %4031 = vst [vmem:[%s4672_s10 + $0x20] sm:$0xff] %v3424_v52   ;;  %v3385_v14 = vadd.f32 %v4330_v21, %v3288_v29  ;;  %v3406_v22 = vadd.f32 %v3405_v13, %v3309_v53  ;;  %v3508_v63 = vunpack.c.l.bf16 %v3424_v52  ;;  %v3509_v7 = vunpack.c.h.bf16 %v3424_v52 }
 0x20f   : > { %v3555_v12 = vadd.f32 %v3554_v4, %v3540_v60  ;;  %v4338_v28 = vpop.f32.mrf.mxu1  ;;  %v3376_v3 = vpop.f32.mrf.mxu0  ;;  %v3518_v51 = vadd.f32 %v3517_v62, %v3503_v39  ;;  %v3548_v6 = vmul.f32 %v3510_v16, %v3510_v16  ;;  %v3549_v54 = vmul.f32 %v3511_v56, %v3511_v56 }
 0x210   : > { %v3417_v17 = vadd.f32 %v4338_v28, %v3320_v48  ;;  %v3377_v47 = vadd.f32 %v3376_v3, %v3280_v33  ;;  %v3423_v8 = vpack.c.bf16 %v3385_v14, %v3382_v9  ;;  %v3546_v19 = vmul.f32 %v3508_v63, %v3508_v63 }
 0x211   : > { %v3556_v5 = vadd.f32 %v3555_v12, %v3541_v2  ;;  %v3408_v35 = vpop.f32.mrf.mxu1  ;;  %v3547_v43 = vmul.f32 %v3509_v7, %v3509_v7 }
 0x212   : > { %v3427_v32 = vpack.c.bf16 %v3417_v17, %v3414_v58  ;;  %v3422_v26 = vpack.c.bf16 %v3377_v47, %v3374_v1  ;;  %v3409_v27 = vadd.f32 %v3408_v35, %v3312_v25  ;;  %4030 = vst [vmem:[%s4672_s10 + $0x18] sm:$0xff] %v3423_v8   ;;  %v3506_v45 = vunpack.c.l.bf16 %v3423_v8 }
 0x213   : > { %v3507_v34 = vunpack.c.h.bf16 %v3423_v8 }
 0x214   : > { %4034 = vst [vmem:[%s4672_s10 + $0x38] sm:$0xff] %v3427_v32   ;;  %4029 = vst [vmem:[%s4672_s10 + $0x10] sm:$0xff] %v3422_v26   ;;  %v3504_v37 = vunpack.c.l.bf16 %v3422_v26  ;;  %v3505_v40 = vunpack.c.h.bf16 %v3422_v26  ;;  %v3426_v30 = vpack.c.bf16 %v3409_v27, %v3406_v22  ;;  %v3544_v24 = vmul.f32 %v3506_v45, %v3506_v45 }
 0x215   : > { %v3545_v41 = vmul.f32 %v3507_v34, %v3507_v34  ;;  %v3514_v57 = vunpack.c.l.bf16 %v3427_v32  ;;  %v3515_v4 = vunpack.c.h.bf16 %v3427_v32 }
 0x216   : > { %v3519_v11 = vadd.f32 %v3518_v51, %v3504_v37  ;;  %v3542_v10 = vmul.f32 %v3504_v37, %v3504_v37  ;;  %4033 = vst [vmem:[%s4672_s10 + $0x30] sm:$0xff] %v3426_v30   ;;  %v3543_v50 = vmul.f32 %v3505_v40, %v3505_v40  ;;  %v3512_v33 = vunpack.c.l.bf16 %v3426_v30 }
 0x217   : > { %v3513_v29 = vunpack.c.h.bf16 %v3426_v30  ;;  %v3552_v42 = vmul.f32 %v3514_v57, %v3514_v57  ;;  %v3553_v25 = vmul.f32 %v3515_v4, %v3515_v4 }
 0x218   : > { %v3520_v20 = vadd.f32 %v3519_v11, %v3505_v40  ;;  %v3557_v44 = vadd.f32 %v3556_v5, %v3542_v10  ;;  %v3550_v60 = vmul.f32 %v3512_v33, %v3512_v33 }
 0x219   : > { %v3551_v21 = vmul.f32 %v3513_v29, %v3513_v29 }
 0x21a   : > { %v3521_v38 = vadd.f32 %v3520_v20, %v3506_v45  ;;  %v3558_v59 = vadd.f32 %v3557_v44, %v3543_v50 }
 0x21c   : > { %v3522_v23 = vadd.f32 %v3521_v38, %v3507_v34  ;;  %v3559_v31 = vadd.f32 %v3558_v59, %v3544_v24 }
 0x21e   : > { %v3523_v39 = vadd.f32 %v3522_v23, %v3508_v63  ;;  %v3560_v0 = vadd.f32 %v3559_v31, %v3545_v41 }
 0x220   : > { %v3561_v15 = vadd.f32 %v3560_v0, %v3546_v19  ;;  %v3524_v36 = vadd.f32 %v3523_v39, %v3509_v7 }
 0x222   : > { %v3525_v18 = vadd.f32 %v3524_v36, %v3510_v16  ;;  %v3562_v49 = vadd.f32 %v3561_v15, %v3547_v43 }
 0x224   : > { %v3526_v52 = vadd.f32 %v3525_v18, %v3511_v56  ;;  %v3563_v55 = vadd.f32 %v3562_v49, %v3548_v6 }
 0x226   : > { %v3527_v46 = vadd.f32 %v3526_v52, %v3512_v33  ;;  %v3564_v62 = vadd.f32 %v3563_v55, %v3549_v54 }
 0x228   : > { %v3528_v13 = vadd.f32 %v3527_v46, %v3513_v29  ;;  %v3565_v2 = vadd.f32 %v3564_v62, %v3550_v60 }
 0x22a   : > { %v3529_v61 = vadd.f32 %v3528_v13, %v3514_v57  ;;  %v3566_v48 = vadd.f32 %v3565_v2, %v3551_v21 }
 0x22c   : > { %v3530_v12 = vadd.f32 %v3529_v61, %v3515_v4  ;;  %v3567_v9 = vadd.f32 %v3566_v48, %v3552_v42 }
 0x22e   : > { %v3531_v14 = vrot.slane %v3530_v12, 4  ;;  %v3568_v28 = vadd.f32 %v3567_v9, %v3553_v25 }
 0x230   : > { %v3532_v3 = vadd.f32 %v3531_v14, %v3530_v12  ;;  %v3569_v51 = vrot.slane %v3568_v28, 4 }
 0x232   : > { %v3533_v58 = vrot.slane %v3532_v3, 2  ;;  %v3570_v1 = vadd.f32 %v3569_v51, %v3568_v28 }
 0x234   : > { %v3534_v17 = vadd.f32 %v3533_v58, %v3532_v3  ;;  %v3571_v47 = vrot.slane %v3570_v1, 2 }
 0x236   : > { %v3535_v53 = vrot.slane %v3534_v17, 1  ;;  %v3572_v8 = vadd.f32 %v3571_v47, %v3570_v1 }
 0x238   : > { %v3536_v5 = vadd.f32 %v3535_v53, %v3534_v17  ;;  %v3573_v35 = vrot.slane %v3572_v8, 1 }
 0x23a   : > { %3537 = vst [vmem:[%s252_s16] sm:$0x1] %v3536_v5  ;;  %v3574_v32 = vadd.f32 %v3573_v35, %v3572_v8 }
 0x23c   : > { %3575 = vst [vmem:[%s259_s25] sm:$0x1] %v3574_v32 }
 0x23d PF: > { %s15_s19 = sadd.s32 1, %s4596_s19   ;;  %s5612_s15 = smov %s4588_s17 }
 0x23e   : > { %p12_p10 = scmp.ge.s32.totalorder %s15_s19, 6   ;;  %s5613_s16 = smov %s4592_s18 }
 0x23f   : > { %s5614_s17 = smov %s5617_s20  ;;  %s5615_s18 = smov %s5621_s21 }
 0x240   :  { %14 = sbr.rel (!%p12_p10) target bundleno = 3 (0x3), region = 96 }

// kernel: basic_block_pallas.4
= control target key start
LH: loop header
LB: loop body
LE: loop exit
PB: predicated region body
PF: predicated region fallthrough
CT: control target
= control target key end

     0   :  { %s4932_s21 = smov 0   ;;  %s4934_s22 = smov 0   ;;  %s5891_s0 = inlined_call_operand.vmem [shape: bf16[2,16,16,128], index: 0, kind: input, shape index: {}]   ;;  %s5892_s1 = inlined_call_operand.vmem [shape: bf16[1152,128], index: 1, kind: input, shape index: {}]   ;;  %s5893_s2 = inlined_call_operand.vmem [shape: f32[1,128], index: 2, kind: input, shape index: {}]   ;;  %s5894_s3 = inlined_call_operand.vmem [shape: f32[1,128], index: 3, kind: input, shape index: {}]   ;;  %s5895_s4 = inlined_call_operand.vmem [shape: bf16[2,16,16,128], index: 4, kind: output, shape index: {0}]   ;;  %s5896_s5 = inlined_call_operand.vmem [shape: f32[2,2,1,128], index: 5, kind: output, shape index: {1}]   ;;  %s5897_s6 = inlined_call_operand.vmem [shape: f32[2,2,1,128], index: 6, kind: output, shape index: {2}]  }
   0x1   :  { %s4936_s23 = smov 0   ;;  %s4938_s24 = smov 0  }
   0x2   :  { %s4940_s25 = smov 0  }
   0x3 LB: > { %s26_s26 = sadd.s32 1, %s4886_s23  ;;  %s29_s27 = sadd.s32 1, %s4890_s24  ;;  %s4894_s25 = sphi %s4940_s25, %s17_s25   ;;  %s4890_s24 = sphi %s4938_s24, %s5961_s24   ;;  %s4886_s23 = sphi %s4936_s23, %s5960_s23   ;;  %s4882_s22 = sphi %s4934_s22, %s5959_s22   ;;  %s4878_s21 = sphi %s4932_s21, %s5958_s21  }
   0x4   : > { %p27_p0 = scmp.ge.s32.totalorder %s26_s26, 2  ;;  %p3968_p1 = scmp.ge.s32.totalorder %s4894_s25, 1 }
   0x5   : > { %p235_p2 = scmp.lt.s32.totalorder %s4894_s25, 5 }
   0x6   : > { %s5963_s26 = smov (%p27_p0, %s26_s26), 0  ;;  %s5965_s27 = smov (!%p27_p0, %s29_s27), %s4890_s24 }
   0x7   : > { %p236_p3 = pnand %p3968_p1, %p235_p2  ;;  %p31_p4 = scmp.ge.s32.totalorder %s5965_s27, 2 }
   0x9   : > { %s5967_s27 = smov (%p31_p4, %s5965_s27), 0  ;;  %239 = sbr.rel (%p236_p3) target bundleno = 611 (0x263), region = 36 }
   0xa   : > { %5898 = sst [smem:[#allocation4_spill]] %s5967_s27 }
   0xe   : > { %p284_p5 = scmp.lt.s32.totalorder %s4882_s22, 1  ;;  %s4965_s28 = sshll.u32 %s4878_s21, 3  ;;  %v4896_v0 = vmov 0   ;;  %v4985_v1 = vld [vmem:[%s5893_s2] ss:$0 sm:$0xff]  ;;  %vm632_vm1 = vcmask 1040384  }
   0xf   : > { %p292_p6 = scmp.lt.s32.totalorder %s4965_s28, 15  ;;  %p302_p7 = scmp.lt.s32.totalorder %s4878_s21, 1  ;;  %750 = vst [vmem:[#allocation2 + $0x4] sm:$0xf] %v4896_v0  ;;  %v5002_v10 = vld [vmem:[%s5894_s3] ss:$0 sm:$0xff] }
  0x10   : > { %s5969_s22 = smov (!%p284_p5, %s4882_s22), 1  ;;  %s4199_s15 = sshll.u32 %s4878_s21, 6  ;;  %vm461_vm0 = vsmask.f32 256  ;;  %vm625_vm2 = vcmask 1043456  }
  0x11   : > { %s293_s29 = scalar_select %p292_p6, %s4965_s28, 15  ;;  %vm626_vm3 = vsmask.f32 7938  ;;  %v628_v51 = vld [vmem:[#allocation2 + $0xc] sm:$0xf]  ;;  %vm5042_vm4 = vmand %vm632_vm1, %vm461_vm0 }
  0x12   : > { %s4197_s30 = sshll.u32 %s5969_s22, 7  ;;  %s3973_s7 = sshll.u32 %s5969_s22, 5  ;;  %v634_v52 = vld [vmem:[#allocation2 + $0x14] sm:$0x1]  ;;  %v637_v61 = vld [vmem:[#allocation2 + $0x18] sm:$0xf]  ;;  %vm5053_vm5 = vmand %vm625_vm2, %vm626_vm3 }
  0x13   : > { %s4974_s10 = scalar_lea.vmem %s5891_s0, %s4197_s30  ;;  %s3972_s11 = sshll.u32 %s293_s29, 1  ;;  %vm462_vm6 = vsmask.f32 4368  ;;  %vm5136_vm7 = vmand %vm632_vm1, %vm626_vm3 }
  0x14   : > { %s296_s12 = sadd.s32 %s3973_s7, %s3972_s11  ;;  %s3975_s13 = sshll.u32 %s5969_s22, 1  ;;  %vm5172_vm8 = vmor %vm461_vm0, %vm462_vm6 }
  0x15   : > { %s3974_s14 = sshll.u32 %s296_s12, 2  ;;  %s4988_s27 = scalar_lea.vmem %s4974_s10, %s4199_s15 }
  0x16   : > { %s4980_s18 = scalar_lea.vmem %s5895_s4, %s3974_s14  ;;  %s5971_s21 = smov (!%p302_p7, %s4878_s21), 1  ;;  %v4239_v2 = vld [vmem:[%s4988_s27] sm:$0xff]   ;;  %v4318_v3 = vld [vmem:[%s4988_s27 + $0x8] sm:$0xff]   ;;  %v4319_v4 = vld [vmem:[%s4988_s27 + $0x10] sm:$0xff]  }
  0x17   : > { %v4240_v5 = vunpack.c.l.bf16 %v4239_v2  ;;  %v4241_v6 = vunpack.c.h.bf16 %v4239_v2  ;;  %v4244_v7 = vunpack.c.l.bf16 %v4318_v3  ;;  %v4245_v8 = vunpack.c.h.bf16 %v4318_v3  ;;  %v4320_v9 = vld [vmem:[%s4988_s27 + $0x18] sm:$0xff]   ;;  %s4997_s22 = sadd.s32 %s3975_s13, %s5971_s21  ;;  %v641_v3 = vld [vmem:[#allocation2 + $0x20] sm:$0x1]  ;;  %p3998_p8 = scmp.le.s32.totalorder %s4965_s28, 0 }
  0x18   : > { %v4248_v11 = vunpack.c.l.bf16 %v4319_v4  ;;  %v4249_v12 = vunpack.c.h.bf16 %v4319_v4  ;;  %v4252_v13 = vunpack.c.l.bf16 %v4320_v9  ;;  %v4253_v14 = vunpack.c.h.bf16 %v4320_v9  ;;  %s306_s9 = scalar_lea.vmem %s5896_s5, %s4997_s22  ;;  %s313_s12 = scalar_lea.vmem %s5897_s6, %s4997_s22 }
  0x19   : > { %v359_v15 = vmul.f32 %v4240_v5, %v4985_v1  ;;  %v360_v16 = vmul.f32 %v4241_v6, %v4985_v1  ;;  %v361_v17 = vmul.f32 %v4244_v7, %v4985_v1  ;;  %v362_v18 = vmul.f32 %v4245_v8, %v4985_v1  ;;  %s3999_s13 = sadd.s32 (!%p3998_p8), 4294967295, %s4965_s28 }
  0x1a   : > { %v363_v19 = vmul.f32 %v4248_v11, %v4985_v1  ;;  %v364_v20 = vmul.f32 %v4249_v12, %v4985_v1  ;;  %v365_v21 = vmul.f32 %v4252_v13, %v4985_v1  ;;  %v366_v22 = vmul.f32 %v4253_v14, %v4985_v1  ;;  %v644_v11 = vld [vmem:[#allocation2 + $0x24] sm:$0xf]  ;;  %v648_v13 = vld [vmem:[#allocation2 + $0x2c] sm:$0x1]  ;;  %s4216_s14 = sshll.u32 (!%p3998_p8), %s3999_s13, 3 }
  0x1b   : > { %v381_v23 = vadd.f32 %v5002_v10, %v359_v15  ;;  %v382_v24 = vadd.f32 %v5002_v10, %v360_v16  ;;  %v383_v25 = vadd.f32 %v5002_v10, %v361_v17  ;;  %v384_v26 = vadd.f32 %v5002_v10, %v362_v18  ;;  %v4321_v18 = vld [vmem:[%s4988_s27 + $0x20] sm:$0xff]   ;;  %s761_s15 = scalar_lea.vmem (!%p3998_p8), %s4974_s10, %s4216_s14 }
  0x1c   : > { %v385_v27 = vadd.f32 %v5002_v10, %v363_v19  ;;  %v386_v28 = vadd.f32 %v5002_v10, %v364_v20  ;;  %v387_v29 = vadd.f32 %v5002_v10, %v365_v21  ;;  %v388_v30 = vadd.f32 %v5002_v10, %v366_v22  ;;  %v4322_v19 = vld [vmem:[%s4988_s27 + $0x28] sm:$0xff]  }
  0x1d   : > { %v397_v31 = vmax.f32 %v381_v23, 0.0  ;;  %v398_v32 = vmax.f32 %v382_v24, 0.0  ;;  %v399_v33 = vmax.f32 %v383_v25, 0.0  ;;  %v400_v34 = vmax.f32 %v384_v26, 0.0  ;;  %v651_v24 = vld [vmem:[#allocation2 + $0x30] sm:$0xf] }
  0x1e   : > { %v401_v35 = vmax.f32 %v385_v27, 0.0  ;;  %v402_v36 = vmax.f32 %v386_v28, 0.0  ;;  %v403_v37 = vmax.f32 %v387_v29, 0.0  ;;  %v404_v38 = vmax.f32 %v388_v30, 0.0  ;;  %v4323_v25 = vld [vmem:[%s4988_s27 + $0x30] sm:$0xff]  }
  0x1f   : > { %v4200_v39 = vpack.c.bf16 %v397_v31, %v397_v31  ;;  %v5028_v40 = vpack.c.bf16 %v398_v32, %v398_v32  ;;  %v4202_v41 = vpack.c.bf16 %v399_v33, %v399_v33  ;;  %v5030_v42 = vpack.c.bf16 %v400_v34, %v400_v34  ;;  %v655_v31 = vld [vmem:[#allocation2 + $0x38] sm:$0x1] }
  0x20   : > { %v4204_v43 = vpack.c.bf16 %v401_v35, %v401_v35  ;;  %v5032_v44 = vpack.c.bf16 %v402_v36, %v402_v36  ;;  %v4206_v45 = vpack.c.bf16 %v403_v37, %v403_v37  ;;  %v5034_v46 = vpack.c.bf16 %v404_v38, %v404_v38  ;;  %v4324_v35 = vld [vmem:[%s4988_s27 + $0x38] sm:$0xff]  }
  0x21   : > { %v465_v47 = vshrl.u32 %v4200_v39, 16  ;;  %v468_v48 = vshll.u32 %v4200_v39, 16  ;;  %v473_v49 = vshrl.u32 %v5028_v40, 16  ;;  %v482_v50 = vshrl.u32 %v4202_v41, 16 }
  0x22   : > { %v485_v53 = vshll.u32 %v4202_v41, 16  ;;  %v490_v54 = vshrl.u32 %v5030_v42, 16  ;;  %v499_v55 = vshrl.u32 %v4204_v43, 16  ;;  %v502_v56 = vshll.u32 %v4204_v43, 16 }
  0x23   : > { %v5038_v57 = vrot.slane %v465_v47, 7  ;;  %v5046_v59 = vrot.slane %v473_v49, 7  ;;  %v5048_v60 = vrot.slane %v482_v50, 7  ;;  %v507_v62 = vshrl.u32 %v5032_v44, 16 }
  0x24   : > { %v5057_v2 = vrot.slane %v490_v54, 7  ;;  %v5059_v4 = vrot.slane %v499_v55, 7  ;;  %v516_v5 = vshrl.u32 %v4206_v45, 16  ;;  %v519_v6 = vshll.u32 %v4206_v45, 16 }
  0x25   : > { %v470_v7 = vor.u32 %v468_v48, %v5038_v57  ;;  %v480_v8 = vrot.slane %v5046_v59, 4  ;;  %v487_v9 = vor.u32 %v485_v53, %v5048_v60  ;;  %v5064_v12 = vrot.slane %v507_v62, 7 }
  0x26   : > { %v497_v14 = vrot.slane %v5057_v2, 4  ;;  %v504_v15 = vor.u32 %v502_v56, %v5059_v4  ;;  %v5068_v16 = vrot.slane %v516_v5, 7  ;;  %v524_v17 = vshrl.u32 %v5034_v46, 16 }
  0x27   : > { %v629_v20 = vsel %vm5053_vm5, %v470_v7, %v628_v51  ;;  %v635_v21 = vsel %vm5042_vm4, %v480_v8, %v634_v52  ;;  %v638_v22 = vsel %vm5053_vm5, %v487_v9, %v637_v61  ;;  %v514_v23 = vrot.slane %v5064_v12, 4 }
  0x28   : > { %630 = vst [vmem:[#allocation2 + $0xc] sm:$0xf] %v629_v20  ;;  %636 = vst [vmem:[#allocation2 + $0x14] sm:$0x1] %v635_v21  ;;  %v642_v26 = vsel %vm5042_vm4, %v497_v14, %v641_v3  ;;  %v645_v27 = vsel %vm5053_vm5, %v504_v15, %v644_v11  ;;  %v521_v28 = vor.u32 %v519_v6, %v5068_v16  ;;  %v5086_v29 = vrot.slane %v524_v17, 7 }
  0x29   : > { %639 = vst [vmem:[#allocation2 + $0x18] sm:$0xf] %v638_v22  ;;  %643 = vst [vmem:[#allocation2 + $0x20] sm:$0x1] %v642_v26  ;;  %v649_v30 = vsel %vm5042_vm4, %v514_v23, %v648_v13  ;;  %v4256_v32 = vunpack.c.l.bf16 %v4321_v18  ;;  %v4257_v33 = vunpack.c.h.bf16 %v4321_v18  ;;  %v4260_v34 = vunpack.c.l.bf16 %v4322_v19 }
  0x2a   : > { %646 = vst [vmem:[#allocation2 + $0x24] sm:$0xf] %v645_v27  ;;  %650 = vst [vmem:[#allocation2 + $0x2c] sm:$0x1] %v649_v30  ;;  %v652_v36 = vsel %vm5053_vm5, %v521_v28, %v651_v24  ;;  %v531_v37 = vrot.slane %v5086_v29, 4  ;;  %v4261_v38 = vunpack.c.h.bf16 %v4322_v19  ;;  %v4264_v39 = vunpack.c.l.bf16 %v4323_v25 }
  0x2b   : > { %653 = vst [vmem:[#allocation2 + $0x30] sm:$0xf] %v652_v36  ;;  %v367_v41 = vmul.f32 %v4256_v32, %v4985_v1  ;;  %v368_v43 = vmul.f32 %v4257_v33, %v4985_v1  ;;  %v369_v45 = vmul.f32 %v4260_v34, %v4985_v1  ;;  %v4265_v47 = vunpack.c.h.bf16 %v4323_v25  ;;  %v658_v28 = vld [vmem:[#allocation2 + $0x3c] sm:$0xf]  ;;  %v662_v30 = vld [vmem:[#allocation2 + $0x44] sm:$0x1] }
  0x2c   : > { %v656_v48 = vsel %vm5042_vm4, %v531_v37, %v655_v31  ;;  %v370_v49 = vmul.f32 %v4261_v38, %v4985_v1  ;;  %v371_v50 = vmul.f32 %v4264_v39, %v4985_v1  ;;  %v4268_v51 = vunpack.c.l.bf16 %v4324_v35  ;;  %v665_v38 = vld [vmem:[#allocation2 + $0x48] sm:$0xf] }
  0x2d   : > { %657 = vst [vmem:[#allocation2 + $0x38] sm:$0x1] %v656_v48  ;;  %v389_v52 = vadd.f32 %v5002_v10, %v367_v41  ;;  %v390_v53 = vadd.f32 %v5002_v10, %v368_v43  ;;  %v391_v54 = vadd.f32 %v5002_v10, %v369_v45  ;;  %v372_v55 = vmul.f32 %v4265_v47, %v4985_v1  ;;  %v669_v43 = vld [vmem:[#allocation2 + $0x50] sm:$0x1] }
  0x2e   : > { %v392_v56 = vadd.f32 %v5002_v10, %v370_v49  ;;  %v393_v61 = vadd.f32 %v5002_v10, %v371_v50  ;;  %v373_v62 = vmul.f32 %v4268_v51, %v4985_v1  ;;  %v4269_v3 = vunpack.c.h.bf16 %v4324_v35 }
  0x2f   : > { %v405_v5 = vmax.f32 %v389_v52, 0.0  ;;  %v406_v6 = vmax.f32 %v390_v53, 0.0  ;;  %v407_v7 = vmax.f32 %v391_v54, 0.0  ;;  %v394_v8 = vadd.f32 %v5002_v10, %v372_v55  ;;  %v672_v52 = vld [vmem:[#allocation2 + $0x54] sm:$0xf] }
  0x30   : > { %v408_v9 = vmax.f32 %v392_v56, 0.0  ;;  %v409_v11 = vmax.f32 %v393_v61, 0.0  ;;  %v395_v13 = vadd.f32 %v5002_v10, %v373_v62  ;;  %v374_v14 = vmul.f32 %v4269_v3, %v4985_v1  ;;  %v686_v54 = vld [vmem:[#allocation2] sm:$0x1] }
  0x31   : > { %v4208_v15 = vpack.c.bf16 %v405_v5, %v405_v5  ;;  %v5111_v17 = vpack.c.bf16 %v406_v6, %v406_v6  ;;  %v4210_v18 = vpack.c.bf16 %v407_v7, %v407_v7  ;;  %v410_v19 = vmax.f32 %v394_v8, 0.0  ;;  %v717_v5 = vld [vmem:[#allocation2 + $0x8] sm:$0x1] }
  0x32   : > { %v5113_v20 = vpack.c.bf16 %v408_v9, %v408_v9  ;;  %v4212_v21 = vpack.c.bf16 %v409_v11, %v409_v11  ;;  %v411_v22 = vmax.f32 %v395_v13, 0.0  ;;  %v396_v23 = vadd.f32 %v5002_v10, %v374_v14  ;;  %v676_v14 = vld [vmem:[#allocation2 + $0x5c] sm:$0x1] }
  0x33   : > { %v533_v24 = vshrl.u32 %v4208_v15, 16  ;;  %v536_v25 = vshll.u32 %v4208_v15, 16  ;;  %v541_v26 = vshrl.u32 %v5111_v17, 16  ;;  %v550_v27 = vshrl.u32 %v4210_v18, 16 }
  0x34   : > { %v553_v31 = vshll.u32 %v4210_v18, 16  ;;  %v558_v32 = vshrl.u32 %v5113_v20, 16  ;;  %v567_v33 = vshrl.u32 %v4212_v21, 16  ;;  %v570_v34 = vshll.u32 %v4212_v21, 16  ;;  %v679_v21 = vld [vmem:[#allocation2 + $0x60] sm:$0xf] }
  0x35   : > { %v5118_v35 = vrot.slane %v533_v24, 7  ;;  %v5120_v36 = vrot.slane %v541_v26, 7  ;;  %v5122_v37 = vrot.slane %v550_v27, 7  ;;  %v5124_v39 = vpack.c.bf16 %v410_v19, %v410_v19 }
  0x36   : > { %v5126_v41 = vrot.slane %v558_v32, 7  ;;  %v5128_v45 = vrot.slane %v567_v33, 7  ;;  %v4214_v47 = vpack.c.bf16 %v411_v22, %v411_v22  ;;  %v412_v48 = vmax.f32 %v396_v23, 0.0 }
  0x37   : > { %v538_v49 = vor.u32 %v536_v25, %v5118_v35  ;;  %v548_v50 = vrot.slane %v5120_v36, 4  ;;  %v555_v51 = vor.u32 %v553_v31, %v5122_v37  ;;  %v575_v53 = vshrl.u32 %v5124_v39, 16 }
  0x38   : > { %v565_v56 = vrot.slane %v5126_v41, 4  ;;  %v572_v61 = vor.u32 %v570_v34, %v5128_v45  ;;  %v584_v62 = vshrl.u32 %v4214_v47, 16  ;;  %v587_v3 = vshll.u32 %v4214_v47, 16 }
  0x39   : > { %v659_v6 = vsel %vm5053_vm5, %v538_v49, %v658_v28  ;;  %v663_v7 = vsel %vm5042_vm4, %v548_v50, %v662_v30  ;;  %v666_v8 = vsel %vm5053_vm5, %v555_v51, %v665_v38  ;;  %v5148_v9 = vrot.slane %v575_v53, 7  ;;  %v689_v51 = vld [vmem:[#allocation2 + $0xc] sm:$0x1] }
  0x3a   : > { %660 = vst [vmem:[#allocation2 + $0x3c] sm:$0xf] %v659_v6  ;;  %664 = vst [vmem:[#allocation2 + $0x44] sm:$0x1] %v663_v7  ;;  %v670_v11 = vsel %vm5042_vm4, %v565_v56, %v669_v43  ;;  %v673_v13 = vsel %vm5053_vm5, %v572_v61, %v672_v52  ;;  %v5154_v15 = vrot.slane %v584_v62, 7  ;;  %v5156_v18 = vpack.c.bf16 %v412_v48, %v412_v48 }
  0x3b   : > { %667 = vst [vmem:[#allocation2 + $0x48] sm:$0xf] %v666_v8  ;;  %671 = vst [vmem:[#allocation2 + $0x50] sm:$0x1] %v670_v11  ;;  %v582_v19 = vrot.slane %v5148_v9, 4  ;;  %v687_v22 = vsel %vm5042_vm4, 0, %v686_v54 }
  0x3c   : > { %674 = vst [vmem:[#allocation2 + $0x54] sm:$0xf] %v673_v13  ;;  %v718_v23 = vsel %vm5136_vm7, 0, %v717_v5  ;;  %v471_v24 = vrot.slane %v5038_v57, 4  ;;  %v589_v25 = vor.u32 %v587_v3, %v5154_v15  ;;  %v592_v26 = vshrl.u32 %v5156_v18, 16 }
  0x3d   : > { %688 = vst [vmem:[#allocation2] sm:$0x1] %v687_v22  ;;  %719 = vst [vmem:[#allocation2 + $0x8] sm:$0x1] %v718_v23  ;;  %v476_v27 = vshll.u32 %v5028_v40, 16  ;;  %v488_v28 = vrot.slane %v5048_v60, 4  ;;  %v677_v30 = vsel %vm5042_vm4, %v582_v19, %v676_v14 }
  0x3e   : > { %v493_v57 = vshll.u32 %v5030_v42, 16  ;;  %v505_v32 = vrot.slane %v5059_v4, 4  ;;  %v510_v33 = vshll.u32 %v5032_v44, 16  ;;  %678 = vst [vmem:[#allocation2 + $0x5c] sm:$0x1] %v677_v30  ;;  %v680_v40 = vsel %vm5053_vm5, %v589_v25, %v679_v21 }
  0x3f   : > { %v594_v60 = vrot.slane %v592_v26, 7  ;;  %v478_v34 = vor.u32 %v476_v27, %v5046_v59  ;;  %v522_v38 = vrot.slane %v5068_v16, 4  ;;  %681 = vst [vmem:[#allocation2 + $0x60] sm:$0xf] %v680_v40  ;;  %v683_v43 = vld [vmem:[#allocation2 + $0x68] sm:$0x1] }
  0x40   : > { %v495_v47 = vor.u32 %v493_v57, %v5057_v2  ;;  %v512_v48 = vor.u32 %v510_v33, %v5064_v12  ;;  %v527_v42 = vshll.u32 %v5034_v46, 16  ;;  %v539_v4 = vrot.slane %v5118_v35, 4  ;;  %v692_v35 = vld [vmem:[#allocation2 + $0x18] sm:$0x1]  ;;  %v695_v52 = vld [vmem:[#allocation2 + $0x24] sm:$0x1] }
  0x41   : > { %v599_v44 = vrot.slane %v594_v60, 4  ;;  %v479_v49 = vsel %vm5172_vm8, %v471_v24, %v478_v34  ;;  %v544_v50 = vshll.u32 %v5111_v17, 16  ;;  %v556_v59 = vrot.slane %v5122_v37, 4  ;;  %v698_v56 = vld [vmem:[#allocation2 + $0x30] sm:$0x1] }
  0x42   : > { %631 = vst [vmem:[#allocation2 + $0x10] sm:$0xf] %v479_v49  ;;  %v496_v16 = vsel %vm5172_vm8, %v488_v28, %v495_v47  ;;  %v513_v2 = vsel %vm5172_vm8, %v505_v32, %v512_v48  ;;  %v529_v46 = vor.u32 %v527_v42, %v5086_v29  ;;  %v561_v12 = vshll.u32 %v5113_v20, 16  ;;  %v701_v61 = vld [vmem:[#allocation2 + $0x3c] sm:$0x1] }
  0x43   : > { %v684_v53 = vsel %vm5042_vm4, %v599_v44, %v683_v43  ;;  %640 = vst [vmem:[#allocation2 + $0x1c] sm:$0xf] %v496_v16  ;;  %647 = vst [vmem:[#allocation2 + $0x28] sm:$0xf] %v513_v2  ;;  %v546_v17 = vor.u32 %v544_v50, %v5120_v36  ;;  %v573_v37 = vrot.slane %v5128_v45, 4  ;;  %v578_v54 = vshll.u32 %v5124_v39, 16 }
  0x44   : > { %v713_v62 = vld [vmem:[#allocation2 + $0x6c] sm:$0x1]  ;;  %v720_v3 = vld [vmem:[#allocation2 + $0x14] sm:$0x1]  ;;  %685 = vst [vmem:[#allocation2 + $0x68] sm:$0x1] %v684_v53  ;;  %v530_v29 = vsel %vm5172_vm8, %v522_v38, %v529_v46  ;;  %v563_v20 = vor.u32 %v561_v12, %v5126_v41 }
  0x45   : > { %v590_v5 = vrot.slane %v5154_v15, 4  ;;  %v595_v6 = vshll.u32 %v5156_v18, 16  ;;  %v704_v7 = vld [vmem:[#allocation2 + $0x48] sm:$0x1]  ;;  %v707_v36 = vld [vmem:[#allocation2 + $0x54] sm:$0x1]  ;;  %v547_v39 = vsel %vm5172_vm8, %v539_v4, %v546_v17  ;;  %v580_v13 = vor.u32 %v578_v54, %v5148_v9 }
  0x46   : > { %v723_v8 = vld [vmem:[#allocation2 + $0x20] sm:$0x1]  ;;  %v726_v45 = vld [vmem:[#allocation2 + $0x2c] sm:$0x1]  ;;  %v729_v11 = vld [vmem:[#allocation2 + $0x38] sm:$0x1]  ;;  %v564_v21 = vsel %vm5172_vm8, %v556_v59, %v563_v20 }
  0x47   : > { %654 = vst [vmem:[#allocation2 + $0x34] sm:$0xf] %v530_v29  ;;  %v690_v14 = vsel %vm5042_vm4, 0, %v689_v51  ;;  %v693_v41 = vsel %vm5042_vm4, 0, %v692_v35  ;;  %v732_v15 = vld [vmem:[#allocation2 + $0x44] sm:$0x1]  ;;  %v597_v22 = vor.u32 %v595_v6, %v594_v60  ;;  %v581_v26 = vsel %vm5172_vm8, %v573_v37, %v580_v13 }
  0x48   : > { %v735_v19 = vld [vmem:[#allocation2 + $0x50] sm:$0x1]  ;;  %v744_v18 = vld [vmem:[#allocation2 + $0x74] sm:$0x1]  ;;  %661 = vst [vmem:[#allocation2 + $0x40] sm:$0xf] %v547_v39 }
  0x49   : > { %691 = vst [vmem:[#allocation2 + $0xc] sm:$0x1] %v690_v14  ;;  %694 = vst [vmem:[#allocation2 + $0x18] sm:$0x1] %v693_v41  ;;  %v696_v23 = vsel %vm5042_vm4, 0, %v695_v52  ;;  %v699_v9 = vsel %vm5042_vm4, 0, %v698_v56  ;;  %v598_v32 = vsel %vm5172_vm8, %v590_v5, %v597_v22 }
  0x4a   : > { %v738_v24 = vld [vmem:[#allocation2 + $0x5c] sm:$0x1]  ;;  %v747_v25 = vld [vmem:[#allocation2] sm:$0xf]  ;;  %668 = vst [vmem:[#allocation2 + $0x4c] sm:$0xf] %v564_v21 }
  0x4b   : > { %697 = vst [vmem:[#allocation2 + $0x24] sm:$0x1] %v696_v23  ;;  %700 = vst [vmem:[#allocation2 + $0x30] sm:$0x1] %v699_v9  ;;  %v702_v27 = vsel %vm5042_vm4, 0, %v701_v61  ;;  %v705_v28 = vsel %vm5042_vm4, 0, %v704_v7 }
  0x4c   : > { %v708_v30 = vsel %vm5042_vm4, 0, %v707_v36  ;;  %v710_v57 = vld [vmem:[#allocation2 + $0x60] sm:$0x1]  ;;  %675 = vst [vmem:[#allocation2 + $0x58] sm:$0xf] %v581_v26  ;;  %v714_v40 = vsel %vm5042_vm4, 0, %v713_v62 }
  0x4d   : > { %703 = vst [vmem:[#allocation2 + $0x3c] sm:$0x1] %v702_v27  ;;  %706 = vst [vmem:[#allocation2 + $0x48] sm:$0x1] %v705_v28  ;;  %v711_v33 = vsel %vm5042_vm4, 0, %v710_v57  ;;  %v721_v60 = vsel %vm5136_vm7, 0, %v720_v3 }
  0x4e   : > { %709 = vst [vmem:[#allocation2 + $0x54] sm:$0x1] %v708_v30  ;;  %v751_v34 = vld [vmem:[#allocation2 + $0x8] sm:$0x1]  ;;  %682 = vst [vmem:[#allocation2 + $0x64] sm:$0xf] %v598_v32 }
  0x4f   : > { %712 = vst [vmem:[#allocation2 + $0x60] sm:$0x1] %v711_v33  ;;  %715 = vst [vmem:[#allocation2 + $0x6c] sm:$0x1] %v714_v40  ;;  %v724_v38 = vsel %vm5136_vm7, 0, %v723_v8  ;;  %v727_v43 = vsel %vm5136_vm7, 0, %v726_v45 }
  0x50   : > { %722 = vst [vmem:[#allocation2 + $0x14] sm:$0x1] %v721_v60  ;;  %v730_v47 = vsel %vm5136_vm7, 0, %v729_v11  ;;  %v733_v48 = vsel %vm5136_vm7, 0, %v732_v15  ;;  %725 = vst [vmem:[#allocation2 + $0x20] sm:$0x1] %v724_v38 }
  0x51   : > { %728 = vst [vmem:[#allocation2 + $0x2c] sm:$0x1] %v727_v43  ;;  %731 = vst [vmem:[#allocation2 + $0x38] sm:$0x1] %v730_v47  ;;  %v736_v42 = vsel %vm5136_vm7, 0, %v735_v19  ;;  %v739_v4 = vsel %vm5136_vm7, 0, %v738_v24 }
  0x52   : > { %734 = vst [vmem:[#allocation2 + $0x44] sm:$0x1] %v733_v48  ;;  %v745_v44 = vsel %vm5136_vm7, 0, %v744_v18  ;;  %v748_v49 = vsel %vm5053_vm5, 0, %v747_v25  ;;  %737 = vst [vmem:[#allocation2 + $0x50] sm:$0x1] %v736_v42 }
  0x53   : > { %740 = vst [vmem:[#allocation2 + $0x5c] sm:$0x1] %v739_v4  ;;  %v741_v50 = vld [vmem:[#allocation2 + $0x68] sm:$0x1]  ;;  %746 = vst [vmem:[#allocation2 + $0x74] sm:$0x1] %v745_v44 }
  0x54   : > { %749 = vst [vmem:[#allocation2] sm:$0xf] %v748_v49  ;;  %v752_v59 = vsel %vm5042_vm4, 0, %v751_v34  ;;  %v742_v51 = vsel %vm5136_vm7, 0, %v741_v50  ;;  %757 = sbr.rel (%p3998_p8) target bundleno = 109 (0x6d), region = 40 }
  0x55   : > { %753 = vst [vmem:[#allocation2 + $0x8] sm:$0x1] %v752_v59  ;;  %743 = vst [vmem:[#allocation2 + $0x68] sm:$0x1] %v742_v51 }
  0x59   : > { %v4271_v16 = vld [vmem:[%s761_s15] sm:$0xff]  }
  0x5a   : > { %v4272_v2 = vunpack.c.l.bf16 %v4271_v16  ;;  %v4273_v46 = vunpack.c.h.bf16 %v4271_v16 }
  0x5b   : > { %v798_v5 = vld [vmem:[#allocation2] sm:$0xf] }
  0x5c   : > { %v766_v12 = vmul.f32 %v4272_v2, %v4985_v1  ;;  %v767_v35 = vmul.f32 %v4273_v46, %v4985_v1  ;;  %v802_v6 = vld [vmem:[#allocation2 + $0x8] sm:$0x1] }
  0x5e   : > { %v768_v55 = vadd.f32 %v5002_v10, %v766_v12  ;;  %v769_v52 = vadd.f32 %v5002_v10, %v767_v35 }
  0x60   : > { %v770_v53 = vmax.f32 %v768_v55, 0.0  ;;  %v771_v17 = vmax.f32 %v769_v52, 0.0 }
  0x62   : > { %v4217_v37 = vpack.c.bf16 %v770_v53, %v770_v53  ;;  %v4218_v54 = vpack.c.bf16 %v771_v17, %v771_v17 }
  0x64   : > { %v779_v56 = vshrl.u32 %v4217_v37, 16  ;;  %v782_v61 = vshll.u32 %v4217_v37, 16  ;;  %v787_v62 = vshrl.u32 %v4218_v54, 16  ;;  %v790_v3 = vshll.u32 %v4218_v54, 16 }
  0x66   : > { %v781_v29 = vrot.slane %v779_v56, 7  ;;  %v789_v20 = vrot.slane %v787_v62, 7 }
  0x68   : > { %v784_v7 = vor.u32 %v782_v61, %v781_v29  ;;  %v785_v36 = vrot.slane %v781_v29, 4  ;;  %v792_v8 = vor.u32 %v790_v3, %v789_v20  ;;  %v794_v45 = vrot.slane %v789_v20, 4 }
  0x6a   : > { %v799_v11 = vsel %vm5053_vm5, %v784_v7, %v798_v5  ;;  %v793_v39 = vsel %vm5172_vm8, %v785_v36, %v792_v8  ;;  %v803_v13 = vsel %vm5042_vm4, %v794_v45, %v802_v6 }
  0x6b   : > { %800 = vst [vmem:[#allocation2] sm:$0xf] %v799_v11  ;;  %801 = vst [vmem:[#allocation2 + $0x4] sm:$0xf] %v793_v39 }
  0x6c   : > { %804 = vst [vmem:[#allocation2 + $0x8] sm:$0x1] %v803_v13 }
  0x6d PF: > { %v806_v14 = vld [vmem:[#allocation2 + $0x6c] sm:$0xf]  ;;  %809 = vst [vmem:[#allocation2 + $0x70] sm:$0xf] %v4896_v0  ;;  %s813_s10 = sadd.s32 8, %s4965_s28 }
  0x6e   : > { %v810_v41 = vld [vmem:[#allocation2 + $0x74] sm:$0x1]  ;;  %v807_v15 = vsel %vm5053_vm5, 0, %v806_v14  ;;  %p4004_p9 = scmp.ge.s32.totalorder %s813_s10, 16 }
  0x6f   : > { %v811_v19 = vsel %vm5042_vm4, 0, %v810_v41  ;;  %808 = vst [vmem:[#allocation2 + $0x6c] sm:$0xf] %v807_v15 }
  0x70   : > { %812 = vst [vmem:[#allocation2 + $0x74] sm:$0x1] %v811_v19  ;;  %817 = sbr.rel (%p4004_p9) target bundleno = 137 (0x89), region = 44 }
  0x75   : > { %v4325_v18 = vld [vmem:[%s4988_s27 + $0x40] sm:$0xff]  }
  0x76   : > { %v4276_v21 = vunpack.c.l.bf16 %v4325_v18  ;;  %v4277_v22 = vunpack.c.h.bf16 %v4325_v18  ;;  %v857_v34 = vld [vmem:[#allocation2 + $0x6c] sm:$0xf] }
  0x77   : > { %v861_v38 = vld [vmem:[#allocation2 + $0x74] sm:$0x1] }
  0x78   : > { %v825_v23 = vmul.f32 %v4276_v21, %v4985_v1  ;;  %v826_v0 = vmul.f32 %v4277_v22, %v4985_v1 }
  0x7a   : > { %v827_v9 = vadd.f32 %v5002_v10, %v825_v23  ;;  %v828_v24 = vadd.f32 %v5002_v10, %v826_v0 }
  0x7c   : > { %v829_v25 = vmax.f32 %v827_v9, 0.0  ;;  %v830_v26 = vmax.f32 %v828_v24, 0.0 }
  0x7e   : > { %v4220_v27 = vpack.c.bf16 %v829_v25, %v829_v25  ;;  %v4221_v28 = vpack.c.bf16 %v830_v26, %v830_v26 }
  0x80   : > { %v838_v30 = vshrl.u32 %v4220_v27, 16  ;;  %v841_v57 = vshll.u32 %v4220_v27, 16  ;;  %v846_v32 = vshrl.u32 %v4221_v28, 16  ;;  %v849_v33 = vshll.u32 %v4221_v28, 16 }
  0x82   : > { %v840_v40 = vrot.slane %v838_v30, 7  ;;  %v848_v60 = vrot.slane %v846_v32, 7 }
  0x84   : > { %v843_v43 = vor.u32 %v841_v57, %v840_v40  ;;  %v844_v47 = vrot.slane %v840_v40, 4  ;;  %v851_v48 = vor.u32 %v849_v33, %v848_v60  ;;  %v853_v1 = vrot.slane %v848_v60, 4 }
  0x86   : > { %v858_v42 = vsel %vm5053_vm5, %v843_v43, %v857_v34  ;;  %v852_v10 = vsel %vm5172_vm8, %v844_v47, %v851_v48  ;;  %v862_v4 = vsel %vm5042_vm4, %v853_v1, %v861_v38 }
  0x87   : > { %859 = vst [vmem:[#allocation2 + $0x6c] sm:$0xf] %v858_v42  ;;  %860 = vst [vmem:[#allocation2 + $0x70] sm:$0xf] %v852_v10 }
  0x88   : > { %863 = vst [vmem:[#allocation2 + $0x74] sm:$0x1] %v862_v4 }
  0x89 PF: > { %v4694_v44 = vld [vmem:[%s5892_s1 + $0x78] sm:$0xff]   ;;  %v4698_v31 = vld [vmem:[%s5892_s1 + $0x70] sm:$0xff]   ;;  %v4702_v16 = vld [vmem:[%s5892_s1 + $0x68] sm:$0xff]   ;;  %vm1195_vm9 = vcmask 1042432   ;;  %vm1196_vm10 = vcmask 1046532  }
  0x8a   : > { %v4695_v49 = vld [vmem:[%s5892_s1 + $0xf8] sm:$0xff]   ;;  %4333 = vmatprep.subr.bf16.mxu0 %v4694_v44  ;;  %v4699_v50 = vld [vmem:[%s5892_s1 + $0xf0] sm:$0xff]   ;;  %v4703_v2 = vld [vmem:[%s5892_s1 + $0xe8] sm:$0xff]   ;;  %vm920_vm11 = vsmask.f32 3328 }
  0x8b   : > { %v4696_v63 = vld [vmem:[%s5892_s1 + $0x38] sm:$0xff]   ;;  %4397 = vmatprep.subr.bf16.mxu1 %v4695_v49  ;;  %v4700_v59 = vld [vmem:[%s5892_s1 + $0x30] sm:$0xff]   ;;  %v4704_v46 = vld [vmem:[%s5892_s1 + $0x28] sm:$0xff]   ;;  %vm921_vm12 = vsmask.f32 7440 }
  0x8c   : > { %v4697_v58 = vld [vmem:[%s5892_s1 + $0xb8] sm:$0xff]   ;;  %4334 = vmatpush3.bf16.msra.mxu0 %v4696_v63  ;;  %v4701_v51 = vld [vmem:[%s5892_s1 + $0xb0] sm:$0xff]   ;;  %v4705_v12 = vld [vmem:[%s5892_s1 + $0xa8] sm:$0xff]  }
  0x8d   : > { %4398 = vmatpush3.bf16.msra.mxu1 %v4697_v58  ;;  %4335 = vmatprep.subr.bf16.mxu0 %v4698_v31  ;;  %v4706_v35 = vld [vmem:[%s5892_s1 + $0x60] sm:$0xff]   ;;  %v4710_v17 = vld [vmem:[%s5892_s1 + $0x58] sm:$0xff]   ;;  %v4714_v61 = vld [vmem:[%s5892_s1 + $0x50] sm:$0xff]  }
  0x8e   : > { %4399 = vmatprep.subr.bf16.mxu1 %v4699_v50  ;;  %v4707_v55 = vld [vmem:[%s5892_s1 + $0xe0] sm:$0xff]   ;;  %v4711_v37 = vld [vmem:[%s5892_s1 + $0xd8] sm:$0xff]   ;;  %v4715_v62 = vld [vmem:[%s5892_s1 + $0xd0] sm:$0xff]  }
  0x8f   : > { %v4708_v52 = vld [vmem:[%s5892_s1 + $0x20] sm:$0xff]   ;;  %v4712_v54 = vld [vmem:[%s5892_s1 + $0x18] sm:$0xff]   ;;  %v4716_v3 = vld [vmem:[%s5892_s1 + $0x10] sm:$0xff]  }
  0x90   : > { %4336 = vmatpush3.bf16.msra.mxu0 %v4700_v59  ;;  %v4709_v53 = vld [vmem:[%s5892_s1 + $0xa0] sm:$0xff]   ;;  %v4713_v56 = vld [vmem:[%s5892_s1 + $0x98] sm:$0xff]   ;;  %v4717_v29 = vld [vmem:[%s5892_s1 + $0x90] sm:$0xff]  }
  0x91   : > { %4400 = vmatpush3.bf16.msra.mxu1 %v4701_v51  ;;  %4337 = vmatprep.subr.bf16.mxu0 %v4702_v16  ;;  %v4718_v20 = vld [vmem:[%s5892_s1 + $0x48] sm:$0xff]   ;;  %v4722_v36 = vld [vmem:[%s5892_s1 + $0x40] sm:$0xff]   ;;  %v4732_v22 = vld [vmem:[%s5892_s1 + $0x178] sm:$0xff]  }
  0x92   : > { %4401 = vmatprep.subr.bf16.mxu1 %v4703_v2  ;;  %v4719_v5 = vld [vmem:[%s5892_s1 + $0xc8] sm:$0xff]   ;;  %v4723_v8 = vld [vmem:[%s5892_s1 + $0xc0] sm:$0xff]   ;;  %vm5387_vm13 = vmor %vm1195_vm9, %vm1196_vm10 }
  0x93   : > { %v4720_v6 = vld [vmem:[%s5892_s1 + $0x8] sm:$0xff]   ;;  %v4724_v45 = vld [vmem:[%s5892_s1] sm:$0xff]   ;;  %v1287_v38 = vld [vmem:[#allocation2 + $0x10] sm:$0xf] }
  0x94   : > { %4338 = vmatpush3.bf16.msra.mxu0 %v4704_v46  ;;  %v4721_v7 = vld [vmem:[%s5892_s1 + $0x88] sm:$0xff]   ;;  %v4725_v11 = vld [vmem:[%s5892_s1 + $0x80] sm:$0xff]   ;;  %vm5393_vm14 = vmor %vm920_vm11, %vm921_vm12  ;;  %1303 = vst [vmem:[#allocation3 + $0x30] sm:$0xf] %v1287_v38 }
  0x95   : > { %4402 = vmatpush3.bf16.msra.mxu1 %v4705_v12  ;;  %4339 = vmatprep.subr.bf16.mxu0 %v4706_v35  ;;  %v864_v39 = vld [vmem:[#allocation2] sm:$0xf]  ;;  %v865_v13 = vld [vmem:[#allocation2 + $0x4] sm:$0xf]  ;;  %v898_v15 = vld [vmem:[#allocation2 + $0x8] sm:$0x1] }
  0x96   : > { %4403 = vmatprep.subr.bf16.mxu1 %v4707_v55  ;;  %v896_v14 = vld [vmem:[#allocation2] sm:$0xf]  ;;  %880 = vst [vmem:[#allocation3] sm:$0xf] %v864_v39  ;;  %881 = vst [vmem:[#allocation3 + $0x24] sm:$0xf] %v865_v13 }
  0x97   : > { %v897_v41 = vld [vmem:[#allocation2 + $0x4] sm:$0xf]  ;;  %v924_v19 = vshrl.u32 %v896_v14, 16  ;;  %v927_v18 = vshll.u32 %v896_v14, 16  ;;  %v943_v0 = vshll.u32 %v898_v15, 16  ;;  %v4747_v13 = vld [vmem:[%s5892_s1 + $0x1f8] sm:$0xff]  }
  0x98   : > { %4340 = vmatpush3.bf16.msra.mxu0 %v4708_v52  ;;  %v933_v21 = vshll.u32 %v897_v41, 16  ;;  %v937_v23 = vshrl.u32 %v897_v41, 16  ;;  %v1147_v9 = vld [vmem:[#allocation2] sm:$0xe]  ;;  %v1148_v24 = vld [vmem:[#allocation2 + $0x4] sm:$0xf] }
  0x99   : > { %4404 = vmatpush3.bf16.msra.mxu1 %v4709_v53  ;;  %4341 = vmatprep.subr.bf16.mxu0 %v4710_v17  ;;  %v926_v25 = vrot.slane %v924_v19, 4  ;;  %v929_v26 = vrot.slane %v927_v18, 5  ;;  %v1149_v28 = vld [vmem:[#allocation2 + $0x8] sm:$0x1]  ;;  %v4011_v57 = vrot.slane %v1147_v9, 9  ;;  %v1200_v33 = vrot.slane %v1148_v24, 5 }
  0x9a   : > { %4405 = vmatprep.subr.bf16.mxu1 %v4711_v37  ;;  %v935_v27 = vrot.slane %v933_v21, 5  ;;  %v939_v32 = vrot.slane %v937_v23, 4  ;;  %v1203_v40 = vrot.slane %v1149_v28, 5  ;;  %v1286_v60 = vld [vmem:[#allocation2 + $0xc] sm:$0xf]  ;;  %v945_v48 = vrot.slane %v943_v0, 5 }
  0x9b   : > { %v930_v34 = vor.u32 %v929_v26, %v926_v25  ;;  %1302 = vst [vmem:[#allocation3 + $0xc] sm:$0xf] %v1286_v60  ;;  %v1201_v1 = vsel %vm5387_vm13, %v4011_v57, %v1200_v33  ;;  %v1202_v42 = vrot.slane %v1200_v33, 4  ;;  %v866_v4 = vld [vmem:[#allocation2 + $0xc] sm:$0xf]  ;;  %v4733_v15 = vld [vmem:[%s5892_s1 + $0x138] sm:$0xff]  }
  0x9c   : > { %4342 = vmatpush3.bf16.msra.mxu0 %v4712_v54  ;;  %v940_v47 = vor.u32 %v939_v32, %v935_v27  ;;  %1270 = vst [vmem:[#allocation3 + $0x8] sm:$0xf] %v1201_v1  ;;  %v867_v44 = vld [vmem:[#allocation2 + $0x10] sm:$0xf]  ;;  %882 = vst [vmem:[#allocation3 + $0x48] sm:$0xf] %v866_v4 }
  0x9d   : > { %4406 = vmatpush3.bf16.msra.mxu1 %v4713_v56  ;;  %4343 = vmatprep.subr.bf16.mxu0 %v4714_v61  ;;  %v931_v10 = vrot.slane %v930_v34, 4  ;;  %v1204_v63 = vsel %vm5387_vm13, %v1202_v42, %v1203_v40  ;;  %883 = vst [vmem:[#allocation3 + $0x6c] sm:$0xf] %v867_v44  ;;  %v899_v58 = vld [vmem:[#allocation2 + $0xc] sm:$0xf]  ;;  %v4739_v26 = vld [vmem:[%s5892_s1 + $0x170] sm:$0xff]  }
  0x9e   : > { %4407 = vmatprep.subr.bf16.mxu1 %v4715_v62  ;;  %v941_v49 = vrot.slane %v940_v47, 4  ;;  %v900_v31 = vld [vmem:[#allocation2 + $0x10] sm:$0xf]  ;;  %1271 = vst [vmem:[#allocation3 + $0x2c] sm:$0xf] %v1204_v63  ;;  %v948_v51 = vshrl.u32 %v899_v58, 16 }
  0x9f   : > { %v936_v50 = vsel %vm5393_vm14, %v931_v10, %v935_v27  ;;  %v901_v59 = vld [vmem:[#allocation2 + $0x14] sm:$0x1]  ;;  %v951_v16 = vshll.u32 %v899_v58, 16  ;;  %v957_v2 = vshll.u32 %v900_v31, 16  ;;  %v961_v12 = vshrl.u32 %v900_v31, 16  ;;  %v4746_v4 = vld [vmem:[%s5892_s1 + $0x168] sm:$0xff]  }
  0xa0   : > { %4344 = vmatpush3.bf16.msra.mxu0 %v4716_v3  ;;  %v946_v46 = vsel %vm5393_vm14, %v941_v49, %v945_v48  ;;  %1131 = vst [vmem:[#allocation3 + $0x4] sm:$0xf] %v936_v50  ;;  %v967_v35 = vshll.u32 %v901_v59, 16  ;;  %v1150_v55 = vld [vmem:[#allocation2 + $0xc] sm:$0xe]  ;;  %v950_v53 = vrot.slane %v948_v51, 4 }
  0xa1   : > { %4408 = vmatpush3.bf16.msra.mxu1 %v4717_v29  ;;  %4345 = vmatprep.subr.bf16.mxu0 %v4718_v20  ;;  %v1151_v52 = vld [vmem:[#allocation2 + $0x10] sm:$0xf]  ;;  %1132 = vst [vmem:[#allocation3 + $0x28] sm:$0xf] %v946_v46  ;;  %v953_v17 = vrot.slane %v951_v16, 5  ;;  %v959_v37 = vrot.slane %v957_v2, 5 }
  0xa2   : > { %4409 = vmatprep.subr.bf16.mxu1 %v4719_v5  ;;  %v1152_v54 = vld [vmem:[#allocation2 + $0x14] sm:$0x1]  ;;  %v4012_v56 = vrot.slane %v1150_v55, 9  ;;  %v963_v61 = vrot.slane %v961_v12, 4  ;;  %v969_v62 = vrot.slane %v967_v35, 5  ;;  %v1207_v3 = vrot.slane %v1151_v52, 5 }
  0xa3   : > { %v1210_v29 = vrot.slane %v1152_v54, 5  ;;  %v1288_v20 = vld [vmem:[#allocation2 + $0x18] sm:$0xf]  ;;  %v954_v5 = vor.u32 %v953_v17, %v950_v53  ;;  %v869_v39 = vld [vmem:[#allocation2 + $0x1c] sm:$0xf]  ;;  %v4740_v33 = vld [vmem:[%s5892_s1 + $0x130] sm:$0xff]  }
  0xa4   : > { %4346 = vmatpush3.bf16.msra.mxu0 %v4720_v6  ;;  %v1289_v6 = vld [vmem:[#allocation2 + $0x1c] sm:$0xf]  ;;  %1304 = vst [vmem:[#allocation3 + $0x54] sm:$0xf] %v1288_v20  ;;  %v4731_v41 = vld [vmem:[#allocation3 + $0xc] ss:$36 sps:$4 sm:$0xff]  }
  0xa5   : > { %4410 = vmatpush3.bf16.msra.mxu1 %v4721_v7  ;;  %4347 = vmatprep.subr.bf16.mxu0 %v4722_v36  ;;  %v964_v7 = vor.u32 %v963_v61, %v959_v37  ;;  %v1208_v36 = vsel %vm5387_vm13, %v4012_v56, %v1207_v3  ;;  %1305 = vst [vmem:[#allocation3 + $0x78] sm:$0xf] %v1289_v6  ;;  %v4729_v14 = vld [vmem:[#allocation3 + $0x8] ss:$36 sps:$4 sm:$0xff]   ;;  %885 = vst [vmem:[#allocation3 + $0xb4] sm:$0xf] %v869_v39 }
  0xa6   : > { %4411 = vmatprep.subr.bf16.mxu1 %v4723_v8  ;;  %v1209_v8 = vrot.slane %v1207_v3, 4  ;;  %1272 = vst [vmem:[#allocation3 + $0x50] sm:$0xf] %v1208_v36  ;;  %v903_v23 = vld [vmem:[#allocation2 + $0x1c] sm:$0xf]  ;;  %3272 = vmatprep.mubr.bf16.mxu1 %v4731_v41  ;;  %v4748_v12 = vld [vmem:[%s5892_s1 + $0x128] sm:$0xff]  }
  0xa7   : > { %v965_v19 = vrot.slane %v964_v7, 4  ;;  %v4726_v0 = vld [vmem:[#allocation3] ss:$36 sps:$4 sm:$0xff]   ;;  %v904_v27 = vld [vmem:[#allocation2 + $0x20] sm:$0x1]  ;;  %v981_v57 = vshll.u32 %v903_v23, 16 }
  0xa8   : > { %4348 = vmatpush3.bf16.msra.mxu0 %v4724_v45  ;;  %v955_v45 = vrot.slane %v954_v5, 4  ;;  %v1211_v18 = vsel %vm5387_vm13, %v1209_v8, %v1210_v29  ;;  %v4728_v9 = vld [vmem:[#allocation3 + $0x4] ss:$36 sps:$4 sm:$0xff]   ;;  %v985_v32 = vshrl.u32 %v903_v23, 16  ;;  %v991_v60 = vshll.u32 %v904_v27, 16 }
  0xa9   : > { %4412 = vmatpush3.bf16.msra.mxu1 %v4725_v11  ;;  %4461 = vmatprep.subr.bf16.mxu0 %v4732_v22  ;;  %v868_v11 = vld [vmem:[#allocation2 + $0x18] sm:$0xf]  ;;  %1273 = vst [vmem:[#allocation3 + $0x74] sm:$0xf] %v1211_v18  ;;  %v970_v24 = vsel %vm5393_vm14, %v965_v19, %v969_v62  ;;  %v1154_v38 = vld [vmem:[#allocation2 + $0x1c] sm:$0xf] }
  0xaa   : > { %884 = vst [vmem:[#allocation3 + $0x90] sm:$0xf] %v868_v11  ;;  %v960_v21 = vsel %vm5393_vm14, %v955_v45, %v959_v37  ;;  %v902_v22 = vld [vmem:[#allocation2 + $0x18] sm:$0xf]  ;;  %4525 = vmatprep.subr.bf16.mxu1 %v4747_v13  ;;  %1134 = vst [vmem:[#allocation3 + $0x70] sm:$0xf] %v970_v24  ;;  %3175 = vmatprep.mubr.bf16.mxu0 %v4728_v9 }
  0xab   : > { %1133 = vst [vmem:[#allocation3 + $0x4c] sm:$0xf] %v960_v21  ;;  %v972_v25 = vshrl.u32 %v902_v22, 16  ;;  %v975_v28 = vshll.u32 %v902_v22, 16  ;;  %v1153_v34 = vld [vmem:[#allocation2 + $0x18] sm:$0xe]  ;;  %3176 = vmatmul.mubr.bf16.vlgmr.msra.gmra.mxu0 %v4726_v0 }
  0xac   : > { %3273 = vmatmul.mubr.bf16.vlgmr.msra.gmra.mxu1 %v4729_v14  ;;  %v983_v48 = vrot.slane %v981_v57, 5  ;;  %v987_v1 = vrot.slane %v985_v32, 4  ;;  %v1155_v42 = vld [vmem:[#allocation2 + $0x20] sm:$0x1]  ;;  %v4013_v10 = vrot.slane %v1153_v34, 9  ;;  %4462 = vmatpush3.bf16.msra.mxu0 %v4733_v15  ;;  %v993_v44 = vrot.slane %v991_v60, 5 }
  0xad   : > { %v974_v40 = vrot.slane %v972_v25, 4  ;;  %v977_v47 = vrot.slane %v975_v28, 5  ;;  %v1214_v49 = vrot.slane %v1154_v38, 5  ;;  %v1217_v63 = vrot.slane %v1155_v42, 5  ;;  %v1290_v58 = vld [vmem:[#allocation2 + $0x24] sm:$0xf]  ;;  %4463 = vmatprep.subr.bf16.mxu0 %v4739_v26 }
  0xae   : > { %v988_v50 = vor.u32 %v987_v1, %v983_v48  ;;  %v1291_v59 = vld [vmem:[#allocation2 + $0x28] sm:$0xf]  ;;  %1306 = vst [vmem:[#allocation3 + $0x9c] sm:$0xf] %v1290_v58  ;;  %v4736_v51 = vld [vmem:[#allocation3 + $0x54] ss:$36 sps:$4 sm:$0xff]  }
  0xaf   : > { %v978_v31 = vor.u32 %v977_v47, %v974_v40  ;;  %v1215_v2 = vsel %vm5387_vm13, %v4013_v10, %v1214_v49  ;;  %v1216_v46 = vrot.slane %v1214_v49, 4  ;;  %1307 = vst [vmem:[#allocation3 + $0xc0] sm:$0xf] %v1291_v59  ;;  %v4749_v53 = vld [vmem:[%s5892_s1 + $0x1b8] sm:$0xff]   ;;  %3280 = vmatprep.mubr.bf16.mxu1 %v4736_v51  ;;  %v870_v3 = vld [vmem:[#allocation2 + $0x24] sm:$0xf] }
  0xb0   : > { %v4738_v16 = vld [vmem:[#allocation3 + $0x50] ss:$36 sps:$4 sm:$0xff]   ;;  %v989_v52 = vrot.slane %v988_v50, 4  ;;  %1274 = vst [vmem:[#allocation3 + $0x98] sm:$0xf] %v1215_v2  ;;  %4464 = vmatpush3.bf16.msra.mxu0 %v4740_v33  ;;  %4526 = vmatpush3.bf16.msra.mxu1 %v4749_v53  ;;  %v4755_v22 = vld [vmem:[%s5892_s1 + $0x160] sm:$0xff]  }
  0xb1   : > { %v979_v55 = vrot.slane %v978_v31, 4  ;;  %v2134_v17 = vld [vmem:[#allocation3 + $0x6c] sm:$0xff]  ;;  %v1218_v54 = vsel %vm5387_vm13, %v1216_v46, %v1217_v63  ;;  %4465 = vmatprep.subr.bf16.mxu0 %v4746_v4  ;;  %886 = vst [vmem:[#allocation3 + $0xd8] sm:$0xf] %v870_v3  ;;  %v907_v6 = vld [vmem:[#allocation2 + $0x2c] sm:$0x1] }
  0xb2   : > { %v2129_v35 = vld [vmem:[#allocation3 + $0x48] sm:$0xff]  ;;  %v994_v62 = vsel %vm5393_vm14, %v989_v52, %v993_v44  ;;  %1275 = vst [vmem:[#allocation3 + $0xbc] sm:$0xf] %v1218_v54  ;;  %v871_v29 = vld [vmem:[#allocation2 + $0x28] sm:$0xf]  ;;  %v1015_v39 = vshll.u32 %v907_v6, 16 }
  0xb3   : > { %v4734_v37 = vld [vmem:[#allocation3 + $0x4c] ss:$36 sps:$4 sm:$0xff]   ;;  %v4044_v56 = vcombine.low %v2129_v35, %v2134_v17  ;;  %v984_v61 = vsel %vm5393_vm14, %v979_v55, %v983_v48  ;;  %1136 = vst [vmem:[#allocation3 + $0xb8] sm:$0xf] %v994_v62  ;;  %887 = vst [vmem:[#allocation3 + $0xfc] sm:$0xf] %v871_v29 }
  0xb4   : > { %3281 = vmatmul.mubr.bf16.gmra.mxu1 %v4738_v16  ;;  %3183 = vmatprep.mubr.bf16.mxu0 %v4734_v37  ;;  %1135 = vst [vmem:[#allocation3 + $0x94] sm:$0xf] %v984_v61  ;;  %v905_v20 = vld [vmem:[#allocation2 + $0x24] sm:$0xf]  ;;  %v906_v5 = vld [vmem:[#allocation2 + $0x28] sm:$0xf] }
  0xb5   : > { %3184 = vmatmul.mubr.bf16.gmra.mxu0 %v4044_v56  ;;  %v996_v7 = vshrl.u32 %v905_v20, 16  ;;  %v999_v36 = vshll.u32 %v905_v20, 16  ;;  %v1005_v8 = vshll.u32 %v906_v5, 16  ;;  %v1009_v45 = vshrl.u32 %v906_v5, 16  ;;  %v1156_v11 = vld [vmem:[#allocation2 + $0x24] sm:$0xe] }
  0xb6   : > { %4466 = vmatpush3.bf16.msra.mxu0 %v4748_v12  ;;  %v1157_v13 = vld [vmem:[#allocation2 + $0x28] sm:$0xf]  ;;  %v1158_v14 = vld [vmem:[#allocation2 + $0x2c] sm:$0x1]  ;;  %v4014_v41 = vrot.slane %v1156_v11, 9  ;;  %v4756_v24 = vld [vmem:[%s5892_s1 + $0x1f0] sm:$0xff]  }
  0xb7   : > { %v998_v15 = vrot.slane %v996_v7, 4  ;;  %v1001_v19 = vrot.slane %v999_v36, 5  ;;  %v1007_v18 = vrot.slane %v1005_v8, 5  ;;  %v1011_v21 = vrot.slane %v1009_v45, 4  ;;  %v1292_v9 = vld [vmem:[#allocation2 + $0x30] sm:$0xf]  ;;  %4467 = vmatprep.subr.bf16.mxu0 %v4755_v22  ;;  %4527 = vmatprep.subr.bf16.mxu1 %v4756_v24 }
  0xb8   : > { %v1221_v23 = vrot.slane %v1157_v13, 5  ;;  %v1224_v0 = vrot.slane %v1158_v14, 5  ;;  %v4743_v25 = vld [vmem:[#allocation3 + $0x9c] ss:$36 sps:$4 sm:$0xff]   ;;  %v1017_v57 = vrot.slane %v1015_v39, 5  ;;  %v4757_v44 = vld [vmem:[%s5892_s1 + $0x120] sm:$0xff]  }
  0xb9   : > { %v4745_v26 = vld [vmem:[#allocation3 + $0x98] ss:$36 sps:$4 sm:$0xff]   ;;  %v1002_v27 = vor.u32 %v1001_v19, %v998_v15  ;;  %v1012_v28 = vor.u32 %v1011_v21, %v1007_v18  ;;  %1308 = vst [vmem:[#allocation3 + $0xe4] sm:$0xf] %v1292_v9  ;;  %3288 = vmatprep.mubr.bf16.mxu1 %v4743_v25  ;;  %v910_v59 = vld [vmem:[#allocation2 + $0x38] sm:$0x1] }
  0xba   : > { %v2144_v33 = vld [vmem:[#allocation3 + $0xb4] sm:$0xff]  ;;  %v1222_v60 = vsel %vm5387_vm13, %v4014_v41, %v1221_v23  ;;  %v1223_v34 = vrot.slane %v1221_v23, 4  ;;  %v1293_v1 = vld [vmem:[#allocation2 + $0x34] sm:$0xf]  ;;  %4468 = vmatpush3.bf16.msra.mxu0 %v4757_v44  ;;  %v1039_v12 = vshll.u32 %v910_v59, 16  ;;  %v4764_v55 = vld [vmem:[%s5892_s1 + $0x158] sm:$0xff]  }
  0xbb   : > { %v2139_v32 = vld [vmem:[#allocation3 + $0x90] sm:$0xff]  ;;  %v1003_v47 = vrot.slane %v1002_v27, 4  ;;  %v1013_v48 = vrot.slane %v1012_v28, 4  ;;  %1276 = vst [vmem:[#allocation3 + $0xe0] sm:$0xf] %v1222_v60  ;;  %v4758_v49 = vld [vmem:[%s5892_s1 + $0x1b0] sm:$0xff]   ;;  %4469 = vmatprep.subr.bf16.mxu0 %v4764_v55 }
  0xbc   : > { %v4741_v40 = vld [vmem:[#allocation3 + $0x94] ss:$36 sps:$4 sm:$0xff]   ;;  %v4053_v38 = vcombine.low %v2139_v32, %v2144_v33  ;;  %3289 = vmatmul.mubr.bf16.gmra.mxu1 %v4745_v26  ;;  %v1225_v42 = vsel %vm5387_vm13, %v1223_v34, %v1224_v0  ;;  %1309 = vst [vmem:[#allocation3 + $0x108] sm:$0xf] %v1293_v1  ;;  %v873_v58 = vld [vmem:[#allocation2 + $0x34] sm:$0xf] }
  0xbd   : > { %3191 = vmatprep.mubr.bf16.mxu0 %v4741_v40  ;;  %v1008_v10 = vsel %vm5393_vm14, %v1003_v47, %v1007_v18  ;;  %v1018_v4 = vsel %vm5393_vm14, %v1013_v48, %v1017_v57  ;;  %1277 = vst [vmem:[#allocation3 + $0x104] sm:$0xf] %v1225_v42  ;;  %v872_v63 = vld [vmem:[#allocation2 + $0x30] sm:$0xf]  ;;  %4528 = vmatpush3.bf16.msra.mxu1 %v4758_v49  ;;  %889 = vst [vmem:[#allocation3 + $0x144] sm:$0xf] %v873_v58 }
  0xbe   : > { %3192 = vmatmul.mubr.bf16.gmra.mxu0 %v4053_v38  ;;  %1137 = vst [vmem:[#allocation3 + $0xdc] sm:$0xf] %v1008_v10  ;;  %1138 = vst [vmem:[#allocation3 + $0x100] sm:$0xf] %v1018_v4  ;;  %v908_v31 = vld [vmem:[#allocation2 + $0x30] sm:$0xf] }
  0xbf   : > { %888 = vst [vmem:[#allocation3 + $0x120] sm:$0xf] %v872_v63  ;;  %v909_v50 = vld [vmem:[#allocation2 + $0x34] sm:$0xf]  ;;  %v1020_v51 = vshrl.u32 %v908_v31, 16  ;;  %v1023_v16 = vshll.u32 %v908_v31, 16 }
  0xc0   : > { %v1029_v2 = vshll.u32 %v909_v50, 16  ;;  %v1033_v46 = vshrl.u32 %v909_v50, 16  ;;  %v1159_v35 = vld [vmem:[#allocation2 + $0x30] sm:$0xe]  ;;  %v1160_v17 = vld [vmem:[#allocation2 + $0x34] sm:$0xf] }
  0xc1   : > { %v1022_v52 = vrot.slane %v1020_v51, 4  ;;  %v1025_v53 = vrot.slane %v1023_v16, 5  ;;  %v4015_v37 = vrot.slane %v1159_v35, 9  ;;  %v1161_v61 = vld [vmem:[#allocation2 + $0x38] sm:$0x1]  ;;  %v1228_v62 = vrot.slane %v1160_v17, 5 }
  0xc2   : > { %v1031_v54 = vrot.slane %v1029_v2, 5  ;;  %v1035_v56 = vrot.slane %v1033_v46, 4  ;;  %v1231_v5 = vrot.slane %v1161_v61, 5  ;;  %v1041_v45 = vrot.slane %v1039_v12, 5  ;;  %v1294_v41 = vld [vmem:[#allocation2 + $0x3c] sm:$0xf] }
  0xc3   : > { %v4752_v3 = vld [vmem:[#allocation3 + $0xe4] ss:$36 sps:$4 sm:$0xff]   ;;  %v1026_v20 = vor.u32 %v1025_v53, %v1022_v52  ;;  %v1229_v11 = vsel %vm5387_vm13, %v4015_v37, %v1228_v62  ;;  %v1230_v39 = vrot.slane %v1228_v62, 4  ;;  %v4765_v19 = vld [vmem:[%s5892_s1 + $0x1e8] sm:$0xff]   ;;  %1310 = vst [vmem:[#allocation3 + $0x12c] sm:$0xf] %v1294_v41 }
  0xc4   : > { %v4754_v29 = vld [vmem:[#allocation3 + $0xe0] ss:$36 sps:$4 sm:$0xff]   ;;  %v1036_v8 = vor.u32 %v1035_v56, %v1031_v54  ;;  %3296 = vmatprep.mubr.bf16.mxu1 %v4752_v3  ;;  %1278 = vst [vmem:[#allocation3 + $0x128] sm:$0xf] %v1229_v11  ;;  %v1295_v15 = vld [vmem:[#allocation2 + $0x40] sm:$0xf]  ;;  %4529 = vmatprep.subr.bf16.mxu1 %v4765_v19 }
  0xc5   : > { %v2149_v6 = vld [vmem:[#allocation3 + $0xd8] sm:$0xff]  ;;  %v1027_v14 = vrot.slane %v1026_v20, 4  ;;  %3297 = vmatmul.mubr.bf16.gmra.mxu1 %v4754_v29  ;;  %v1232_v21 = vsel %vm5387_vm13, %v1230_v39, %v1231_v5  ;;  %1311 = vst [vmem:[#allocation3 + $0x150] sm:$0xf] %v1295_v15  ;;  %v4766_v22 = vld [vmem:[%s5892_s1 + $0x118] sm:$0xff]   ;;  %v4767_v9 = vld [vmem:[%s5892_s1 + $0x1a8] sm:$0xff]  }
  0xc6   : > { %v2154_v7 = vld [vmem:[#allocation3 + $0xfc] sm:$0xff]  ;;  %v1037_v18 = vrot.slane %v1036_v8, 4  ;;  %1279 = vst [vmem:[#allocation3 + $0x14c] sm:$0xf] %v1232_v21  ;;  %4470 = vmatpush3.bf16.msra.mxu0 %v4766_v22  ;;  %v874_v24 = vld [vmem:[#allocation2 + $0x3c] sm:$0xf]  ;;  %4530 = vmatpush3.bf16.msra.mxu1 %v4767_v9 }
  0xc7   : > { %v4750_v36 = vld [vmem:[#allocation3 + $0xdc] ss:$36 sps:$4 sm:$0xff]   ;;  %v4062_v13 = vcombine.low %v2149_v6, %v2154_v7  ;;  %v1032_v23 = vsel %vm5393_vm14, %v1027_v14, %v1031_v54  ;;  %v875_v25 = vld [vmem:[#allocation2 + $0x40] sm:$0xf]  ;;  %890 = vst [vmem:[#allocation3 + $0x168] sm:$0xf] %v874_v24 }
  0xc8   : > { %3199 = vmatprep.mubr.bf16.mxu0 %v4750_v36  ;;  %v1042_v0 = vsel %vm5393_vm14, %v1037_v18, %v1041_v45  ;;  %1139 = vst [vmem:[#allocation3 + $0x124] sm:$0xf] %v1032_v23  ;;  %891 = vst [vmem:[#allocation3 + $0x18c] sm:$0xf] %v875_v25  ;;  %v911_v26 = vld [vmem:[#allocation2 + $0x3c] sm:$0xf] }
  0xc9   : > { %3200 = vmatmul.mubr.bf16.gmra.mxu0 %v4062_v13  ;;  %1140 = vst [vmem:[#allocation3 + $0x148] sm:$0xf] %v1042_v0  ;;  %v912_v27 = vld [vmem:[#allocation2 + $0x40] sm:$0xf]  ;;  %v913_v28 = vld [vmem:[#allocation2 + $0x44] sm:$0x1] }
  0xca   : > { %v1044_v57 = vshrl.u32 %v911_v26, 16  ;;  %v1047_v32 = vshll.u32 %v911_v26, 16  ;;  %v1053_v33 = vshll.u32 %v912_v27, 16  ;;  %v1057_v40 = vshrl.u32 %v912_v27, 16  ;;  %v1162_v60 = vld [vmem:[#allocation2 + $0x3c] sm:$0xe] }
  0xcb   : > { %v1063_v34 = vshll.u32 %v913_v28, 16  ;;  %v1163_v38 = vld [vmem:[#allocation2 + $0x40] sm:$0xf]  ;;  %v1164_v47 = vld [vmem:[#allocation2 + $0x44] sm:$0x1]  ;;  %v4016_v48 = vrot.slane %v1162_v60, 9 }
  0xcc   : > { %v1046_v1 = vrot.slane %v1044_v57, 4  ;;  %v1049_v42 = vrot.slane %v1047_v32, 5  ;;  %v1055_v10 = vrot.slane %v1053_v33, 5  ;;  %v1059_v4 = vrot.slane %v1057_v40, 4  ;;  %v4773_v44 = vld [vmem:[%s5892_s1 + $0x150] sm:$0xff]   ;;  %v4774_v2 = vld [vmem:[%s5892_s1 + $0x1e0] sm:$0xff]  }
  0xcd   : > { %v4761_v49 = vld [vmem:[#allocation3 + $0x12c] ss:$36 sps:$4 sm:$0xff]   ;;  %v1065_v59 = vrot.slane %v1063_v34, 5  ;;  %v1235_v51 = vrot.slane %v1163_v38, 5  ;;  %4471 = vmatprep.subr.bf16.mxu0 %v4773_v44  ;;  %v1238_v35 = vrot.slane %v1164_v47, 5  ;;  %4531 = vmatprep.subr.bf16.mxu1 %v4774_v2  ;;  %v4775_v56 = vld [vmem:[%s5892_s1 + $0x110] sm:$0xff]  }
  0xce   : > { %v4763_v63 = vld [vmem:[#allocation3 + $0x128] ss:$36 sps:$4 sm:$0xff]   ;;  %v1050_v31 = vor.u32 %v1049_v42, %v1046_v1  ;;  %v1060_v50 = vor.u32 %v1059_v4, %v1055_v10  ;;  %v1296_v16 = vld [vmem:[#allocation2 + $0x48] sm:$0xf]  ;;  %3304 = vmatprep.mubr.bf16.mxu1 %v4761_v49  ;;  %v1297_v55 = vld [vmem:[#allocation2 + $0x4c] sm:$0xf]  ;;  %4472 = vmatpush3.bf16.msra.mxu0 %v4775_v56 }
  0xcf   : > { %v2159_v58 = vld [vmem:[#allocation3 + $0x120] sm:$0xff]  ;;  %1312 = vst [vmem:[#allocation3 + $0x174] sm:$0xf] %v1296_v16  ;;  %3305 = vmatmul.mubr.bf16.gmra.mxu1 %v4763_v63  ;;  %v1236_v37 = vsel %vm5387_vm13, %v4016_v48, %v1235_v51  ;;  %1313 = vst [vmem:[#allocation3 + $0x198] sm:$0xf] %v1297_v55  ;;  %v1237_v54 = vrot.slane %v1235_v51, 4 }
  0xd0   : > { %v2164_v46 = vld [vmem:[#allocation3 + $0x144] sm:$0xff]  ;;  %v1051_v53 = vrot.slane %v1050_v31, 4  ;;  %v1061_v17 = vrot.slane %v1060_v50, 4  ;;  %1280 = vst [vmem:[#allocation3 + $0x170] sm:$0xf] %v1236_v37  ;;  %v4782_v15 = vld [vmem:[%s5892_s1 + $0x148] sm:$0xff]  }
  0xd1   : > { %v4759_v12 = vld [vmem:[#allocation3 + $0x124] ss:$36 sps:$4 sm:$0xff]   ;;  %v4071_v52 = vcombine.low %v2159_v58, %v2164_v46  ;;  %v1239_v3 = vsel %vm5387_vm13, %v1237_v54, %v1238_v35  ;;  %v876_v20 = vld [vmem:[#allocation2 + $0x48] sm:$0xf]  ;;  %v877_v5 = vld [vmem:[#allocation2 + $0x4c] sm:$0xf]  ;;  %4473 = vmatprep.subr.bf16.mxu0 %v4782_v15 }
  0xd2   : > { %3207 = vmatprep.mubr.bf16.mxu0 %v4759_v12  ;;  %v1056_v61 = vsel %vm5393_vm14, %v1051_v53, %v1055_v10  ;;  %v1066_v62 = vsel %vm5393_vm14, %v1061_v17, %v1065_v59  ;;  %v4776_v29 = vld [vmem:[%s5892_s1 + $0x1a0] sm:$0xff]   ;;  %1281 = vst [vmem:[#allocation3 + $0x194] sm:$0xf] %v1239_v3  ;;  %892 = vst [vmem:[#allocation3 + $0x1b0] sm:$0xf] %v876_v20  ;;  %v4783_v25 = vld [vmem:[%s5892_s1 + $0x1d8] sm:$0xff]  }
  0xd3   : > { %3208 = vmatmul.mubr.bf16.gmra.mxu0 %v4071_v52  ;;  %1141 = vst [vmem:[#allocation3 + $0x16c] sm:$0xf] %v1056_v61  ;;  %1142 = vst [vmem:[#allocation3 + $0x190] sm:$0xf] %v1066_v62  ;;  %v914_v6 = vld [vmem:[#allocation2 + $0x48] sm:$0xf]  ;;  %4532 = vmatpush3.bf16.msra.mxu1 %v4776_v29 }
  0xd4   : > { %v915_v7 = vld [vmem:[#allocation2 + $0x4c] sm:$0xf]  ;;  %893 = vst [vmem:[#allocation3 + $0x1d4] sm:$0xf] %v877_v5  ;;  %v916_v36 = vld [vmem:[#allocation2 + $0x50] sm:$0x1]  ;;  %4533 = vmatprep.subr.bf16.mxu1 %v4783_v25 }
  0xd5   : > { %v1068_v8 = vshrl.u32 %v914_v6, 16  ;;  %v1071_v45 = vshll.u32 %v914_v6, 16  ;;  %v1077_v11 = vshll.u32 %v915_v7, 16  ;;  %v1081_v39 = vshrl.u32 %v915_v7, 16  ;;  %v1165_v14 = vld [vmem:[#allocation2 + $0x48] sm:$0xe] }
  0xd6   : > { %v1087_v13 = vshll.u32 %v916_v36, 16  ;;  %v1166_v41 = vld [vmem:[#allocation2 + $0x4c] sm:$0xf]  ;;  %v1167_v23 = vld [vmem:[#allocation2 + $0x50] sm:$0x1]  ;;  %v4017_v0 = vrot.slane %v1165_v14, 9 }
  0xd7   : > { %v1070_v19 = vrot.slane %v1068_v8, 4  ;;  %v1073_v18 = vrot.slane %v1071_v45, 5  ;;  %v1079_v21 = vrot.slane %v1077_v11, 5  ;;  %v1083_v22 = vrot.slane %v1081_v39, 4  ;;  %v1298_v28 = vld [vmem:[#allocation2 + $0x54] sm:$0xf] }
  0xd8   : > { %v1242_v9 = vrot.slane %v1166_v41, 5  ;;  %v1245_v24 = vrot.slane %v1167_v23, 5  ;;  %v1299_v57 = vld [vmem:[#allocation2 + $0x58] sm:$0xf]  ;;  %v1089_v60 = vrot.slane %v1087_v13, 5  ;;  %v4784_v44 = vld [vmem:[%s5892_s1 + $0x108] sm:$0xff]  }
  0xd9   : > { %v1074_v26 = vor.u32 %v1073_v18, %v1070_v19  ;;  %v1084_v27 = vor.u32 %v1083_v22, %v1079_v21  ;;  %1314 = vst [vmem:[#allocation3 + $0x1bc] sm:$0xf] %v1298_v28  ;;  %1315 = vst [vmem:[#allocation3 + $0x1e0] sm:$0xf] %v1299_v57  ;;  %v4770_v47 = vld [vmem:[#allocation3 + $0x174] ss:$36 sps:$4 sm:$0xff]   ;;  %4474 = vmatpush3.bf16.msra.mxu0 %v4784_v44 }
  0xda   : > { %v2169_v32 = vld [vmem:[#allocation3 + $0x168] sm:$0xff]  ;;  %v1243_v34 = vsel %vm5387_vm13, %v4017_v0, %v1242_v9  ;;  %v1244_v38 = vrot.slane %v1242_v9, 4  ;;  %v4772_v1 = vld [vmem:[#allocation3 + $0x170] ss:$36 sps:$4 sm:$0xff]   ;;  %3312 = vmatprep.mubr.bf16.mxu1 %v4770_v47  ;;  %v4785_v58 = vld [vmem:[%s5892_s1 + $0x198] sm:$0xff]  }
  0xdb   : > { %v2174_v33 = vld [vmem:[#allocation3 + $0x18c] sm:$0xff]  ;;  %v1075_v42 = vrot.slane %v1074_v26, 4  ;;  %1282 = vst [vmem:[#allocation3 + $0x1b8] sm:$0xf] %v1243_v34  ;;  %v1085_v10 = vrot.slane %v1084_v27, 4  ;;  %3313 = vmatmul.mubr.bf16.gmra.mxu1 %v4772_v1  ;;  %v4786_v31 = vld [vmem:[%s5892_s1 + $0x1d0] sm:$0xff]  }
  0xdc   : > { %v4768_v40 = vld [vmem:[#allocation3 + $0x16c] ss:$36 sps:$4 sm:$0xff]   ;;  %v4080_v48 = vcombine.low %v2169_v32, %v2174_v33  ;;  %v1246_v4 = vsel %vm5387_vm13, %v1244_v38, %v1245_v24  ;;  %4534 = vmatpush3.bf16.msra.mxu1 %v4785_v58  ;;  %v4787_v50 = vld [vmem:[%s5892_s1 + $0x190] sm:$0xff]   ;;  %v879_v51 = vld [vmem:[#allocation2 + $0x58] sm:$0xf] }
  0xdd   : > { %3215 = vmatprep.mubr.bf16.mxu0 %v4768_v40  ;;  %v1080_v49 = vsel %vm5393_vm14, %v1075_v42, %v1079_v21  ;;  %1283 = vst [vmem:[#allocation3 + $0x1dc] sm:$0xf] %v1246_v4  ;;  %v1090_v63 = vsel %vm5393_vm14, %v1085_v10, %v1089_v60  ;;  %4535 = vmatprep.subr.bf16.mxu1 %v4786_v31  ;;  %v878_v59 = vld [vmem:[#allocation2 + $0x54] sm:$0xf]  ;;  %895 = vst [vmem:[#allocation3 + $0x21c] sm:$0xf] %v879_v51 }
  0xde   : > { %3216 = vmatmul.mubr.bf16.gmra.mxu0 %v4080_v48  ;;  %1143 = vst [vmem:[#allocation3 + $0x1b4] sm:$0xf] %v1080_v49  ;;  %1144 = vst [vmem:[#allocation3 + $0x1d8] sm:$0xf] %v1090_v63  ;;  %v917_v16 = vld [vmem:[#allocation2 + $0x54] sm:$0xf] }
  0xdf   : > { %894 = vst [vmem:[#allocation3 + $0x1f8] sm:$0xf] %v878_v59  ;;  %v918_v2 = vld [vmem:[#allocation2 + $0x58] sm:$0xf]  ;;  %v919_v46 = vld [vmem:[#allocation2 + $0x5c] sm:$0x1] }
  0xe0   : > { %v1092_v12 = vshrl.u32 %v917_v16, 16  ;;  %v1095_v35 = vshll.u32 %v917_v16, 16  ;;  %v1101_v55 = vshll.u32 %v918_v2, 16  ;;  %v1105_v52 = vshrl.u32 %v918_v2, 16  ;;  %v1168_v17 = vld [vmem:[#allocation2 + $0x54] sm:$0xe]  ;;  %4536 = vmatpush3.bf16.msra.mxu1 %v4787_v50 }
  0xe1   : > { %v1111_v53 = vshll.u32 %v919_v46, 16  ;;  %v4779_v37 = vld [vmem:[#allocation3 + $0x1bc] ss:$36 sps:$4 sm:$0xff]   ;;  %v4793_v5 = vld [vmem:[%s5892_s1 + $0x140] sm:$0xff]   ;;  %v4018_v8 = vrot.slane %v1168_v17, 9  ;;  %v4794_v15 = vld [vmem:[%s5892_s1 + $0x1c8] sm:$0xff]  }
  0xe2   : > { %v1094_v56 = vrot.slane %v1092_v12, 4  ;;  %v1097_v62 = vrot.slane %v1095_v35, 5  ;;  %v1103_v3 = vrot.slane %v1101_v55, 5  ;;  %v1107_v29 = vrot.slane %v1105_v52, 4  ;;  %3320 = vmatprep.mubr.bf16.mxu1 %v4779_v37  ;;  %v1169_v36 = vld [vmem:[#allocation2 + $0x58] sm:$0xf]  ;;  %4475 = vmatprep.subr.bf16.mxu0 %v4793_v5 }
  0xe3   : > { %v1113_v20 = vrot.slane %v1111_v53, 5  ;;  %v1170_v13 = vld [vmem:[#allocation2 + $0x5c] sm:$0x1]  ;;  %v1249_v14 = vrot.slane %v1169_v36, 5  ;;  %v1300_v41 = vld [vmem:[#allocation2 + $0x60] sm:$0xf]  ;;  %4537 = vmatprep.subr.bf16.mxu1 %v4794_v15 }
  0xe4   : > { %v4781_v54 = vld [vmem:[#allocation3 + $0x1b8] ss:$36 sps:$4 sm:$0xff]   ;;  %v1098_v11 = vor.u32 %v1097_v62, %v1094_v56  ;;  %v1108_v39 = vor.u32 %v1107_v29, %v1103_v3  ;;  %v1252_v19 = vrot.slane %v1170_v13, 5  ;;  %v1301_v18 = vld [vmem:[#allocation2 + $0x64] sm:$0xf]  ;;  %v4796_v24 = vld [vmem:[%s5892_s1 + $0x188] sm:$0xff]  }
  0xe5   : > { %v2179_v61 = vld [vmem:[#allocation3 + $0x1b0] sm:$0xff]  ;;  %3321 = vmatmul.mubr.bf16.gmra.mxu1 %v4781_v54  ;;  %1316 = vst [vmem:[#allocation3 + $0x204] sm:$0xf] %v1300_v41  ;;  %v4795_v21 = vld [vmem:[%s5892_s1 + $0x100] sm:$0xff]   ;;  %v1250_v0 = vsel %vm5387_vm13, %v4018_v8, %v1249_v14  ;;  %v1251_v9 = vrot.slane %v1249_v14, 4  ;;  %v5557_v31 = vld [vmem:[%s5892_s1 + $0x238] sm:$0xff]  }
  0xe6   : > { %v2184_v6 = vld [vmem:[#allocation3 + $0x1d4] sm:$0xff]  ;;  %v1099_v22 = vrot.slane %v1098_v11, 4  ;;  %v1109_v23 = vrot.slane %v1108_v39, 4  ;;  %1317 = vst [vmem:[#allocation3 + $0x228] sm:$0xf] %v1301_v18  ;;  %4476 = vmatpush3.bf16.msra.mxu0 %v4795_v21  ;;  %4538 = vmatpush3.bf16.msra.mxu1 %v4796_v24  ;;  %v4797_v28 = vld [vmem:[%s5892_s1 + $0x1c0] sm:$0xff]  }
  0xe7   : > { %v4777_v7 = vld [vmem:[#allocation3 + $0x1b4] ss:$36 sps:$4 sm:$0xff]   ;;  %v4089_v45 = vcombine.low %v2179_v61, %v2184_v6  ;;  %1284 = vst [vmem:[#allocation3 + $0x200] sm:$0xf] %v1250_v0  ;;  %v1253_v27 = vsel %vm5387_vm13, %v1251_v9, %v1252_v19  ;;  %v4798_v57 = vld [vmem:[%s5892_s1 + $0x180] sm:$0xff]   ;;  %4539 = vmatprep.subr.bf16.mxu1 %v4797_v28  ;;  %4605 = vmatprep.subr.bf16.mxu0 %v5557_v31 }
  0xe8   : > { %3223 = vmatprep.mubr.bf16.mxu0 %v4777_v7  ;;  %v1104_v25 = vsel %vm5393_vm14, %v1099_v22, %v1103_v3  ;;  %v1114_v26 = vsel %vm5393_vm14, %v1109_v23, %v1113_v20  ;;  %1285 = vst [vmem:[#allocation3 + $0x224] sm:$0xf] %v1253_v27  ;;  %v1318_v32 = vld [vmem:[#allocation2 + $0xc] sm:$0xf]  ;;  %v1319_v33 = vld [vmem:[#allocation2 + $0x10] sm:$0xf] }
  0xe9   : > { %3224 = vmatmul.mubr.bf16.gmra.mxu0 %v4089_v45  ;;  %1145 = vst [vmem:[#allocation3 + $0x1fc] sm:$0xf] %v1104_v25  ;;  %1146 = vst [vmem:[#allocation3 + $0x220] sm:$0xf] %v1114_v26  ;;  %v1320_v40 = vld [vmem:[#allocation2 + $0x14] sm:$0x1] }
  0xea   : > { %4540 = vmatpush3.bf16.msra.mxu1 %v4798_v57  ;;  %v1343_v60 = vshrl.u32 %v1318_v32, 16  ;;  %v1346_v34 = vshll.u32 %v1318_v32, 16  ;;  %v1352_v38 = vshll.u32 %v1319_v33, 16  ;;  %v1356_v47 = vshrl.u32 %v1319_v33, 16  ;;  %v1566_v48 = vld [vmem:[#allocation2 + $0xc] sm:$0xe] }
  0xeb   : > { %v1362_v1 = vshll.u32 %v1320_v40, 16  ;;  %v1567_v42 = vld [vmem:[#allocation2 + $0x10] sm:$0xf]  ;;  %v1568_v10 = vld [vmem:[#allocation2 + $0x14] sm:$0x1]  ;;  %v4019_v4 = vrot.slane %v1566_v48, 9  ;;  %4637 = vmatprep.subr.bf16.mxu1 %v5557_v31 }
  0xec   : > { %v1345_v44 = vrot.slane %v1343_v60, 4  ;;  %v1348_v49 = vrot.slane %v1346_v34, 5  ;;  %v1354_v63 = vrot.slane %v1352_v38, 5  ;;  %v1358_v58 = vrot.slane %v1356_v47, 4  ;;  %v1703_v51 = vld [vmem:[#allocation2 + $0x18] sm:$0xf] }
  0xed   : > { %v1616_v50 = vrot.slane %v1567_v42, 5  ;;  %v1619_v59 = vrot.slane %v1568_v10, 5  ;;  %v1364_v55 = vrot.slane %v1362_v1, 5  ;;  %1719 = vst [vmem:[#allocation3 + $0x18] sm:$0xf] %v1703_v51 }
  0xee   : > { %v1349_v12 = vor.u32 %v1348_v49, %v1345_v44  ;;  %v1359_v35 = vor.u32 %v1358_v58, %v1354_v63  ;;  %v4790_v52 = vld [vmem:[#allocation3 + $0x204] ss:$36 sps:$4 sm:$0xff]   ;;  %v1735_v3 = vld [vmem:[#allocation2 + $0x18] sm:$0xf]  ;;  %v1705_v42 = vld [vmem:[#allocation2 + $0x24] sm:$0xf] }
  0xef   : > { %v4792_v17 = vld [vmem:[#allocation3 + $0x200] ss:$36 sps:$4 sm:$0xff]   ;;  %v1617_v37 = vsel %vm5387_vm13, %v4019_v4, %v1616_v50  ;;  %v1618_v54 = vrot.slane %v1616_v50, 4  ;;  %3328 = vmatprep.mubr.bf16.mxu1 %v4790_v52  ;;  %v1737_v5 = vld [vmem:[#allocation2 + $0x20] sm:$0x1]  ;;  %v1760_v6 = vshrl.u32 %v1735_v3, 16 }
  0xf0   : > { %v2189_v16 = vld [vmem:[#allocation3 + $0x1f8] sm:$0xff]  ;;  %v1350_v56 = vrot.slane %v1349_v12, 4  ;;  %v1360_v61 = vrot.slane %v1359_v35, 4  ;;  %1686 = vst [vmem:[#allocation3 + $0x14] sm:$0xf] %v1617_v37  ;;  %v1763_v7 = vshll.u32 %v1735_v3, 16  ;;  %3329 = vmatmul.mubr.bf16.gmra.mxu1 %v4792_v17 }
  0xf1   : > { %v2194_v2 = vld [vmem:[#allocation3 + $0x21c] sm:$0xff]  ;;  %v1704_v62 = vld [vmem:[#allocation2 + $0x1c] sm:$0xf]  ;;  %v1620_v29 = vsel %vm5387_vm13, %v1618_v54, %v1619_v59  ;;  %v1762_v39 = vrot.slane %v1760_v6, 4  ;;  %v1779_v14 = vshll.u32 %v1737_v5, 16 }
  0xf2   : > { %v4788_v46 = vld [vmem:[#allocation3 + $0x1fc] ss:$36 sps:$4 sm:$0xff]   ;;  %v4098_v53 = vcombine.low %v2189_v16, %v2194_v2  ;;  %1720 = vst [vmem:[#allocation3 + $0x3c] sm:$0xf] %v1704_v62  ;;  %v1736_v20 = vld [vmem:[#allocation2 + $0x1c] sm:$0xf]  ;;  %v1355_v36 = vsel %vm5393_vm14, %v1350_v56, %v1354_v63  ;;  %v1365_v8 = vsel %vm5393_vm14, %v1360_v61, %v1364_v55 }
  0xf3   : > { %3231 = vmatprep.mubr.bf16.mxu0 %v4788_v46  ;;  %1687 = vst [vmem:[#allocation3 + $0x38] sm:$0xf] %v1620_v29  ;;  %v1769_v45 = vshll.u32 %v1736_v20, 16  ;;  %v1773_v11 = vshrl.u32 %v1736_v20, 16  ;;  %1550 = vst [vmem:[#allocation3 + $0x10] sm:$0xf] %v1355_v36 }
  0xf4   : > { %3232 = vmatmul.mubr.bf16.gmra.mxu0 %v4098_v53  ;;  %1551 = vst [vmem:[#allocation3 + $0x34] sm:$0xf] %v1365_v8  ;;  %v1765_v13 = vrot.slane %v1763_v7, 5  ;;  %v1321_v41 = vld [vmem:[#allocation2 + $0x18] sm:$0xf]  ;;  %v1781_v23 = vrot.slane %v1779_v14, 5 }
  0xf5   : > { %v1771_v15 = vrot.slane %v1769_v45, 5  ;;  %v1775_v19 = vrot.slane %v1773_v11, 4  ;;  %v1322_v18 = vld [vmem:[#allocation2 + $0x1c] sm:$0xf]  ;;  %v1323_v21 = vld [vmem:[#allocation2 + $0x20] sm:$0x1] }
  0xf6   : > { %v1766_v22 = vor.u32 %v1765_v13, %v1762_v39  ;;  %v1367_v0 = vshrl.u32 %v1321_v41, 16  ;;  %v1370_v9 = vshll.u32 %v1321_v41, 16  ;;  %v1569_v24 = vld [vmem:[#allocation2 + $0x18] sm:$0xe]  ;;  %v1376_v26 = vshll.u32 %v1322_v18, 16  ;;  %v5576_v46 = vld [vmem:[%s5892_s1 + $0x230] sm:$0xff]  }
  0xf7   : > { %v1776_v25 = vor.u32 %v1775_v19, %v1771_v15  ;;  %v1380_v27 = vshrl.u32 %v1322_v18, 16  ;;  %v1386_v28 = vshll.u32 %v1323_v21, 16  ;;  %v1570_v57 = vld [vmem:[#allocation2 + $0x1c] sm:$0xf]  ;;  %v1571_v60 = vld [vmem:[#allocation2 + $0x20] sm:$0x1] }
  0xf8   : > { %v1767_v32 = vrot.slane %v1766_v22, 4  ;;  %v1369_v33 = vrot.slane %v1367_v0, 4  ;;  %v1372_v40 = vrot.slane %v1370_v9, 5  ;;  %v4020_v34 = vrot.slane %v1569_v24, 9  ;;  %v1706_v63 = vld [vmem:[#allocation2 + $0x28] sm:$0xf] }
  0xf9   : > { %v1777_v38 = vrot.slane %v1776_v25, 4  ;;  %v1378_v47 = vrot.slane %v1376_v26, 5  ;;  %v1382_v48 = vrot.slane %v1380_v27, 4  ;;  %v1388_v1 = vrot.slane %v1386_v28, 5  ;;  %1721 = vst [vmem:[#allocation3 + $0x60] sm:$0xf] %v1705_v42 }
  0xfa   : > { %v1772_v10 = vsel %vm5393_vm14, %v1767_v32, %v1771_v15  ;;  %v1373_v4 = vor.u32 %v1372_v40, %v1369_v33  ;;  %v1623_v44 = vrot.slane %v1570_v57, 5  ;;  %v1626_v49 = vrot.slane %v1571_v60, 5  ;;  %v1738_v58 = vld [vmem:[#allocation2 + $0x24] sm:$0xf]  ;;  %1722 = vst [vmem:[#allocation3 + $0x84] sm:$0xf] %v1706_v63 }
  0xfb   : > { %v4799_v50 = vld [vmem:[#allocation3 + $0x10] ss:$36 sps:$4 sm:$0xff]   ;;  %v1782_v59 = vsel %vm5393_vm14, %v1777_v38, %v1781_v23  ;;  %1967 = vst [vmem:[#allocation3 + $0x1c] sm:$0xf] %v1772_v10  ;;  %v1383_v51 = vor.u32 %v1382_v48, %v1378_v47  ;;  %v1784_v16 = vshrl.u32 %v1738_v58, 16  ;;  %v1787_v2 = vshll.u32 %v1738_v58, 16 }
  0xfc   : > { %v4801_v12 = vld [vmem:[#allocation3 + $0x14] ss:$36 sps:$4 sm:$0xff]   ;;  %1968 = vst [vmem:[#allocation3 + $0x40] sm:$0xf] %v1782_v59  ;;  %v1374_v35 = vrot.slane %v1373_v4, 4  ;;  %v1624_v55 = vsel %vm5387_vm13, %v4020_v34, %v1623_v44  ;;  %v1625_v52 = vrot.slane %v1623_v44, 4 }
  0xfd   : > { %v1739_v53 = vld [vmem:[#allocation2 + $0x28] sm:$0xf]  ;;  %v1384_v17 = vrot.slane %v1383_v51, 4  ;;  %1688 = vst [vmem:[#allocation3 + $0x5c] sm:$0xf] %v1624_v55  ;;  %v1786_v54 = vrot.slane %v1784_v16, 4  ;;  %3369 = vmatprep.mubr.bf16.mxu0 %v4801_v12 }
  0xfe   : > { %v1740_v37 = vld [vmem:[#allocation2 + $0x2c] sm:$0x1]  ;;  %v1789_v56 = vrot.slane %v1787_v2, 5  ;;  %v1793_v61 = vshll.u32 %v1739_v53, 16  ;;  %v1379_v62 = vsel %vm5393_vm14, %v1374_v35, %v1378_v47  ;;  %v1627_v3 = vsel %vm5387_vm13, %v1625_v52, %v1626_v49  ;;  %3370 = vmatmul.mubr.bf16.vlgmr.msra.gmra.mxu0 %v4799_v50  ;;  %v1324_v36 = vld [vmem:[#allocation2 + $0x24] sm:$0xf] }
  0xff   : > { %v1797_v29 = vshrl.u32 %v1739_v53, 16  ;;  %v1803_v20 = vshll.u32 %v1740_v37, 16  ;;  %v1389_v5 = vsel %vm5393_vm14, %v1384_v17, %v1388_v1  ;;  %1552 = vst [vmem:[#allocation3 + $0x58] sm:$0xf] %v1379_v62  ;;  %1689 = vst [vmem:[#allocation3 + $0x80] sm:$0xf] %v1627_v3  ;;  %4606 = vmatpush3.bf16.msra.mxu0 %v5557_v31 }
 0x100   : > { %v1790_v6 = vor.u32 %v1789_v56, %v1786_v54  ;;  %v1795_v7 = vrot.slane %v1793_v61, 5  ;;  %v1325_v8 = vld [vmem:[#allocation2 + $0x28] sm:$0xf]  ;;  %1553 = vst [vmem:[#allocation3 + $0x7c] sm:$0xf] %v1389_v5  ;;  %v1391_v14 = vshrl.u32 %v1324_v36, 16  ;;  %4607 = vmatprep.subr.bf16.mxu0 %v5576_v46 }
 0x101   : > { %v5589_v45 = vld [vmem:[%s5892_s1 + $0x228] sm:$0xff]   ;;  %v1799_v11 = vrot.slane %v1797_v29, 4  ;;  %v1805_v39 = vrot.slane %v1803_v20, 5  ;;  %v1394_v41 = vshll.u32 %v1324_v36, 16  ;;  %v1400_v19 = vshll.u32 %v1325_v8, 16  ;;  %v5599_v38 = vld [vmem:[%s5892_s1 + $0x220] sm:$0xff]  }
 0x102   : > { %v1326_v13 = vld [vmem:[#allocation2 + $0x2c] sm:$0x1]  ;;  %v1791_v15 = vrot.slane %v1790_v6, 4  ;;  %v1404_v18 = vshrl.u32 %v1325_v8, 16  ;;  %v1572_v22 = vld [vmem:[#allocation2 + $0x24] sm:$0xe] }
 0x103   : > { %v1410_v21 = vshll.u32 %v1326_v13, 16  ;;  %v1800_v23 = vor.u32 %v1799_v11, %v1795_v7  ;;  %v1393_v0 = vrot.slane %v1391_v14, 4  ;;  %v1396_v9 = vrot.slane %v1394_v41, 5  ;;  %v1573_v24 = vld [vmem:[#allocation2 + $0x28] sm:$0xf]  ;;  %4608 = vmatpush3.bf16.msra.mxu0 %v5576_v46  ;;  %v5617_v56 = vld [vmem:[%s5892_s1 + $0x218] sm:$0xff]  }
 0x104   : > { %v4021_v25 = vrot.slane %v1572_v22, 9  ;;  %v4802_v26 = vld [vmem:[#allocation3 + $0x18] ss:$36 sps:$4 sm:$0xff]   ;;  %v1796_v28 = vsel %vm5393_vm14, %v1791_v15, %v1795_v7  ;;  %v1402_v57 = vrot.slane %v1400_v19, 5  ;;  %v1406_v40 = vrot.slane %v1404_v18, 4  ;;  %4609 = vmatprep.subr.bf16.mxu0 %v5589_v45 }
 0x105   : > { %v4804_v27 = vld [vmem:[#allocation3 + $0x1c] ss:$36 sps:$4 sm:$0xff]   ;;  %v1801_v32 = vrot.slane %v1800_v23, 4  ;;  %1969 = vst [vmem:[#allocation3 + $0x64] sm:$0xf] %v1796_v28  ;;  %v1397_v33 = vor.u32 %v1396_v9, %v1393_v0  ;;  %v1412_v60 = vrot.slane %v1410_v21, 5 }
 0x106   : > { %v1574_v34 = vld [vmem:[#allocation2 + $0x2c] sm:$0x1]  ;;  %3466 = vmatprep.mubr.bf16.mxu1 %v4804_v27  ;;  %v1630_v47 = vrot.slane %v1573_v24, 5  ;;  %v1707_v1 = vld [vmem:[#allocation2 + $0x30] sm:$0xf]  ;;  %v1407_v49 = vor.u32 %v1406_v40, %v1402_v57 }
 0x107   : > { %v1633_v48 = vrot.slane %v1574_v34, 5  ;;  %v1708_v42 = vld [vmem:[#allocation2 + $0x34] sm:$0xf]  ;;  %3467 = vmatmul.mubr.bf16.vlgmr.msra.gmra.mxu1 %v4802_v26  ;;  %v1806_v4 = vsel %vm5393_vm14, %v1801_v32, %v1805_v39  ;;  %v1398_v44 = vrot.slane %v1397_v33, 4  ;;  %1723 = vst [vmem:[#allocation3 + $0xa8] sm:$0xf] %v1707_v1  ;;  %4610 = vmatpush3.bf16.msra.mxu0 %v5589_v45 }
 0x108   : > { %v2131_v10 = vld [vmem:[#allocation3 + $0x58] sm:$0xff]  ;;  %1724 = vst [vmem:[#allocation3 + $0xcc] sm:$0xf] %v1708_v42  ;;  %1970 = vst [vmem:[#allocation3 + $0x88] sm:$0xf] %v1806_v4  ;;  %v1631_v51 = vsel %vm5387_vm13, %v4021_v25, %v1630_v47  ;;  %v1632_v16 = vrot.slane %v1630_v47, 4  ;;  %4645 = vmatpush3.bf16.msra.mxu1 %v5557_v31  ;;  %4611 = vmatprep.subr.bf16.mxu0 %v5599_v38 }
 0x109   : > { %v1741_v63 = vld [vmem:[#allocation2 + $0x30] sm:$0xf]  ;;  %v1742_v58 = vld [vmem:[#allocation2 + $0x34] sm:$0xf]  ;;  %v1743_v2 = vld [vmem:[#allocation2 + $0x38] sm:$0x1]  ;;  %v1403_v35 = vsel %vm5393_vm14, %v1398_v44, %v1402_v57  ;;  %4638 = vmatprep.subr.bf16.mxu1 %v5576_v46 }
 0x10a   : > { %v2136_v50 = vld [vmem:[#allocation3 + $0x7c] sm:$0xff]  ;;  %v1408_v55 = vrot.slane %v1407_v49, 4  ;;  %1690 = vst [vmem:[#allocation3 + $0xa4] sm:$0xf] %v1631_v51  ;;  %v1808_v52 = vshrl.u32 %v1741_v63, 16  ;;  %v1634_v53 = vsel %vm5387_vm13, %v1632_v16, %v1633_v48  ;;  %v1811_v17 = vshll.u32 %v1741_v63, 16 }
 0x10b   : > { %v4806_v59 = vld [vmem:[#allocation3 + $0x5c] ss:$36 sps:$4 sm:$0xff]   ;;  %v4048_v12 = vcombine.low %v2131_v10, %v2136_v50  ;;  %1554 = vst [vmem:[#allocation3 + $0xa0] sm:$0xf] %v1403_v35  ;;  %v1817_v37 = vshll.u32 %v1742_v58, 16  ;;  %v1821_v54 = vshrl.u32 %v1742_v58, 16  ;;  %4612 = vmatpush3.bf16.msra.mxu0 %v5599_v38 }
 0x10c   : > { %3377 = vmatprep.mubr.bf16.mxu0 %v4806_v59  ;;  %v1327_v31 = vld [vmem:[#allocation2 + $0x30] sm:$0xf]  ;;  %v1413_v61 = vsel %vm5393_vm14, %v1408_v55, %v1412_v60  ;;  %1691 = vst [vmem:[#allocation3 + $0xc8] sm:$0xf] %v1634_v53  ;;  %v1810_v62 = vrot.slane %v1808_v52, 4  ;;  %v1827_v3 = vshll.u32 %v1743_v2, 16  ;;  %4646 = vmatpush3.bf16.msra.mxu1 %v5576_v46 }
 0x10d   : > { %3378 = vmatmul.mubr.bf16.gmra.mxu0 %v4048_v12  ;;  %v1328_v29 = vld [vmem:[#allocation2 + $0x34] sm:$0xf]  ;;  %v1329_v20 = vld [vmem:[#allocation2 + $0x38] sm:$0x1]  ;;  %1555 = vst [vmem:[#allocation3 + $0xc4] sm:$0xf] %v1413_v61  ;;  %4639 = vmatprep.subr.bf16.mxu1 %v5589_v45 }
 0x10e   : > { %v1813_v5 = vrot.slane %v1811_v17, 5  ;;  %v1819_v6 = vrot.slane %v1817_v37, 5  ;;  %v1823_v7 = vrot.slane %v1821_v54, 4  ;;  %v1415_v36 = vshrl.u32 %v1327_v31, 16  ;;  %v1575_v14 = vld [vmem:[#allocation2 + $0x30] sm:$0xe]  ;;  %4613 = vmatprep.subr.bf16.mxu0 %v5617_v56 }
 0x10f   : > { %v1829_v8 = vrot.slane %v1827_v3, 5  ;;  %v1418_v11 = vshll.u32 %v1327_v31, 16  ;;  %v1424_v39 = vshll.u32 %v1328_v29, 16  ;;  %v1428_v13 = vshrl.u32 %v1328_v29, 16  ;;  %v5627_v41 = vld [vmem:[%s5892_s1 + $0x210] sm:$0xff]   ;;  %4614 = vmatpush3.bf16.msra.mxu0 %v5617_v56  ;;  %v5640_v4 = vld [vmem:[%s5892_s1 + $0x208] sm:$0xff]  }
 0x110   : > { %v1814_v15 = vor.u32 %v1813_v5, %v1810_v62  ;;  %v1824_v19 = vor.u32 %v1823_v7, %v1819_v6  ;;  %v1417_v18 = vrot.slane %v1415_v36, 4  ;;  %v1434_v21 = vshll.u32 %v1329_v20, 16  ;;  %v1576_v22 = vld [vmem:[#allocation2 + $0x34] sm:$0xf]  ;;  %v1577_v46 = vld [vmem:[#allocation2 + $0x38] sm:$0x1]  ;;  %4647 = vmatpush3.bf16.msra.mxu1 %v5589_v45  ;;  %4615 = vmatprep.subr.bf16.mxu0 %v5627_v41 }
 0x111   : > { %v4808_v23 = vld [vmem:[#allocation3 + $0x64] ss:$36 sps:$4 sm:$0xff]   ;;  %v1420_v9 = vrot.slane %v1418_v11, 5  ;;  %v1426_v26 = vrot.slane %v1424_v39, 5  ;;  %v1430_v27 = vrot.slane %v1428_v13, 4  ;;  %v4022_v40 = vrot.slane %v1575_v14, 9  ;;  %4640 = vmatprep.subr.bf16.mxu1 %v5599_v38 }
 0x112   : > { %v4810_v0 = vld [vmem:[#allocation3 + $0x60] ss:$36 sps:$4 sm:$0xff]   ;;  %v1815_v24 = vrot.slane %v1814_v15, 4  ;;  %v1825_v25 = vrot.slane %v1824_v19, 4  ;;  %3474 = vmatprep.mubr.bf16.mxu1 %v4808_v23  ;;  %v1436_v33 = vrot.slane %v1434_v21, 5  ;;  %v1637_v60 = vrot.slane %v1576_v22, 5 }
 0x113   : > { %v1709_v28 = vld [vmem:[#allocation2 + $0x3c] sm:$0xf]  ;;  %v1421_v32 = vor.u32 %v1420_v9, %v1417_v18  ;;  %v1710_v34 = vld [vmem:[#allocation2 + $0x40] sm:$0xf]  ;;  %3475 = vmatmul.mubr.bf16.gmra.mxu1 %v4810_v0  ;;  %v1431_v1 = vor.u32 %v1430_v27, %v1426_v26  ;;  %v1640_v42 = vrot.slane %v1577_v46, 5  ;;  %4616 = vmatpush3.bf16.msra.mxu0 %v5627_v41 }
 0x114   : > { %v2141_v57 = vld [vmem:[#allocation3 + $0xa0] sm:$0xff]  ;;  %1725 = vst [vmem:[#allocation3 + $0xf0] sm:$0xf] %v1709_v28  ;;  %v1820_v47 = vsel %vm5393_vm14, %v1815_v24, %v1819_v6  ;;  %v1830_v48 = vsel %vm5393_vm14, %v1825_v25, %v1829_v8  ;;  %1726 = vst [vmem:[#allocation3 + $0x114] sm:$0xf] %v1710_v34  ;;  %v1638_v58 = vsel %vm5387_vm13, %v4022_v40, %v1637_v60  ;;  %v1639_v50 = vrot.slane %v1637_v60, 4 }
 0x115   : > { %v1744_v45 = vld [vmem:[#allocation2 + $0x3c] sm:$0xf]  ;;  %v1745_v10 = vld [vmem:[#allocation2 + $0x40] sm:$0xf]  ;;  %1971 = vst [vmem:[#allocation3 + $0xac] sm:$0xf] %v1820_v47  ;;  %4648 = vmatpush3.bf16.msra.mxu1 %v5599_v38  ;;  %4617 = vmatprep.subr.bf16.mxu0 %v5640_v4 }
 0x116   : > { %v2146_v44 = vld [vmem:[#allocation3 + $0xc4] sm:$0xff]  ;;  %1972 = vst [vmem:[#allocation3 + $0xd0] sm:$0xf] %v1830_v48  ;;  %v1422_v63 = vrot.slane %v1421_v32, 4  ;;  %v1832_v59 = vshrl.u32 %v1744_v45, 16  ;;  %v1432_v16 = vrot.slane %v1431_v1, 4  ;;  %v1641_v52 = vsel %vm5387_vm13, %v1639_v50, %v1640_v42  ;;  %4641 = vmatprep.subr.bf16.mxu1 %v5617_v56 }
 0x117   : > { %v4812_v49 = vld [vmem:[#allocation3 + $0xa4] ss:$36 sps:$4 sm:$0xff]   ;;  %v4057_v51 = vcombine.low %v2141_v57, %v2146_v44  ;;  %1692 = vst [vmem:[#allocation3 + $0xec] sm:$0xf] %v1638_v58  ;;  %v1746_v2 = vld [vmem:[#allocation2 + $0x44] sm:$0x1]  ;;  %4618 = vmatpush3.bf16.msra.mxu0 %v5640_v4 }
 0x118   : > { %v1835_v12 = vshll.u32 %v1744_v45, 16  ;;  %v1841_v35 = vshll.u32 %v1745_v10, 16  ;;  %3385 = vmatprep.mubr.bf16.mxu0 %v4812_v49  ;;  %v1427_v55 = vsel %vm5393_vm14, %v1422_v63, %v1426_v26  ;;  %v1834_v53 = vrot.slane %v1832_v59, 4  ;;  %1693 = vst [vmem:[#allocation3 + $0x110] sm:$0xf] %v1641_v52  ;;  %v5657_v62 = vld [vmem:[%s5892_s1 + $0x200] sm:$0xff]  }
 0x119   : > { %v1845_v17 = vshrl.u32 %v1745_v10, 16  ;;  %3386 = vmatmul.mubr.bf16.gmra.mxu0 %v4057_v51  ;;  %v1437_v37 = vsel %vm5393_vm14, %v1432_v16, %v1436_v33  ;;  %1556 = vst [vmem:[#allocation3 + $0xe8] sm:$0xf] %v1427_v55  ;;  %v1851_v38 = vshll.u32 %v1746_v2, 16  ;;  %v1330_v61 = vld [vmem:[#allocation2 + $0x3c] sm:$0xf]  ;;  %4649 = vmatpush3.bf16.msra.mxu1 %v5617_v56 }
 0x11a   : > { %v1837_v54 = vrot.slane %v1835_v12, 5  ;;  %v1843_v31 = vrot.slane %v1841_v35, 5  ;;  %1557 = vst [vmem:[#allocation3 + $0x10c] sm:$0xf] %v1437_v37  ;;  %v1331_v29 = vld [vmem:[#allocation2 + $0x40] sm:$0xf]  ;;  %4642 = vmatprep.subr.bf16.mxu1 %v5627_v41  ;;  %4619 = vmatprep.subr.bf16.mxu0 %v5657_v62 }
 0x11b   : > { %v1847_v3 = vrot.slane %v1845_v17, 4  ;;  %v1332_v20 = vld [vmem:[#allocation2 + $0x44] sm:$0x1]  ;;  %v1439_v5 = vshrl.u32 %v1330_v61, 16  ;;  %v1853_v7 = vrot.slane %v1851_v38, 5  ;;  %v1442_v36 = vshll.u32 %v1330_v61, 16  ;;  %4620 = vmatpush3.bf16.msra.mxu0 %v5657_v62 }
 0x11c   : > { %v1838_v6 = vor.u32 %v1837_v54, %v1834_v53  ;;  %v1448_v8 = vshll.u32 %v1331_v29, 16  ;;  %v1578_v11 = vld [vmem:[#allocation2 + $0x3c] sm:$0xe]  ;;  %v1452_v14 = vshrl.u32 %v1331_v29, 16  ;;  %v1458_v15 = vshll.u32 %v1332_v20, 16 }
 0x11d   : > { %v1848_v39 = vor.u32 %v1847_v3, %v1843_v31  ;;  %v1441_v13 = vrot.slane %v1439_v5, 4  ;;  %v1579_v19 = vld [vmem:[#allocation2 + $0x40] sm:$0xf]  ;;  %v4814_v18 = vld [vmem:[#allocation3 + $0xac] ss:$36 sps:$4 sm:$0xff]   ;;  %v1444_v22 = vrot.slane %v1442_v36, 5  ;;  %4650 = vmatpush3.bf16.msra.mxu1 %v5627_v41 }
 0x11e   : > { %v1839_v21 = vrot.slane %v1838_v6, 4  ;;  %v4816_v46 = vld [vmem:[#allocation3 + $0xa8] ss:$36 sps:$4 sm:$0xff]   ;;  %v1450_v0 = vrot.slane %v1448_v8, 5  ;;  %v1454_v9 = vrot.slane %v1452_v14, 4  ;;  %v1460_v24 = vrot.slane %v1458_v15, 5  ;;  %3482 = vmatprep.mubr.bf16.mxu1 %v4814_v18  ;;  %4643 = vmatprep.subr.bf16.mxu1 %v5640_v4 }
 0x11f   : > { %v1849_v23 = vrot.slane %v1848_v39, 4  ;;  %v1445_v25 = vor.u32 %v1444_v22, %v1441_v13  ;;  %v1580_v26 = vld [vmem:[#allocation2 + $0x44] sm:$0x1]  ;;  %v4023_v27 = vrot.slane %v1578_v11, 9  ;;  %v1644_v28 = vrot.slane %v1579_v19, 5  ;;  %3483 = vmatmul.mubr.bf16.gmra.mxu1 %v4816_v46 }
 0x120   : > { %v1844_v56 = vsel %vm5393_vm14, %v1839_v21, %v1843_v31  ;;  %v1711_v57 = vld [vmem:[#allocation2 + $0x48] sm:$0xf]  ;;  %v2151_v32 = vld [vmem:[#allocation3 + $0xe8] sm:$0xff]  ;;  %v1455_v40 = vor.u32 %v1454_v9, %v1450_v0  ;;  %v1647_v60 = vrot.slane %v1580_v26, 5  ;;  %v1712_v34 = vld [vmem:[#allocation2 + $0x4c] sm:$0xf] }
 0x121   : > { %v1854_v33 = vsel %vm5393_vm14, %v1849_v23, %v1853_v7  ;;  %1973 = vst [vmem:[#allocation3 + $0xf4] sm:$0xf] %v1844_v56  ;;  %1727 = vst [vmem:[#allocation3 + $0x138] sm:$0xf] %v1711_v57  ;;  %v1747_v47 = vld [vmem:[#allocation2 + $0x48] sm:$0xf]  ;;  %v1645_v41 = vsel %vm5387_vm13, %v4023_v27, %v1644_v28  ;;  %4651 = vmatpush3.bf16.msra.mxu1 %v5640_v4 }
 0x122   : > { %v2156_v48 = vld [vmem:[#allocation3 + $0x10c] sm:$0xff]  ;;  %1974 = vst [vmem:[#allocation3 + $0x118] sm:$0xf] %v1854_v33  ;;  %v1446_v42 = vrot.slane %v1445_v25, 4  ;;  %v1646_v45 = vrot.slane %v1644_v28, 4  ;;  %v1856_v10 = vshrl.u32 %v1747_v47, 16  ;;  %4644 = vmatprep.subr.bf16.mxu1 %v5657_v62 }
 0x123   : > { %v4818_v1 = vld [vmem:[#allocation3 + $0xec] ss:$36 sps:$4 sm:$0xff]   ;;  %1728 = vst [vmem:[#allocation3 + $0x15c] sm:$0xf] %v1712_v34  ;;  %v4066_v44 = vcombine.low %v2151_v32, %v2156_v48  ;;  %v1456_v49 = vrot.slane %v1455_v40, 4  ;;  %v1859_v50 = vshll.u32 %v1747_v47, 16 }
 0x124   : > { %1694 = vst [vmem:[#allocation3 + $0x134] sm:$0xf] %v1645_v41  ;;  %v1748_v63 = vld [vmem:[#allocation2 + $0x4c] sm:$0xf]  ;;  %v1749_v58 = vld [vmem:[#allocation2 + $0x50] sm:$0x1]  ;;  %3393 = vmatprep.mubr.bf16.mxu0 %v4818_v1  ;;  %v1451_v59 = vsel %vm5393_vm14, %v1446_v42, %v1450_v0  ;;  %v1648_v51 = vsel %vm5387_vm13, %v1646_v45, %v1647_v60 }
 0x125   : > { %v1858_v16 = vrot.slane %v1856_v10, 4  ;;  %v1865_v2 = vshll.u32 %v1748_v63, 16  ;;  %3394 = vmatmul.mubr.bf16.gmra.mxu0 %v4066_v44  ;;  %v1461_v12 = vsel %vm5393_vm14, %v1456_v49, %v1460_v24  ;;  %1558 = vst [vmem:[#allocation3 + $0x130] sm:$0xf] %v1451_v59  ;;  %1695 = vst [vmem:[#allocation3 + $0x158] sm:$0xf] %v1648_v51  ;;  %4652 = vmatpush3.bf16.msra.mxu1 %v5657_v62 }
 0x126   : > { %v1861_v35 = vrot.slane %v1859_v50, 5  ;;  %v1869_v55 = vshrl.u32 %v1748_v63, 16  ;;  %v1875_v52 = vshll.u32 %v1749_v58, 16  ;;  %v1333_v53 = vld [vmem:[#allocation2 + $0x48] sm:$0xf] }
 0x127   : > { %1559 = vst [vmem:[#allocation3 + $0x154] sm:$0xf] %v1461_v12  ;;  %v1867_v17 = vrot.slane %v1865_v2, 5  ;;  %v1334_v37 = vld [vmem:[#allocation2 + $0x4c] sm:$0xf]  ;;  %v1463_v31 = vshrl.u32 %v1333_v53, 16 }
 0x128   : > { %v1335_v54 = vld [vmem:[#allocation2 + $0x50] sm:$0x1]  ;;  %v1862_v38 = vor.u32 %v1861_v35, %v1858_v16  ;;  %v1871_v61 = vrot.slane %v1869_v55, 4  ;;  %v1877_v4 = vrot.slane %v1875_v52, 5  ;;  %v1466_v3 = vshll.u32 %v1333_v53, 16 }
 0x129   : > { %v1581_v29 = vld [vmem:[#allocation2 + $0x48] sm:$0xe]  ;;  %v1465_v20 = vrot.slane %v1463_v31, 4  ;;  %v1472_v5 = vshll.u32 %v1334_v37, 16  ;;  %v1476_v6 = vshrl.u32 %v1334_v37, 16  ;;  %v1482_v7 = vshll.u32 %v1335_v54, 16 }
 0x12a   : > { %v4820_v36 = vld [vmem:[#allocation3 + $0xf4] ss:$36 sps:$4 sm:$0xff]   ;;  %v1863_v11 = vrot.slane %v1862_v38, 4  ;;  %v1872_v39 = vor.u32 %v1871_v61, %v1867_v17  ;;  %v1468_v13 = vrot.slane %v1466_v3, 5  ;;  %v4024_v23 = vrot.slane %v1581_v29, 9 }
 0x12b   : > { %v4822_v8 = vld [vmem:[#allocation3 + $0xf0] ss:$36 sps:$4 sm:$0xff]   ;;  %v1474_v14 = vrot.slane %v1472_v5, 5  ;;  %v1478_v15 = vrot.slane %v1476_v6, 4  ;;  %v1484_v19 = vrot.slane %v1482_v7, 5  ;;  %3490 = vmatprep.mubr.bf16.mxu1 %v4820_v36 }
 0x12c   : > { %v1582_v18 = vld [vmem:[#allocation2 + $0x4c] sm:$0xf]  ;;  %v1868_v21 = vsel %vm5393_vm14, %v1863_v11, %v1867_v17  ;;  %v1873_v22 = vrot.slane %v1872_v39, 4  ;;  %v1583_v46 = vld [vmem:[#allocation2 + $0x50] sm:$0x1]  ;;  %3491 = vmatmul.mubr.bf16.gmra.mxu1 %v4822_v8  ;;  %v1469_v62 = vor.u32 %v1468_v13, %v1465_v20 }
 0x12d   : > { %v1651_v0 = vrot.slane %v1582_v18, 5  ;;  %v2161_v9 = vld [vmem:[#allocation3 + $0x130] sm:$0xff]  ;;  %1975 = vst [vmem:[#allocation3 + $0x13c] sm:$0xf] %v1868_v21  ;;  %v1479_v24 = vor.u32 %v1478_v15, %v1474_v14  ;;  %v1654_v56 = vrot.slane %v1583_v46, 5 }
 0x12e   : > { %v1713_v25 = vld [vmem:[#allocation2 + $0x54] sm:$0xf]  ;;  %v1714_v26 = vld [vmem:[#allocation2 + $0x58] sm:$0xf]  ;;  %v2166_v27 = vld [vmem:[#allocation3 + $0x154] sm:$0xff]  ;;  %v1878_v57 = vsel %vm5393_vm14, %v1873_v22, %v1877_v4  ;;  %v1470_v34 = vrot.slane %v1469_v62, 4 }
 0x12f   : > { %v4824_v28 = vld [vmem:[#allocation3 + $0x134] ss:$36 sps:$4 sm:$0xff]   ;;  %v1652_v32 = vsel %vm5387_vm13, %v4024_v23, %v1651_v0  ;;  %v1653_v33 = vrot.slane %v1651_v0, 4  ;;  %1729 = vst [vmem:[#allocation3 + $0x180] sm:$0xf] %v1713_v25  ;;  %v4075_v60 = vcombine.low %v2161_v9, %v2166_v27  ;;  %v1480_v47 = vrot.slane %v1479_v24, 4 }
 0x130   : > { %1730 = vst [vmem:[#allocation3 + $0x1a4] sm:$0xf] %v1714_v26  ;;  %v1750_v40 = vld [vmem:[#allocation2 + $0x54] sm:$0xf]  ;;  %1976 = vst [vmem:[#allocation3 + $0x160] sm:$0xf] %v1878_v57  ;;  %3401 = vmatprep.mubr.bf16.mxu0 %v4824_v28  ;;  %v1475_v44 = vsel %vm5393_vm14, %v1470_v34, %v1474_v14 }
 0x131   : > { %1696 = vst [vmem:[#allocation3 + $0x17c] sm:$0xf] %v1652_v32  ;;  %v1751_v48 = vld [vmem:[#allocation2 + $0x58] sm:$0xf]  ;;  %v1752_v1 = vld [vmem:[#allocation2 + $0x5c] sm:$0x1]  ;;  %v1655_v42 = vsel %vm5387_vm13, %v1653_v33, %v1654_v56  ;;  %3402 = vmatmul.mubr.bf16.gmra.mxu0 %v4075_v60  ;;  %v1485_v49 = vsel %vm5393_vm14, %v1480_v47, %v1484_v19 }
 0x132   : > { %v1880_v41 = vshrl.u32 %v1750_v40, 16  ;;  %v1883_v45 = vshll.u32 %v1750_v40, 16  ;;  %v1889_v10 = vshll.u32 %v1751_v48, 16  ;;  %1697 = vst [vmem:[#allocation3 + $0x1a0] sm:$0xf] %v1655_v42  ;;  %v1893_v63 = vshrl.u32 %v1751_v48, 16 }
 0x133   : > { %v1899_v58 = vshll.u32 %v1752_v1, 16  ;;  %v1336_v50 = vld [vmem:[#allocation2 + $0x54] sm:$0xf]  ;;  %1560 = vst [vmem:[#allocation3 + $0x178] sm:$0xf] %v1475_v44 }
 0x134   : > { %1561 = vst [vmem:[#allocation3 + $0x19c] sm:$0xf] %v1485_v49  ;;  %v1882_v59 = vrot.slane %v1880_v41, 4  ;;  %v1885_v51 = vrot.slane %v1883_v45, 5  ;;  %v1891_v16 = vrot.slane %v1889_v10, 5  ;;  %v1487_v12 = vshrl.u32 %v1336_v50, 16 }
 0x135   : > { %v1337_v2 = vld [vmem:[#allocation2 + $0x58] sm:$0xf]  ;;  %v1895_v35 = vrot.slane %v1893_v63, 4  ;;  %v1901_v55 = vrot.slane %v1899_v58, 5  ;;  %v1338_v52 = vld [vmem:[#allocation2 + $0x5c] sm:$0x1] }
 0x136   : > { %v1490_v53 = vshll.u32 %v1336_v50, 16  ;;  %v1496_v17 = vshll.u32 %v1337_v2, 16  ;;  %v1886_v37 = vor.u32 %v1885_v51, %v1882_v59  ;;  %v1489_v54 = vrot.slane %v1487_v12, 4  ;;  %v1584_v61 = vld [vmem:[#allocation2 + $0x54] sm:$0xe] }
 0x137   : > { %v1500_v31 = vshrl.u32 %v1337_v2, 16  ;;  %v1506_v38 = vshll.u32 %v1338_v52, 16  ;;  %v1896_v4 = vor.u32 %v1895_v35, %v1891_v16  ;;  %v1585_v20 = vld [vmem:[#allocation2 + $0x58] sm:$0xf]  ;;  %v1586_v5 = vld [vmem:[#allocation2 + $0x5c] sm:$0x1] }
 0x138   : > { %v1492_v3 = vrot.slane %v1490_v53, 5  ;;  %v1498_v29 = vrot.slane %v1496_v17, 5  ;;  %v4826_v6 = vld [vmem:[#allocation3 + $0x13c] ss:$36 sps:$4 sm:$0xff]   ;;  %v1887_v36 = vrot.slane %v1886_v37, 4  ;;  %v4025_v15 = vrot.slane %v1584_v61, 9 }
 0x139   : > { %v4828_v7 = vld [vmem:[#allocation3 + $0x138] ss:$36 sps:$4 sm:$0xff]   ;;  %v1897_v8 = vrot.slane %v1896_v4, 4  ;;  %v1502_v39 = vrot.slane %v1500_v31, 4  ;;  %v1715_v13 = vld [vmem:[#allocation2 + $0x60] sm:$0xf]  ;;  %3498 = vmatprep.mubr.bf16.mxu1 %v4826_v6 }
 0x13a   : > { %v1493_v11 = vor.u32 %v1492_v3, %v1489_v54  ;;  %v1892_v14 = vsel %vm5393_vm14, %v1887_v36, %v1891_v16  ;;  %v1658_v19 = vrot.slane %v1585_v20, 5  ;;  %v1661_v18 = vrot.slane %v1586_v5, 5  ;;  %v1716_v21 = vld [vmem:[#allocation2 + $0x64] sm:$0xf]  ;;  %1731 = vst [vmem:[#allocation3 + $0x1c8] sm:$0xf] %v1715_v13  ;;  %3499 = vmatmul.mubr.bf16.gmra.mxu1 %v4828_v7 }
 0x13b   : > { %v2171_v22 = vld [vmem:[#allocation3 + $0x178] sm:$0xff]  ;;  %v1902_v0 = vsel %vm5393_vm14, %v1897_v8, %v1901_v55  ;;  %1977 = vst [vmem:[#allocation3 + $0x184] sm:$0xf] %v1892_v14  ;;  %v1503_v62 = vor.u32 %v1502_v39, %v1498_v29  ;;  %v1508_v24 = vrot.slane %v1506_v38, 5  ;;  %1732 = vst [vmem:[#allocation3 + $0x1ec] sm:$0xf] %v1716_v21 }
 0x13c   : > { %v2176_v46 = vld [vmem:[#allocation3 + $0x19c] sm:$0xff]  ;;  %v1494_v9 = vrot.slane %v1493_v11, 4  ;;  %1978 = vst [vmem:[#allocation3 + $0x1a8] sm:$0xf] %v1902_v0  ;;  %v1659_v25 = vsel %vm5387_vm13, %v4025_v15, %v1658_v19  ;;  %v1660_v26 = vrot.slane %v1658_v19, 4 }
 0x13d   : > { %v4830_v23 = vld [vmem:[#allocation3 + $0x17c] ss:$36 sps:$4 sm:$0xff]   ;;  %v4084_v56 = vcombine.low %v2171_v22, %v2176_v46  ;;  %v1753_v27 = vld [vmem:[#allocation2 + $0x60] sm:$0xf]  ;;  %v1754_v28 = vld [vmem:[#allocation2 + $0x64] sm:$0xf] }
 0x13e   : > { %3409 = vmatprep.mubr.bf16.mxu0 %v4830_v23  ;;  %v1499_v57 = vsel %vm5393_vm14, %v1494_v9, %v1498_v29  ;;  %v1504_v32 = vrot.slane %v1503_v62, 4  ;;  %1698 = vst [vmem:[#allocation3 + $0x1c4] sm:$0xf] %v1659_v25  ;;  %v1755_v33 = vld [vmem:[#allocation2 + $0x68] sm:$0x1]  ;;  %v1904_v40 = vshrl.u32 %v1753_v27, 16  ;;  %v1662_v34 = vsel %vm5387_vm13, %v1660_v26, %v1661_v18 }
 0x13f   : > { %v1907_v60 = vshll.u32 %v1753_v27, 16  ;;  %3410 = vmatmul.mubr.bf16.gmra.mxu0 %v4084_v56  ;;  %1562 = vst [vmem:[#allocation3 + $0x1c0] sm:$0xf] %v1499_v57  ;;  %v1913_v47 = vshll.u32 %v1754_v28, 16  ;;  %v1917_v48 = vshrl.u32 %v1754_v28, 16  ;;  %v1923_v1 = vshll.u32 %v1755_v33, 16 }
 0x140   : > { %v1509_v42 = vsel %vm5393_vm14, %v1504_v32, %v1508_v24  ;;  %1699 = vst [vmem:[#allocation3 + $0x1e8] sm:$0xf] %v1662_v34  ;;  %v1906_v41 = vrot.slane %v1904_v40, 4  ;;  %v1339_v10 = vld [vmem:[#allocation2 + $0x60] sm:$0xf] }
 0x141   : > { %v1909_v45 = vrot.slane %v1907_v60, 5  ;;  %1563 = vst [vmem:[#allocation3 + $0x1e4] sm:$0xf] %v1509_v42  ;;  %v1915_v44 = vrot.slane %v1913_v47, 5  ;;  %v1919_v49 = vrot.slane %v1917_v48, 4  ;;  %v1511_v58 = vshrl.u32 %v1339_v10, 16 }
 0x142   : > { %v1340_v63 = vld [vmem:[#allocation2 + $0x64] sm:$0xf]  ;;  %v1341_v59 = vld [vmem:[#allocation2 + $0x68] sm:$0x1]  ;;  %v1514_v51 = vshll.u32 %v1339_v10, 16  ;;  %v1925_v35 = vrot.slane %v1923_v1, 5 }
 0x143   : > { %v1910_v50 = vor.u32 %v1909_v45, %v1906_v41  ;;  %v1520_v16 = vshll.u32 %v1340_v63, 16  ;;  %v1524_v2 = vshrl.u32 %v1340_v63, 16  ;;  %v1920_v12 = vor.u32 %v1919_v49, %v1915_v44  ;;  %v1587_v53 = vld [vmem:[#allocation2 + $0x60] sm:$0xe]  ;;  %v4834_v37 = vld [vmem:[#allocation3 + $0x180] ss:$36 sps:$4 sm:$0xff]  }
 0x144   : > { %v1513_v55 = vrot.slane %v1511_v58, 4  ;;  %v1530_v52 = vshll.u32 %v1341_v59, 16  ;;  %v4832_v17 = vld [vmem:[#allocation3 + $0x184] ss:$36 sps:$4 sm:$0xff]   ;;  %v1516_v38 = vrot.slane %v1514_v51, 5  ;;  %v4026_v7 = vrot.slane %v1587_v53, 9 }
 0x145   : > { %v1911_v54 = vrot.slane %v1910_v50, 4  ;;  %v1921_v31 = vrot.slane %v1920_v12, 4  ;;  %v1522_v61 = vrot.slane %v1520_v16, 5  ;;  %v1526_v4 = vrot.slane %v1524_v2, 4  ;;  %v1588_v3 = vld [vmem:[#allocation2 + $0x64] sm:$0xf]  ;;  %3506 = vmatprep.mubr.bf16.mxu1 %v4832_v17 }
 0x146   : > { %v2181_v29 = vld [vmem:[#allocation3 + $0x1c0] sm:$0xff]  ;;  %v1532_v5 = vrot.slane %v1530_v52, 5  ;;  %v1589_v6 = vld [vmem:[#allocation2 + $0x68] sm:$0x1]  ;;  %v1665_v36 = vrot.slane %v1588_v3, 5  ;;  %3507 = vmatmul.mubr.bf16.gmra.mxu1 %v4834_v37  ;;  %v1517_v11 = vor.u32 %v1516_v38, %v1513_v55 }
 0x147   : > { %v1916_v20 = vsel %vm5393_vm14, %v1911_v54, %v1915_v44  ;;  %v1926_v8 = vsel %vm5393_vm14, %v1921_v31, %v1925_v35  ;;  %v1527_v39 = vor.u32 %v1526_v4, %v1522_v61  ;;  %v1668_v13 = vrot.slane %v1589_v6, 5  ;;  %v1717_v14 = vld [vmem:[#allocation2 + $0x6c] sm:$0xf]  ;;  %v1718_v15 = vld [vmem:[#allocation2 + $0x70] sm:$0xf] }
 0x148   : > { %1979 = vst [vmem:[#allocation3 + $0x1cc] sm:$0xf] %v1916_v20  ;;  %v2186_v19 = vld [vmem:[#allocation3 + $0x1e4] sm:$0xff]  ;;  %1980 = vst [vmem:[#allocation3 + $0x1f0] sm:$0xf] %v1926_v8  ;;  %v1666_v21 = vsel %vm5387_vm13, %v4026_v7, %v1665_v36  ;;  %v1667_v22 = vrot.slane %v1665_v36, 4 }
 0x149   : > { %v4836_v18 = vld [vmem:[#allocation3 + $0x1c4] ss:$36 sps:$4 sm:$0xff]   ;;  %1733 = vst [vmem:[#allocation3 + $0x210] sm:$0xf] %v1717_v14  ;;  %1734 = vst [vmem:[#allocation3 + $0x234] sm:$0xf] %v1718_v15  ;;  %v4093_v23 = vcombine.low %v2181_v29, %v2186_v19 }
 0x14a   : > { %v1756_v46 = vld [vmem:[#allocation2 + $0x6c] sm:$0xf]  ;;  %v1518_v0 = vrot.slane %v1517_v11, 4  ;;  %v1528_v9 = vrot.slane %v1527_v39, 4  ;;  %1700 = vst [vmem:[#allocation3 + $0x20c] sm:$0xf] %v1666_v21  ;;  %3417 = vmatprep.mubr.bf16.mxu0 %v4836_v18  ;;  %v1669_v56 = vsel %vm5387_vm13, %v1667_v22, %v1668_v13 }
 0x14b   : > { %v1757_v62 = vld [vmem:[#allocation2 + $0x70] sm:$0xf]  ;;  %v1758_v24 = vld [vmem:[#allocation2 + $0x74] sm:$0x1]  ;;  %v1928_v25 = vshrl.u32 %v1756_v46, 16  ;;  %v1931_v26 = vshll.u32 %v1756_v46, 16  ;;  %3418 = vmatmul.mubr.bf16.gmra.mxu0 %v4093_v23 }
 0x14c   : > { %v1937_v27 = vshll.u32 %v1757_v62, 16  ;;  %v1523_v28 = vsel %vm5393_vm14, %v1518_v0, %v1522_v61  ;;  %v1533_v57 = vsel %vm5393_vm14, %v1528_v9, %v1532_v5  ;;  %1701 = vst [vmem:[#allocation3 + $0x230] sm:$0xf] %v1669_v56  ;;  %v1941_v32 = vshrl.u32 %v1757_v62, 16  ;;  %v1983_v40 = vld [vmem:[#allocation2 + $0x18] sm:$0xe] }
 0x14d   : > { %v1947_v33 = vshll.u32 %v1758_v24, 16  ;;  %1564 = vst [vmem:[#allocation3 + $0x208] sm:$0xf] %v1523_v28  ;;  %1565 = vst [vmem:[#allocation3 + $0x22c] sm:$0xf] %v1533_v57  ;;  %v1930_v60 = vrot.slane %v1928_v25, 4 }
 0x14e   : > { %v1933_v34 = vrot.slane %v1931_v26, 5  ;;  %v1939_v47 = vrot.slane %v1937_v27, 5  ;;  %v1984_v48 = vld [vmem:[#allocation2 + $0x1c] sm:$0xf]  ;;  %v4027_v1 = vrot.slane %v1983_v40, 9  ;;  %v1943_v42 = vrot.slane %v1941_v32, 4 }
 0x14f   : > { %v1949_v41 = vrot.slane %v1947_v33, 5  ;;  %v1985_v45 = vld [vmem:[#allocation2 + $0x20] sm:$0x1]  ;;  %v2033_v10 = vrot.slane %v1984_v48, 5  ;;  %v1995_v63 = vld [vmem:[#allocation2 + $0x48] sm:$0xe] }
 0x150   : > { %v1934_v44 = vor.u32 %v1933_v34, %v1930_v60  ;;  %v2036_v49 = vrot.slane %v1985_v45, 5  ;;  %v1996_v58 = vld [vmem:[#allocation2 + $0x4c] sm:$0xf]  ;;  %v4838_v50 = vld [vmem:[#allocation3 + $0x1cc] ss:$36 sps:$4 sm:$0xff]   ;;  %v1944_v51 = vor.u32 %v1943_v42, %v1939_v47  ;;  %v4031_v55 = vrot.slane %v1995_v63, 9 }
 0x151   : > { %v4840_v59 = vld [vmem:[#allocation3 + $0x1c8] ss:$36 sps:$4 sm:$0xff]   ;;  %v2034_v16 = vsel %vm5387_vm13, %v4027_v1, %v2033_v10  ;;  %v2035_v2 = vrot.slane %v2033_v10, 4  ;;  %v1997_v35 = vld [vmem:[#allocation2 + $0x50] sm:$0x1]  ;;  %v2061_v52 = vrot.slane %v1996_v58, 5  ;;  %3514 = vmatprep.mubr.bf16.mxu1 %v4838_v50 }
 0x152   : > { %v1935_v12 = vrot.slane %v1934_v44, 4  ;;  %2103 = vst [vmem:[#allocation3 + $0x20] sm:$0xf] %v2034_v16  ;;  %v1945_v53 = vrot.slane %v1944_v51, 4  ;;  %v2064_v37 = vrot.slane %v1997_v35, 5  ;;  %3515 = vmatmul.mubr.bf16.gmra.mxu1 %v4840_v59 }
 0x153   : > { %v2037_v17 = vsel %vm5387_vm13, %v2035_v2, %v2036_v49  ;;  %v1986_v54 = vld [vmem:[#allocation2 + $0x24] sm:$0xe]  ;;  %v1987_v31 = vld [vmem:[#allocation2 + $0x28] sm:$0xf]  ;;  %v2062_v61 = vsel %vm5387_vm13, %v4031_v55, %v2061_v52  ;;  %v2063_v4 = vrot.slane %v2061_v52, 4 }
 0x154   : > { %v1940_v38 = vsel %vm5393_vm14, %v1935_v12, %v1939_v47  ;;  %2104 = vst [vmem:[#allocation3 + $0x44] sm:$0xf] %v2037_v17  ;;  %v1988_v3 = vld [vmem:[#allocation2 + $0x2c] sm:$0x1]  ;;  %v4028_v29 = vrot.slane %v1986_v54, 9  ;;  %v2191_v5 = vld [vmem:[#allocation3 + $0x208] sm:$0xff]  ;;  %v1950_v36 = vsel %vm5393_vm14, %v1945_v53, %v1949_v41 }
 0x155   : > { %v1998_v20 = vld [vmem:[#allocation2 + $0x54] sm:$0xe]  ;;  %v2196_v6 = vld [vmem:[#allocation3 + $0x22c] sm:$0xff]  ;;  %1981 = vst [vmem:[#allocation3 + $0x214] sm:$0xf] %v1940_v38  ;;  %v2040_v8 = vrot.slane %v1987_v31, 5  ;;  %v2065_v13 = vsel %vm5387_vm13, %v2063_v4, %v2064_v37 }
 0x156   : > { %v4842_v7 = vld [vmem:[#allocation3 + $0x20c] ss:$36 sps:$4 sm:$0xff]   ;;  %2111 = vst [vmem:[#allocation3 + $0x140] sm:$0xf] %v2062_v61  ;;  %v2043_v11 = vrot.slane %v1988_v3, 5  ;;  %v4102_v39 = vcombine.low %v2191_v5, %v2196_v6  ;;  %v4032_v19 = vrot.slane %v1998_v20, 9 }
 0x157   : > { %1982 = vst [vmem:[#allocation3 + $0x238] sm:$0xf] %v1950_v36  ;;  %v1999_v14 = vld [vmem:[#allocation2 + $0x58] sm:$0xf]  ;;  %v2000_v15 = vld [vmem:[#allocation2 + $0x5c] sm:$0x1]  ;;  %3425 = vmatprep.mubr.bf16.mxu0 %v4842_v7  ;;  %v2041_v18 = vsel %vm5387_vm13, %v4028_v29, %v2040_v8 }
 0x158   : > { %2112 = vst [vmem:[#allocation3 + $0x164] sm:$0xf] %v2065_v13  ;;  %v2042_v21 = vrot.slane %v2040_v8, 4  ;;  %v2068_v43 = vrot.slane %v1999_v14, 5  ;;  %v2071_v22 = vrot.slane %v2000_v15, 5  ;;  %3426 = vmatmul.mubr.bf16.gmra.mxu0 %v4102_v39 }
 0x159   : > { %v1989_v46 = vld [vmem:[#allocation2 + $0x30] sm:$0xe]  ;;  %2105 = vst [vmem:[#allocation3 + $0x68] sm:$0xf] %v2041_v18  ;;  %v1990_v23 = vld [vmem:[#allocation2 + $0x34] sm:$0xf] }
 0x15a   : > { %v1991_v0 = vld [vmem:[#allocation2 + $0x38] sm:$0x1]  ;;  %v4029_v9 = vrot.slane %v1989_v46, 9  ;;  %v2044_v62 = vsel %vm5387_vm13, %v2042_v21, %v2043_v11  ;;  %v2069_v24 = vsel %vm5387_vm13, %v4032_v19, %v2068_v43  ;;  %v2070_v56 = vrot.slane %v2068_v43, 4  ;;  %v2001_v26 = vld [vmem:[#allocation2 + $0x60] sm:$0xe] }
 0x15b   : > { %v2047_v25 = vrot.slane %v1990_v23, 5  ;;  %2106 = vst [vmem:[#allocation3 + $0x8c] sm:$0xf] %v2044_v62  ;;  %2113 = vst [vmem:[#allocation3 + $0x188] sm:$0xf] %v2069_v24  ;;  %v2050_v27 = vrot.slane %v1991_v0, 5 }
 0x15c   : > { %v2002_v28 = vld [vmem:[#allocation2 + $0x64] sm:$0xf]  ;;  %v2003_v57 = vld [vmem:[#allocation2 + $0x68] sm:$0x1]  ;;  %v4033_v32 = vrot.slane %v2001_v26, 9  ;;  %v2072_v40 = vsel %vm5387_vm13, %v2070_v56, %v2071_v22 }
 0x15d   : > { %v4848_v33 = vld [vmem:[#allocation3 + $0x20] ss:$36 sps:$4 sm:$0xff]   ;;  %v2048_v60 = vsel %vm5387_vm13, %v4029_v9, %v2047_v25  ;;  %v2049_v34 = vrot.slane %v2047_v25, 4  ;;  %v2075_v47 = vrot.slane %v2002_v28, 5  ;;  %2114 = vst [vmem:[#allocation3 + $0x1ac] sm:$0xf] %v2072_v40 }
 0x15e   : > { %2107 = vst [vmem:[#allocation3 + $0xb0] sm:$0xf] %v2048_v60  ;;  %v2078_v48 = vrot.slane %v2003_v57, 5  ;;  %v1992_v1 = vld [vmem:[#allocation2 + $0x3c] sm:$0xe]  ;;  %4621 = vmatprep.mubr.bf16.mxu0 %v4848_v33 }
 0x15f   : > { %v4844_v42 = vld [vmem:[#allocation3 + $0x214] ss:$36 sps:$4 sm:$0xff]   ;;  %v2051_v45 = vsel %vm5387_vm13, %v2049_v34, %v2050_v27  ;;  %v2076_v10 = vsel %vm5387_vm13, %v4033_v32, %v2075_v47  ;;  %v2077_v44 = vrot.slane %v2075_v47, 4  ;;  %v4849_v49 = vld [vmem:[#allocation3 + $0x140] ss:$36 sps:$4 sm:$0xff]   ;;  %v4030_v59 = vrot.slane %v1992_v1, 9 }
 0x160   : > { %v4846_v41 = vld [vmem:[#allocation3 + $0x210] ss:$36 sps:$4 sm:$0xff]   ;;  %2108 = vst [vmem:[#allocation3 + $0xd4] sm:$0xf] %v2051_v45  ;;  %2115 = vst [vmem:[#allocation3 + $0x1d0] sm:$0xf] %v2076_v10  ;;  %3522 = vmatprep.mubr.bf16.mxu1 %v4844_v42 }
 0x161   : > { %v1993_v63 = vld [vmem:[#allocation2 + $0x40] sm:$0xf]  ;;  %v2079_v58 = vsel %vm5387_vm13, %v2077_v44, %v2078_v48  ;;  %v1994_v50 = vld [vmem:[#allocation2 + $0x44] sm:$0x1]  ;;  %3523 = vmatmul.mubr.bf16.gmra.mxu1 %v4846_v41  ;;  %v2004_v2 = vld [vmem:[#allocation2 + $0x6c] sm:$0xe] }
 0x162   : > { %v2054_v51 = vrot.slane %v1993_v63, 5  ;;  %2116 = vst [vmem:[#allocation3 + $0x1f4] sm:$0xf] %v2079_v58  ;;  %v2057_v16 = vrot.slane %v1994_v50, 5  ;;  %v2005_v12 = vld [vmem:[#allocation2 + $0x70] sm:$0xf]  ;;  %4629 = vmatprep.mubr.bf16.mxu1 %v4849_v49 }
 0x163   : > { %v4850_v35 = vld [vmem:[#allocation3 + $0x68] ss:$36 sps:$4 sm:$0xff]   ;;  %v2006_v53 = vld [vmem:[#allocation2 + $0x74] sm:$0x1]  ;;  %v4034_v17 = vrot.slane %v2004_v2, 9  ;;  %v2082_v37 = vrot.slane %v2005_v12, 5 }
 0x164   : > { %v2055_v55 = vsel %vm5387_vm13, %v4030_v59, %v2054_v51  ;;  %v2056_v52 = vrot.slane %v2054_v51, 4  ;;  %4622 = vmatmul.mubr.bf16.vlgmr.msra.gmra.mxu0 %v4850_v35  ;;  %v4851_v54 = vld [vmem:[#allocation3 + $0x188] ss:$36 sps:$4 sm:$0xff]   ;;  %v2085_v4 = vrot.slane %v2006_v53, 5 }
 0x165   : > { %2109 = vst [vmem:[#allocation3 + $0xf8] sm:$0xf] %v2055_v55  ;;  %v2083_v38 = vsel %vm5387_vm13, %v4034_v17, %v2082_v37  ;;  %v2084_v61 = vrot.slane %v2082_v37, 4 }
 0x166   : > { %v2058_v31 = vsel %vm5387_vm13, %v2056_v52, %v2057_v16  ;;  %2117 = vst [vmem:[#allocation3 + $0x218] sm:$0xf] %v2083_v38 }
 0x167   : > { %v4852_v3 = vld [vmem:[#allocation3 + $0xb0] ss:$36 sps:$4 sm:$0xff]   ;;  %2110 = vst [vmem:[#allocation3 + $0x11c] sm:$0xf] %v2058_v31  ;;  %v2086_v29 = vsel %vm5387_vm13, %v2084_v61, %v2085_v4 }
 0x168   : > { %4625 = vmatprep.mubr.bf16.mxu0 %v4852_v3  ;;  %2118 = vst [vmem:[#allocation3 + $0x23c] sm:$0xf] %v2086_v29 }
 0x169   : > { %v4853_v20 = vld [vmem:[#allocation3 + $0x1d0] ss:$36 sps:$4 sm:$0xff]   ;;  %4630 = vmatmul.mubr.bf16.vlgmr.msra.gmra.mxu1 %v4851_v54 }
 0x16a   : > { %4633 = vmatprep.mubr.bf16.mxu1 %v4853_v20 }
 0x16b   : > { %v4349_v36 = vpop.f32.mrf.mxu0 }
 0x16c   : > { %v4413_v7 = vpop.f32.mrf.mxu1 }
 0x16d   : > { %v4350_v39 = vpop.f32.mrf.mxu0 }
 0x16e   : > { %v4854_v5 = vld [vmem:[#allocation3 + $0xf8] ss:$36 sps:$4 sm:$0xff]   ;;  %v4414_v8 = vpop.f32.mrf.mxu1  ;;  %v4351_v14 = vadd.f32 %v4350_v39, %v4349_v36 }
 0x16f   : > { %4626 = vmatmul.mubr.bf16.gmra.mxu0 %v4854_v5  ;;  %v4855_v6 = vld [vmem:[#allocation3 + $0x218] ss:$36 sps:$4 sm:$0xff]   ;;  %v4415_v11 = vadd.f32 %v4414_v8, %v4413_v7  ;;  %v4352_v15 = vpop.f32.mrf.mxu0 }
 0x170   : > { %v4416_v13 = vpop.f32.mrf.mxu1 }
 0x171   : > { %4634 = vmatmul.mubr.bf16.gmra.mxu1 %v4855_v6  ;;  %v5754_v30 = vadd.f32 %v4415_v11, %v4351_v14  ;;  %v4353_v21 = vpop.f32.mrf.mxu0 }
 0x172   : > { %v4417_v19 = vpop.f32.mrf.mxu1  ;;  %v4354_v22 = vadd.f32 %v4353_v21, %v4352_v15 }
 0x173   : > { %v4418_v18 = vadd.f32 %v4417_v19, %v4416_v13 }
 0x174   : > { %v4419_v43 = vpop.f32.mrf.mxu1 }
 0x175   : > { %v4355_v46 = vpop.f32.mrf.mxu0  ;;  %v5756_v0 = vadd.f32 %v4418_v18, %v4354_v22 }
 0x176   : > { %v4420_v23 = vpop.f32.mrf.mxu1 }
 0x177   : > { %v4421_v9 = vadd.f32 %v4420_v23, %v4419_v43  ;;  %v4356_v62 = vpop.f32.mrf.mxu0 }
 0x178   : > { %v4422_v24 = vpop.f32.mrf.mxu1  ;;  %v4357_v56 = vadd.f32 %v4356_v62, %v4355_v46 }
 0x179   : > { %v4358_v25 = vpop.f32.mrf.mxu0 }
 0x17a   : > { %v4423_v26 = vpop.f32.mrf.mxu1  ;;  %v5758_v27 = vadd.f32 %v4421_v9, %v4357_v56 }
 0x17b   : > { %v4424_v28 = vadd.f32 %v4423_v26, %v4422_v24  ;;  %v4359_v57 = vpop.f32.mrf.mxu0 }
 0x17c   : > { %v4360_v32 = vadd.f32 %v4359_v57, %v4358_v25  ;;  %v4425_v33 = vpop.f32.mrf.mxu1 }
 0x17e   : > { %v5760_v40 = vadd.f32 %v4424_v28, %v4360_v32  ;;  %v4361_v60 = vpop.f32.mrf.mxu0  ;;  %v4426_v34 = vpop.f32.mrf.mxu1 }
 0x17f   : > { %v4427_v48 = vadd.f32 %v4426_v34, %v4425_v33 }
 0x180   : > { %v4362_v47 = vpop.f32.mrf.mxu0  ;;  %v4428_v42 = vpop.f32.mrf.mxu1 }
 0x181   : > { %v4363_v1 = vadd.f32 %v4362_v47, %v4361_v60 }
 0x182   : > { %v4364_v41 = vpop.f32.mrf.mxu0  ;;  %v4429_v10 = vpop.f32.mrf.mxu1 }
 0x183   : > { %v5762_v45 = vadd.f32 %v4427_v48, %v4363_v1  ;;  %v4430_v49 = vadd.f32 %v4429_v10, %v4428_v42 }
 0x184   : > { %v4365_v44 = vpop.f32.mrf.mxu0 }
 0x185   : > { %v4366_v63 = vadd.f32 %v4365_v44, %v4364_v41  ;;  %v4431_v50 = vpop.f32.mrf.mxu1 }
 0x187   : > { %v5764_v58 = vadd.f32 %v4430_v49, %v4366_v63  ;;  %v4432_v51 = vpop.f32.mrf.mxu1 }
 0x188   : > { %v4433_v2 = vadd.f32 %v4432_v51, %v4431_v50 }
 0x189   : > { %5911 = vst [vmem:[#allocation5_spill] sm:$0xff] %v5764_v58  ;;  %v4367_v59 = vpop.f32.mrf.mxu0  ;;  %v4434_v35 = vpop.f32.mrf.mxu1 }
 0x18b   : > { %v4368_v16 = vpop.f32.mrf.mxu0  ;;  %v4435_v53 = vpop.f32.mrf.mxu1 }
 0x18c   : > { %v4369_v12 = vadd.f32 %v4368_v16, %v4367_v59  ;;  %v4436_v37 = vadd.f32 %v4435_v53, %v4434_v35 }
 0x18d   : > { %v4370_v55 = vpop.f32.mrf.mxu0 }
 0x18e   : > { %v5766_v52 = vadd.f32 %v4433_v2, %v4369_v12 }
 0x18f   : > { %v4371_v17 = vpop.f32.mrf.mxu0  ;;  %v4437_v38 = vpop.f32.mrf.mxu1 }
 0x190   : > { %5912 = vst [vmem:[#allocation6_spill] sm:$0xff] %v5766_v52  ;;  %v4372_v54 = vadd.f32 %v4371_v17, %v4370_v55 }
 0x191   : > { %v4438_v4 = vpop.f32.mrf.mxu1 }
 0x192   : > { %v5768_v31 = vadd.f32 %v4436_v37, %v4372_v54  ;;  %v4439_v3 = vadd.f32 %v4438_v4, %v4437_v38 }
 0x193   : > { %v4373_v61 = vpop.f32.mrf.mxu0  ;;  %v4440_v20 = vpop.f32.mrf.mxu1 }
 0x194   : > { %5913 = vst [vmem:[#allocation7_spill] sm:$0xff] %v5768_v31 }
 0x195   : > { %v4374_v29 = vpop.f32.mrf.mxu0  ;;  %v4441_v7 = vpop.f32.mrf.mxu1 }
 0x196   : > { %v4375_v5 = vadd.f32 %v4374_v29, %v4373_v61  ;;  %v4442_v8 = vadd.f32 %v4441_v7, %v4440_v20 }
 0x197   : > { %v4376_v6 = vpop.f32.mrf.mxu0 }
 0x198   : > { %v5770_v36 = vadd.f32 %v4439_v3, %v4375_v5 }
 0x199   : > { %v4377_v11 = vpop.f32.mrf.mxu0 }
 0x19a   : > { %5914 = vst [vmem:[#allocation8_spill] sm:$0xff] %v5770_v36  ;;  %v4378_v39 = vadd.f32 %v4377_v11, %v4376_v6 }
 0x19b   : > { %v4443_v15 = vpop.f32.mrf.mxu1 }
 0x19c   : > { %v5772_v13 = vadd.f32 %v4442_v8, %v4378_v39 }
 0x19d   : > { %v4444_v21 = vpop.f32.mrf.mxu1 }
 0x19e   : > { %5915 = vst [vmem:[#allocation9_spill] sm:$0xff] %v5772_v13  ;;  %v4379_v14 = vpop.f32.mrf.mxu0  ;;  %v4445_v43 = vadd.f32 %v4444_v21, %v4443_v15 }
 0x19f   : > { %v4446_v46 = vpop.f32.mrf.mxu1 }
 0x1a0   : > { %v4380_v19 = vpop.f32.mrf.mxu0 }
 0x1a1   : > { %v4381_v18 = vadd.f32 %v4380_v19, %v4379_v14  ;;  %v4447_v24 = vpop.f32.mrf.mxu1 }
 0x1a2   : > { %v4382_v22 = vpop.f32.mrf.mxu0  ;;  %v4448_v56 = vadd.f32 %v4447_v24, %v4446_v46 }
 0x1a3   : > { %v5774_v23 = vadd.f32 %v4445_v43, %v4381_v18 }
 0x1a4   : > { %v4383_v9 = vpop.f32.mrf.mxu0 }
 0x1a5   : > { %5916 = vst [vmem:[#allocation10_spill] sm:$0xff] %v5774_v23  ;;  %v4384_v62 = vadd.f32 %v4383_v9, %v4382_v22  ;;  %v4449_v26 = vpop.f32.mrf.mxu1 }
 0x1a7   : > { %v5776_v25 = vadd.f32 %v4448_v56, %v4384_v62  ;;  %v4450_v57 = vpop.f32.mrf.mxu1 }
 0x1a8   : > { %v4451_v32 = vadd.f32 %v4450_v57, %v4449_v26 }
 0x1a9   : > { %5917 = vst [vmem:[#allocation11_spill] sm:$0xff] %v5776_v25  ;;  %v4385_v28 = vpop.f32.mrf.mxu0  ;;  %v4452_v60 = vpop.f32.mrf.mxu1 }
 0x1ab   : > { %v4386_v33 = vpop.f32.mrf.mxu0  ;;  %v4453_v48 = vpop.f32.mrf.mxu1 }
 0x1ac   : > { %v4387_v34 = vadd.f32 %v4386_v33, %v4385_v28  ;;  %v4454_v42 = vadd.f32 %v4453_v48, %v4452_v60 }
 0x1ad   : > { %v4388_v47 = vpop.f32.mrf.mxu0 }
 0x1ae   : > { %v5778_v1 = vadd.f32 %v4451_v32, %v4387_v34 }
 0x1af   : > { %v4389_v41 = vpop.f32.mrf.mxu0 }
 0x1b0   : > { %5918 = vst [vmem:[#allocation12_spill] sm:$0xff] %v5778_v1  ;;  %v4390_v10 = vadd.f32 %v4389_v41, %v4388_v47  ;;  %v4455_v63 = vpop.f32.mrf.mxu1 }
 0x1b2   : > { %v5780_v44 = vadd.f32 %v4454_v42, %v4390_v10  ;;  %v4456_v51 = vpop.f32.mrf.mxu1 }
 0x1b3   : > { %v4457_v16 = vadd.f32 %v4456_v51, %v4455_v63 }
 0x1b4   : > { %5919 = vst [vmem:[#allocation13_spill] sm:$0xff] %v5780_v44  ;;  %v4391_v49 = vpop.f32.mrf.mxu0  ;;  %v4458_v12 = vpop.f32.mrf.mxu1 }
 0x1b6   : > { %v4392_v50 = vpop.f32.mrf.mxu0  ;;  %v4459_v17 = vpop.f32.mrf.mxu1 }
 0x1b7   : > { %v4393_v59 = vadd.f32 %v4392_v50, %v4391_v49  ;;  %v4460_v37 = vadd.f32 %v4459_v17, %v4458_v12 }
 0x1b8   : > { %v4394_v2 = vpop.f32.mrf.mxu0 }
 0x1b9   : > { %v5782_v35 = vadd.f32 %v4457_v16, %v4393_v59 }
 0x1ba   : > { %v4395_v55 = vpop.f32.mrf.mxu0 }
 0x1bb   : > { %5920 = vst [vmem:[#allocation14_spill] sm:$0xff] %v5782_v35  ;;  %v4396_v53 = vadd.f32 %v4395_v55, %v4394_v2 }
 0x1bd   : > { %v5784_v54 = vadd.f32 %v4460_v37, %v4396_v53 }
 0x1be   : > { %v4477_v38 = vpop.f32.mrf.mxu0 }
 0x1bf   : > { %5921 = vst [vmem:[#allocation15_spill] sm:$0xff] %v5784_v54 }
 0x1c0   : > { %v4478_v61 = vpop.f32.mrf.mxu0 }
 0x1c1   : > { %v4479_v4 = vadd.f32 %v4478_v61, %v4477_v38 }
 0x1c2   : > { %v4480_v3 = vpop.f32.mrf.mxu0 }
 0x1c3   : > { %v5787_v29 = vadd.f32 %v4479_v4, %v5754_v30 }
 0x1c4   : > { %v4481_v5 = vpop.f32.mrf.mxu0 }
 0x1c7   : > { %v4541_v20 = vpop.f32.mrf.mxu1 }
 0x1c9   : > { %v4542_v6 = vpop.f32.mrf.mxu1 }
 0x1ca   : > { %v4543_v36 = vadd.f32 %v4542_v6, %v4541_v20 }
 0x1cb   : > { %v4544_v7 = vpop.f32.mrf.mxu1 }
 0x1cd   : > { %v4483_v8 = vpop.f32.mrf.mxu0  ;;  %v4545_v39 = vpop.f32.mrf.mxu1 }
 0x1cf   : > { %v4484_v11 = vpop.f32.mrf.mxu0 }
 0x1d1   : > { %v4486_v14 = vpop.f32.mrf.mxu0 }
 0x1d3   : > { %v4547_v15 = vpop.f32.mrf.mxu1  ;;  %v4487_v19 = vpop.f32.mrf.mxu0 }
 0x1d4   : > { %v4488_v25 = vadd.f32 %v4487_v19, %v4486_v14 }
 0x1d5   : > { %v4548_v18 = vpop.f32.mrf.mxu1 }
 0x1d7   : > { %v4550_v21 = vpop.f32.mrf.mxu1 }
 0x1d9   : > { %v4489_v43 = vpop.f32.mrf.mxu0  ;;  %v4551_v46 = vpop.f32.mrf.mxu1 }
 0x1db   : > { %v4490_v22 = vpop.f32.mrf.mxu0 }
 0x1dd   : > { %v4492_v9 = vpop.f32.mrf.mxu0 }
 0x1df   : > { %v4553_v62 = vpop.f32.mrf.mxu1  ;;  %v4493_v24 = vpop.f32.mrf.mxu0 }
 0x1e1   : > { %v4554_v30 = vpop.f32.mrf.mxu1 }
 0x1e3   : > { %v5789_v56 = vpop.f32.mrf.mxu1 }
 0x1e4   : > { %5922 = vst [vmem:[#allocation16_spill] sm:$0xff] %v5789_v56  ;;  %v4494_v56 = vadd.f32 %v4493_v24, %v4492_v9 }
 0x1e5   : > { %v4495_v26 = vpop.f32.mrf.mxu0  ;;  %v5791_v57 = vpop.f32.mrf.mxu1 }
 0x1e6   : > { %5923 = vst [vmem:[#allocation17_spill] sm:$0xff] %v5791_v57  ;;  %v4549_v57 = vadd.f32 %v4548_v18, %v4547_v15 }
 0x1e7   : > { %v4496_v28 = vpop.f32.mrf.mxu0 }
 0x1e9   : > { %v5793_v32 = vpop.f32.mrf.mxu0 }
 0x1ea   : > { %5924 = vst [vmem:[#allocation18_spill] sm:$0xff] %v5793_v32  ;;  %v4546_v32 = vadd.f32 %v4545_v39, %v4544_v7  ;;  %v3469_v7 = vadd.f32 %v4543_v36, %v5787_v29 }
 0x1eb   : > { %v4499_v60 = vpop.f32.mrf.mxu0 }
 0x1ec   : > { %v5795_v33 = vpop.f32.mrf.mxu1 }
 0x1ed   : > { %5925 = vst [vmem:[#allocation19_spill] sm:$0xff] %v5795_v33  ;;  %v4485_v33 = vadd.f32 %v4484_v11, %v4483_v8  ;;  %v4497_v8 = vadd.f32 %v4496_v28, %v4495_v26  ;;  %v5939_v26 = vld [vmem:[#allocation8_spill] sm:$0xff] }
 0x1ee   : > { %v5797_v34 = vpop.f32.mrf.mxu1 }
 0x1ef   : > { %5926 = vst [vmem:[#allocation20_spill] sm:$0xff] %v5797_v34  ;;  %v4482_v34 = vadd.f32 %v4481_v5, %v4480_v3  ;;  %v4555_v5 = vadd.f32 %v4554_v30, %v4553_v62 }
 0x1f0   : > { %v5799_v47 = vpop.f32.mrf.mxu1 }
 0x1f1   : > { %5927 = vst [vmem:[#allocation21_spill] sm:$0xff] %v5799_v47  ;;  %v4501_v48 = vpop.f32.mrf.mxu0  ;;  %v5938_v9 = vld [vmem:[#allocation18_spill] sm:$0xff] }
 0x1f2   : > { %v5801_v41 = vpop.f32.mrf.mxu1  ;;  %v4500_v62 = vadd.f32 %v4499_v60, %v5938_v9 }
 0x1f3   : > { %v4502_v42 = vpop.f32.mrf.mxu0  ;;  %5928 = vst [vmem:[#allocation22_spill] sm:$0xff] %v5801_v41 }
 0x1f4   : > { %v4503_v11 = vadd.f32 %v4502_v42, %v4501_v48 }
 0x1f5   : > { %v4504_v10 = vpop.f32.mrf.mxu0 }
 0x1f6   : > { %v3404_v36 = vadd.f32 %v4503_v11, %v5939_v26 }
 0x1f7   : > { %v4505_v49 = vpop.f32.mrf.mxu0 }
 0x1f8   : > { %v4506_v14 = vadd.f32 %v4505_v49, %v4504_v10 }
 0x1fa   : > { %v4565_v63 = vpop.f32.mrf.mxu1 }
 0x1fc   : > { %v4566_v50 = vpop.f32.mrf.mxu1 }
 0x1fd   : > { %v4567_v29 = vadd.f32 %v4566_v50, %v4565_v63  ;;  %v5945_v63 = vld [vmem:[#allocation7_spill] sm:$0xff] }
 0x1fe   : > { %v4568_v51 = vpop.f32.mrf.mxu1  ;;  %v3399_v50 = vadd.f32 %v4500_v62, %v5945_v63 }
 0x1ff   : > { %v4507_v59 = vpop.f32.mrf.mxu0 }
 0x200   : > { %v4569_v2 = vpop.f32.mrf.mxu1 }
 0x201   : > { %v4508_v16 = vpop.f32.mrf.mxu0 }
 0x202   : > { %v4509_v20 = vadd.f32 %v4508_v16, %v4507_v59 }
 0x203   : > { %v4510_v12 = vpop.f32.mrf.mxu0 }
 0x205   : > { %v4511_v53 = vpop.f32.mrf.mxu0 }
 0x206   : > { %v4571_v55 = vpop.f32.mrf.mxu1  ;;  %v4512_v6 = vadd.f32 %v4511_v53, %v4510_v12  ;;  %v5943_v12 = vld [vmem:[#allocation19_spill] sm:$0xff]  ;;  %v5944_v53 = vld [vmem:[#allocation20_spill] sm:$0xff] }
 0x208   : > { %v4572_v17 = vpop.f32.mrf.mxu1 }
 0x20a   : > { %v4574_v37 = vpop.f32.mrf.mxu1 }
 0x20b   : > { %v5803_v38 = vpop.f32.mrf.mxu0 }
 0x20c   : > { %5929 = vst [vmem:[#allocation23_spill] sm:$0xff] %v5803_v38  ;;  %v4575_v4 = vpop.f32.mrf.mxu1  ;;  %v4491_v38 = vadd.f32 %v4490_v22, %v4489_v43  ;;  %v5936_v43 = vld [vmem:[#allocation17_spill] sm:$0xff]  ;;  %v5937_v22 = vld [vmem:[#allocation6_spill] sm:$0xff] }
 0x20d   : > { %v5805_v61 = vpop.f32.mrf.mxu0  ;;  %v4576_v42 = vadd.f32 %v4575_v4, %v4574_v37 }
 0x20e   : > { %5930 = vst [vmem:[#allocation24_spill] sm:$0xff] %v5805_v61  ;;  %v3375_v61 = vadd.f32 %v4482_v34, %v5756_v0  ;;  %v3388_v3 = vadd.f32 %v4491_v38, %v5762_v45  ;;  %v5942_v34 = vld [vmem:[#allocation11_spill] sm:$0xff]  ;;  %v4561_v38 = vadd.f32 %v5944_v53, %v5943_v12 }
 0x20f   : > { %v4516_v1 = vpop.f32.mrf.mxu0  ;;  %v3415_v48 = vadd.f32 %v4512_v6, %v5942_v34 }
 0x210   : > { %v3472_v18 = vadd.f32 %v4546_v32, %v3375_v61  ;;  %v5829_v30 = vadd.f32 %v4555_v5, %v3388_v3  ;;  %v4573_v32 = vadd.f32 %v4572_v17, %v4571_v55  ;;  %v5946_v61 = vld [vmem:[#allocation21_spill] sm:$0xff]  ;;  %v3501_v5 = vadd.f32 %v4567_v29, %v3404_v36 }
 0x211   : > { %v4517_v35 = vpop.f32.mrf.mxu0  ;;  %v3512_v11 = vadd.f32 %v4576_v42, %v3415_v48 }
 0x212   : > { %v5807_v54 = vpop.f32.mrf.mxu1  ;;  %v4518_v10 = vadd.f32 %v4517_v35, %v4516_v1 }
 0x213   : > { %5931 = vst [vmem:[#allocation25_spill] sm:$0xff] %v5807_v54  ;;  %v3380_v54 = vadd.f32 %v4485_v33, %v5758_v27  ;;  %v5934_v27 = vld [vmem:[#allocation5_spill] sm:$0xff]  ;;  %v4570_v33 = vadd.f32 %v4569_v2, %v4568_v51  ;;  %v5947_v51 = vld [vmem:[#allocation22_spill] sm:$0xff] }
 0x214   : > { %v5809_v44 = vpop.f32.mrf.mxu1  ;;  %v5821_v39 = vadd.f32 %v4494_v56, %v5934_v27  ;;  %v5940_v56 = vld [vmem:[#allocation9_spill] sm:$0xff]  ;;  %v4564_v2 = vadd.f32 %v5947_v51, %v5946_v61 }
 0x215   : > { %5932 = vst [vmem:[#allocation26_spill] sm:$0xff] %v5809_v44  ;;  %v3383_v44 = vadd.f32 %v4488_v25, %v5760_v40  ;;  %v3477_v40 = vadd.f32 %v4549_v57, %v3380_v54  ;;  %v3407_v28 = vadd.f32 %v4506_v14, %v5940_v56  ;;  %v5949_v35 = vld [vmem:[#allocation24_spill] sm:$0xff] }
 0x216   : > { %v5811_v41 = vpop.f32.mrf.mxu1 }
 0x217   : > { %5933 = vst [vmem:[#allocation27_spill] sm:$0xff] %v5811_v41  ;;  %v4552_v41 = vadd.f32 %v4551_v46, %v4550_v21  ;;  %v5935_v21 = vld [vmem:[#allocation16_spill] sm:$0xff]  ;;  %v5826_v46 = vadd.f32 %v4497_v8, %v5937_v22  ;;  %v3504_v14 = vadd.f32 %v4570_v33, %v3407_v28 }
 0x218   : > { %v4519_v47 = vpop.f32.mrf.mxu0  ;;  %v5813_v23 = vpop.f32.mrf.mxu1  ;;  %v4558_v45 = vadd.f32 %v5936_v43, %v5935_v21  ;;  %v5953_v21 = vld [vmem:[#allocation15_spill] sm:$0xff] }
 0x219   : > { %v3480_v25 = vadd.f32 %v4552_v41, %v3383_v44  ;;  %v5941_v44 = vld [vmem:[#allocation10_spill] sm:$0xff]  ;;  %v3493_v42 = vadd.f32 %v4561_v38, %v5826_v46 }
 0x21a   : > { %v4520_v31 = vpop.f32.mrf.mxu0  ;;  %v3412_v57 = vadd.f32 %v4509_v20, %v5941_v44  ;;  %v5950_v20 = vld [vmem:[#allocation13_spill] sm:$0xff] }
 0x21b   : > { %v4521_v49 = vadd.f32 %v4520_v31, %v4519_v47  ;;  %v5948_v31 = vld [vmem:[#allocation23_spill] sm:$0xff]  ;;  %v3423_v6 = vadd.f32 %v4518_v10, %v5950_v20  ;;  %v5955_v10 = vld [vmem:[#allocation25_spill] sm:$0xff] }
 0x21c   : > { %v4522_v13 = vpop.f32.mrf.mxu0  ;;  %v4515_v47 = vadd.f32 %v5949_v35, %v5948_v31  ;;  %v3509_v8 = vadd.f32 %v4573_v32, %v3412_v57 }
 0x21e   : > { %v4523_v52 = vpop.f32.mrf.mxu0 }
 0x21f   : > { %v4524_v3 = vadd.f32 %v4523_v52, %v4522_v13 }
 0x221   : > { %v4583_v58 = vpop.f32.mrf.mxu1 }
 0x223   : > { %v4584_v19 = vpop.f32.mrf.mxu1 }
 0x224   : > { %v4623_v0 = vpop.f32.mrf.mxu0 }
 0x225   : > { %v4586_v15 = vpop.f32.mrf.mxu1  ;;  %v3574_v60 = vadd.f32 %v4623_v0, %v3477_v40  ;;  %v5951_v0 = vld [vmem:[#allocation27_spill] sm:$0xff]  ;;  %v5952_v40 = vld [vmem:[#allocation14_spill] sm:$0xff] }
 0x226   : > { %v3565_v24 = vpop.f32.mrf.mxu0  ;;  %v4582_v27 = vadd.f32 %v5813_v23, %v5951_v0  ;;  %v3428_v52 = vadd.f32 %v4521_v49, %v5952_v40  ;;  %v5956_v49 = vld [vmem:[#allocation26_spill] sm:$0xff] }
 0x227   : > { %v4587_v54 = vpop.f32.mrf.mxu1  ;;  %v3566_v17 = vadd.f32 %v3565_v24, %v3469_v7 }
 0x228   : > { %v4624_v41 = vpop.f32.mrf.mxu0  ;;  %v4588_v9 = vadd.f32 %v4587_v54, %v4586_v15  ;;  %v3488_v15 = vadd.f32 %v4558_v45, %v5821_v39  ;;  %v5954_v54 = vld [vmem:[#allocation12_spill] sm:$0xff]  ;;  %v3520_v45 = vadd.f32 %v4582_v27, %v3423_v6 }
 0x229   : > { %v4631_v59 = vpop.f32.mrf.mxu1  ;;  %v3577_v16 = vadd.f32 %v4624_v41, %v3480_v25  ;;  %v4585_v25 = vadd.f32 %v4584_v19, %v4583_v58  ;;  %v3420_v34 = vadd.f32 %v4515_v47, %v5954_v54  ;;  %v3496_v41 = vadd.f32 %v4564_v2, %v3399_v50 }
 0x22a   : > { %v3568_v55 = vpop.f32.mrf.mxu0  ;;  %v3606_v43 = vadd.f32 %v4631_v59, %v3509_v8 }
 0x22b   : > { %v3597_v37 = vpop.f32.mrf.mxu1  ;;  %v3629_v4 = vpack.c.bf16 %v3577_v16, %v3574_v60  ;;  %v3569_v1 = vadd.f32 %v3568_v55, %v3472_v18  ;;  %v3431_v18 = vadd.f32 %v4524_v3, %v5953_v21  ;;  %v4579_v60 = vadd.f32 %v5956_v49, %v5955_v10 }
 0x22c   : > { %v3598_v56 = vadd.f32 %v3597_v37, %v3501_v5  ;;  %v3525_v51 = vadd.f32 %v4585_v25, %v3428_v52 }
 0x22d   : > { %4326 = vst [vmem:[%s4980_s18 + $0x8] sm:$0xff] %v3629_v4   ;;  %v4632_v13 = vpop.f32.mrf.mxu1  ;;  %v3628_v7 = vpack.c.bf16 %v3569_v1, %v3566_v17  ;;  %v3710_v62 = vunpack.c.l.bf16 %v3629_v4  ;;  %v3711_v23 = vunpack.c.h.bf16 %v3629_v4  ;;  %v3528_v39 = vadd.f32 %v4588_v9, %v3431_v18 }
 0x22e   : > { %v3609_v22 = vadd.f32 %v4632_v13, %v3512_v11  ;;  %v3517_v1 = vadd.f32 %v4579_v60, %v3420_v34 }
 0x22f   : > { %4282 = vst [vmem:[%s4980_s18] sm:$0xff] %v3628_v7   ;;  %v3708_v24 = vunpack.c.l.bf16 %v3628_v7  ;;  %v3709_v26 = vunpack.c.h.bf16 %v3628_v7  ;;  %v3600_v36 = vpop.f32.mrf.mxu1  ;;  %v4627_v29 = vpop.f32.mrf.mxu0  ;;  %v3748_v59 = vmul.f32 %v3710_v62, %v3710_v62  ;;  %v3749_v61 = vmul.f32 %v3711_v23, %v3711_v23 }
 0x230   : > { %v5849_v28 = vpack.c.bf16 %v3609_v22, %v3606_v43  ;;  %v3601_v33 = vadd.f32 %v3600_v36, %v3504_v14  ;;  %v3590_v55 = vadd.f32 %v4627_v29, %v3493_v42 }
 0x231   : > { %v3724_v44 = vadd.f32 %v3709_v26, %v3708_v24  ;;  %v3746_v57 = vmul.f32 %v3708_v24, %v3708_v24  ;;  %v3747_v58 = vmul.f32 %v3709_v26, %v3709_v26  ;;  %v4635_v19 = vpop.f32.mrf.mxu1  ;;  %v3581_v32 = vpop.f32.mrf.mxu0 }
 0x232   : > { %4330 = vst [vmem:[%s4980_s18 + $0x28] sm:$0xff] %v5849_v28   ;;  %v3632_v48 = vpack.c.bf16 %v3601_v33, %v3598_v56  ;;  %v3622_v50 = vadd.f32 %v4635_v19, %v3525_v51  ;;  %v3582_v2 = vadd.f32 %v3581_v32, %v5829_v30  ;;  %v3718_v29 = vunpack.c.l.bf16 %v5849_v28 }
 0x233   : > { %v3725_v16 = vadd.f32 %v3724_v44, %v3710_v62  ;;  %v3762_v12 = vadd.f32 %v3747_v58, %v3746_v57  ;;  %v3613_v53 = vpop.f32.mrf.mxu1  ;;  %v4628_v63 = vpop.f32.mrf.mxu0  ;;  %v3719_v44 = vunpack.c.h.bf16 %v5849_v28 }
 0x234   : > { %4329 = vst [vmem:[%s4980_s18 + $0x20] sm:$0xff] %v3632_v48   ;;  %v3593_v17 = vadd.f32 %v4628_v63, %v3496_v41  ;;  %v3614_v20 = vadd.f32 %v3613_v53, %v3517_v1  ;;  %v3716_v18 = vunpack.c.l.bf16 %v3632_v48  ;;  %v3717_v62 = vunpack.c.h.bf16 %v3632_v48 }
 0x235   : > { %v3763_v3 = vadd.f32 %v3762_v12, %v3748_v59  ;;  %v4636_v5 = vpop.f32.mrf.mxu1  ;;  %v3584_v46 = vpop.f32.mrf.mxu0  ;;  %v3726_v38 = vadd.f32 %v3725_v16, %v3711_v23  ;;  %v3756_v32 = vmul.f32 %v3718_v29, %v3718_v29  ;;  %v3757_v42 = vmul.f32 %v3719_v44, %v3719_v44 }
 0x236   : > { %v3625_v37 = vadd.f32 %v4636_v5, %v3528_v39  ;;  %v3585_v4 = vadd.f32 %v3584_v46, %v3488_v15  ;;  %v3631_v31 = vpack.c.bf16 %v3593_v17, %v3590_v55  ;;  %v3754_v56 = vmul.f32 %v3716_v18, %v3716_v18 }
 0x237   : > { %v3764_v35 = vadd.f32 %v3763_v3, %v3749_v61  ;;  %v3616_v47 = vpop.f32.mrf.mxu1  ;;  %v3755_v57 = vmul.f32 %v3717_v62, %v3717_v62 }
 0x238   : > { %v3635_v8 = vpack.c.bf16 %v3625_v37, %v3622_v50  ;;  %v3630_v11 = vpack.c.bf16 %v3585_v4, %v3582_v2  ;;  %v3617_v14 = vadd.f32 %v3616_v47, %v3520_v45  ;;  %4328 = vst [vmem:[%s4980_s18 + $0x18] sm:$0xff] %v3631_v31   ;;  %v3714_v40 = vunpack.c.l.bf16 %v3631_v31 }
 0x239   : > { %v3715_v13 = vunpack.c.h.bf16 %v3631_v31 }
 0x23a   : > { %4332 = vst [vmem:[%s4980_s18 + $0x38] sm:$0xff] %v3635_v8   ;;  %4327 = vst [vmem:[%s4980_s18 + $0x10] sm:$0xff] %v3630_v11   ;;  %v3712_v6 = vunpack.c.l.bf16 %v3630_v11  ;;  %v3713_v0 = vunpack.c.h.bf16 %v3630_v11  ;;  %v3634_v27 = vpack.c.bf16 %v3617_v14, %v3614_v20  ;;  %v3752_v43 = vmul.f32 %v3714_v40, %v3714_v40 }
 0x23b   : > { %v3753_v24 = vmul.f32 %v3715_v13, %v3715_v13  ;;  %v3722_v49 = vunpack.c.l.bf16 %v3635_v8  ;;  %v3723_v12 = vunpack.c.h.bf16 %v3635_v8 }
 0x23c   : > { %v3727_v52 = vadd.f32 %v3726_v38, %v3712_v6  ;;  %v3750_v30 = vmul.f32 %v3712_v6, %v3712_v6  ;;  %4331 = vst [vmem:[%s4980_s18 + $0x30] sm:$0xff] %v3634_v27   ;;  %v3751_v25 = vmul.f32 %v3713_v0, %v3713_v0  ;;  %v3720_v15 = vunpack.c.l.bf16 %v3634_v27 }
 0x23d   : > { %v3721_v41 = vunpack.c.h.bf16 %v3634_v27  ;;  %v3760_v28 = vmul.f32 %v3722_v49, %v3722_v49  ;;  %v3761_v45 = vmul.f32 %v3723_v12, %v3723_v12 }
 0x23e   : > { %v3728_v7 = vadd.f32 %v3727_v52, %v3713_v0  ;;  %v3765_v21 = vadd.f32 %v3764_v35, %v3750_v30  ;;  %v3758_v59 = vmul.f32 %v3720_v15, %v3720_v15 }
 0x23f   : > { %v3759_v63 = vmul.f32 %v3721_v41, %v3721_v41 }
 0x240   : > { %v3729_v22 = vadd.f32 %v3728_v7, %v3714_v40  ;;  %v3766_v9 = vadd.f32 %v3765_v21, %v3751_v25 }
 0x242   : > { %v3730_v26 = vadd.f32 %v3729_v22, %v3715_v13  ;;  %v3767_v36 = vadd.f32 %v3766_v9, %v3752_v43 }
 0x244   : > { %v3731_v23 = vadd.f32 %v3730_v26, %v3716_v18  ;;  %v3768_v33 = vadd.f32 %v3767_v36, %v3753_v24 }
 0x246   : > { %v3769_v58 = vadd.f32 %v3768_v33, %v3754_v56  ;;  %v3732_v19 = vadd.f32 %v3731_v23, %v3717_v62 }
 0x248   : > { %v3733_v54 = vadd.f32 %v3732_v19, %v3718_v29  ;;  %v3770_v34 = vadd.f32 %v3769_v58, %v3755_v57 }
 0x24a   : > { %v3734_v48 = vadd.f32 %v3733_v54, %v3719_v44  ;;  %v3771_v10 = vadd.f32 %v3770_v34, %v3756_v32 }
 0x24c   : > { %v3735_v60 = vadd.f32 %v3734_v48, %v3720_v15  ;;  %v3772_v16 = vadd.f32 %v3771_v10, %v3757_v42 }
 0x24e   : > { %v3736_v53 = vadd.f32 %v3735_v60, %v3721_v41  ;;  %v3773_v61 = vadd.f32 %v3772_v16, %v3758_v59 }
 0x250   : > { %v3737_v51 = vadd.f32 %v3736_v53, %v3722_v49  ;;  %v3774_v39 = vadd.f32 %v3773_v61, %v3759_v63 }
 0x252   : > { %v3738_v3 = vadd.f32 %v3737_v51, %v3723_v12  ;;  %v3775_v55 = vadd.f32 %v3774_v39, %v3760_v28 }
 0x254   : > { %v3739_v17 = vrot.slane %v3738_v3, 4  ;;  %v3776_v5 = vadd.f32 %v3775_v55, %v3761_v45 }
 0x256   : > { %v3740_v46 = vadd.f32 %v3739_v17, %v3738_v3  ;;  %v3777_v38 = vrot.slane %v3776_v5, 4 }
 0x258   : > { %v3741_v50 = vrot.slane %v3740_v46, 2  ;;  %v3778_v2 = vadd.f32 %v3777_v38, %v3776_v5 }
 0x25a   : > { %v3742_v37 = vadd.f32 %v3741_v50, %v3740_v46  ;;  %v3779_v4 = vrot.slane %v3778_v2, 2 }
 0x25c   : > { %v3743_v1 = vrot.slane %v3742_v37, 1  ;;  %v3780_v31 = vadd.f32 %v3779_v4, %v3778_v2 }
 0x25e   : > { %v3744_v35 = vadd.f32 %v3743_v1, %v3742_v37  ;;  %v3781_v47 = vrot.slane %v3780_v31, 1 }
 0x260   : > { %3745 = vst [vmem:[%s306_s9] sm:$0x1] %v3744_v35  ;;  %v3782_v8 = vadd.f32 %v3781_v47, %v3780_v31 }
 0x262   : > { %3783 = vst [vmem:[%s313_s12] sm:$0x1] %v3782_v8 }
 0x263 PF: > { %s17_s25 = sadd.s32 1, %s4894_s25   ;;  %s5957_s17 = sld [smem:[#allocation4_spill]] }
 0x264   : > { %p14_p10 = scmp.ge.s32.totalorder %s17_s25, 6   ;;  %s5958_s21 = smov %s4886_s23 }
 0x265   : > { %s5959_s22 = smov %s4890_s24  ;;  %s5960_s23 = smov %s5963_s26 }
 0x266   :  { %16 = sbr.rel (!%p14_p10) target bundleno = 3 (0x3), region = 104 }
 0x269   : > { %s5961_s24 = smov %s5957_s17 }

</bundles_post_ra>
